<compile_context>
chip_gen: v6e
topology: v6e:2x2x1
jax: 0.10.0
libtpu: 0.0.40
codegen_flags: <defaults>
</compile_context>

<pallas_src>
import functools

import jax
import jax.numpy as jnp
from jax.experimental import pallas as pl
from jax.experimental.pallas import tpu as pltpu


def _round_up(x, m):
    return ((x + m - 1) // m) * m


def _pick_tile_m(m, cap=1024):
    """Largest multiple-of-8 divisor of m (<= cap) that leaves >= 2 blocks."""
    if m <= 8:
        return _round_up(m, 8)
    best = 0
    limit = min(cap, m // 2)
    for t in range(8, limit + 1, 8):
        if m % t == 0:
            best = t
    if best >= 64:
        return best
    return min(cap, _round_up(m, 8))


# --------------------------------------------------------------------------
# Tiled linear kernel: out = act(x @ w + b), grid over rows of x.
# --------------------------------------------------------------------------

def _linear_kernel(x_ref, w_ref, b_ref, o_ref, *, activation):
    acc = jnp.dot(x_ref[...], w_ref[...], preferred_element_type=jnp.float32)
    acc = acc + b_ref[...]
    if activation == "relu":
        acc = jnp.maximum(acc, 0.0)
    o_ref[...] = acc.astype(o_ref.dtype)


def linear_pallas(x, w, b, activation="none", out_dtype=jnp.float32):
    """x: (M, K), w: (K, N), b: (N,).  Lane-dense (128-padded) output slab."""
    M, K = x.shape
    N = w.shape[1]
    Np = _round_up(N, 128)                       # lane-dense stores
    xb = x.astype(jnp.bfloat16)
    wb = w.astype(jnp.bfloat16)
    bf = b.reshape(1, N).astype(jnp.float32)
    if Np != N:
        wb = jnp.pad(wb, ((0, 0), (0, Np - N)))
        bf = jnp.pad(bf, ((0, 0), (0, Np - N)))

    tm = _pick_tile_m(M)
    Mp = _round_up(M, tm)
    if Mp != M:
        xb = jnp.pad(xb, ((0, Mp - M), (0, 0)))

    out = pl.pallas_call(
        functools.partial(_linear_kernel, activation=activation),
        out_shape=jax.ShapeDtypeStruct((Mp, Np), out_dtype),
        grid_spec=pltpu.PrefetchScalarGridSpec(
            num_scalar_prefetch=0,
            grid=(Mp // tm,),
            in_specs=[
                pl.BlockSpec((tm, K), lambda i: (i, 0)),
                pl.BlockSpec((K, Np), lambda i: (0, 0)),
                pl.BlockSpec((1, Np), lambda i: (0, 0)),
            ],
            out_specs=pl.BlockSpec((tm, Np), lambda i: (i, 0)),
        ),
        compiler_params=pltpu.CompilerParams(
            dimension_semantics=("parallel",),
            vmem_limit_bytes=32 * 1024 * 1024),
    )(xb, wb, bf)
    if Mp != M or Np != N:
        out = out[:M, :N]
    return out


# --------------------------------------------------------------------------
# Patch extraction (XLA glue): NHWC -> (N*OH*OW, C*kh*kw), feature order (c,i,j)
# --------------------------------------------------------------------------

def conv_patches(x, kh, kw, stride, pad):
    patches = jax.lax.conv_general_dilated_patches(
        x, (kh, kw), (stride, stride), [(pad, pad), (pad, pad)],
        dimension_numbers=("NHWC", "HWIO", "NHWC"))
    N, OH, OW, K = patches.shape
    return patches.reshape(N * OH * OW, K), OH, OW


def conv2d_relu_pallas(x_nhwc, w, b, stride, pad):
    """x: [N,H,W,C] NHWC, w: [O,C,kh,kw] (PyTorch layout) -> NHWC bf16 output."""
    O, C, kh, kw = w.shape
    patches, OH, OW = conv_patches(x_nhwc, kh, kw, stride, pad)
    w_mat = jnp.transpose(w, (1, 2, 3, 0)).reshape(C * kh * kw, O)   # (c,i,j) rows
    out = linear_pallas(patches, w_mat, b, activation="relu",
                        out_dtype=jnp.bfloat16)
    return out.reshape(x_nhwc.shape[0], OH, OW, O)


# --------------------------------------------------------------------------
# Fused tail: conv3 + fc + W_ih projection + LSTM recurrence + pi/value heads.
# Gate ordering matches torch.nn.LSTM: [i, f, g, o].
# --------------------------------------------------------------------------

def _fused_tail_kernel(p3_ref, w3_ref, b3_ref, fcw_ref, fcb_ref,
                       ar_ref, wfc_ref, war_ref, bl_ref,
                       whh_ref, h0_ref, c0_ref, hw_ref, hb_ref,
                       head_ref, hn_ref, cn_ref,
                       zx_sc, hseq_sc, *, T, B, num_actions):
    P, TB, _ = p3_ref.shape
    O3 = w3_ref.shape[-1]
    H = h0_ref.shape[-1]
    FC = fcw_ref.shape[-1]

    # conv3 per spatial position, accumulated directly into fc pre-activation
    # (avoids any in-kernel reshape of the conv3 output).
    fc_z = jnp.zeros((TB, FC), jnp.float32)
    for p in range(P):                                   # P small, unrolled
        h3 = jnp.dot(p3_ref[p], w3_ref[...], preferred_element_type=jnp.float32)
        h3 = jnp.maximum(h3 + b3_ref[...], 0.0).astype(jnp.bfloat16)
        fc_z = fc_z + jnp.dot(h3, fcw_ref[p * O3:(p + 1) * O3, :],
                              preferred_element_type=jnp.float32)
    fc_out = jnp.maximum(fc_z + fcb_ref[...], 0.0).astype(jnp.bfloat16)

    # Hoisted LSTM input projection: zx = [fc_out | act | rew] @ W_ih + b.
    zx_sc[...] = (jnp.dot(fc_out, wfc_ref[...], preferred_element_type=jnp.float32)
                  + jnp.dot(ar_ref[...], war_ref[...],
                            preferred_element_type=jnp.float32)
                  + bl_ref[...])

    # LSTM recurrence: W_hh held across the unrolled steps; only one
    # (B,H)x(H,4H) matmul per step.
    whh = whh_ref[...]
    h = h0_ref[...]
    c = c0_ref[...]
    for t in range(T):
        z = zx_sc[t * B:(t + 1) * B, :] + jnp.dot(
            h.astype(jnp.bfloat16), whh, preferred_element_type=jnp.float32)
        i_g = jax.nn.sigmoid(z[:, 0 * H:1 * H])
        f_g = jax.nn.sigmoid(z[:, 1 * H:2 * H])
        g_g = jnp.tanh(z[:, 2 * H:3 * H])
        o_g = jax.nn.sigmoid(z[:, 3 * H:4 * H])
        c = f_g * c + i_g * g_g
        h = o_g * jnp.tanh(c)
        hseq_sc[t * B:(t + 1) * B, :] = h
    hn_ref[...] = h
    cn_ref[...] = c

    # Fused heads: one lane-dense (T*B, H) @ (H, 128) matmul.
    logits = (jnp.dot(hseq_sc[...].astype(jnp.bfloat16), hw_ref[...],
                      preferred_element_type=jnp.float32) + hb_ref[...])
    col = jax.lax.broadcasted_iota(jnp.int32, logits.shape, 1)
    is_pi = col < num_actions
    masked = jnp.where(is_pi, logits, -1e30)             # mask padded/value cols
    m = jnp.max(masked, axis=-1, keepdims=True)
    e = jnp.exp(masked - m)
    denom = jnp.sum(e, axis=-1, keepdims=True)
    pi = e * pl.reciprocal(denom, approx=False)          # exact: rows sum to 1
    head_ref[...] = jnp.where(is_pi, pi, logits)         # col A = raw value


def fused_tail_pallas(p3, w3_mat, b3, fc_w, fc_b, ar, wih_fc, wih_ar, lstm_b,
                      w_hh, h0, c0, head_w, head_b, *, T, B, num_actions):
    P, TB, _ = p3.shape
    H = w_hh.shape[0]
    NP = head_w.shape[1]
    O3 = w3_mat.shape[1]
    FC = fc_w.shape[1]
    kernel = functools.partial(_fused_tail_kernel, T=T, B=B,
                               num_actions=num_actions)
    vmem = pl.BlockSpec(memory_space=pltpu.MemorySpace.VMEM)
    return pl.pallas_call(
        kernel,
        out_shape=(
            jax.ShapeDtypeStruct((TB, NP), jnp.float32),   # [pi | v | pad]
            jax.ShapeDtypeStruct((B, H), jnp.float32),     # hn
            jax.ShapeDtypeStruct((B, H), jnp.float32),     # cn
        ),
        in_specs=[vmem] * 14,
        out_specs=(vmem, vmem, vmem),
        scratch_shapes=[pltpu.VMEM((TB, 4 * H), jnp.float32),   # zx
                        pltpu.VMEM((TB, H), jnp.float32)],      # hidden seq
        compiler_params=pltpu.CompilerParams(vmem_limit_bytes=32 * 1024 * 1024),
    )(p3.astype(jnp.bfloat16), w3_mat.astype(jnp.bfloat16),
      b3.reshape(1, O3).astype(jnp.float32),
      fc_w.astype(jnp.bfloat16), fc_b.reshape(1, FC).astype(jnp.float32),
      ar.astype(jnp.bfloat16), wih_fc.astype(jnp.bfloat16),
      wih_ar.astype(jnp.bfloat16), lstm_b.reshape(1, 4 * H).astype(jnp.float32),
      w_hh.astype(jnp.bfloat16), h0.astype(jnp.float32), c0.astype(jnp.float32),
      head_w.astype(jnp.bfloat16), head_b.reshape(1, NP).astype(jnp.float32))


# --------------------------------------------------------------------------
# Parameter init (deterministic, PyTorch-like fan-in uniform)
# --------------------------------------------------------------------------

def init_params(key, image_shape, output_size, fc_size, lstm_size,
                channels, kernel_sizes, strides, paddings):
    C, H, W = image_shape
    keys = iter(jax.random.split(key, 24))

    def u(k, shape, fan_in):
        bound = 1.0 / jnp.sqrt(jnp.float32(fan_in))
        return jax.random.uniform(k, shape, jnp.float32, -bound, bound)

    params = {"conv_w": [], "conv_b": []}
    in_c, h, w_sp = C, H, W
    for out_c, ks, st, pd in zip(channels, kernel_sizes, strides, paddings):
        fan_in = in_c * ks * ks
        params["conv_w"].append(u(next(keys), (out_c, in_c, ks, ks), fan_in))
        params["conv_b"].append(u(next(keys), (out_c,), fan_in))
        h = (h + 2 * pd - ks) // st + 1
        w_sp = (w_sp + 2 * pd - ks) // st + 1
        in_c = out_c
    conv_out = in_c * h * w_sp

    # fc consumes NHWC-flattened conv features (equivalent re-parameterization).
    params["fc_w"] = u(next(keys), (conv_out, fc_size), conv_out)
    params["fc_b"] = u(next(keys), (fc_size,), conv_out)

    lstm_in = fc_size + output_size + 1
    params["lstm_w_ih"] = u(next(keys), (lstm_in, 4 * lstm_size), lstm_size)
    params["lstm_w_hh"] = u(next(keys), (lstm_size, 4 * lstm_size), lstm_size)
    params["lstm_b"] = (u(next(keys), (4 * lstm_size,), lstm_size)
                        + u(next(keys), (4 * lstm_size,), lstm_size))  # b_ih+b_hh

    params["pi_w"] = u(next(keys), (lstm_size, output_size), lstm_size)
    params["pi_b"] = u(next(keys), (output_size,), lstm_size)
    params["v_w"] = u(next(keys), (lstm_size, 1), lstm_size)
    params["v_b"] = u(next(keys), (1,), lstm_size)

    params["strides"] = strides
    params["paddings"] = paddings
    return params


# --------------------------------------------------------------------------
# Full forward (mirrors DoomLstmModel.forward, lead_dim = 2 i.e. [T, B, ...])
# --------------------------------------------------------------------------

def doom_lstm_forward(params, image, prev_action, prev_reward, init_rnn_state):
    T, B = image.shape[0], image.shape[1]
    A = params["pi_w"].shape[1]
    H = params["lstm_w_hh"].shape[0]
    FC = params["fc_w"].shape[1]

    h0, c0 = init_rnn_state
    Bp = _round_up(B, 8)                       # sublane-aligned batch
    if Bp != B:
        db = Bp - B
        image = jnp.pad(image, ((0, 0), (0, db)) + ((0, 0),) * (image.ndim - 2))
        prev_action = jnp.pad(prev_action, ((0, 0), (0, db), (0, 0)))
        prev_reward = jnp.pad(prev_reward, ((0, 0), (0, db)))
        h0 = jnp.pad(h0, ((0, db), (0, 0)))
        c0 = jnp.pad(c0, ((0, db), (0, 0)))
    TB = T * Bp

    img = image.astype(jnp.float32) * (1.0 / 255.0)
    x = img.reshape(TB, *image.shape[2:])                 # [TB, C, H, W]
    x = jnp.transpose(x, (0, 2, 3, 1)).astype(jnp.bfloat16)  # NHWC once

    # conv1, conv2: Pallas matmul+ReLU per layer (lane-dense 128-padded stores)
    for li in range(2):
        x = conv2d_relu_pallas(x, params["conv_w"][li], params["conv_b"][li],
                               params["strides"][li], params["paddings"][li])

    # conv3 patches, grouped per spatial position for the fused tail kernel.
    w3 = params["conv_w"][2]
    O3, C2, kh3, kw3 = w3.shape
    p3, OH3, OW3 = conv_patches(x, kh3, kw3,
                                params["strides"][2], params["paddings"][2])
    P = OH3 * OW3
    K3 = C2 * kh3 * kw3
    p3 = p3.reshape(TB, P, K3).transpose(1, 0, 2)          # (P, TB, K3)
    w3_mat = jnp.transpose(w3, (1, 2, 3, 0)).reshape(K3, O3)

    # prev_action / prev_reward packed into one small (TB, 8) operand; W_ih is
    # split accordingly so no concat is needed (identical math).
    ar = jnp.concatenate(
        [prev_action.reshape(TB, A).astype(jnp.float32),
         prev_reward.reshape(TB, 1).astype(jnp.float32)], axis=1)
    ARp = _round_up(A + 1, 8)
    ar = jnp.pad(ar, ((0, 0), (0, ARp - (A + 1))))
    wih = params["lstm_w_ih"]
    wih_fc = wih[:FC]
    wih_ar = jnp.pad(wih[FC:], ((0, ARp - (A + 1)), (0, 0)))

    # Pack pi and value heads into one lane-dense (H, 128) projection.
    NP = _round_up(A + 1, 128)
    pad = NP - A - 1
    head_w = jnp.concatenate(
        [params["pi_w"], params["v_w"], jnp.zeros((H, pad), jnp.float32)], axis=1)
    head_b = jnp.concatenate(
        [params["pi_b"], params["v_b"], jnp.zeros((pad,), jnp.float32)])

    head, hn, cn = fused_tail_pallas(
        p3, w3_mat, params["conv_b"][2], params["fc_w"], params["fc_b"],
        ar, wih_fc, wih_ar, params["lstm_b"], params["lstm_w_hh"],
        h0, c0, head_w, head_b, T=T, B=Bp, num_actions=A)

    pi = head[:, :A].reshape(T, Bp, A)
    v = head[:, A].reshape(T, Bp)                          # squeeze(-1)
    if Bp != B:
        pi, v, hn, cn = pi[:, :B], v[:, :B], hn[:B], cn[:B]
    return pi, v, (hn, cn)


# --------------------------------------------------------------------------

if __name__ == "__main__":
    # Small shapes consistent with the module (defaults downscaled).
    T, B = 8, 8
    image_shape = (3, 32, 32)        # (C, H, W)
    output_size = 6                  # number of actions
    fc_size = 128
    lstm_size = 128                  # 128-aligned gate slices
    channels = [32, 64, 128]
    kernel_sizes = [8, 4, 3]
    strides = [4, 2, 2]
    paddings = [0, 1, 1]

    root = jax.random.PRNGKey(0)
    k_img, k_act, k_rew, k_par = jax.random.split(root, 4)

    image = jax.random.randint(k_img, (T, B) + image_shape, 0, 256,
                               jnp.int32).astype(jnp.uint8)
    actions = jax.random.randint(k_act, (T, B), 0, output_size, jnp.int32)
    prev_action = jax.nn.one_hot(actions, output_size, dtype=jnp.float32)
    prev_reward = jax.random.normal(k_rew, (T, B), jnp.float32)
    init_rnn_state = (jnp.zeros((B, lstm_size), jnp.float32),
                      jnp.zeros((B, lstm_size), jnp.float32))

    params = init_params(k_par, image_shape, output_size, fc_size, lstm_size,
                         channels, kernel_sizes, strides, paddings)

    fwd = jax.jit(functools.partial(doom_lstm_forward, params))
    pi, v, (hn, cn) = fwd(image, prev_action, prev_reward, init_rnn_state)
    jax.block_until_ready((pi, v, hn, cn))

    assert pi.shape == (T, B, output_size)
    assert v.shape == (T, B)
    assert hn.shape == (B, lstm_size) and cn.shape == (B, lstm_size)
    assert bool(jnp.all(jnp.isfinite(pi))) and bool(jnp.all(jnp.isfinite(v)))
    assert bool(jnp.all(jnp.isfinite(hn))) and bool(jnp.all(jnp.isfinite(cn)))
    # softmax rows sum to 1 (exact reciprocal -> f32 rounding only)
    assert bool(jnp.allclose(jnp.sum(pi, axis=-1), 1.0, atol=1e-3))

    print("KERNEL_OK")
</pallas_src>

<mosaic_0001>
module attributes {stable_mosaic.version = 11 : i64} {
  func.func @_linear_kernel(%arg0: i32, %arg1: memref<784x192xbf16, #tpu.memory_space<vmem>>, %arg2: memref<192x128xbf16, #tpu.memory_space<vmem>>, %arg3: memref<1x128xf32, #tpu.memory_space<vmem>>, %arg4: memref<784x128xbf16, #tpu.memory_space<vmem>>) attributes {dimension_semantics = [#tpu.dimension_semantics<parallel>], iteration_bounds = array<i64: 4>, scalar_prefetch = 0 : i64, scratch_operands = 0 : i64, tpu.core_type = #tpu.core_type<tc>, window_params = [{transform_indices = @transform_0, window_bounds = array<i64: 784, 192>}, {pipeline_mode = #tpu.pipeline_mode<synchronous>, transform_indices = @transform_1, window_bounds = array<i64: 192, 128>}, {pipeline_mode = #tpu.pipeline_mode<synchronous>, transform_indices = @transform_2, window_bounds = array<i64: 1, 128>}, {transform_indices = @transform_3, window_bounds = array<i64: 784, 128>}]} {
    %c0 = arith.constant 0 : index
    %c0_0 = arith.constant 0 : index
    %0 = vector.load %arg1[%c0, %c0_0] : memref<784x192xbf16, #tpu.memory_space<vmem>>, vector<784x192xbf16>
    %c0_1 = arith.constant 0 : index
    %c0_2 = arith.constant 0 : index
    %1 = vector.load %arg2[%c0_1, %c0_2] : memref<192x128xbf16, #tpu.memory_space<vmem>>, vector<192x128xbf16>
    %cst = arith.constant dense<0.000000e+00> : vector<784x128xf32>
    %2 = tpu.matmul %0, %1, %cst {dimension_numbers = #tpu.dot_dimension_numbers<[1], [0], [0], [1], [0, 0, 1, 1], [], []>} : vector<784x192xbf16>, vector<192x128xbf16>, vector<784x128xf32> -> vector<784x128xf32>
    %c0_3 = arith.constant 0 : index
    %c0_4 = arith.constant 0 : index
    %3 = vector.load %arg3[%c0_3, %c0_4] : memref<1x128xf32, #tpu.memory_space<vmem>>, vector<1x128xf32>
    %4 = vector.broadcast %3 : vector<1x128xf32> to vector<784x128xf32>
    %5 = arith.addf %2, %4 : vector<784x128xf32>
    %cst_5 = arith.constant 0.000000e+00 : f32
    %6 = vector.broadcast %cst_5 : f32 to vector<784x128xf32>
    %7 = arith.maximumf %5, %6 : vector<784x128xf32>
    %8 = arith.truncf %7 : vector<784x128xf32> to vector<784x128xbf16>
    %c0_6 = arith.constant 0 : index
    %c0_7 = arith.constant 0 : index
    %9 = vector.load %arg4[%c0_6, %c0_7] : memref<784x128xbf16, #tpu.memory_space<vmem>>, vector<784x128xbf16>
    tpu.vector_store %arg4[%c0_6, %c0_7], %8 {strides = array<i32>} : memref<784x128xbf16, #tpu.memory_space<vmem>>, vector<784x128xbf16>,
    return
  }
  func.func @transform_0(%arg0: i32) -> (i32, i32) {
    %c0_i32 = arith.constant 0 : i32
    %c0_i32_0 = arith.constant 0 : i32
    return %arg0, %c0_i32 : i32, i32
  }
  func.func @transform_1(%arg0: i32) -> (i32, i32) {
    %c0_i32 = arith.constant 0 : i32
    %c0_i32_0 = arith.constant 0 : i32
    %c0_i32_1 = arith.constant 0 : i32
    return %c0_i32, %c0_i32_0 : i32, i32
  }
  func.func @transform_2(%arg0: i32) -> (i32, i32) {
    %c0_i32 = arith.constant 0 : i32
    %c0_i32_0 = arith.constant 0 : i32
    %c0_i32_1 = arith.constant 0 : i32
    return %c0_i32, %c0_i32_0 : i32, i32
  }
  func.func @transform_3(%arg0: i32) -> (i32, i32) {
    %c0_i32 = arith.constant 0 : i32
    %c0_i32_0 = arith.constant 0 : i32
    return %arg0, %c0_i32 : i32, i32
  }
}

module attributes {stable_mosaic.version = 11 : i64} {
  func.func @_linear_kernel(%arg0: i32, %arg1: memref<288x512xbf16, #tpu.memory_space<vmem>>, %arg2: memref<512x128xbf16, #tpu.memory_space<vmem>>, %arg3: memref<1x128xf32, #tpu.memory_space<vmem>>, %arg4: memref<288x128xbf16, #tpu.memory_space<vmem>>) attributes {dimension_semantics = [#tpu.dimension_semantics<parallel>], iteration_bounds = array<i64: 2>, scalar_prefetch = 0 : i64, scratch_operands = 0 : i64, tpu.core_type = #tpu.core_type<tc>, window_params = [{transform_indices = @transform_0, window_bounds = array<i64: 288, 512>}, {pipeline_mode = #tpu.pipeline_mode<synchronous>, transform_indices = @transform_1, window_bounds = array<i64: 512, 128>}, {pipeline_mode = #tpu.pipeline_mode<synchronous>, transform_indices = @transform_2, window_bounds = array<i64: 1, 128>}, {transform_indices = @transform_3, window_bounds = array<i64: 288, 128>}]} {
    %c0 = arith.constant 0 : index
    %c0_0 = arith.constant 0 : index
    %0 = vector.load %arg1[%c0, %c0_0] : memref<288x512xbf16, #tpu.memory_space<vmem>>, vector<288x512xbf16>
    %c0_1 = arith.constant 0 : index
    %c0_2 = arith.constant 0 : index
    %1 = vector.load %arg2[%c0_1, %c0_2] : memref<512x128xbf16, #tpu.memory_space<vmem>>, vector<512x128xbf16>
    %cst = arith.constant dense<0.000000e+00> : vector<288x128xf32>
    %2 = tpu.matmul %0, %1, %cst {dimension_numbers = #tpu.dot_dimension_numbers<[1], [0], [0], [1], [0, 0, 1, 1], [], []>} : vector<288x512xbf16>, vector<512x128xbf16>, vector<288x128xf32> -> vector<288x128xf32>
    %c0_3 = arith.constant 0 : index
    %c0_4 = arith.constant 0 : index
    %3 = vector.load %arg3[%c0_3, %c0_4] : memref<1x128xf32, #tpu.memory_space<vmem>>, vector<1x128xf32>
    %4 = vector.broadcast %3 : vector<1x128xf32> to vector<288x128xf32>
    %5 = arith.addf %2, %4 : vector<288x128xf32>
    %cst_5 = arith.constant 0.000000e+00 : f32
    %6 = vector.broadcast %cst_5 : f32 to vector<288x128xf32>
    %7 = arith.maximumf %5, %6 : vector<288x128xf32>
    %8 = arith.truncf %7 : vector<288x128xf32> to vector<288x128xbf16>
    %c0_6 = arith.constant 0 : index
    %c0_7 = arith.constant 0 : index
    %9 = vector.load %arg4[%c0_6, %c0_7] : memref<288x128xbf16, #tpu.memory_space<vmem>>, vector<288x128xbf16>
    tpu.vector_store %arg4[%c0_6, %c0_7], %8 {strides = array<i32>} : memref<288x128xbf16, #tpu.memory_space<vmem>>, vector<288x128xbf16>,
    return
  }
  func.func @transform_0(%arg0: i32) -> (i32, i32) {
    %c0_i32 = arith.constant 0 : i32
    %c0_i32_0 = arith.constant 0 : i32
    return %arg0, %c0_i32 : i32, i32
  }
  func.func @transform_1(%arg0: i32) -> (i32, i32) {
    %c0_i32 = arith.constant 0 : i32
    %c0_i32_0 = arith.constant 0 : i32
    %c0_i32_1 = arith.constant 0 : i32
    return %c0_i32, %c0_i32_0 : i32, i32
  }
  func.func @transform_2(%arg0: i32) -> (i32, i32) {
    %c0_i32 = arith.constant 0 : i32
    %c0_i32_0 = arith.constant 0 : i32
    %c0_i32_1 = arith.constant 0 : i32
    return %c0_i32, %c0_i32_0 : i32, i32
  }
  func.func @transform_3(%arg0: i32) -> (i32, i32) {
    %c0_i32 = arith.constant 0 : i32
    %c0_i32_0 = arith.constant 0 : i32
    return %arg0, %c0_i32 : i32, i32
  }
}

module attributes {stable_mosaic.version = 11 : i64} {
  func.func @_fused_tail_kernel(%arg0: memref<4x64x576xbf16, #tpu.memory_space<vmem>>, %arg1: memref<576x128xbf16, #tpu.memory_space<vmem>>, %arg2: memref<1x128xf32, #tpu.memory_space<vmem>>, %arg3: memref<512x128xbf16, #tpu.memory_space<vmem>>, %arg4: memref<1x128xf32, #tpu.memory_space<vmem>>, %arg5: memref<64x8xbf16, #tpu.memory_space<vmem>>, %arg6: memref<128x512xbf16, #tpu.memory_space<vmem>>, %arg7: memref<8x512xbf16, #tpu.memory_space<vmem>>, %arg8: memref<1x512xf32, #tpu.memory_space<vmem>>, %arg9: memref<128x512xbf16, #tpu.memory_space<vmem>>, %arg10: memref<8x128xf32, #tpu.memory_space<vmem>>, %arg11: memref<8x128xf32, #tpu.memory_space<vmem>>, %arg12: memref<128x128xbf16, #tpu.memory_space<vmem>>, %arg13: memref<1x128xf32, #tpu.memory_space<vmem>>, %arg14: memref<64x128xf32, #tpu.memory_space<vmem>>, %arg15: memref<8x128xf32, #tpu.memory_space<vmem>>, %arg16: memref<8x128xf32, #tpu.memory_space<vmem>>, %arg17: memref<64x512xf32, #tpu.memory_space<vmem>>, %arg18: memref<64x128xf32, #tpu.memory_space<vmem>>) attributes {dimension_semantics = [], scalar_prefetch = 0 : i64, scratch_operands = 2 : i64, tpu.core_type = #tpu.core_type<tc>} {
    %cst = arith.constant 0.000000e+00 : f32
    %0 = vector.broadcast %cst : f32 to vector<64x128xf32>
    %c0 = arith.constant 0 : index
    %c0_0 = arith.constant 0 : index
    %c0_1 = arith.constant 0 : index
    %1 = vector.load %arg0[%c0, %c0_0, %c0_1] : memref<4x64x576xbf16, #tpu.memory_space<vmem>>, vector<1x64x576xbf16>
    %2 = vector.shape_cast %1 : vector<1x64x576xbf16> to vector<64x576xbf16>
    %c0_2 = arith.constant 0 : index
    %c0_3 = arith.constant 0 : index
    %3 = vector.load %arg1[%c0_2, %c0_3] : memref<576x128xbf16, #tpu.memory_space<vmem>>, vector<576x128xbf16>
    %cst_4 = arith.constant dense<0.000000e+00> : vector<64x128xf32>
    %4 = tpu.matmul %2, %3, %cst_4 {dimension_numbers = #tpu.dot_dimension_numbers<[1], [0], [0], [1], [0, 0, 1, 1], [], []>} : vector<64x576xbf16>, vector<576x128xbf16>, vector<64x128xf32> -> vector<64x128xf32>
    %c0_5 = arith.constant 0 : index
    %c0_6 = arith.constant 0 : index
    %5 = vector.load %arg2[%c0_5, %c0_6] : memref<1x128xf32, #tpu.memory_space<vmem>>, vector<1x128xf32>
    %6 = vector.broadcast %5 : vector<1x128xf32> to vector<64x128xf32>
    %7 = arith.addf %4, %6 : vector<64x128xf32>
    %cst_7 = arith.constant 0.000000e+00 : f32
    %8 = vector.broadcast %cst_7 : f32 to vector<64x128xf32>
    %9 = arith.maximumf %7, %8 : vector<64x128xf32>
    %10 = arith.truncf %9 : vector<64x128xf32> to vector<64x128xbf16>
    %c0_8 = arith.constant 0 : index
    %c0_9 = arith.constant 0 : index
    %11 = vector.load %arg3[%c0_8, %c0_9] : memref<512x128xbf16, #tpu.memory_space<vmem>>, vector<128x128xbf16>
    %cst_10 = arith.constant dense<0.000000e+00> : vector<64x128xf32>
    %12 = tpu.matmul %10, %11, %cst_10 {dimension_numbers = #tpu.dot_dimension_numbers<[1], [0], [0], [1], [0, 0, 1, 1], [], []>} : vector<64x128xbf16>, vector<128x128xbf16>, vector<64x128xf32> -> vector<64x128xf32>
    %13 = arith.addf %0, %12 : vector<64x128xf32>
    %c1 = arith.constant 1 : index
    %c0_11 = arith.constant 0 : index
    %c0_12 = arith.constant 0 : index
    %14 = vector.load %arg0[%c1, %c0_11, %c0_12] : memref<4x64x576xbf16, #tpu.memory_space<vmem>>, vector<1x64x576xbf16>
    %15 = vector.shape_cast %14 : vector<1x64x576xbf16> to vector<64x576xbf16>
    %c0_13 = arith.constant 0 : index
    %c0_14 = arith.constant 0 : index
    %16 = vector.load %arg1[%c0_13, %c0_14] : memref<576x128xbf16, #tpu.memory_space<vmem>>, vector<576x128xbf16>
    %cst_15 = arith.constant dense<0.000000e+00> : vector<64x128xf32>
    %17 = tpu.matmul %15, %16, %cst_15 {dimension_numbers = #tpu.dot_dimension_numbers<[1], [0], [0], [1], [0, 0, 1, 1], [], []>} : vector<64x576xbf16>, vector<576x128xbf16>, vector<64x128xf32> -> vector<64x128xf32>
    %c0_16 = arith.constant 0 : index
    %c0_17 = arith.constant 0 : index
    %18 = vector.load %arg2[%c0_16, %c0_17] : memref<1x128xf32, #tpu.memory_space<vmem>>, vector<1x128xf32>
    %19 = vector.broadcast %18 : vector<1x128xf32> to vector<64x128xf32>
    %20 = arith.addf %17, %19 : vector<64x128xf32>
    %cst_18 = arith.constant 0.000000e+00 : f32
    %21 = vector.broadcast %cst_18 : f32 to vector<64x128xf32>
    %22 = arith.maximumf %20, %21 : vector<64x128xf32>
    %23 = arith.truncf %22 : vector<64x128xf32> to vector<64x128xbf16>
    %c128 = arith.constant 128 : index
    %c0_19 = arith.constant 0 : index
    %24 = vector.load %arg3[%c128, %c0_19] : memref<512x128xbf16, #tpu.memory_space<vmem>>, vector<128x128xbf16>
    %cst_20 = arith.constant dense<0.000000e+00> : vector<64x128xf32>
    %25 = tpu.matmul %23, %24, %cst_20 {dimension_numbers = #tpu.dot_dimension_numbers<[1], [0], [0], [1], [0, 0, 1, 1], [], []>} : vector<64x128xbf16>, vector<128x128xbf16>, vector<64x128xf32> -> vector<64x128xf32>
    %26 = arith.addf %13, %25 : vector<64x128xf32>
    %c2 = arith.constant 2 : index
    %c0_21 = arith.constant 0 : index
    %c0_22 = arith.constant 0 : index
    %27 = vector.load %arg0[%c2, %c0_21, %c0_22] : memref<4x64x576xbf16, #tpu.memory_space<vmem>>, vector<1x64x576xbf16>
    %28 = vector.shape_cast %27 : vector<1x64x576xbf16> to vector<64x576xbf16>
    %c0_23 = arith.constant 0 : index
    %c0_24 = arith.constant 0 : index
    %29 = vector.load %arg1[%c0_23, %c0_24] : memref<576x128xbf16, #tpu.memory_space<vmem>>, vector<576x128xbf16>
    %cst_25 = arith.constant dense<0.000000e+00> : vector<64x128xf32>
    %30 = tpu.matmul %28, %29, %cst_25 {dimension_numbers = #tpu.dot_dimension_numbers<[1], [0], [0], [1], [0, 0, 1, 1], [], []>} : vector<64x576xbf16>, vector<576x128xbf16>, vector<64x128xf32> -> vector<64x128xf32>
    %c0_26 = arith.constant 0 : index
    %c0_27 = arith.constant 0 : index
    %31 = vector.load %arg2[%c0_26, %c0_27] : memref<1x128xf32, #tpu.memory_space<vmem>>, vector<1x128xf32>
    %32 = vector.broadcast %31 : vector<1x128xf32> to vector<64x128xf32>
    %33 = arith.addf %30, %32 : vector<64x128xf32>
    %cst_28 = arith.constant 0.000000e+00 : f32
    %34 = vector.broadcast %cst_28 : f32 to vector<64x128xf32>
    %35 = arith.maximumf %33, %34 : vector<64x128xf32>
    %36 = arith.truncf %35 : vector<64x128xf32> to vector<64x128xbf16>
    %c256 = arith.constant 256 : index
    %c0_29 = arith.constant 0 : index
    %37 = vector.load %arg3[%c256, %c0_29] : memref<512x128xbf16, #tpu.memory_space<vmem>>, vector<128x128xbf16>
    %cst_30 = arith.constant dense<0.000000e+00> : vector<64x128xf32>
    %38 = tpu.matmul %36, %37, %cst_30 {dimension_numbers = #tpu.dot_dimension_numbers<[1], [0], [0], [1], [0, 0, 1, 1], [], []>} : vector<64x128xbf16>, vector<128x128xbf16>, vector<64x128xf32> -> vector<64x128xf32>
    %39 = arith.addf %26, %38 : vector<64x128xf32>
    %c3 = arith.constant 3 : index
    %c0_31 = arith.constant 0 : index
    %c0_32 = arith.constant 0 : index
    %40 = vector.load %arg0[%c3, %c0_31, %c0_32] : memref<4x64x576xbf16, #tpu.memory_space<vmem>>, vector<1x64x576xbf16>
    %41 = vector.shape_cast %40 : vector<1x64x576xbf16> to vector<64x576xbf16>
    %c0_33 = arith.constant 0 : index
    %c0_34 = arith.constant 0 : index
    %42 = vector.load %arg1[%c0_33, %c0_34] : memref<576x128xbf16, #tpu.memory_space<vmem>>, vector<576x128xbf16>
    %cst_35 = arith.constant dense<0.000000e+00> : vector<64x128xf32>
    %43 = tpu.matmul %41, %42, %cst_35 {dimension_numbers = #tpu.dot_dimension_numbers<[1], [0], [0], [1], [0, 0, 1, 1], [], []>} : vector<64x576xbf16>, vector<576x128xbf16>, vector<64x128xf32> -> vector<64x128xf32>
    %c0_36 = arith.constant 0 : index
    %c0_37 = arith.constant 0 : index
    %44 = vector.load %arg2[%c0_36, %c0_37] : memref<1x128xf32, #tpu.memory_space<vmem>>, vector<1x128xf32>
    %45 = vector.broadcast %44 : vector<1x128xf32> to vector<64x128xf32>
    %46 = arith.addf %43, %45 : vector<64x128xf32>
    %cst_38 = arith.constant 0.000000e+00 : f32
    %47 = vector.broadcast %cst_38 : f32 to vector<64x128xf32>
    %48 = arith.maximumf %46, %47 : vector<64x128xf32>
    %49 = arith.truncf %48 : vector<64x128xf32> to vector<64x128xbf16>
    %c384 = arith.constant 384 : index
    %c0_39 = arith.constant 0 : index
    %50 = vector.load %arg3[%c384, %c0_39] : memref<512x128xbf16, #tpu.memory_space<vmem>>, vector<128x128xbf16>
    %cst_40 = arith.constant dense<0.000000e+00> : vector<64x128xf32>
    %51 = tpu.matmul %49, %50, %cst_40 {dimension_numbers = #tpu.dot_dimension_numbers<[1], [0], [0], [1], [0, 0, 1, 1], [], []>} : vector<64x128xbf16>, vector<128x128xbf16>, vector<64x128xf32> -> vector<64x128xf32>
    %52 = arith.addf %39, %51 : vector<64x128xf32>
    %c0_41 = arith.constant 0 : index
    %c0_42 = arith.constant 0 : index
    %53 = vector.load %arg4[%c0_41, %c0_42] : memref<1x128xf32, #tpu.memory_space<vmem>>, vector<1x128xf32>
    %54 = vector.broadcast %53 : vector<1x128xf32> to vector<64x128xf32>
    %55 = arith.addf %52, %54 : vector<64x128xf32>
    %cst_43 = arith.constant 0.000000e+00 : f32
    %56 = vector.broadcast %cst_43 : f32 to vector<64x128xf32>
    %57 = arith.maximumf %55, %56 : vector<64x128xf32>
    %58 = arith.truncf %57 : vector<64x128xf32> to vector<64x128xbf16>
    %c0_44 = arith.constant 0 : index
    %c0_45 = arith.constant 0 : index
    %59 = vector.load %arg6[%c0_44, %c0_45] : memref<128x512xbf16, #tpu.memory_space<vmem>>, vector<128x512xbf16>
    %cst_46 = arith.constant dense<0.000000e+00> : vector<64x512xf32>
    %60 = tpu.matmul %58, %59, %cst_46 {dimension_numbers = #tpu.dot_dimension_numbers<[1], [0], [0], [1], [0, 0, 1, 1], [], []>} : vector<64x128xbf16>, vector<128x512xbf16>, vector<64x512xf32> -> vector<64x512xf32>
    %c0_47 = arith.constant 0 : index
    %c0_48 = arith.constant 0 : index
    %61 = vector.load %arg5[%c0_47, %c0_48] : memref<64x8xbf16, #tpu.memory_space<vmem>>, vector<64x8xbf16>
    %c0_49 = arith.constant 0 : index
    %c0_50 = arith.constant 0 : index
    %62 = vector.load %arg7[%c0_49, %c0_50] : memref<8x512xbf16, #tpu.memory_space<vmem>>, vector<8x512xbf16>
    %cst_51 = arith.constant dense<0.000000e+00> : vector<64x512xf32>
    %63 = tpu.matmul %61, %62, %cst_51 {dimension_numbers = #tpu.dot_dimension_numbers<[1], [0], [0], [1], [0, 0, 1, 1], [], []>} : vector<64x8xbf16>, vector<8x512xbf16>, vector<64x512xf32> -> vector<64x512xf32>
    %64 = arith.addf %60, %63 : vector<64x512xf32>
    %c0_52 = arith.constant 0 : index
    %c0_53 = arith.constant 0 : index
    %65 = vector.load %arg8[%c0_52, %c0_53] : memref<1x512xf32, #tpu.memory_space<vmem>>, vector<1x512xf32>
    %66 = vector.broadcast %65 : vector<1x512xf32> to vector<64x512xf32>
    %67 = arith.addf %64, %66 : vector<64x512xf32>
    %c0_54 = arith.constant 0 : index
    %c0_55 = arith.constant 0 : index
    %68 = vector.load %arg17[%c0_54, %c0_55] : memref<64x512xf32, #tpu.memory_space<vmem>>, vector<64x512xf32>
    tpu.vector_store %arg17[%c0_54, %c0_55], %67 {strides = array<i32>} : memref<64x512xf32, #tpu.memory_space<vmem>>, vector<64x512xf32>,
    %c0_56 = arith.constant 0 : index
    %c0_57 = arith.constant 0 : index
    %69 = vector.load %arg9[%c0_56, %c0_57] : memref<128x512xbf16, #tpu.memory_space<vmem>>, vector<128x512xbf16>
    %c0_58 = arith.constant 0 : index
    %c0_59 = arith.constant 0 : index
    %70 = vector.load %arg10[%c0_58, %c0_59] : memref<8x128xf32, #tpu.memory_space<vmem>>, vector<8x128xf32>
    %c0_60 = arith.constant 0 : index
    %c0_61 = arith.constant 0 : index
    %71 = vector.load %arg11[%c0_60, %c0_61] : memref<8x128xf32, #tpu.memory_space<vmem>>, vector<8x128xf32>
    %c0_62 = arith.constant 0 : index
    %c0_63 = arith.constant 0 : index
    %72 = vector.load %arg17[%c0_62, %c0_63] : memref<64x512xf32, #tpu.memory_space<vmem>>, vector<8x512xf32>
    %73 = arith.truncf %70 : vector<8x128xf32> to vector<8x128xbf16>
    %cst_64 = arith.constant dense<0.000000e+00> : vector<8x512xf32>
    %74 = tpu.matmul %73, %69, %cst_64 {dimension_numbers = #tpu.dot_dimension_numbers<[1], [0], [0], [1], [0, 0, 1, 1], [], []>} : vector<8x128xbf16>, vector<128x512xbf16>, vector<8x512xf32> -> vector<8x512xf32>
    %75 = arith.addf %72, %74 : vector<8x512xf32>
    %76 = vector.extract_strided_slice %75 {offsets = [0, 0], sizes = [8, 128], strides = [1, 1]} : vector<8x512xf32> to vector<8x128xf32>
    %77 = arith.negf %76 : vector<8x128xf32>
    %78 = math.exp %77 : vector<8x128xf32>
    %cst_65 = arith.constant 1.000000e+00 : f32
    %79 = vector.broadcast %cst_65 : f32 to vector<8x128xf32>
    %80 = arith.addf %79, %78 : vector<8x128xf32>
    %81 = arith.divf %79, %80 : vector<8x128xf32>
    %82 = vector.extract_strided_slice %75 {offsets = [0, 128], sizes = [8, 128], strides = [1, 1]} : vector<8x512xf32> to vector<8x128xf32>
    %83 = arith.negf %82 : vector<8x128xf32>
    %84 = math.exp %83 : vector<8x128xf32>
    %cst_66 = arith.constant 1.000000e+00 : f32
    %85 = vector.broadcast %cst_66 : f32 to vector<8x128xf32>
    %86 = arith.addf %85, %84 : vector<8x128xf32>
    %87 = arith.divf %85, %86 : vector<8x128xf32>
    %88 = vector.extract_strided_slice %75 {offsets = [0, 256], sizes = [8, 128], strides = [1, 1]} : vector<8x512xf32> to vector<8x128xf32>
    %89 = math.tanh %88 : vector<8x128xf32>
    %90 = vector.extract_strided_slice %75 {offsets = [0, 384], sizes = [8, 128], strides = [1, 1]} : vector<8x512xf32> to vector<8x128xf32>
    %91 = arith.negf %90 : vector<8x128xf32>
    %92 = math.exp %91 : vector<8x128xf32>
    %cst_67 = arith.constant 1.000000e+00 : f32
    %93 = vector.broadcast %cst_67 : f32 to vector<8x128xf32>
    %94 = arith.addf %93, %92 : vector<8x128xf32>
    %95 = arith.divf %93, %94 : vector<8x128xf32>
    %96 = arith.mulf %87, %71 : vector<8x128xf32>
    %97 = arith.mulf %81, %89 : vector<8x128xf32>
    %98 = arith.addf %96, %97 : vector<8x128xf32>
    %99 = math.tanh %98 : vector<8x128xf32>
    %100 = arith.mulf %95, %99 : vector<8x128xf32>
    %c0_68 = arith.constant 0 : index
    %c0_69 = arith.constant 0 : index
    %101 = vector.load %arg18[%c0_68, %c0_69] : memref<64x128xf32, #tpu.memory_space<vmem>>, vector<8x128xf32>
    tpu.vector_store %arg18[%c0_68, %c0_69], %100 {strides = array<i32>} : memref<64x128xf32, #tpu.memory_space<vmem>>, vector<8x128xf32>,
    %c8 = arith.constant 8 : index
    %c0_70 = arith.constant 0 : index
    %102 = vector.load %arg17[%c8, %c0_70] : memref<64x512xf32, #tpu.memory_space<vmem>>, vector<8x512xf32>
    %103 = arith.truncf %100 : vector<8x128xf32> to vector<8x128xbf16>
    %cst_71 = arith.constant dense<0.000000e+00> : vector<8x512xf32>
    %104 = tpu.matmul %103, %69, %cst_71 {dimension_numbers = #tpu.dot_dimension_numbers<[1], [0], [0], [1], [0, 0, 1, 1], [], []>} : vector<8x128xbf16>, vector<128x512xbf16>, vector<8x512xf32> -> vector<8x512xf32>
    %105 = arith.addf %102, %104 : vector<8x512xf32>
    %106 = vector.extract_strided_slice %105 {offsets = [0, 0], sizes = [8, 128], strides = [1, 1]} : vector<8x512xf32> to vector<8x128xf32>
    %107 = arith.negf %106 : vector<8x128xf32>
    %108 = math.exp %107 : vector<8x128xf32>
    %cst_72 = arith.constant 1.000000e+00 : f32
    %109 = vector.broadcast %cst_72 : f32 to vector<8x128xf32>
    %110 = arith.addf %109, %108 : vector<8x128xf32>
    %111 = arith.divf %109, %110 : vector<8x128xf32>
    %112 = vector.extract_strided_slice %105 {offsets = [0, 128], sizes = [8, 128], strides = [1, 1]} : vector<8x512xf32> to vector<8x128xf32>
    %113 = arith.negf %112 : vector<8x128xf32>
    %114 = math.exp %113 : vector<8x128xf32>
    %cst_73 = arith.constant 1.000000e+00 : f32
    %115 = vector.broadcast %cst_73 : f32 to vector<8x128xf32>
    %116 = arith.addf %115, %114 : vector<8x128xf32>
    %117 = arith.divf %115, %116 : vector<8x128xf32>
    %118 = vector.extract_strided_slice %105 {offsets = [0, 256], sizes = [8, 128], strides = [1, 1]} : vector<8x512xf32> to vector<8x128xf32>
    %119 = math.tanh %118 : vector<8x128xf32>
    %120 = vector.extract_strided_slice %105 {offsets = [0, 384], sizes = [8, 128], strides = [1, 1]} : vector<8x512xf32> to vector<8x128xf32>
    %121 = arith.negf %120 : vector<8x128xf32>
    %122 = math.exp %121 : vector<8x128xf32>
    %cst_74 = arith.constant 1.000000e+00 : f32
    %123 = vector.broadcast %cst_74 : f32 to vector<8x128xf32>
    %124 = arith.addf %123, %122 : vector<8x128xf32>
    %125 = arith.divf %123, %124 : vector<8x128xf32>
    %126 = arith.mulf %117, %98 : vector<8x128xf32>
    %127 = arith.mulf %111, %119 : vector<8x128xf32>
    %128 = arith.addf %126, %127 : vector<8x128xf32>
    %129 = math.tanh %128 : vector<8x128xf32>
    %130 = arith.mulf %125, %129 : vector<8x128xf32>
    %c8_75 = arith.constant 8 : index
    %c0_76 = arith.constant 0 : index
    %131 = vector.load %arg18[%c8_75, %c0_76] : memref<64x128xf32, #tpu.memory_space<vmem>>, vector<8x128xf32>
    tpu.vector_store %arg18[%c8_75, %c0_76], %130 {strides = array<i32>} : memref<64x128xf32, #tpu.memory_space<vmem>>, vector<8x128xf32>,
    %c16 = arith.constant 16 : index
    %c0_77 = arith.constant 0 : index
    %132 = vector.load %arg17[%c16, %c0_77] : memref<64x512xf32, #tpu.memory_space<vmem>>, vector<8x512xf32>
    %133 = arith.truncf %130 : vector<8x128xf32> to vector<8x128xbf16>
    %cst_78 = arith.constant dense<0.000000e+00> : vector<8x512xf32>
    %134 = tpu.matmul %133, %69, %cst_78 {dimension_numbers = #tpu.dot_dimension_numbers<[1], [0], [0], [1], [0, 0, 1, 1], [], []>} : vector<8x128xbf16>, vector<128x512xbf16>, vector<8x512xf32> -> vector<8x512xf32>
    %135 = arith.addf %132, %134 : vector<8x512xf32>
    %136 = vector.extract_strided_slice %135 {offsets = [0, 0], sizes = [8, 128], strides = [1, 1]} : vector<8x512xf32> to vector<8x128xf32>
    %137 = arith.negf %136 : vector<8x128xf32>
    %138 = math.exp %137 : vector<8x128xf32>
    %cst_79 = arith.constant 1.000000e+00 : f32
    %139 = vector.broadcast %cst_79 : f32 to vector<8x128xf32>
    %140 = arith.addf %139, %138 : vector<8x128xf32>
    %141 = arith.divf %139, %140 : vector<8x128xf32>
    %142 = vector.extract_strided_slice %135 {offsets = [0, 128], sizes = [8, 128], strides = [1, 1]} : vector<8x512xf32> to vector<8x128xf32>
    %143 = arith.negf %142 : vector<8x128xf32>
    %144 = math.exp %143 : vector<8x128xf32>
    %cst_80 = arith.constant 1.000000e+00 : f32
    %145 = vector.broadcast %cst_80 : f32 to vector<8x128xf32>
    %146 = arith.addf %145, %144 : vector<8x128xf32>
    %147 = arith.divf %145, %146 : vector<8x128xf32>
    %148 = vector.extract_strided_slice %135 {offsets = [0, 256], sizes = [8, 128], strides = [1, 1]} : vector<8x512xf32> to vector<8x128xf32>
    %149 = math.tanh %148 : vector<8x128xf32>
    %150 = vector.extract_strided_slice %135 {offsets = [0, 384], sizes = [8, 128], strides = [1, 1]} : vector<8x512xf32> to vector<8x128xf32>
    %151 = arith.negf %150 : vector<8x128xf32>
    %152 = math.exp %151 : vector<8x128xf32>
    %cst_81 = arith.constant 1.000000e+00 : f32
    %153 = vector.broadcast %cst_81 : f32 to vector<8x128xf32>
    %154 = arith.addf %153, %152 : vector<8x128xf32>
    %155 = arith.divf %153, %154 : vector<8x128xf32>
    %156 = arith.mulf %147, %128 : vector<8x128xf32>
    %157 = arith.mulf %141, %149 : vector<8x128xf32>
    %158 = arith.addf %156, %157 : vector<8x128xf32>
    %159 = math.tanh %158 : vector<8x128xf32>
    %160 = arith.mulf %155, %159 : vector<8x128xf32>
    %c16_82 = arith.constant 16 : index
    %c0_83 = arith.constant 0 : index
    %161 = vector.load %arg18[%c16_82, %c0_83] : memref<64x128xf32, #tpu.memory_space<vmem>>, vector<8x128xf32>
    tpu.vector_store %arg18[%c16_82, %c0_83], %160 {strides = array<i32>} : memref<64x128xf32, #tpu.memory_space<vmem>>, vector<8x128xf32>,
    %c24 = arith.constant 24 : index
    %c0_84 = arith.constant 0 : index
    %162 = vector.load %arg17[%c24, %c0_84] : memref<64x512xf32, #tpu.memory_space<vmem>>, vector<8x512xf32>
    %163 = arith.truncf %160 : vector<8x128xf32> to vector<8x128xbf16>
    %cst_85 = arith.constant dense<0.000000e+00> : vector<8x512xf32>
    %164 = tpu.matmul %163, %69, %cst_85 {dimension_numbers = #tpu.dot_dimension_numbers<[1], [0], [0], [1], [0, 0, 1, 1], [], []>} : vector<8x128xbf16>, vector<128x512xbf16>, vector<8x512xf32> -> vector<8x512xf32>
    %165 = arith.addf %162, %164 : vector<8x512xf32>
    %166 = vector.extract_strided_slice %165 {offsets = [0, 0], sizes = [8, 128], strides = [1, 1]} : vector<8x512xf32> to vector<8x128xf32>
    %167 = arith.negf %166 : vector<8x128xf32>
    %168 = math.exp %167 : vector<8x128xf32>
    %cst_86 = arith.constant 1.000000e+00 : f32
    %169 = vector.broadcast %cst_86 : f32 to vector<8x128xf32>
    %170 = arith.addf %169, %168 : vector<8x128xf32>
    %171 = arith.divf %169, %170 : vector<8x128xf32>
    %172 = vector.extract_strided_slice %165 {offsets = [0, 128], sizes = [8, 128], strides = [1, 1]} : vector<8x512xf32> to vector<8x128xf32>
    %173 = arith.negf %172 : vector<8x128xf32>
    %174 = math.exp %173 : vector<8x128xf32>
    %cst_87 = arith.constant 1.000000e+00 : f32
    %175 = vector.broadcast %cst_87 : f32 to vector<8x128xf32>
    %176 = arith.addf %175, %174 : vector<8x128xf32>
    %177 = arith.divf %175, %176 : vector<8x128xf32>
    %178 = vector.extract_strided_slice %165 {offsets = [0, 256], sizes = [8, 128], strides = [1, 1]} : vector<8x512xf32> to vector<8x128xf32>
    %179 = math.tanh %178 : vector<8x128xf32>
    %180 = vector.extract_strided_slice %165 {offsets = [0, 384], sizes = [8, 128], strides = [1, 1]} : vector<8x512xf32> to vector<8x128xf32>
    %181 = arith.negf %180 : vector<8x128xf32>
    %182 = math.exp %181 : vector<8x128xf32>
    %cst_88 = arith.constant 1.000000e+00 : f32
    %183 = vector.broadcast %cst_88 : f32 to vector<8x128xf32>
    %184 = arith.addf %183, %182 : vector<8x128xf32>
    %185 = arith.divf %183, %184 : vector<8x128xf32>
    %186 = arith.mulf %177, %158 : vector<8x128xf32>
    %187 = arith.mulf %171, %179 : vector<8x128xf32>
    %188 = arith.addf %186, %187 : vector<8x128xf32>
    %189 = math.tanh %188 : vector<8x128xf32>
    %190 = arith.mulf %185, %189 : vector<8x128xf32>
    %c24_89 = arith.constant 24 : index
    %c0_90 = arith.constant 0 : index
    %191 = vector.load %arg18[%c24_89, %c0_90] : memref<64x128xf32, #tpu.memory_space<vmem>>, vector<8x128xf32>
    tpu.vector_store %arg18[%c24_89, %c0_90], %190 {strides = array<i32>} : memref<64x128xf32, #tpu.memory_space<vmem>>, vector<8x128xf32>,
    %c32 = arith.constant 32 : index
    %c0_91 = arith.constant 0 : index
    %192 = vector.load %arg17[%c32, %c0_91] : memref<64x512xf32, #tpu.memory_space<vmem>>, vector<8x512xf32>
    %193 = arith.truncf %190 : vector<8x128xf32> to vector<8x128xbf16>
    %cst_92 = arith.constant dense<0.000000e+00> : vector<8x512xf32>
    %194 = tpu.matmul %193, %69, %cst_92 {dimension_numbers = #tpu.dot_dimension_numbers<[1], [0], [0], [1], [0, 0, 1, 1], [], []>} : vector<8x128xbf16>, vector<128x512xbf16>, vector<8x512xf32> -> vector<8x512xf32>
    %195 = arith.addf %192, %194 : vector<8x512xf32>
    %196 = vector.extract_strided_slice %195 {offsets = [0, 0], sizes = [8, 128], strides = [1, 1]} : vector<8x512xf32> to vector<8x128xf32>
    %197 = arith.negf %196 : vector<8x128xf32>
    %198 = math.exp %197 : vector<8x128xf32>
    %cst_93 = arith.constant 1.000000e+00 : f32
    %199 = vector.broadcast %cst_93 : f32 to vector<8x128xf32>
    %200 = arith.addf %199, %198 : vector<8x128xf32>
    %201 = arith.divf %199, %200 : vector<8x128xf32>
    %202 = vector.extract_strided_slice %195 {offsets = [0, 128], sizes = [8, 128], strides = [1, 1]} : vector<8x512xf32> to vector<8x128xf32>
    %203 = arith.negf %202 : vector<8x128xf32>
    %204 = math.exp %203 : vector<8x128xf32>
    %cst_94 = arith.constant 1.000000e+00 : f32
    %205 = vector.broadcast %cst_94 : f32 to vector<8x128xf32>
    %206 = arith.addf %205, %204 : vector<8x128xf32>
    %207 = arith.divf %205, %206 : vector<8x128xf32>
    %208 = vector.extract_strided_slice %195 {offsets = [0, 256], sizes = [8, 128], strides = [1, 1]} : vector<8x512xf32> to vector<8x128xf32>
    %209 = math.tanh %208 : vector<8x128xf32>
    %210 = vector.extract_strided_slice %195 {offsets = [0, 384], sizes = [8, 128], strides = [1, 1]} : vector<8x512xf32> to vector<8x128xf32>
    %211 = arith.negf %210 : vector<8x128xf32>
    %212 = math.exp %211 : vector<8x128xf32>
    %cst_95 = arith.constant 1.000000e+00 : f32
    %213 = vector.broadcast %cst_95 : f32 to vector<8x128xf32>
    %214 = arith.addf %213, %212 : vector<8x128xf32>
    %215 = arith.divf %213, %214 : vector<8x128xf32>
    %216 = arith.mulf %207, %188 : vector<8x128xf32>
    %217 = arith.mulf %201, %209 : vector<8x128xf32>
    %218 = arith.addf %216, %217 : vector<8x128xf32>
    %219 = math.tanh %218 : vector<8x128xf32>
    %220 = arith.mulf %215, %219 : vector<8x128xf32>
    %c32_96 = arith.constant 32 : index
    %c0_97 = arith.constant 0 : index
    %221 = vector.load %arg18[%c32_96, %c0_97] : memref<64x128xf32, #tpu.memory_space<vmem>>, vector<8x128xf32>
    tpu.vector_store %arg18[%c32_96, %c0_97], %220 {strides = array<i32>} : memref<64x128xf32, #tpu.memory_space<vmem>>, vector<8x128xf32>,
    %c40 = arith.constant 40 : index
    %c0_98 = arith.constant 0 : index
    %222 = vector.load %arg17[%c40, %c0_98] : memref<64x512xf32, #tpu.memory_space<vmem>>, vector<8x512xf32>
    %223 = arith.truncf %220 : vector<8x128xf32> to vector<8x128xbf16>
    %cst_99 = arith.constant dense<0.000000e+00> : vector<8x512xf32>
    %224 = tpu.matmul %223, %69, %cst_99 {dimension_numbers = #tpu.dot_dimension_numbers<[1], [0], [0], [1], [0, 0, 1, 1], [], []>} : vector<8x128xbf16>, vector<128x512xbf16>, vector<8x512xf32> -> vector<8x512xf32>
    %225 = arith.addf %222, %224 : vector<8x512xf32>
    %226 = vector.extract_strided_slice %225 {offsets = [0, 0], sizes = [8, 128], strides = [1, 1]} : vector<8x512xf32> to vector<8x128xf32>
    %227 = arith.negf %226 : vector<8x128xf32>
    %228 = math.exp %227 : vector<8x128xf32>
    %cst_100 = arith.constant 1.000000e+00 : f32
    %229 = vector.broadcast %cst_100 : f32 to vector<8x128xf32>
    %230 = arith.addf %229, %228 : vector<8x128xf32>
    %231 = arith.divf %229, %230 : vector<8x128xf32>
    %232 = vector.extract_strided_slice %225 {offsets = [0, 128], sizes = [8, 128], strides = [1, 1]} : vector<8x512xf32> to vector<8x128xf32>
    %233 = arith.negf %232 : vector<8x128xf32>
    %234 = math.exp %233 : vector<8x128xf32>
    %cst_101 = arith.constant 1.000000e+00 : f32
    %235 = vector.broadcast %cst_101 : f32 to vector<8x128xf32>
    %236 = arith.addf %235, %234 : vector<8x128xf32>
    %237 = arith.divf %235, %236 : vector<8x128xf32>
    %238 = vector.extract_strided_slice %225 {offsets = [0, 256], sizes = [8, 128], strides = [1, 1]} : vector<8x512xf32> to vector<8x128xf32>
    %239 = math.tanh %238 : vector<8x128xf32>
    %240 = vector.extract_strided_slice %225 {offsets = [0, 384], sizes = [8, 128], strides = [1, 1]} : vector<8x512xf32> to vector<8x128xf32>
    %241 = arith.negf %240 : vector<8x128xf32>
    %242 = math.exp %241 : vector<8x128xf32>
    %cst_102 = arith.constant 1.000000e+00 : f32
    %243 = vector.broadcast %cst_102 : f32 to vector<8x128xf32>
    %244 = arith.addf %243, %242 : vector<8x128xf32>
    %245 = arith.divf %243, %244 : vector<8x128xf32>
    %246 = arith.mulf %237, %218 : vector<8x128xf32>
    %247 = arith.mulf %231, %239 : vector<8x128xf32>
    %248 = arith.addf %246, %247 : vector<8x128xf32>
    %249 = math.tanh %248 : vector<8x128xf32>
    %250 = arith.mulf %245, %249 : vector<8x128xf32>
    %c40_103 = arith.constant 40 : index
    %c0_104 = arith.constant 0 : index
    %251 = vector.load %arg18[%c40_103, %c0_104] : memref<64x128xf32, #tpu.memory_space<vmem>>, vector<8x128xf32>
    tpu.vector_store %arg18[%c40_103, %c0_104], %250 {strides = array<i32>} : memref<64x128xf32, #tpu.memory_space<vmem>>, vector<8x128xf32>,
    %c48 = arith.constant 48 : index
    %c0_105 = arith.constant 0 : index
    %252 = vector.load %arg17[%c48, %c0_105] : memref<64x512xf32, #tpu.memory_space<vmem>>, vector<8x512xf32>
    %253 = arith.truncf %250 : vector<8x128xf32> to vector<8x128xbf16>
    %cst_106 = arith.constant dense<0.000000e+00> : vector<8x512xf32>
    %254 = tpu.matmul %253, %69, %cst_106 {dimension_numbers = #tpu.dot_dimension_numbers<[1], [0], [0], [1], [0, 0, 1, 1], [], []>} : vector<8x128xbf16>, vector<128x512xbf16>, vector<8x512xf32> -> vector<8x512xf32>
    %255 = arith.addf %252, %254 : vector<8x512xf32>
    %256 = vector.extract_strided_slice %255 {offsets = [0, 0], sizes = [8, 128], strides = [1, 1]} : vector<8x512xf32> to vector<8x128xf32>
    %257 = arith.negf %256 : vector<8x128xf32>
    %258 = math.exp %257 : vector<8x128xf32>
    %cst_107 = arith.constant 1.000000e+00 : f32
    %259 = vector.broadcast %cst_107 : f32 to vector<8x128xf32>
    %260 = arith.addf %259, %258 : vector<8x128xf32>
    %261 = arith.divf %259, %260 : vector<8x128xf32>
    %262 = vector.extract_strided_slice %255 {offsets = [0, 128], sizes = [8, 128], strides = [1, 1]} : vector<8x512xf32> to vector<8x128xf32>
    %263 = arith.negf %262 : vector<8x128xf32>
    %264 = math.exp %263 : vector<8x128xf32>
    %cst_108 = arith.constant 1.000000e+00 : f32
    %265 = vector.broadcast %cst_108 : f32 to vector<8x128xf32>
    %266 = arith.addf %265, %264 : vector<8x128xf32>
    %267 = arith.divf %265, %266 : vector<8x128xf32>
    %268 = vector.extract_strided_slice %255 {offsets = [0, 256], sizes = [8, 128], strides = [1, 1]} : vector<8x512xf32> to vector<8x128xf32>
    %269 = math.tanh %268 : vector<8x128xf32>
    %270 = vector.extract_strided_slice %255 {offsets = [0, 384], sizes = [8, 128], strides = [1, 1]} : vector<8x512xf32> to vector<8x128xf32>
    %271 = arith.negf %270 : vector<8x128xf32>
    %272 = math.exp %271 : vector<8x128xf32>
    %cst_109 = arith.constant 1.000000e+00 : f32
    %273 = vector.broadcast %cst_109 : f32 to vector<8x128xf32>
    %274 = arith.addf %273, %272 : vector<8x128xf32>
    %275 = arith.divf %273, %274 : vector<8x128xf32>
    %276 = arith.mulf %267, %248 : vector<8x128xf32>
    %277 = arith.mulf %261, %269 : vector<8x128xf32>
    %278 = arith.addf %276, %277 : vector<8x128xf32>
    %279 = math.tanh %278 : vector<8x128xf32>
    %280 = arith.mulf %275, %279 : vector<8x128xf32>
    %c48_110 = arith.constant 48 : index
    %c0_111 = arith.constant 0 : index
    %281 = vector.load %arg18[%c48_110, %c0_111] : memref<64x128xf32, #tpu.memory_space<vmem>>, vector<8x128xf32>
    tpu.vector_store %arg18[%c48_110, %c0_111], %280 {strides = array<i32>} : memref<64x128xf32, #tpu.memory_space<vmem>>, vector<8x128xf32>,
    %c56 = arith.constant 56 : index
    %c0_112 = arith.constant 0 : index
    %282 = vector.load %arg17[%c56, %c0_112] : memref<64x512xf32, #tpu.memory_space<vmem>>, vector<8x512xf32>
    %283 = arith.truncf %280 : vector<8x128xf32> to vector<8x128xbf16>
    %cst_113 = arith.constant dense<0.000000e+00> : vector<8x512xf32>
    %284 = tpu.matmul %283, %69, %cst_113 {dimension_numbers = #tpu.dot_dimension_numbers<[1], [0], [0], [1], [0, 0, 1, 1], [], []>} : vector<8x128xbf16>, vector<128x512xbf16>, vector<8x512xf32> -> vector<8x512xf32>
    %285 = arith.addf %282, %284 : vector<8x512xf32>
    %286 = vector.extract_strided_slice %285 {offsets = [0, 0], sizes = [8, 128], strides = [1, 1]} : vector<8x512xf32> to vector<8x128xf32>
    %287 = arith.negf %286 : vector<8x128xf32>
    %288 = math.exp %287 : vector<8x128xf32>
    %cst_114 = arith.constant 1.000000e+00 : f32
    %289 = vector.broadcast %cst_114 : f32 to vector<8x128xf32>
    %290 = arith.addf %289, %288 : vector<8x128xf32>
    %291 = arith.divf %289, %290 : vector<8x128xf32>
    %292 = vector.extract_strided_slice %285 {offsets = [0, 128], sizes = [8, 128], strides = [1, 1]} : vector<8x512xf32> to vector<8x128xf32>
    %293 = arith.negf %292 : vector<8x128xf32>
    %294 = math.exp %293 : vector<8x128xf32>
    %cst_115 = arith.constant 1.000000e+00 : f32
    %295 = vector.broadcast %cst_115 : f32 to vector<8x128xf32>
    %296 = arith.addf %295, %294 : vector<8x128xf32>
    %297 = arith.divf %295, %296 : vector<8x128xf32>
    %298 = vector.extract_strided_slice %285 {offsets = [0, 256], sizes = [8, 128], strides = [1, 1]} : vector<8x512xf32> to vector<8x128xf32>
    %299 = math.tanh %298 : vector<8x128xf32>
    %300 = vector.extract_strided_slice %285 {offsets = [0, 384], sizes = [8, 128], strides = [1, 1]} : vector<8x512xf32> to vector<8x128xf32>
    %301 = arith.negf %300 : vector<8x128xf32>
    %302 = math.exp %301 : vector<8x128xf32>
    %cst_116 = arith.constant 1.000000e+00 : f32
    %303 = vector.broadcast %cst_116 : f32 to vector<8x128xf32>
    %304 = arith.addf %303, %302 : vector<8x128xf32>
    %305 = arith.divf %303, %304 : vector<8x128xf32>
    %306 = arith.mulf %297, %278 : vector<8x128xf32>
    %307 = arith.mulf %291, %299 : vector<8x128xf32>
    %308 = arith.addf %306, %307 : vector<8x128xf32>
    %309 = math.tanh %308 : vector<8x128xf32>
    %310 = arith.mulf %305, %309 : vector<8x128xf32>
    %c56_117 = arith.constant 56 : index
    %c0_118 = arith.constant 0 : index
    %311 = vector.load %arg18[%c56_117, %c0_118] : memref<64x128xf32, #tpu.memory_space<vmem>>, vector<8x128xf32>
    tpu.vector_store %arg18[%c56_117, %c0_118], %310 {strides = array<i32>} : memref<64x128xf32, #tpu.memory_space<vmem>>, vector<8x128xf32>,
    %c0_119 = arith.constant 0 : index
    %c0_120 = arith.constant 0 : index
    %312 = vector.load %arg15[%c0_119, %c0_120] : memref<8x128xf32, #tpu.memory_space<vmem>>, vector<8x128xf32>
    tpu.vector_store %arg15[%c0_119, %c0_120], %310 {strides = array<i32>} : memref<8x128xf32, #tpu.memory_space<vmem>>, vector<8x128xf32>,
    %c0_121 = arith.constant 0 : index
    %c0_122 = arith.constant 0 : index
    %313 = vector.load %arg16[%c0_121, %c0_122] : memref<8x128xf32, #tpu.memory_space<vmem>>, vector<8x128xf32>
    tpu.vector_store %arg16[%c0_121, %c0_122], %308 {strides = array<i32>} : memref<8x128xf32, #tpu.memory_space<vmem>>, vector<8x128xf32>,
    %c0_123 = arith.constant 0 : index
    %c0_124 = arith.constant 0 : index
    %314 = vector.load %arg18[%c0_123, %c0_124] : memref<64x128xf32, #tpu.memory_space<vmem>>, vector<64x128xf32>
    %315 = arith.truncf %314 : vector<64x128xf32> to vector<64x128xbf16>
    %c0_125 = arith.constant 0 : index
    %c0_126 = arith.constant 0 : index
    %316 = vector.load %arg12[%c0_125, %c0_126] : memref<128x128xbf16, #tpu.memory_space<vmem>>, vector<128x128xbf16>
    %cst_127 = arith.constant dense<0.000000e+00> : vector<64x128xf32>
    %317 = tpu.matmul %315, %316, %cst_127 {dimension_numbers = #tpu.dot_dimension_numbers<[1], [0], [0], [1], [0, 0, 1, 1], [], []>} : vector<64x128xbf16>, vector<128x128xbf16>, vector<64x128xf32> -> vector<64x128xf32>
    %c0_128 = arith.constant 0 : index
    %c0_129 = arith.constant 0 : index
    %318 = vector.load %arg13[%c0_128, %c0_129] : memref<1x128xf32, #tpu.memory_space<vmem>>, vector<1x128xf32>
    %319 = vector.broadcast %318 : vector<1x128xf32> to vector<64x128xf32>
    %320 = arith.addf %317, %319 : vector<64x128xf32>
    %321 = tpu.iota {dimensions = array<i32: 1>} : vector<64x128xi32>
    %c6_i32 = arith.constant 6 : i32
    %322 = vector.broadcast %c6_i32 : i32 to vector<64x128xi32>
    %323 = arith.cmpi slt, %321, %322 : vector<64x128xi32>
    %cst_130 = arith.constant -1.000000e+30 : f32
    %324 = vector.broadcast %cst_130 : f32 to vector<64x128xf32>
    %325 = arith.select %323, %320, %324 : vector<64x128xi1>, vector<64x128xf32>
    %cst_131 = arith.constant dense<0xFF800000> : vector<64xf32>
    %326 = vector.multi_reduction <maximumf>, %325, %cst_131 [1] : vector<64x128xf32> to vector<64xf32>
    %327 = vector.shape_cast %326 : vector<64xf32> to vector<64x1xf32>
    %328 = vector.broadcast %327 : vector<64x1xf32> to vector<64x128xf32>
    %329 = arith.subf %325, %328 : vector<64x128xf32>
    %330 = math.exp %329 : vector<64x128xf32>
    %cst_132 = arith.constant dense<0.000000e+00> : vector<64xf32>
    %331 = vector.multi_reduction <add>, %330, %cst_132 [1] : vector<64x128xf32> to vector<64xf32>
    %332 = vector.shape_cast %331 : vector<64xf32> to vector<64x1xf32>
    %333 = tpu.reciprocal %332 : vector<64x1xf32> -> vector<64x1xf32>
    %334 = vector.broadcast %333 : vector<64x1xf32> to vector<64x128xf32>
    %335 = arith.mulf %330, %334 : vector<64x128xf32>
    %336 = arith.select %323, %335, %320 : vector<64x128xi1>, vector<64x128xf32>
    %c0_133 = arith.constant 0 : index
    %c0_134 = arith.constant 0 : index
    %337 = vector.load %arg14[%c0_133, %c0_134] : memref<64x128xf32, #tpu.memory_space<vmem>>, vector<64x128xf32>
    tpu.vector_store %arg14[%c0_133, %c0_134], %336 {strides = array<i32>} : memref<64x128xf32, #tpu.memory_space<vmem>>, vector<64x128xf32>,
    return
  }
}

</mosaic_0001>

<bundles_post_ra>
// kernel: doom_lstm_forward.3
= control target key start
LH: loop header
LB: loop body
LE: loop exit
PB: predicated region body
PF: predicated region fallthrough
CT: control target
= control target key end

     0   :  { %s2918_s12 = smov 0   ;;  %s3302_s0 = inlined_call_operand.vmem [shape: bf16[3136,192], index: 0, kind: input, shape index: {}]   ;;  %s3303_s1 = inlined_call_operand.vmem [shape: bf16[192,128], index: 1, kind: input, shape index: {}]   ;;  %s3304_s2 = inlined_call_operand.vmem [shape: f32[1,128], index: 2, kind: input, shape index: {}]   ;;  %s3305_s3 = inlined_call_operand.vmem [shape: bf16[3136,128], index: 3, kind: output, shape index: {}]  }
   0x1 LB: > { %s2037_s13 = sadd.s32 4294967295, %s2895_s12   ;;  %p2041_p0 = scmp.ge.s32.totalorder %s2895_s12, 1  ;;  %s2895_s12 = sphi %s2918_s12, %s13_s12  }
   0x2   : > { %p139_p1 = scmp.lt.s32.totalorder %s2895_s12, 5 }
   0x4   : > { %p140_p2 = pnand %p2041_p0, %p139_p1 }
   0x5   : > { %s164_s16 = smul.u32 (!%p140_p2), 98, %s2037_s13 }
   0x6   : > { %143 = sbr.rel (%p140_p2) target bundleno = 456 (0x1c8), region = 32 }
   0x7   : > { %p165_p3 = scmp.lt.s32.totalorder (!%p140_p2), %s164_s16, 391 }
   0xb   : > { %v2730_v0 = vld [vmem:[%s3303_s1 + $0x38] sm:$0xff]   ;;  %v2897_v1 = vmov 0   ;;  %v2731_v2 = vld [vmem:[%s3303_s1 + $0x30] sm:$0xff]   ;;  %s3307_s16 = smov (!%p165_p3, %s164_s16), 391  ;;  %v2732_v3 = vld [vmem:[%s3303_s1 + $0x28] sm:$0xff]   ;;  %vm820_vm0 = vcmask 523264  }
   0xc   : > { %968 = vmatprep.subr.bf16.mxu0 %v2897_v1  ;;  %2697 = vmatprep.subr.bf16.mxu1 %v2897_v1  ;;  %s2305_s21 = sshll.u32 %s3307_s16, 3  ;;  %v2733_v4 = vld [vmem:[%s3303_s1 + $0x20] sm:$0xff]   ;;  %v2734_v6 = vld [vmem:[%s3303_s1 + $0x18] sm:$0xff]   ;;  %v2735_v8 = vld [vmem:[%s3303_s1 + $0x10] sm:$0xff]   ;;  %s2044_s20 = sshll.u32 %s3307_s16, 2 }
   0xd   : > { %969 = vmatpush1.bf16.msra.mxu0 %v2730_v0  ;;  %2709 = vmatpush1.bf16.msra.mxu1 %v2730_v0  ;;  %s2950_s26 = scalar_lea.vmem %s3302_s0, %s2305_s21  ;;  %v2736_v9 = vld [vmem:[%s3303_s1 + $0x8] sm:$0xff]   ;;  %v2737_v10 = vld [vmem:[%s3303_s1] sm:$0xff]   ;;  %v2738_v11 = vld [vmem:[%s3303_s1 + $0x58] sm:$0xff]   ;;  %s3154_s23 = scalar_lea.vmem %s3305_s3, %s2044_s20 }
   0xe   : > { %970 = vmatprep.subr.bf16.mxu0 %v2897_v1  ;;  %2698 = vmatprep.subr.bf16.mxu1 %v2897_v1  ;;  %v2744_v5 = vld [vmem:[%s2950_s26 + $0x4] ss:$8 sps:$4 sm:$0xff]   ;;  %v2747_v7 = vld [vmem:[%s2950_s26 + $0x194] ss:$8 sps:$4 sm:$0xff]   ;;  %v2742_v15 = vld [vmem:[%s2950_s26] ss:$8 sps:$4 sm:$0xff]  }
   0xf   : > { %2156 = vmatprep.mubr.msk.bf16.mxu0 %vm820_vm0, %v2744_v5  ;;  %2181 = vmatprep.mubr.msk.bf16.mxu1 %vm820_vm0, %v2747_v7  ;;  %v2739_v12 = vld [vmem:[%s3303_s1 + $0x50] sm:$0xff]   ;;  %v2740_v13 = vld [vmem:[%s3303_s1 + $0x48] sm:$0xff]   ;;  %v2741_v14 = vld [vmem:[%s3303_s1 + $0x40] sm:$0xff]  }
  0x10   : > { %v2745_v16 = vld [vmem:[%s2950_s26 + $0x190] ss:$8 sps:$4 sm:$0xff]   ;;  %v2748_v17 = vld [vmem:[%s2950_s26 + $0x14] ss:$8 sps:$4 sm:$0xff]   ;;  %v2751_v18 = vld [vmem:[%s2950_s26 + $0x1a4] ss:$8 sps:$4 sm:$0xff]  }
  0x11   : > { %971 = vmatpush1.bf16.msra.mxu0 %v2731_v2  ;;  %2710 = vmatpush1.bf16.msra.mxu1 %v2731_v2  ;;  %v2750_v19 = vld [vmem:[%s2950_s26 + $0x10] ss:$8 sps:$4 sm:$0xff]   ;;  %v2753_v20 = vld [vmem:[%s2950_s26 + $0x1a0] ss:$8 sps:$4 sm:$0xff]   ;;  %v2754_v21 = vld [vmem:[%s2950_s26 + $0x24] ss:$8 sps:$4 sm:$0xff]  }
  0x12   : > { %972 = vmatprep.subr.bf16.mxu0 %v2897_v1  ;;  %2699 = vmatprep.subr.bf16.mxu1 %v2897_v1  ;;  %v2757_v22 = vld [vmem:[%s2950_s26 + $0x1b4] ss:$8 sps:$4 sm:$0xff]   ;;  %v2756_v23 = vld [vmem:[%s2950_s26 + $0x20] ss:$8 sps:$4 sm:$0xff]   ;;  %v2759_v24 = vld [vmem:[%s2950_s26 + $0x1b0] ss:$8 sps:$4 sm:$0xff]  }
  0x13   : > { %v2760_v25 = vld [vmem:[%s2950_s26 + $0x34] ss:$8 sps:$4 sm:$0xff]   ;;  %v2763_v26 = vld [vmem:[%s2950_s26 + $0x1c4] ss:$8 sps:$4 sm:$0xff]   ;;  %v2762_v27 = vld [vmem:[%s2950_s26 + $0x30] ss:$8 sps:$4 sm:$0xff]  }
  0x14   : > { %v2765_v28 = vld [vmem:[%s2950_s26 + $0x1c0] ss:$8 sps:$4 sm:$0xff]   ;;  %v2766_v29 = vld [vmem:[%s2950_s26 + $0x44] ss:$8 sps:$4 sm:$0xff]   ;;  %v2769_v30 = vld [vmem:[%s2950_s26 + $0x1d4] ss:$8 sps:$4 sm:$0xff]  }
  0x15   : > { %973 = vmatpush1.bf16.msra.mxu0 %v2732_v3  ;;  %2711 = vmatpush1.bf16.msra.mxu1 %v2732_v3  ;;  %v2768_v31 = vld [vmem:[%s2950_s26 + $0x40] ss:$8 sps:$4 sm:$0xff]   ;;  %v2771_v32 = vld [vmem:[%s2950_s26 + $0x1d0] ss:$8 sps:$4 sm:$0xff]   ;;  %v2772_v33 = vld [vmem:[%s2950_s26 + $0x54] ss:$8 sps:$4 sm:$0xff]  }
  0x16   : > { %974 = vmatprep.subr.bf16.mxu0 %v2897_v1  ;;  %2700 = vmatprep.subr.bf16.mxu1 %v2897_v1  ;;  %v2775_v34 = vld [vmem:[%s2950_s26 + $0x1e4] ss:$8 sps:$4 sm:$0xff]   ;;  %v2774_v35 = vld [vmem:[%s2950_s26 + $0x50] ss:$8 sps:$4 sm:$0xff]   ;;  %v2777_v36 = vld [vmem:[%s2950_s26 + $0x1e0] ss:$8 sps:$4 sm:$0xff]  }
  0x17   : > { %v2778_v37 = vld [vmem:[%s2950_s26 + $0x64] ss:$8 sps:$4 sm:$0xff]   ;;  %v2781_v38 = vld [vmem:[%s2950_s26 + $0x1f4] ss:$8 sps:$4 sm:$0xff]   ;;  %v2780_v39 = vld [vmem:[%s2950_s26 + $0x60] ss:$8 sps:$4 sm:$0xff]  }
  0x18   : > { %v2783_v40 = vld [vmem:[%s2950_s26 + $0x1f0] ss:$8 sps:$4 sm:$0xff]   ;;  %v2784_v41 = vld [vmem:[%s2950_s26 + $0x74] ss:$8 sps:$4 sm:$0xff]   ;;  %v2787_v42 = vld [vmem:[%s2950_s26 + $0x204] ss:$8 sps:$4 sm:$0xff]  }
  0x19   : > { %975 = vmatpush1.bf16.msra.mxu0 %v2733_v4  ;;  %2712 = vmatpush1.bf16.msra.mxu1 %v2733_v4  ;;  %v2786_v43 = vld [vmem:[%s2950_s26 + $0x70] ss:$8 sps:$4 sm:$0xff]   ;;  %v2789_v44 = vld [vmem:[%s2950_s26 + $0x200] ss:$8 sps:$4 sm:$0xff]   ;;  %v2790_v45 = vld [vmem:[%s2950_s26 + $0x84] ss:$8 sps:$4 sm:$0xff]  }
  0x1a   : > { %976 = vmatprep.subr.bf16.mxu0 %v2897_v1  ;;  %2701 = vmatprep.subr.bf16.mxu1 %v2897_v1  ;;  %v2793_v46 = vld [vmem:[%s2950_s26 + $0x214] ss:$8 sps:$4 sm:$0xff]   ;;  %v2792_v47 = vld [vmem:[%s2950_s26 + $0x80] ss:$8 sps:$4 sm:$0xff]   ;;  %v2795_v48 = vld [vmem:[%s2950_s26 + $0x210] ss:$8 sps:$4 sm:$0xff]  }
  0x1b   : > { %v2796_v49 = vld [vmem:[%s2950_s26 + $0x94] ss:$8 sps:$4 sm:$0xff]   ;;  %v2799_v50 = vld [vmem:[%s2950_s26 + $0x224] ss:$8 sps:$4 sm:$0xff]   ;;  %v2798_v51 = vld [vmem:[%s2950_s26 + $0x90] ss:$8 sps:$4 sm:$0xff]  }
  0x1c   : > { %v2801_v52 = vld [vmem:[%s2950_s26 + $0x220] ss:$8 sps:$4 sm:$0xff]   ;;  %v2802_v53 = vld [vmem:[%s2950_s26 + $0xa4] ss:$8 sps:$4 sm:$0xff]   ;;  %v2805_v54 = vld [vmem:[%s2950_s26 + $0x234] ss:$8 sps:$4 sm:$0xff]  }
  0x1d   : > { %977 = vmatpush1.bf16.msra.mxu0 %v2734_v6  ;;  %2713 = vmatpush1.bf16.msra.mxu1 %v2734_v6  ;;  %v2804_v55 = vld [vmem:[%s2950_s26 + $0xa0] ss:$8 sps:$4 sm:$0xff]   ;;  %v2807_v56 = vld [vmem:[%s2950_s26 + $0x230] ss:$8 sps:$4 sm:$0xff]   ;;  %v2808_v57 = vld [vmem:[%s2950_s26 + $0xb4] ss:$8 sps:$4 sm:$0xff]  }
  0x1e   : > { %978 = vmatprep.subr.bf16.mxu0 %v2897_v1  ;;  %2702 = vmatprep.subr.bf16.mxu1 %v2897_v1  ;;  %v2811_v58 = vld [vmem:[%s2950_s26 + $0x244] ss:$8 sps:$4 sm:$0xff]   ;;  %v2810_v59 = vld [vmem:[%s2950_s26 + $0xb0] ss:$8 sps:$4 sm:$0xff]   ;;  %v2813_v60 = vld [vmem:[%s2950_s26 + $0x240] ss:$8 sps:$4 sm:$0xff]  }
  0x1f   : > { %v2814_v61 = vld [vmem:[%s2950_s26 + $0xc4] ss:$8 sps:$4 sm:$0xff]   ;;  %v2817_v62 = vld [vmem:[%s2950_s26 + $0x254] ss:$8 sps:$4 sm:$0xff]   ;;  %v2816_v63 = vld [vmem:[%s2950_s26 + $0xc0] ss:$8 sps:$4 sm:$0xff]  }
  0x20   : > { %v2819_v0 = vld [vmem:[%s2950_s26 + $0x250] ss:$8 sps:$4 sm:$0xff]   ;;  %v2823_v2 = vld [vmem:[%s2950_s26 + $0x264] ss:$8 sps:$4 sm:$0xff]   ;;  %v2825_v4 = vld [vmem:[%s2950_s26 + $0x260] ss:$8 sps:$4 sm:$0xff]  }
  0x21   : > { %979 = vmatpush1.bf16.msra.mxu0 %v2735_v8  ;;  %2714 = vmatpush1.bf16.msra.mxu1 %v2735_v8  ;;  %v2822_v3 = vld [vmem:[%s2950_s26 + $0xd0] ss:$8 sps:$4 sm:$0xff]   ;;  %v2826_v5 = vld [vmem:[%s2950_s26 + $0xe4] ss:$8 sps:$4 sm:$0xff]   ;;  %v2829_v6 = vld [vmem:[%s2950_s26 + $0x274] ss:$8 sps:$4 sm:$0xff]  }
  0x22   : > { %980 = vmatprep.subr.bf16.mxu0 %v2897_v1  ;;  %2703 = vmatprep.subr.bf16.mxu1 %v2897_v1  ;;  %v2828_v7 = vld [vmem:[%s2950_s26 + $0xe0] ss:$8 sps:$4 sm:$0xff]   ;;  %v2831_v8 = vld [vmem:[%s2950_s26 + $0x270] ss:$8 sps:$4 sm:$0xff]  }
  0x25   : > { %981 = vmatpush1.bf16.msra.mxu0 %v2736_v9  ;;  %2715 = vmatpush1.bf16.msra.mxu1 %v2736_v9  ;;  %v2832_v9 = vld [vmem:[%s2950_s26 + $0xf4] ss:$8 sps:$4 sm:$0xff]  }
  0x26   : > { %982 = vmatprep.subr.bf16.mxu0 %v2897_v1  ;;  %2704 = vmatprep.subr.bf16.mxu1 %v2897_v1 }
  0x29   : > { %983 = vmatpush1.bf16.msra.mxu0 %v2737_v10  ;;  %2716 = vmatpush1.bf16.msra.mxu1 %v2737_v10  ;;  %v2835_v10 = vld [vmem:[%s2950_s26 + $0x284] ss:$8 sps:$4 sm:$0xff]  }
  0x2a   : > { %992 = vmatprep.subr.bf16.mxu0 %v2897_v1  ;;  %2705 = vmatprep.subr.bf16.mxu1 %v2897_v1 }
  0x2d   : > { %993 = vmatpush2.bf16.msra.mxu0 %v2738_v11  ;;  %2717 = vmatpush2.bf16.msra.mxu1 %v2738_v11  ;;  %v2834_v11 = vld [vmem:[%s2950_s26 + $0xf0] ss:$8 sps:$4 sm:$0xff]  }
  0x2e   : > { %994 = vmatprep.subr.bf16.mxu0 %v2897_v1  ;;  %2706 = vmatprep.subr.bf16.mxu1 %v2897_v1 }
  0x31   : > { %995 = vmatpush2.bf16.msra.mxu0 %v2739_v12  ;;  %2718 = vmatpush2.bf16.msra.mxu1 %v2739_v12  ;;  %v2837_v12 = vld [vmem:[%s2950_s26 + $0x280] ss:$8 sps:$4 sm:$0xff]  }
  0x32   : > { %996 = vmatprep.subr.bf16.mxu0 %v2897_v1  ;;  %2707 = vmatprep.subr.bf16.mxu1 %v2897_v1 }
  0x35   : > { %997 = vmatpush2.bf16.msra.mxu0 %v2740_v13  ;;  %2719 = vmatpush2.bf16.msra.mxu1 %v2740_v13  ;;  %v2838_v13 = vld [vmem:[%s2950_s26 + $0x104] ss:$8 sps:$4 sm:$0xff]  }
  0x36   : > { %998 = vmatprep.subr.bf16.mxu0 %v2897_v1  ;;  %2708 = vmatprep.subr.bf16.mxu1 %v2897_v1  ;;  %v2820_v1 = vld [vmem:[%s2950_s26 + $0xd4] ss:$8 sps:$4 sm:$0xff]  }
  0x39   : > { %999 = vmatpush2.bf16.msra.mxu0 %v2741_v14  ;;  %2720 = vmatpush2.bf16.msra.mxu1 %v2741_v14  ;;  %v2841_v14 = vld [vmem:[%s2950_s26 + $0x294] ss:$8 sps:$4 sm:$0xff]  }
  0x3c   : > { %1001 = vmatmul.mubr.bf16.vlgmr.msra.gmra.mxu0 %v2742_v15  ;;  %1201 = vmatmul.mubr.bf16.vlgmr.msra.gmra.mxu1 %v2745_v16  ;;  %v2840_v15 = vld [vmem:[%s2950_s26 + $0x100] ss:$8 sps:$4 sm:$0xff]   ;;  %v2843_v16 = vld [vmem:[%s2950_s26 + $0x290] ss:$8 sps:$4 sm:$0xff]  }
  0x3d   : > { %2157 = vmatprep.mubr.msk.bf16.mxu0 %vm820_vm0, %v2748_v17  ;;  %2182 = vmatprep.mubr.msk.bf16.mxu1 %vm820_vm0, %v2751_v18  ;;  %v2844_v17 = vld [vmem:[%s2950_s26 + $0x114] ss:$8 sps:$4 sm:$0xff]   ;;  %v2847_v18 = vld [vmem:[%s2950_s26 + $0x2a4] ss:$8 sps:$4 sm:$0xff]  }
  0x44   : > { %1009 = vmatmul.mubr.bf16.gmra.mxu0 %v2750_v19  ;;  %1209 = vmatmul.mubr.bf16.gmra.mxu1 %v2753_v20  ;;  %v2846_v19 = vld [vmem:[%s2950_s26 + $0x110] ss:$8 sps:$4 sm:$0xff]   ;;  %v2849_v20 = vld [vmem:[%s2950_s26 + $0x2a0] ss:$8 sps:$4 sm:$0xff]  }
  0x45   : > { %2158 = vmatprep.mubr.msk.bf16.mxu0 %vm820_vm0, %v2754_v21  ;;  %2183 = vmatprep.mubr.msk.bf16.mxu1 %vm820_vm0, %v2757_v22  ;;  %v2850_v21 = vld [vmem:[%s2950_s26 + $0x124] ss:$8 sps:$4 sm:$0xff]   ;;  %v2853_v22 = vld [vmem:[%s2950_s26 + $0x2b4] ss:$8 sps:$4 sm:$0xff]  }
  0x4c   : > { %1017 = vmatmul.mubr.bf16.gmra.mxu0 %v2756_v23  ;;  %1217 = vmatmul.mubr.bf16.gmra.mxu1 %v2759_v24  ;;  %v2852_v23 = vld [vmem:[%s2950_s26 + $0x120] ss:$8 sps:$4 sm:$0xff]   ;;  %v2855_v24 = vld [vmem:[%s2950_s26 + $0x2b0] ss:$8 sps:$4 sm:$0xff]  }
  0x4d   : > { %2159 = vmatprep.mubr.msk.bf16.mxu0 %vm820_vm0, %v2760_v25  ;;  %2184 = vmatprep.mubr.msk.bf16.mxu1 %vm820_vm0, %v2763_v26  ;;  %v2856_v25 = vld [vmem:[%s2950_s26 + $0x134] ss:$8 sps:$4 sm:$0xff]   ;;  %v2859_v26 = vld [vmem:[%s2950_s26 + $0x2c4] ss:$8 sps:$4 sm:$0xff]  }
  0x54   : > { %1025 = vmatmul.mubr.bf16.gmra.mxu0 %v2762_v27  ;;  %1225 = vmatmul.mubr.bf16.gmra.mxu1 %v2765_v28  ;;  %v2858_v27 = vld [vmem:[%s2950_s26 + $0x130] ss:$8 sps:$4 sm:$0xff]   ;;  %v2861_v28 = vld [vmem:[%s2950_s26 + $0x2c0] ss:$8 sps:$4 sm:$0xff]  }
  0x55   : > { %2160 = vmatprep.mubr.msk.bf16.mxu0 %vm820_vm0, %v2766_v29  ;;  %2185 = vmatprep.mubr.msk.bf16.mxu1 %vm820_vm0, %v2769_v30  ;;  %v2862_v29 = vld [vmem:[%s2950_s26 + $0x144] ss:$8 sps:$4 sm:$0xff]   ;;  %v2865_v30 = vld [vmem:[%s2950_s26 + $0x2d4] ss:$8 sps:$4 sm:$0xff]  }
  0x5c   : > { %1033 = vmatmul.mubr.bf16.gmra.mxu0 %v2768_v31  ;;  %1233 = vmatmul.mubr.bf16.gmra.mxu1 %v2771_v32  ;;  %v2864_v31 = vld [vmem:[%s2950_s26 + $0x140] ss:$8 sps:$4 sm:$0xff]   ;;  %v2867_v32 = vld [vmem:[%s2950_s26 + $0x2d0] ss:$8 sps:$4 sm:$0xff]  }
  0x5d   : > { %2161 = vmatprep.mubr.msk.bf16.mxu0 %vm820_vm0, %v2772_v33  ;;  %2186 = vmatprep.mubr.msk.bf16.mxu1 %vm820_vm0, %v2775_v34  ;;  %v2868_v33 = vld [vmem:[%s2950_s26 + $0x154] ss:$8 sps:$4 sm:$0xff]   ;;  %v2871_v34 = vld [vmem:[%s2950_s26 + $0x2e4] ss:$8 sps:$4 sm:$0xff]  }
  0x64   : > { %1041 = vmatmul.mubr.bf16.gmra.mxu0 %v2774_v35  ;;  %1241 = vmatmul.mubr.bf16.gmra.mxu1 %v2777_v36  ;;  %v2870_v35 = vld [vmem:[%s2950_s26 + $0x150] ss:$8 sps:$4 sm:$0xff]   ;;  %v2873_v36 = vld [vmem:[%s2950_s26 + $0x2e0] ss:$8 sps:$4 sm:$0xff]  }
  0x65   : > { %2162 = vmatprep.mubr.msk.bf16.mxu0 %vm820_vm0, %v2778_v37  ;;  %2187 = vmatprep.mubr.msk.bf16.mxu1 %vm820_vm0, %v2781_v38  ;;  %v2874_v37 = vld [vmem:[%s2950_s26 + $0x164] ss:$8 sps:$4 sm:$0xff]   ;;  %v2877_v38 = vld [vmem:[%s2950_s26 + $0x2f4] ss:$8 sps:$4 sm:$0xff]  }
  0x6c   : > { %1049 = vmatmul.mubr.bf16.gmra.mxu0 %v2780_v39  ;;  %1249 = vmatmul.mubr.bf16.gmra.mxu1 %v2783_v40  ;;  %v2876_v39 = vld [vmem:[%s2950_s26 + $0x160] ss:$8 sps:$4 sm:$0xff]   ;;  %v2879_v40 = vld [vmem:[%s2950_s26 + $0x2f0] ss:$8 sps:$4 sm:$0xff]  }
  0x6d   : > { %2163 = vmatprep.mubr.msk.bf16.mxu0 %vm820_vm0, %v2784_v41  ;;  %2188 = vmatprep.mubr.msk.bf16.mxu1 %vm820_vm0, %v2787_v42  ;;  %v2880_v41 = vld [vmem:[%s2950_s26 + $0x174] ss:$8 sps:$4 sm:$0xff]   ;;  %v2883_v42 = vld [vmem:[%s2950_s26 + $0x304] ss:$8 sps:$4 sm:$0xff]  }
  0x74   : > { %1057 = vmatmul.mubr.bf16.gmra.mxu0 %v2786_v43  ;;  %1257 = vmatmul.mubr.bf16.gmra.mxu1 %v2789_v44  ;;  %v2882_v43 = vld [vmem:[%s2950_s26 + $0x170] ss:$8 sps:$4 sm:$0xff]   ;;  %v2885_v44 = vld [vmem:[%s2950_s26 + $0x300] ss:$8 sps:$4 sm:$0xff]  }
  0x75   : > { %2164 = vmatprep.mubr.msk.bf16.mxu0 %vm820_vm0, %v2790_v45  ;;  %2189 = vmatprep.mubr.msk.bf16.mxu1 %vm820_vm0, %v2793_v46  ;;  %v2886_v45 = vld [vmem:[%s2950_s26 + $0x184] ss:$8 sps:$4 sm:$0xff]   ;;  %v2888_v46 = vld [vmem:[%s2950_s26 + $0x180] ss:$8 sps:$4 sm:$0xff]  }
  0x7c   : > { %1065 = vmatmul.mubr.bf16.gmra.mxu0 %v2792_v47  ;;  %1265 = vmatmul.mubr.bf16.gmra.mxu1 %v2795_v48  ;;  %v3144_v47 = vld [vmem:[%s3304_s2] ss:$0 sm:$0xff] }
  0x7d   : > { %2165 = vmatprep.mubr.msk.bf16.mxu0 %vm820_vm0, %v2796_v49  ;;  %2190 = vmatprep.mubr.msk.bf16.mxu1 %vm820_vm0, %v2799_v50 }
  0x84   : > { %1073 = vmatmul.mubr.bf16.gmra.mxu0 %v2798_v51  ;;  %1273 = vmatmul.mubr.bf16.gmra.mxu1 %v2801_v52 }
  0x85   : > { %2166 = vmatprep.mubr.msk.bf16.mxu0 %vm820_vm0, %v2802_v53  ;;  %2191 = vmatprep.mubr.msk.bf16.mxu1 %vm820_vm0, %v2805_v54 }
  0x8c   : > { %1081 = vmatmul.mubr.bf16.gmra.mxu0 %v2804_v55  ;;  %1281 = vmatmul.mubr.bf16.gmra.mxu1 %v2807_v56 }
  0x8d   : > { %2167 = vmatprep.mubr.msk.bf16.mxu0 %vm820_vm0, %v2808_v57  ;;  %2192 = vmatprep.mubr.msk.bf16.mxu1 %vm820_vm0, %v2811_v58 }
  0x94   : > { %1089 = vmatmul.mubr.bf16.gmra.mxu0 %v2810_v59  ;;  %1289 = vmatmul.mubr.bf16.gmra.mxu1 %v2813_v60 }
  0x95   : > { %2168 = vmatprep.mubr.msk.bf16.mxu0 %vm820_vm0, %v2814_v61  ;;  %2193 = vmatprep.mubr.msk.bf16.mxu1 %vm820_vm0, %v2817_v62 }
  0x9c   : > { %1097 = vmatmul.mubr.bf16.gmra.mxu0 %v2816_v63  ;;  %1297 = vmatmul.mubr.bf16.gmra.mxu1 %v2819_v0 }
  0x9d   : > { %2169 = vmatprep.mubr.msk.bf16.mxu0 %vm820_vm0, %v2820_v1  ;;  %2194 = vmatprep.mubr.msk.bf16.mxu1 %vm820_vm0, %v2823_v2 }
  0xa4   : > { %1105 = vmatmul.mubr.bf16.gmra.mxu0 %v2822_v3  ;;  %1305 = vmatmul.mubr.bf16.gmra.mxu1 %v2825_v4 }
  0xa5   : > { %2170 = vmatprep.mubr.msk.bf16.mxu0 %vm820_vm0, %v2826_v5  ;;  %2195 = vmatprep.mubr.msk.bf16.mxu1 %vm820_vm0, %v2829_v6 }
  0xac   : > { %1113 = vmatmul.mubr.bf16.gmra.mxu0 %v2828_v7  ;;  %1313 = vmatmul.mubr.bf16.gmra.mxu1 %v2831_v8 }
  0xad   : > { %2171 = vmatprep.mubr.msk.bf16.mxu0 %vm820_vm0, %v2832_v9  ;;  %2196 = vmatprep.mubr.msk.bf16.mxu1 %vm820_vm0, %v2835_v10 }
  0xb4   : > { %1121 = vmatmul.mubr.bf16.gmra.mxu0 %v2834_v11  ;;  %1321 = vmatmul.mubr.bf16.gmra.mxu1 %v2837_v12 }
  0xb5   : > { %2172 = vmatprep.mubr.msk.bf16.mxu0 %vm820_vm0, %v2838_v13  ;;  %2197 = vmatprep.mubr.msk.bf16.mxu1 %vm820_vm0, %v2841_v14 }
  0xbc   : > { %1129 = vmatmul.mubr.bf16.gmra.mxu0 %v2840_v15  ;;  %1329 = vmatmul.mubr.bf16.gmra.mxu1 %v2843_v16 }
  0xbd   : > { %2173 = vmatprep.mubr.msk.bf16.mxu0 %vm820_vm0, %v2844_v17  ;;  %2198 = vmatprep.mubr.msk.bf16.mxu1 %vm820_vm0, %v2847_v18 }
  0xc4   : > { %1137 = vmatmul.mubr.bf16.gmra.mxu0 %v2846_v19  ;;  %1337 = vmatmul.mubr.bf16.gmra.mxu1 %v2849_v20 }
  0xc5   : > { %2174 = vmatprep.mubr.msk.bf16.mxu0 %vm820_vm0, %v2850_v21  ;;  %2199 = vmatprep.mubr.msk.bf16.mxu1 %vm820_vm0, %v2853_v22 }
  0xcc   : > { %1145 = vmatmul.mubr.bf16.gmra.mxu0 %v2852_v23  ;;  %1345 = vmatmul.mubr.bf16.gmra.mxu1 %v2855_v24 }
  0xcd   : > { %2175 = vmatprep.mubr.msk.bf16.mxu0 %vm820_vm0, %v2856_v25  ;;  %2200 = vmatprep.mubr.msk.bf16.mxu1 %vm820_vm0, %v2859_v26 }
  0xd4   : > { %1153 = vmatmul.mubr.bf16.gmra.mxu0 %v2858_v27  ;;  %1353 = vmatmul.mubr.bf16.gmra.mxu1 %v2861_v28 }
  0xd5   : > { %2176 = vmatprep.mubr.msk.bf16.mxu0 %vm820_vm0, %v2862_v29  ;;  %2201 = vmatprep.mubr.msk.bf16.mxu1 %vm820_vm0, %v2865_v30 }
  0xdc   : > { %1161 = vmatmul.mubr.bf16.gmra.mxu0 %v2864_v31  ;;  %1361 = vmatmul.mubr.bf16.gmra.mxu1 %v2867_v32 }
  0xdd   : > { %2177 = vmatprep.mubr.msk.bf16.mxu0 %vm820_vm0, %v2868_v33  ;;  %2202 = vmatprep.mubr.msk.bf16.mxu1 %vm820_vm0, %v2871_v34 }
  0xe4   : > { %1169 = vmatmul.mubr.bf16.gmra.mxu0 %v2870_v35  ;;  %1369 = vmatmul.mubr.bf16.gmra.mxu1 %v2873_v36 }
  0xe5   : > { %2178 = vmatprep.mubr.msk.bf16.mxu0 %vm820_vm0, %v2874_v37  ;;  %2203 = vmatprep.mubr.msk.bf16.mxu1 %vm820_vm0, %v2877_v38 }
  0xec   : > { %1177 = vmatmul.mubr.bf16.gmra.mxu0 %v2876_v39  ;;  %1377 = vmatmul.mubr.bf16.gmra.mxu1 %v2879_v40 }
  0xed   : > { %2179 = vmatprep.mubr.msk.bf16.mxu0 %vm820_vm0, %v2880_v41  ;;  %2204 = vmatprep.mubr.msk.bf16.mxu1 %vm820_vm0, %v2883_v42 }
  0xf4   : > { %1185 = vmatmul.mubr.bf16.gmra.mxu0 %v2882_v43  ;;  %1385 = vmatmul.mubr.bf16.gmra.mxu1 %v2885_v44 }
  0xf5   : > { %2180 = vmatprep.mubr.msk.bf16.mxu0 %vm820_vm0, %v2886_v45 }
  0xfc   : > { %v1002_v48 = vpop.f32.mrf.mxu0  ;;  %1193 = vmatmul.mubr.bf16.gmra.mxu0 %v2888_v46  ;;  %v1202_v49 = vpop.f32.mrf.mxu1 }
  0xfd   : > { %v1203_v50 = vadd.f32 %v3144_v47, %v1202_v49  ;;  %v1003_v53 = vadd.f32 %v3144_v47, %v1002_v48 }
  0xfe   : > { %v1004_v51 = vpop.f32.mrf.mxu0  ;;  %v1204_v52 = vpop.f32.mrf.mxu1 }
  0xff   : > { %v1443_v56 = vmax.f32 %v1203_v50, 0.0  ;;  %v1393_v61 = vmax.f32 %v1003_v53, 0.0 }
 0x100   : > { %v1005_v54 = vpop.f32.mrf.mxu0  ;;  %v1205_v55 = vpop.f32.mrf.mxu1 }
 0x101   : > { %v1006_v57 = vadd.f32 %v3144_v47, %v1005_v54  ;;  %v1206_v58 = vadd.f32 %v3144_v47, %v1205_v55 }
 0x102   : > { %v1007_v59 = vpop.f32.mrf.mxu0  ;;  %v1207_v60 = vpop.f32.mrf.mxu1 }
 0x103   : > { %v1394_v62 = vmax.f32 %v1006_v57, 0.0  ;;  %v1444_v63 = vmax.f32 %v1206_v58, 0.0 }
 0x104   : > { %v1010_v0 = vpop.f32.mrf.mxu0  ;;  %v1210_v1 = vpop.f32.mrf.mxu1 }
 0x105   : > { %v2407_v2 = vpack.c.bf16 %v1394_v62, %v1393_v61  ;;  %v2532_v3 = vpack.c.bf16 %v1444_v63, %v1443_v56  ;;  %v1211_v4 = vadd.f32 %v3144_v47, %v1210_v1  ;;  %v1011_v7 = vadd.f32 %v3144_v47, %v1010_v0 }
 0x106   : > { %v1012_v5 = vpop.f32.mrf.mxu0  ;;  %v1212_v6 = vpop.f32.mrf.mxu1 }
 0x107   : > { %2408 = vst [vmem:[%s3154_s23] sm:$0xff] %v2407_v2   ;;  %2673 = vst [vmem:[%s3154_s23 + $0xc8] sm:$0xff] %v2532_v3   ;;  %v1445_v10 = vmax.f32 %v1211_v4, 0.0  ;;  %v1395_v15 = vmax.f32 %v1011_v7, 0.0 }
 0x108   : > { %v1013_v8 = vpop.f32.mrf.mxu0  ;;  %v1213_v9 = vpop.f32.mrf.mxu1 }
 0x109   : > { %v1014_v11 = vadd.f32 %v3144_v47, %v1013_v8  ;;  %v1214_v12 = vadd.f32 %v3144_v47, %v1213_v9 }
 0x10a   : > { %v1015_v13 = vpop.f32.mrf.mxu0  ;;  %v1215_v14 = vpop.f32.mrf.mxu1 }
 0x10b   : > { %v1396_v16 = vmax.f32 %v1014_v11, 0.0  ;;  %v1446_v17 = vmax.f32 %v1214_v12, 0.0 }
 0x10c   : > { %v1018_v18 = vpop.f32.mrf.mxu0  ;;  %v1218_v19 = vpop.f32.mrf.mxu1 }
 0x10d   : > { %v2412_v20 = vpack.c.bf16 %v1396_v16, %v1395_v15  ;;  %v2537_v21 = vpack.c.bf16 %v1446_v17, %v1445_v10  ;;  %v1219_v22 = vadd.f32 %v3144_v47, %v1218_v19  ;;  %v1019_v25 = vadd.f32 %v3144_v47, %v1018_v18 }
 0x10e   : > { %v1020_v23 = vpop.f32.mrf.mxu0  ;;  %v1220_v24 = vpop.f32.mrf.mxu1 }
 0x10f   : > { %2649 = vst [vmem:[%s3154_s23 + $0x8] sm:$0xff] %v2412_v20   ;;  %2674 = vst [vmem:[%s3154_s23 + $0xd0] sm:$0xff] %v2537_v21   ;;  %v1447_v28 = vmax.f32 %v1219_v22, 0.0  ;;  %v1397_v33 = vmax.f32 %v1019_v25, 0.0 }
 0x110   : > { %v1021_v26 = vpop.f32.mrf.mxu0  ;;  %v1221_v27 = vpop.f32.mrf.mxu1 }
 0x111   : > { %v1022_v29 = vadd.f32 %v3144_v47, %v1021_v26  ;;  %v1222_v30 = vadd.f32 %v3144_v47, %v1221_v27 }
 0x112   : > { %v1023_v31 = vpop.f32.mrf.mxu0  ;;  %v1223_v32 = vpop.f32.mrf.mxu1 }
 0x113   : > { %v1398_v34 = vmax.f32 %v1022_v29, 0.0  ;;  %v1448_v35 = vmax.f32 %v1222_v30, 0.0 }
 0x114   : > { %v1026_v36 = vpop.f32.mrf.mxu0  ;;  %v1226_v37 = vpop.f32.mrf.mxu1 }
 0x115   : > { %v2417_v38 = vpack.c.bf16 %v1398_v34, %v1397_v33  ;;  %v2542_v39 = vpack.c.bf16 %v1448_v35, %v1447_v28  ;;  %v1227_v40 = vadd.f32 %v3144_v47, %v1226_v37  ;;  %v1027_v43 = vadd.f32 %v3144_v47, %v1026_v36 }
 0x116   : > { %v1028_v41 = vpop.f32.mrf.mxu0  ;;  %v1228_v42 = vpop.f32.mrf.mxu1 }
 0x117   : > { %2650 = vst [vmem:[%s3154_s23 + $0x10] sm:$0xff] %v2417_v38   ;;  %2675 = vst [vmem:[%s3154_s23 + $0xd8] sm:$0xff] %v2542_v39   ;;  %v1449_v46 = vmax.f32 %v1227_v40, 0.0  ;;  %v1399_v52 = vmax.f32 %v1027_v43, 0.0 }
 0x118   : > { %v1029_v44 = vpop.f32.mrf.mxu0  ;;  %v1229_v45 = vpop.f32.mrf.mxu1 }
 0x119   : > { %v1030_v48 = vadd.f32 %v3144_v47, %v1029_v44  ;;  %v1230_v49 = vadd.f32 %v3144_v47, %v1229_v45 }
 0x11a   : > { %v1031_v50 = vpop.f32.mrf.mxu0  ;;  %v1231_v51 = vpop.f32.mrf.mxu1 }
 0x11b   : > { %v1400_v53 = vmax.f32 %v1030_v48, 0.0  ;;  %v1450_v54 = vmax.f32 %v1230_v49, 0.0 }
 0x11c   : > { %v1034_v55 = vpop.f32.mrf.mxu0  ;;  %v1234_v56 = vpop.f32.mrf.mxu1 }
 0x11d   : > { %v2422_v57 = vpack.c.bf16 %v1400_v53, %v1399_v52  ;;  %v2547_v58 = vpack.c.bf16 %v1450_v54, %v1449_v46  ;;  %v1235_v59 = vadd.f32 %v3144_v47, %v1234_v56  ;;  %v1035_v62 = vadd.f32 %v3144_v47, %v1034_v55 }
 0x11e   : > { %v1036_v60 = vpop.f32.mrf.mxu0  ;;  %v1236_v61 = vpop.f32.mrf.mxu1 }
 0x11f   : > { %2651 = vst [vmem:[%s3154_s23 + $0x18] sm:$0xff] %v2422_v57   ;;  %2676 = vst [vmem:[%s3154_s23 + $0xe0] sm:$0xff] %v2547_v58   ;;  %v1451_v1 = vmax.f32 %v1235_v59, 0.0  ;;  %v1401_v6 = vmax.f32 %v1035_v62, 0.0 }
 0x120   : > { %v1037_v63 = vpop.f32.mrf.mxu0  ;;  %v1237_v0 = vpop.f32.mrf.mxu1 }
 0x121   : > { %v1038_v2 = vadd.f32 %v3144_v47, %v1037_v63  ;;  %v1238_v3 = vadd.f32 %v3144_v47, %v1237_v0 }
 0x122   : > { %v1039_v4 = vpop.f32.mrf.mxu0  ;;  %v1239_v5 = vpop.f32.mrf.mxu1 }
 0x123   : > { %v1402_v7 = vmax.f32 %v1038_v2, 0.0  ;;  %v1452_v8 = vmax.f32 %v1238_v3, 0.0 }
 0x124   : > { %v1042_v9 = vpop.f32.mrf.mxu0  ;;  %v1242_v10 = vpop.f32.mrf.mxu1 }
 0x125   : > { %v2427_v11 = vpack.c.bf16 %v1402_v7, %v1401_v6  ;;  %v2552_v12 = vpack.c.bf16 %v1452_v8, %v1451_v1  ;;  %v1243_v13 = vadd.f32 %v3144_v47, %v1242_v10  ;;  %v1043_v16 = vadd.f32 %v3144_v47, %v1042_v9 }
 0x126   : > { %v1044_v14 = vpop.f32.mrf.mxu0  ;;  %v1244_v15 = vpop.f32.mrf.mxu1 }
 0x127   : > { %2652 = vst [vmem:[%s3154_s23 + $0x20] sm:$0xff] %v2427_v11   ;;  %2677 = vst [vmem:[%s3154_s23 + $0xe8] sm:$0xff] %v2552_v12   ;;  %v1453_v19 = vmax.f32 %v1243_v13, 0.0  ;;  %v1403_v24 = vmax.f32 %v1043_v16, 0.0 }
 0x128   : > { %v1045_v17 = vpop.f32.mrf.mxu0  ;;  %v1245_v18 = vpop.f32.mrf.mxu1 }
 0x129   : > { %v1046_v20 = vadd.f32 %v3144_v47, %v1045_v17  ;;  %v1246_v21 = vadd.f32 %v3144_v47, %v1245_v18 }
 0x12a   : > { %v1047_v22 = vpop.f32.mrf.mxu0  ;;  %v1247_v23 = vpop.f32.mrf.mxu1 }
 0x12b   : > { %v1404_v25 = vmax.f32 %v1046_v20, 0.0  ;;  %v1454_v26 = vmax.f32 %v1246_v21, 0.0 }
 0x12c   : > { %v1050_v27 = vpop.f32.mrf.mxu0  ;;  %v1250_v28 = vpop.f32.mrf.mxu1 }
 0x12d   : > { %v2432_v29 = vpack.c.bf16 %v1404_v25, %v1403_v24  ;;  %v2557_v30 = vpack.c.bf16 %v1454_v26, %v1453_v19  ;;  %v1251_v31 = vadd.f32 %v3144_v47, %v1250_v28  ;;  %v1051_v34 = vadd.f32 %v3144_v47, %v1050_v27 }
 0x12e   : > { %v1052_v32 = vpop.f32.mrf.mxu0  ;;  %v1252_v33 = vpop.f32.mrf.mxu1 }
 0x12f   : > { %2653 = vst [vmem:[%s3154_s23 + $0x28] sm:$0xff] %v2432_v29   ;;  %2678 = vst [vmem:[%s3154_s23 + $0xf0] sm:$0xff] %v2557_v30   ;;  %v1455_v37 = vmax.f32 %v1251_v31, 0.0  ;;  %v1405_v42 = vmax.f32 %v1051_v34, 0.0 }
 0x130   : > { %v1053_v35 = vpop.f32.mrf.mxu0  ;;  %v1253_v36 = vpop.f32.mrf.mxu1 }
 0x131   : > { %v1054_v38 = vadd.f32 %v3144_v47, %v1053_v35  ;;  %v1254_v39 = vadd.f32 %v3144_v47, %v1253_v36 }
 0x132   : > { %v1055_v40 = vpop.f32.mrf.mxu0  ;;  %v1255_v41 = vpop.f32.mrf.mxu1 }
 0x133   : > { %v1406_v43 = vmax.f32 %v1054_v38, 0.0  ;;  %v1456_v44 = vmax.f32 %v1254_v39, 0.0 }
 0x134   : > { %v1058_v45 = vpop.f32.mrf.mxu0  ;;  %v1258_v46 = vpop.f32.mrf.mxu1 }
 0x135   : > { %v2437_v48 = vpack.c.bf16 %v1406_v43, %v1405_v42  ;;  %v2562_v49 = vpack.c.bf16 %v1456_v44, %v1455_v37  ;;  %v1259_v50 = vadd.f32 %v3144_v47, %v1258_v46  ;;  %v1059_v53 = vadd.f32 %v3144_v47, %v1058_v45 }
 0x136   : > { %v1060_v51 = vpop.f32.mrf.mxu0  ;;  %v1260_v52 = vpop.f32.mrf.mxu1 }
 0x137   : > { %2654 = vst [vmem:[%s3154_s23 + $0x30] sm:$0xff] %v2437_v48   ;;  %2679 = vst [vmem:[%s3154_s23 + $0xf8] sm:$0xff] %v2562_v49   ;;  %v1457_v56 = vmax.f32 %v1259_v50, 0.0  ;;  %v1407_v61 = vmax.f32 %v1059_v53, 0.0 }
 0x138   : > { %v1061_v54 = vpop.f32.mrf.mxu0  ;;  %v1261_v55 = vpop.f32.mrf.mxu1 }
 0x139   : > { %v1062_v57 = vadd.f32 %v3144_v47, %v1061_v54  ;;  %v1262_v58 = vadd.f32 %v3144_v47, %v1261_v55 }
 0x13a   : > { %v1063_v59 = vpop.f32.mrf.mxu0  ;;  %v1263_v60 = vpop.f32.mrf.mxu1 }
 0x13b   : > { %v1408_v62 = vmax.f32 %v1062_v57, 0.0  ;;  %v1458_v63 = vmax.f32 %v1262_v58, 0.0 }
 0x13c   : > { %v1066_v0 = vpop.f32.mrf.mxu0  ;;  %v1266_v1 = vpop.f32.mrf.mxu1 }
 0x13d   : > { %v2442_v2 = vpack.c.bf16 %v1408_v62, %v1407_v61  ;;  %v2567_v3 = vpack.c.bf16 %v1458_v63, %v1457_v56  ;;  %v1267_v4 = vadd.f32 %v3144_v47, %v1266_v1  ;;  %v1067_v7 = vadd.f32 %v3144_v47, %v1066_v0 }
 0x13e   : > { %v1068_v5 = vpop.f32.mrf.mxu0  ;;  %v1268_v6 = vpop.f32.mrf.mxu1 }
 0x13f   : > { %2655 = vst [vmem:[%s3154_s23 + $0x38] sm:$0xff] %v2442_v2   ;;  %2680 = vst [vmem:[%s3154_s23 + $0x100] sm:$0xff] %v2567_v3   ;;  %v1459_v10 = vmax.f32 %v1267_v4, 0.0  ;;  %v1409_v15 = vmax.f32 %v1067_v7, 0.0 }
 0x140   : > { %v1069_v8 = vpop.f32.mrf.mxu0  ;;  %v1269_v9 = vpop.f32.mrf.mxu1 }
 0x141   : > { %v1070_v11 = vadd.f32 %v3144_v47, %v1069_v8  ;;  %v1270_v12 = vadd.f32 %v3144_v47, %v1269_v9 }
 0x142   : > { %v1071_v13 = vpop.f32.mrf.mxu0  ;;  %v1271_v14 = vpop.f32.mrf.mxu1 }
 0x143   : > { %v1410_v16 = vmax.f32 %v1070_v11, 0.0  ;;  %v1460_v17 = vmax.f32 %v1270_v12, 0.0 }
 0x144   : > { %v1074_v18 = vpop.f32.mrf.mxu0  ;;  %v1274_v19 = vpop.f32.mrf.mxu1 }
 0x145   : > { %v2447_v20 = vpack.c.bf16 %v1410_v16, %v1409_v15  ;;  %v2572_v21 = vpack.c.bf16 %v1460_v17, %v1459_v10  ;;  %v1275_v22 = vadd.f32 %v3144_v47, %v1274_v19  ;;  %v1075_v25 = vadd.f32 %v3144_v47, %v1074_v18 }
 0x146   : > { %v1076_v23 = vpop.f32.mrf.mxu0  ;;  %v1276_v24 = vpop.f32.mrf.mxu1 }
 0x147   : > { %2656 = vst [vmem:[%s3154_s23 + $0x40] sm:$0xff] %v2447_v20   ;;  %2681 = vst [vmem:[%s3154_s23 + $0x108] sm:$0xff] %v2572_v21   ;;  %v1461_v28 = vmax.f32 %v1275_v22, 0.0  ;;  %v1411_v33 = vmax.f32 %v1075_v25, 0.0 }
 0x148   : > { %v1077_v26 = vpop.f32.mrf.mxu0  ;;  %v1277_v27 = vpop.f32.mrf.mxu1 }
 0x149   : > { %v1078_v29 = vadd.f32 %v3144_v47, %v1077_v26  ;;  %v1278_v30 = vadd.f32 %v3144_v47, %v1277_v27 }
 0x14a   : > { %v1079_v31 = vpop.f32.mrf.mxu0  ;;  %v1279_v32 = vpop.f32.mrf.mxu1 }
 0x14b   : > { %v1412_v34 = vmax.f32 %v1078_v29, 0.0  ;;  %v1462_v35 = vmax.f32 %v1278_v30, 0.0 }
 0x14c   : > { %v1082_v36 = vpop.f32.mrf.mxu0  ;;  %v1282_v37 = vpop.f32.mrf.mxu1 }
 0x14d   : > { %v2452_v38 = vpack.c.bf16 %v1412_v34, %v1411_v33  ;;  %v2577_v39 = vpack.c.bf16 %v1462_v35, %v1461_v28  ;;  %v1283_v40 = vadd.f32 %v3144_v47, %v1282_v37  ;;  %v1083_v43 = vadd.f32 %v3144_v47, %v1082_v36 }
 0x14e   : > { %v1084_v41 = vpop.f32.mrf.mxu0  ;;  %v1284_v42 = vpop.f32.mrf.mxu1 }
 0x14f   : > { %2657 = vst [vmem:[%s3154_s23 + $0x48] sm:$0xff] %v2452_v38   ;;  %2682 = vst [vmem:[%s3154_s23 + $0x110] sm:$0xff] %v2577_v39   ;;  %v1463_v46 = vmax.f32 %v1283_v40, 0.0  ;;  %v1413_v52 = vmax.f32 %v1083_v43, 0.0 }
 0x150   : > { %v1085_v44 = vpop.f32.mrf.mxu0  ;;  %v1285_v45 = vpop.f32.mrf.mxu1 }
 0x151   : > { %v1086_v48 = vadd.f32 %v3144_v47, %v1085_v44  ;;  %v1286_v49 = vadd.f32 %v3144_v47, %v1285_v45 }
 0x152   : > { %v1087_v50 = vpop.f32.mrf.mxu0  ;;  %v1287_v51 = vpop.f32.mrf.mxu1 }
 0x153   : > { %v1414_v53 = vmax.f32 %v1086_v48, 0.0  ;;  %v1464_v54 = vmax.f32 %v1286_v49, 0.0 }
 0x154   : > { %v1090_v55 = vpop.f32.mrf.mxu0  ;;  %v1290_v56 = vpop.f32.mrf.mxu1 }
 0x155   : > { %v2457_v57 = vpack.c.bf16 %v1414_v53, %v1413_v52  ;;  %v2582_v58 = vpack.c.bf16 %v1464_v54, %v1463_v46  ;;  %v1291_v59 = vadd.f32 %v3144_v47, %v1290_v56  ;;  %v1091_v62 = vadd.f32 %v3144_v47, %v1090_v55 }
 0x156   : > { %v1092_v60 = vpop.f32.mrf.mxu0  ;;  %v1292_v61 = vpop.f32.mrf.mxu1 }
 0x157   : > { %2658 = vst [vmem:[%s3154_s23 + $0x50] sm:$0xff] %v2457_v57   ;;  %2683 = vst [vmem:[%s3154_s23 + $0x118] sm:$0xff] %v2582_v58   ;;  %v1465_v1 = vmax.f32 %v1291_v59, 0.0  ;;  %v1415_v6 = vmax.f32 %v1091_v62, 0.0 }
 0x158   : > { %v1093_v63 = vpop.f32.mrf.mxu0  ;;  %v1293_v0 = vpop.f32.mrf.mxu1 }
 0x159   : > { %v1094_v2 = vadd.f32 %v3144_v47, %v1093_v63  ;;  %v1294_v3 = vadd.f32 %v3144_v47, %v1293_v0 }
 0x15a   : > { %v1095_v4 = vpop.f32.mrf.mxu0  ;;  %v1295_v5 = vpop.f32.mrf.mxu1 }
 0x15b   : > { %v1416_v7 = vmax.f32 %v1094_v2, 0.0  ;;  %v1466_v8 = vmax.f32 %v1294_v3, 0.0 }
 0x15c   : > { %v1098_v9 = vpop.f32.mrf.mxu0  ;;  %v1298_v10 = vpop.f32.mrf.mxu1 }
 0x15d   : > { %v2462_v11 = vpack.c.bf16 %v1416_v7, %v1415_v6  ;;  %v2587_v12 = vpack.c.bf16 %v1466_v8, %v1465_v1  ;;  %v1299_v13 = vadd.f32 %v3144_v47, %v1298_v10  ;;  %v1099_v16 = vadd.f32 %v3144_v47, %v1098_v9 }
 0x15e   : > { %v1100_v14 = vpop.f32.mrf.mxu0  ;;  %v1300_v15 = vpop.f32.mrf.mxu1 }
 0x15f   : > { %2659 = vst [vmem:[%s3154_s23 + $0x58] sm:$0xff] %v2462_v11   ;;  %2684 = vst [vmem:[%s3154_s23 + $0x120] sm:$0xff] %v2587_v12   ;;  %v1467_v19 = vmax.f32 %v1299_v13, 0.0  ;;  %v1417_v24 = vmax.f32 %v1099_v16, 0.0 }
 0x160   : > { %v1101_v17 = vpop.f32.mrf.mxu0  ;;  %v1301_v18 = vpop.f32.mrf.mxu1 }
 0x161   : > { %v1102_v20 = vadd.f32 %v3144_v47, %v1101_v17  ;;  %v1302_v21 = vadd.f32 %v3144_v47, %v1301_v18 }
 0x162   : > { %v1103_v22 = vpop.f32.mrf.mxu0  ;;  %v1303_v23 = vpop.f32.mrf.mxu1 }
 0x163   : > { %v1418_v25 = vmax.f32 %v1102_v20, 0.0  ;;  %v1468_v26 = vmax.f32 %v1302_v21, 0.0 }
 0x164   : > { %v1106_v27 = vpop.f32.mrf.mxu0  ;;  %v1306_v28 = vpop.f32.mrf.mxu1 }
 0x165   : > { %v2467_v29 = vpack.c.bf16 %v1418_v25, %v1417_v24  ;;  %v2592_v30 = vpack.c.bf16 %v1468_v26, %v1467_v19  ;;  %v1307_v31 = vadd.f32 %v3144_v47, %v1306_v28  ;;  %v1107_v34 = vadd.f32 %v3144_v47, %v1106_v27 }
 0x166   : > { %v1108_v32 = vpop.f32.mrf.mxu0  ;;  %v1308_v33 = vpop.f32.mrf.mxu1 }
 0x167   : > { %2660 = vst [vmem:[%s3154_s23 + $0x60] sm:$0xff] %v2467_v29   ;;  %2685 = vst [vmem:[%s3154_s23 + $0x128] sm:$0xff] %v2592_v30   ;;  %v1469_v37 = vmax.f32 %v1307_v31, 0.0  ;;  %v1419_v42 = vmax.f32 %v1107_v34, 0.0 }
 0x168   : > { %v1109_v35 = vpop.f32.mrf.mxu0  ;;  %v1309_v36 = vpop.f32.mrf.mxu1 }
 0x169   : > { %v1110_v38 = vadd.f32 %v3144_v47, %v1109_v35  ;;  %v1310_v39 = vadd.f32 %v3144_v47, %v1309_v36 }
 0x16a   : > { %v1111_v40 = vpop.f32.mrf.mxu0  ;;  %v1311_v41 = vpop.f32.mrf.mxu1 }
 0x16b   : > { %v1420_v43 = vmax.f32 %v1110_v38, 0.0  ;;  %v1470_v44 = vmax.f32 %v1310_v39, 0.0 }
 0x16c   : > { %v1114_v45 = vpop.f32.mrf.mxu0  ;;  %v1314_v46 = vpop.f32.mrf.mxu1 }
 0x16d   : > { %v2472_v48 = vpack.c.bf16 %v1420_v43, %v1419_v42  ;;  %v2597_v49 = vpack.c.bf16 %v1470_v44, %v1469_v37  ;;  %v1315_v50 = vadd.f32 %v3144_v47, %v1314_v46  ;;  %v1115_v53 = vadd.f32 %v3144_v47, %v1114_v45 }
 0x16e   : > { %v1116_v51 = vpop.f32.mrf.mxu0  ;;  %v1316_v52 = vpop.f32.mrf.mxu1 }
 0x16f   : > { %2661 = vst [vmem:[%s3154_s23 + $0x68] sm:$0xff] %v2472_v48   ;;  %2686 = vst [vmem:[%s3154_s23 + $0x130] sm:$0xff] %v2597_v49   ;;  %v1471_v56 = vmax.f32 %v1315_v50, 0.0  ;;  %v1421_v61 = vmax.f32 %v1115_v53, 0.0 }
 0x170   : > { %v1117_v54 = vpop.f32.mrf.mxu0  ;;  %v1317_v55 = vpop.f32.mrf.mxu1 }
 0x171   : > { %v1118_v57 = vadd.f32 %v3144_v47, %v1117_v54  ;;  %v1318_v58 = vadd.f32 %v3144_v47, %v1317_v55 }
 0x172   : > { %v1119_v59 = vpop.f32.mrf.mxu0  ;;  %v1319_v60 = vpop.f32.mrf.mxu1 }
 0x173   : > { %v1422_v62 = vmax.f32 %v1118_v57, 0.0  ;;  %v1472_v63 = vmax.f32 %v1318_v58, 0.0 }
 0x174   : > { %v1122_v0 = vpop.f32.mrf.mxu0  ;;  %v1322_v1 = vpop.f32.mrf.mxu1 }
 0x175   : > { %v2477_v2 = vpack.c.bf16 %v1422_v62, %v1421_v61  ;;  %v2602_v3 = vpack.c.bf16 %v1472_v63, %v1471_v56  ;;  %v1323_v4 = vadd.f32 %v3144_v47, %v1322_v1  ;;  %v1123_v7 = vadd.f32 %v3144_v47, %v1122_v0 }
 0x176   : > { %v1124_v5 = vpop.f32.mrf.mxu0  ;;  %v1324_v6 = vpop.f32.mrf.mxu1 }
 0x177   : > { %2662 = vst [vmem:[%s3154_s23 + $0x70] sm:$0xff] %v2477_v2   ;;  %2687 = vst [vmem:[%s3154_s23 + $0x138] sm:$0xff] %v2602_v3   ;;  %v1473_v10 = vmax.f32 %v1323_v4, 0.0  ;;  %v1423_v15 = vmax.f32 %v1123_v7, 0.0 }
 0x178   : > { %v1125_v8 = vpop.f32.mrf.mxu0  ;;  %v1325_v9 = vpop.f32.mrf.mxu1 }
 0x179   : > { %v1126_v11 = vadd.f32 %v3144_v47, %v1125_v8  ;;  %v1326_v12 = vadd.f32 %v3144_v47, %v1325_v9 }
 0x17a   : > { %v1127_v13 = vpop.f32.mrf.mxu0  ;;  %v1327_v14 = vpop.f32.mrf.mxu1 }
 0x17b   : > { %v1424_v16 = vmax.f32 %v1126_v11, 0.0  ;;  %v1474_v17 = vmax.f32 %v1326_v12, 0.0 }
 0x17c   : > { %v1130_v18 = vpop.f32.mrf.mxu0  ;;  %v1330_v19 = vpop.f32.mrf.mxu1 }
 0x17d   : > { %v2482_v20 = vpack.c.bf16 %v1424_v16, %v1423_v15  ;;  %v2607_v21 = vpack.c.bf16 %v1474_v17, %v1473_v10  ;;  %v1331_v22 = vadd.f32 %v3144_v47, %v1330_v19  ;;  %v1131_v25 = vadd.f32 %v3144_v47, %v1130_v18 }
 0x17e   : > { %v1132_v23 = vpop.f32.mrf.mxu0  ;;  %v1332_v24 = vpop.f32.mrf.mxu1 }
 0x17f   : > { %2663 = vst [vmem:[%s3154_s23 + $0x78] sm:$0xff] %v2482_v20   ;;  %2688 = vst [vmem:[%s3154_s23 + $0x140] sm:$0xff] %v2607_v21   ;;  %v1475_v28 = vmax.f32 %v1331_v22, 0.0  ;;  %v1425_v33 = vmax.f32 %v1131_v25, 0.0 }
 0x180   : > { %v1133_v26 = vpop.f32.mrf.mxu0  ;;  %v1333_v27 = vpop.f32.mrf.mxu1 }
 0x181   : > { %v1134_v29 = vadd.f32 %v3144_v47, %v1133_v26  ;;  %v1334_v30 = vadd.f32 %v3144_v47, %v1333_v27 }
 0x182   : > { %v1135_v31 = vpop.f32.mrf.mxu0  ;;  %v1335_v32 = vpop.f32.mrf.mxu1 }
 0x183   : > { %v1426_v34 = vmax.f32 %v1134_v29, 0.0  ;;  %v1476_v35 = vmax.f32 %v1334_v30, 0.0 }
 0x184   : > { %v1138_v36 = vpop.f32.mrf.mxu0  ;;  %v1338_v37 = vpop.f32.mrf.mxu1 }
 0x185   : > { %v2487_v38 = vpack.c.bf16 %v1426_v34, %v1425_v33  ;;  %v2612_v39 = vpack.c.bf16 %v1476_v35, %v1475_v28  ;;  %v1339_v40 = vadd.f32 %v3144_v47, %v1338_v37  ;;  %v1139_v43 = vadd.f32 %v3144_v47, %v1138_v36 }
 0x186   : > { %v1140_v41 = vpop.f32.mrf.mxu0  ;;  %v1340_v42 = vpop.f32.mrf.mxu1 }
 0x187   : > { %2664 = vst [vmem:[%s3154_s23 + $0x80] sm:$0xff] %v2487_v38   ;;  %2689 = vst [vmem:[%s3154_s23 + $0x148] sm:$0xff] %v2612_v39   ;;  %v1477_v46 = vmax.f32 %v1339_v40, 0.0  ;;  %v1427_v52 = vmax.f32 %v1139_v43, 0.0 }
 0x188   : > { %v1141_v44 = vpop.f32.mrf.mxu0  ;;  %v1341_v45 = vpop.f32.mrf.mxu1 }
 0x189   : > { %v1142_v48 = vadd.f32 %v3144_v47, %v1141_v44  ;;  %v1342_v49 = vadd.f32 %v3144_v47, %v1341_v45 }
 0x18a   : > { %v1143_v50 = vpop.f32.mrf.mxu0  ;;  %v1343_v51 = vpop.f32.mrf.mxu1 }
 0x18b   : > { %v1428_v53 = vmax.f32 %v1142_v48, 0.0  ;;  %v1478_v54 = vmax.f32 %v1342_v49, 0.0 }
 0x18c   : > { %v1146_v55 = vpop.f32.mrf.mxu0  ;;  %v1346_v56 = vpop.f32.mrf.mxu1 }
 0x18d   : > { %v2492_v57 = vpack.c.bf16 %v1428_v53, %v1427_v52  ;;  %v2617_v58 = vpack.c.bf16 %v1478_v54, %v1477_v46  ;;  %v1347_v59 = vadd.f32 %v3144_v47, %v1346_v56  ;;  %v1147_v62 = vadd.f32 %v3144_v47, %v1146_v55 }
 0x18e   : > { %v1148_v60 = vpop.f32.mrf.mxu0  ;;  %v1348_v61 = vpop.f32.mrf.mxu1 }
 0x18f   : > { %2665 = vst [vmem:[%s3154_s23 + $0x88] sm:$0xff] %v2492_v57   ;;  %2690 = vst [vmem:[%s3154_s23 + $0x150] sm:$0xff] %v2617_v58   ;;  %v1479_v1 = vmax.f32 %v1347_v59, 0.0  ;;  %v1429_v6 = vmax.f32 %v1147_v62, 0.0 }
 0x190   : > { %v1149_v63 = vpop.f32.mrf.mxu0  ;;  %v1349_v0 = vpop.f32.mrf.mxu1 }
 0x191   : > { %v1150_v2 = vadd.f32 %v3144_v47, %v1149_v63  ;;  %v1350_v3 = vadd.f32 %v3144_v47, %v1349_v0 }
 0x192   : > { %v1151_v4 = vpop.f32.mrf.mxu0  ;;  %v1351_v5 = vpop.f32.mrf.mxu1 }
 0x193   : > { %v1430_v7 = vmax.f32 %v1150_v2, 0.0  ;;  %v1480_v8 = vmax.f32 %v1350_v3, 0.0 }
 0x194   : > { %v1154_v9 = vpop.f32.mrf.mxu0  ;;  %v1354_v10 = vpop.f32.mrf.mxu1 }
 0x195   : > { %v2497_v11 = vpack.c.bf16 %v1430_v7, %v1429_v6  ;;  %v2622_v12 = vpack.c.bf16 %v1480_v8, %v1479_v1  ;;  %v1355_v13 = vadd.f32 %v3144_v47, %v1354_v10  ;;  %v1155_v16 = vadd.f32 %v3144_v47, %v1154_v9 }
 0x196   : > { %v1156_v14 = vpop.f32.mrf.mxu0  ;;  %v1356_v15 = vpop.f32.mrf.mxu1 }
 0x197   : > { %2666 = vst [vmem:[%s3154_s23 + $0x90] sm:$0xff] %v2497_v11   ;;  %2691 = vst [vmem:[%s3154_s23 + $0x158] sm:$0xff] %v2622_v12   ;;  %v1481_v19 = vmax.f32 %v1355_v13, 0.0  ;;  %v1431_v24 = vmax.f32 %v1155_v16, 0.0 }
 0x198   : > { %v1157_v17 = vpop.f32.mrf.mxu0  ;;  %v1357_v18 = vpop.f32.mrf.mxu1 }
 0x199   : > { %v1158_v20 = vadd.f32 %v3144_v47, %v1157_v17  ;;  %v1358_v21 = vadd.f32 %v3144_v47, %v1357_v18 }
 0x19a   : > { %v1159_v22 = vpop.f32.mrf.mxu0  ;;  %v1359_v23 = vpop.f32.mrf.mxu1 }
 0x19b   : > { %v1432_v25 = vmax.f32 %v1158_v20, 0.0  ;;  %v1482_v26 = vmax.f32 %v1358_v21, 0.0 }
 0x19c   : > { %v1162_v27 = vpop.f32.mrf.mxu0  ;;  %v1362_v28 = vpop.f32.mrf.mxu1 }
 0x19d   : > { %v2502_v29 = vpack.c.bf16 %v1432_v25, %v1431_v24  ;;  %v2627_v30 = vpack.c.bf16 %v1482_v26, %v1481_v19  ;;  %v1363_v31 = vadd.f32 %v3144_v47, %v1362_v28  ;;  %v1163_v34 = vadd.f32 %v3144_v47, %v1162_v27 }
 0x19e   : > { %v1164_v32 = vpop.f32.mrf.mxu0  ;;  %v1364_v33 = vpop.f32.mrf.mxu1 }
 0x19f   : > { %2667 = vst [vmem:[%s3154_s23 + $0x98] sm:$0xff] %v2502_v29   ;;  %2692 = vst [vmem:[%s3154_s23 + $0x160] sm:$0xff] %v2627_v30   ;;  %v1483_v37 = vmax.f32 %v1363_v31, 0.0  ;;  %v1433_v42 = vmax.f32 %v1163_v34, 0.0 }
 0x1a0   : > { %v1165_v35 = vpop.f32.mrf.mxu0  ;;  %v1365_v36 = vpop.f32.mrf.mxu1 }
 0x1a1   : > { %v1166_v38 = vadd.f32 %v3144_v47, %v1165_v35  ;;  %v1366_v39 = vadd.f32 %v3144_v47, %v1365_v36 }
 0x1a2   : > { %v1167_v40 = vpop.f32.mrf.mxu0  ;;  %v1367_v41 = vpop.f32.mrf.mxu1 }
 0x1a3   : > { %v1434_v43 = vmax.f32 %v1166_v38, 0.0  ;;  %v1484_v44 = vmax.f32 %v1366_v39, 0.0 }
 0x1a4   : > { %v1170_v45 = vpop.f32.mrf.mxu0  ;;  %v1370_v46 = vpop.f32.mrf.mxu1 }
 0x1a5   : > { %v2507_v48 = vpack.c.bf16 %v1434_v43, %v1433_v42  ;;  %v2632_v49 = vpack.c.bf16 %v1484_v44, %v1483_v37  ;;  %v1371_v50 = vadd.f32 %v3144_v47, %v1370_v46  ;;  %v1171_v53 = vadd.f32 %v3144_v47, %v1170_v45 }
 0x1a6   : > { %v1172_v51 = vpop.f32.mrf.mxu0  ;;  %v1372_v52 = vpop.f32.mrf.mxu1 }
 0x1a7   : > { %2668 = vst [vmem:[%s3154_s23 + $0xa0] sm:$0xff] %v2507_v48   ;;  %2693 = vst [vmem:[%s3154_s23 + $0x168] sm:$0xff] %v2632_v49   ;;  %v1485_v56 = vmax.f32 %v1371_v50, 0.0  ;;  %v1435_v61 = vmax.f32 %v1171_v53, 0.0 }
 0x1a8   : > { %v1173_v54 = vpop.f32.mrf.mxu0  ;;  %v1373_v55 = vpop.f32.mrf.mxu1 }
 0x1a9   : > { %v1174_v57 = vadd.f32 %v3144_v47, %v1173_v54  ;;  %v1374_v58 = vadd.f32 %v3144_v47, %v1373_v55 }
 0x1aa   : > { %v1175_v59 = vpop.f32.mrf.mxu0  ;;  %v1375_v60 = vpop.f32.mrf.mxu1 }
 0x1ab   : > { %v1436_v62 = vmax.f32 %v1174_v57, 0.0  ;;  %v1486_v63 = vmax.f32 %v1374_v58, 0.0 }
 0x1ac   : > { %v1178_v0 = vpop.f32.mrf.mxu0  ;;  %v1378_v1 = vpop.f32.mrf.mxu1 }
 0x1ad   : > { %v2512_v2 = vpack.c.bf16 %v1436_v62, %v1435_v61  ;;  %v2637_v3 = vpack.c.bf16 %v1486_v63, %v1485_v56  ;;  %v1379_v4 = vadd.f32 %v3144_v47, %v1378_v1  ;;  %v1179_v7 = vadd.f32 %v3144_v47, %v1178_v0 }
 0x1ae   : > { %v1180_v5 = vpop.f32.mrf.mxu0  ;;  %v1380_v6 = vpop.f32.mrf.mxu1 }
 0x1af   : > { %2669 = vst [vmem:[%s3154_s23 + $0xa8] sm:$0xff] %v2512_v2   ;;  %2694 = vst [vmem:[%s3154_s23 + $0x170] sm:$0xff] %v2637_v3   ;;  %v1487_v10 = vmax.f32 %v1379_v4, 0.0  ;;  %v1437_v15 = vmax.f32 %v1179_v7, 0.0 }
 0x1b0   : > { %v1181_v8 = vpop.f32.mrf.mxu0  ;;  %v1381_v9 = vpop.f32.mrf.mxu1 }
 0x1b1   : > { %v1182_v11 = vadd.f32 %v3144_v47, %v1181_v8  ;;  %v1382_v12 = vadd.f32 %v3144_v47, %v1381_v9 }
 0x1b2   : > { %v1183_v13 = vpop.f32.mrf.mxu0  ;;  %v1383_v14 = vpop.f32.mrf.mxu1 }
 0x1b3   : > { %v1438_v16 = vmax.f32 %v1182_v11, 0.0  ;;  %v1488_v17 = vmax.f32 %v1382_v12, 0.0 }
 0x1b4   : > { %v1186_v18 = vpop.f32.mrf.mxu0  ;;  %v1386_v19 = vpop.f32.mrf.mxu1 }
 0x1b5   : > { %v2517_v20 = vpack.c.bf16 %v1438_v16, %v1437_v15  ;;  %v2642_v21 = vpack.c.bf16 %v1488_v17, %v1487_v10  ;;  %v1387_v22 = vadd.f32 %v3144_v47, %v1386_v19  ;;  %v1187_v25 = vadd.f32 %v3144_v47, %v1186_v18 }
 0x1b6   : > { %v1188_v23 = vpop.f32.mrf.mxu0  ;;  %v1388_v24 = vpop.f32.mrf.mxu1 }
 0x1b7   : > { %2670 = vst [vmem:[%s3154_s23 + $0xb0] sm:$0xff] %v2517_v20   ;;  %2695 = vst [vmem:[%s3154_s23 + $0x178] sm:$0xff] %v2642_v21   ;;  %v1489_v28 = vmax.f32 %v1387_v22, 0.0  ;;  %v1439_v33 = vmax.f32 %v1187_v25, 0.0 }
 0x1b8   : > { %v1189_v26 = vpop.f32.mrf.mxu0  ;;  %v1389_v27 = vpop.f32.mrf.mxu1 }
 0x1b9   : > { %v1190_v29 = vadd.f32 %v3144_v47, %v1189_v26  ;;  %v1390_v30 = vadd.f32 %v3144_v47, %v1389_v27 }
 0x1ba   : > { %v1191_v31 = vpop.f32.mrf.mxu0  ;;  %v1391_v32 = vpop.f32.mrf.mxu1 }
 0x1bb   : > { %v1440_v34 = vmax.f32 %v1190_v29, 0.0  ;;  %v1490_v35 = vmax.f32 %v1390_v30, 0.0 }
 0x1bc   : > { %v1194_v36 = vpop.f32.mrf.mxu0 }
 0x1bd   : > { %v2522_v37 = vpack.c.bf16 %v1440_v34, %v1439_v33  ;;  %v2647_v38 = vpack.c.bf16 %v1490_v35, %v1489_v28  ;;  %v1195_v40 = vadd.f32 %v3144_v47, %v1194_v36 }
 0x1be   : > { %v1196_v39 = vpop.f32.mrf.mxu0 }
 0x1bf   : > { %2671 = vst [vmem:[%s3154_s23 + $0xb8] sm:$0xff] %v2522_v37   ;;  %2696 = vst [vmem:[%s3154_s23 + $0x180] sm:$0xff] %v2647_v38   ;;  %v1441_v44 = vmax.f32 %v1195_v40, 0.0 }
 0x1c0   : > { %v1197_v41 = vpop.f32.mrf.mxu0 }
 0x1c1   : > { %v1198_v42 = vadd.f32 %v3144_v47, %v1197_v41 }
 0x1c2   : > { %v1199_v43 = vpop.f32.mrf.mxu0 }
 0x1c3   : > { %v1442_v45 = vmax.f32 %v1198_v42, 0.0 }
 0x1c5   : > { %v2527_v46 = vpack.c.bf16 %v1442_v45, %v1441_v44 }
 0x1c7   : > { %2672 = vst [vmem:[%s3154_s23 + $0xc0] sm:$0xff] %v2527_v46  }
 0x1c8 PF: > { %s13_s12 = sadd.s32 1, %s2895_s12  }
 0x1c9   : > { %p10_p4 = scmp.ge.s32.totalorder %s13_s12, 6  }
 0x1cb   :  { %12 = sbr.rel (!%p10_p4) target bundleno = 1 (0x1), region = 62 }

// kernel: doom_lstm_forward.4
= control target key start
LH: loop header
LB: loop body
LE: loop exit
PB: predicated region body
PF: predicated region fallthrough
CT: control target
= control target key end

     0   :  { %s1972_s12 = smov 0   ;;  %s2258_s0 = inlined_call_operand.vmem [shape: bf16[576,512], index: 0, kind: input, shape index: {}]   ;;  %s2259_s1 = inlined_call_operand.vmem [shape: bf16[512,128], index: 1, kind: input, shape index: {}]   ;;  %s2260_s2 = inlined_call_operand.vmem [shape: f32[1,128], index: 2, kind: input, shape index: {}]   ;;  %s2261_s3 = inlined_call_operand.vmem [shape: bf16[576,128], index: 3, kind: output, shape index: {}]  }
   0x1 LB: > { %s1499_s13 = sadd.s32 4294967295, %s1949_s12   ;;  %p1503_p0 = scmp.ge.s32.totalorder %s1949_s12, 1  ;;  %s1949_s12 = sphi %s1972_s12, %s13_s12  }
   0x2   : > { %p139_p1 = scmp.lt.s32.totalorder %s1949_s12, 3 }
   0x4   : > { %p140_p2 = pnand %p1503_p0, %p139_p1 }
   0x5   : > { %s164_s7 = smul.u32 (!%p140_p2), 36, %s1499_s13 }
   0x6   : > { %143 = sbr.rel (%p140_p2) target bundleno = 418 (0x1a2), region = 32 }
   0x7   : > { %p165_p3 = scmp.lt.s32.totalorder (!%p140_p2), %s164_s7, 71 }
   0xb   : > { %v1803_v0 = vld [vmem:[%s2259_s1 + $0x38] sm:$0xff]   ;;  %v1951_v1 = vmov 0   ;;  %v1805_v3 = vld [vmem:[%s2259_s1 + $0x30] sm:$0xff]   ;;  %v1807_v5 = vld [vmem:[%s2259_s1 + $0x28] sm:$0xff]   ;;  %s2263_s7 = smov (!%p165_p3, %s164_s7), 71 }
   0xc   : > { %873 = vmatprep.subr.bf16.mxu0 %v1951_v1  ;;  %1050 = vmatprep.subr.bf16.mxu1 %v1951_v1  ;;  %v1804_v2 = vld [vmem:[%s2259_s1 + $0xb8] sm:$0xff]   ;;  %v1806_v4 = vld [vmem:[%s2259_s1 + $0xb0] sm:$0xff]   ;;  %v1808_v6 = vld [vmem:[%s2259_s1 + $0xa8] sm:$0xff]   ;;  %s1650_s21 = sshll.u32 %s2263_s7, 4 }
   0xd   : > { %874 = vmatpush1.bf16.msra.mxu0 %v1803_v0  ;;  %1051 = vmatpush1.bf16.msra.mxu1 %v1804_v2  ;;  %v1809_v7 = vld [vmem:[%s2259_s1 + $0x20] sm:$0xff]   ;;  %v1811_v9 = vld [vmem:[%s2259_s1 + $0x18] sm:$0xff]   ;;  %v1813_v11 = vld [vmem:[%s2259_s1 + $0x10] sm:$0xff]   ;;  %s2055_s26 = scalar_lea.vmem %s2258_s0, %s1650_s21 }
   0xe   : > { %875 = vmatprep.subr.bf16.mxu0 %v1951_v1  ;;  %1052 = vmatprep.subr.bf16.mxu1 %v1951_v1  ;;  %v1810_v8 = vld [vmem:[%s2259_s1 + $0xa0] sm:$0xff]   ;;  %v1812_v10 = vld [vmem:[%s2259_s1 + $0x98] sm:$0xff]   ;;  %v1814_v12 = vld [vmem:[%s2259_s1 + $0x90] sm:$0xff]  }
   0xf   : > { %v1815_v13 = vld [vmem:[%s2259_s1 + $0x8] sm:$0xff]   ;;  %v1817_v15 = vld [vmem:[%s2259_s1] sm:$0xff]   ;;  %v1819_v17 = vld [vmem:[%s2259_s1 + $0x78] sm:$0xff]  }
  0x10   : > { %v1816_v14 = vld [vmem:[%s2259_s1 + $0x88] sm:$0xff]   ;;  %v1818_v16 = vld [vmem:[%s2259_s1 + $0x80] sm:$0xff]   ;;  %v1820_v18 = vld [vmem:[%s2259_s1 + $0xf8] sm:$0xff]  }
  0x11   : > { %876 = vmatpush1.bf16.msra.mxu0 %v1805_v3  ;;  %1053 = vmatpush1.bf16.msra.mxu1 %v1806_v4  ;;  %v1837_v19 = vld [vmem:[%s2055_s26 + $0x4] ss:$16 sps:$4 sm:$0xff]   ;;  %v1840_v21 = vld [vmem:[%s2055_s26 + $0xc] ss:$16 sps:$4 sm:$0xff]   ;;  %v1835_v35 = vld [vmem:[%s2055_s26] ss:$16 sps:$4 sm:$0xff]  }
  0x12   : > { %877 = vmatprep.subr.bf16.mxu0 %v1951_v1  ;;  %1054 = vmatprep.subr.bf16.mxu1 %v1951_v1  ;;  %v1821_v20 = vld [vmem:[%s2259_s1 + $0x70] sm:$0xff]   ;;  %v1823_v23 = vld [vmem:[%s2259_s1 + $0x68] sm:$0xff]   ;;  %v1825_v25 = vld [vmem:[%s2259_s1 + $0x60] sm:$0xff]  }
  0x13   : > { %v1822_v22 = vld [vmem:[%s2259_s1 + $0xf0] sm:$0xff]   ;;  %905 = vmatprep.mubr.bf16.mxu0 %v1837_v19  ;;  %1082 = vmatprep.mubr.bf16.mxu1 %v1840_v21  ;;  %v1824_v24 = vld [vmem:[%s2259_s1 + $0xe8] sm:$0xff]   ;;  %v1826_v26 = vld [vmem:[%s2259_s1 + $0xe0] sm:$0xff]  }
  0x14   : > { %v1827_v27 = vld [vmem:[%s2259_s1 + $0x58] sm:$0xff]   ;;  %v1829_v29 = vld [vmem:[%s2259_s1 + $0x50] sm:$0xff]   ;;  %v1831_v31 = vld [vmem:[%s2259_s1 + $0x48] sm:$0xff]  }
  0x15   : > { %878 = vmatpush1.bf16.msra.mxu0 %v1807_v5  ;;  %1055 = vmatpush1.bf16.msra.mxu1 %v1808_v6  ;;  %v1828_v28 = vld [vmem:[%s2259_s1 + $0xd8] sm:$0xff]   ;;  %v1830_v30 = vld [vmem:[%s2259_s1 + $0xd0] sm:$0xff]   ;;  %v1832_v32 = vld [vmem:[%s2259_s1 + $0xc8] sm:$0xff]  }
  0x16   : > { %879 = vmatprep.subr.bf16.mxu0 %v1951_v1  ;;  %1056 = vmatprep.subr.bf16.mxu1 %v1951_v1  ;;  %v1833_v33 = vld [vmem:[%s2259_s1 + $0x40] sm:$0xff]   ;;  %v1838_v36 = vld [vmem:[%s2055_s26 + $0x8] ss:$16 sps:$4 sm:$0xff]   ;;  %v1843_v38 = vld [vmem:[%s2055_s26 + $0x2c] ss:$16 sps:$4 sm:$0xff]  }
  0x17   : > { %v1834_v34 = vld [vmem:[%s2259_s1 + $0xc0] sm:$0xff]   ;;  %v1846_v40 = vld [vmem:[%s2055_s26 + $0x28] ss:$16 sps:$4 sm:$0xff]   ;;  %v1849_v42 = vld [vmem:[%s2055_s26 + $0x4c] ss:$16 sps:$4 sm:$0xff]  }
  0x18   : > { %v1841_v37 = vld [vmem:[%s2055_s26 + $0x24] ss:$16 sps:$4 sm:$0xff]   ;;  %v1845_v39 = vld [vmem:[%s2055_s26 + $0x20] ss:$16 sps:$4 sm:$0xff]   ;;  %v1852_v44 = vld [vmem:[%s2055_s26 + $0x48] ss:$16 sps:$4 sm:$0xff]  }
  0x19   : > { %880 = vmatpush1.bf16.msra.mxu0 %v1809_v7  ;;  %1057 = vmatpush1.bf16.msra.mxu1 %v1810_v8  ;;  %v1847_v41 = vld [vmem:[%s2055_s26 + $0x44] ss:$16 sps:$4 sm:$0xff]   ;;  %v1851_v43 = vld [vmem:[%s2055_s26 + $0x40] ss:$16 sps:$4 sm:$0xff]   ;;  %v1855_v46 = vld [vmem:[%s2055_s26 + $0x6c] ss:$16 sps:$4 sm:$0xff]  }
  0x1a   : > { %881 = vmatprep.subr.bf16.mxu0 %v1951_v1  ;;  %1058 = vmatprep.subr.bf16.mxu1 %v1951_v1  ;;  %v1853_v45 = vld [vmem:[%s2055_s26 + $0x64] ss:$16 sps:$4 sm:$0xff]   ;;  %v1857_v47 = vld [vmem:[%s2055_s26 + $0x60] ss:$16 sps:$4 sm:$0xff]   ;;  %v1858_v48 = vld [vmem:[%s2055_s26 + $0x68] ss:$16 sps:$4 sm:$0xff]  }
  0x1b   : > { %v1859_v49 = vld [vmem:[%s2055_s26 + $0x84] ss:$16 sps:$4 sm:$0xff]   ;;  %v1861_v50 = vld [vmem:[%s2055_s26 + $0x8c] ss:$16 sps:$4 sm:$0xff]   ;;  %v1863_v51 = vld [vmem:[%s2055_s26 + $0x80] ss:$16 sps:$4 sm:$0xff]  }
  0x1c   : > { %v1864_v52 = vld [vmem:[%s2055_s26 + $0x88] ss:$16 sps:$4 sm:$0xff]   ;;  %v1865_v53 = vld [vmem:[%s2055_s26 + $0xa4] ss:$16 sps:$4 sm:$0xff]   ;;  %v1867_v54 = vld [vmem:[%s2055_s26 + $0xac] ss:$16 sps:$4 sm:$0xff]  }
  0x1d   : > { %882 = vmatpush1.bf16.msra.mxu0 %v1811_v9  ;;  %1059 = vmatpush1.bf16.msra.mxu1 %v1812_v10  ;;  %v1869_v55 = vld [vmem:[%s2055_s26 + $0xa0] ss:$16 sps:$4 sm:$0xff]   ;;  %v1870_v56 = vld [vmem:[%s2055_s26 + $0xa8] ss:$16 sps:$4 sm:$0xff]   ;;  %v1871_v57 = vld [vmem:[%s2055_s26 + $0xc4] ss:$16 sps:$4 sm:$0xff]  }
  0x1e   : > { %883 = vmatprep.subr.bf16.mxu0 %v1951_v1  ;;  %1060 = vmatprep.subr.bf16.mxu1 %v1951_v1  ;;  %v1873_v58 = vld [vmem:[%s2055_s26 + $0xcc] ss:$16 sps:$4 sm:$0xff]   ;;  %v1875_v59 = vld [vmem:[%s2055_s26 + $0xc0] ss:$16 sps:$4 sm:$0xff]   ;;  %v1876_v60 = vld [vmem:[%s2055_s26 + $0xc8] ss:$16 sps:$4 sm:$0xff]  }
  0x1f   : > { %v1877_v61 = vld [vmem:[%s2055_s26 + $0xe4] ss:$16 sps:$4 sm:$0xff]   ;;  %v1879_v62 = vld [vmem:[%s2055_s26 + $0xec] ss:$16 sps:$4 sm:$0xff]   ;;  %v1881_v63 = vld [vmem:[%s2055_s26 + $0xe0] ss:$16 sps:$4 sm:$0xff]  }
  0x20   : > { %v1882_v0 = vld [vmem:[%s2055_s26 + $0xe8] ss:$16 sps:$4 sm:$0xff]   ;;  %v1885_v2 = vld [vmem:[%s2055_s26 + $0x10c] ss:$16 sps:$4 sm:$0xff]   ;;  %v1887_v3 = vld [vmem:[%s2055_s26 + $0x100] ss:$16 sps:$4 sm:$0xff]  }
  0x21   : > { %884 = vmatpush1.bf16.msra.mxu0 %v1813_v11  ;;  %1061 = vmatpush1.bf16.msra.mxu1 %v1814_v12  ;;  %v1888_v4 = vld [vmem:[%s2055_s26 + $0x108] ss:$16 sps:$4 sm:$0xff]   ;;  %v1889_v5 = vld [vmem:[%s2055_s26 + $0x124] ss:$16 sps:$4 sm:$0xff]   ;;  %v1891_v6 = vld [vmem:[%s2055_s26 + $0x12c] ss:$16 sps:$4 sm:$0xff]  }
  0x22   : > { %885 = vmatprep.subr.bf16.mxu0 %v1951_v1  ;;  %1062 = vmatprep.subr.bf16.mxu1 %v1951_v1  ;;  %v1893_v7 = vld [vmem:[%s2055_s26 + $0x120] ss:$16 sps:$4 sm:$0xff]   ;;  %v1894_v8 = vld [vmem:[%s2055_s26 + $0x128] ss:$16 sps:$4 sm:$0xff]   ;;  %v1895_v9 = vld [vmem:[%s2055_s26 + $0x144] ss:$16 sps:$4 sm:$0xff]  }
  0x23   : > { %v1897_v10 = vld [vmem:[%s2055_s26 + $0x14c] ss:$16 sps:$4 sm:$0xff]   ;;  %v1899_v11 = vld [vmem:[%s2055_s26 + $0x140] ss:$16 sps:$4 sm:$0xff]   ;;  %v1900_v12 = vld [vmem:[%s2055_s26 + $0x148] ss:$16 sps:$4 sm:$0xff]  }
  0x24   : > { %v1911_v19 = vld [vmem:[%s2055_s26 + $0x180] ss:$16 sps:$4 sm:$0xff]   ;;  %v1913_v21 = vld [vmem:[%s2055_s26 + $0x1a4] ss:$16 sps:$4 sm:$0xff]  }
  0x25   : > { %886 = vmatpush1.bf16.msra.mxu0 %v1815_v13  ;;  %1063 = vmatpush1.bf16.msra.mxu1 %v1816_v14  ;;  %v1901_v13 = vld [vmem:[%s2055_s26 + $0x164] ss:$16 sps:$4 sm:$0xff]   ;;  %v1903_v14 = vld [vmem:[%s2055_s26 + $0x16c] ss:$16 sps:$4 sm:$0xff]  }
  0x26   : > { %887 = vmatprep.subr.bf16.mxu0 %v1951_v1  ;;  %1064 = vmatprep.subr.bf16.mxu1 %v1951_v1 }
  0x29   : > { %888 = vmatpush1.bf16.msra.mxu0 %v1817_v15  ;;  %1065 = vmatpush1.bf16.msra.mxu1 %v1818_v16  ;;  %v1905_v15 = vld [vmem:[%s2055_s26 + $0x160] ss:$16 sps:$4 sm:$0xff]   ;;  %v1906_v16 = vld [vmem:[%s2055_s26 + $0x168] ss:$16 sps:$4 sm:$0xff]  }
  0x2a   : > { %889 = vmatprep.subr.bf16.mxu0 %v1951_v1  ;;  %1066 = vmatprep.subr.bf16.mxu1 %v1951_v1 }
  0x2d   : > { %890 = vmatpush2.bf16.msra.mxu0 %v1819_v17  ;;  %1067 = vmatpush2.bf16.msra.mxu1 %v1820_v18  ;;  %v1907_v17 = vld [vmem:[%s2055_s26 + $0x184] ss:$16 sps:$4 sm:$0xff]   ;;  %v1909_v18 = vld [vmem:[%s2055_s26 + $0x18c] ss:$16 sps:$4 sm:$0xff]  }
  0x2e   : > { %891 = vmatprep.subr.bf16.mxu0 %v1951_v1  ;;  %1068 = vmatprep.subr.bf16.mxu1 %v1951_v1 }
  0x31   : > { %892 = vmatpush2.bf16.msra.mxu0 %v1821_v20  ;;  %1069 = vmatpush2.bf16.msra.mxu1 %v1822_v22  ;;  %v1912_v20 = vld [vmem:[%s2055_s26 + $0x188] ss:$16 sps:$4 sm:$0xff]   ;;  %v1915_v22 = vld [vmem:[%s2055_s26 + $0x1ac] ss:$16 sps:$4 sm:$0xff]  }
  0x32   : > { %893 = vmatprep.subr.bf16.mxu0 %v1951_v1  ;;  %1070 = vmatprep.subr.bf16.mxu1 %v1951_v1 }
  0x35   : > { %894 = vmatpush2.bf16.msra.mxu0 %v1823_v23  ;;  %1071 = vmatpush2.bf16.msra.mxu1 %v1824_v24  ;;  %v1917_v23 = vld [vmem:[%s2055_s26 + $0x1a0] ss:$16 sps:$4 sm:$0xff]   ;;  %v1918_v24 = vld [vmem:[%s2055_s26 + $0x1a8] ss:$16 sps:$4 sm:$0xff]  }
  0x36   : > { %895 = vmatprep.subr.bf16.mxu0 %v1951_v1  ;;  %1072 = vmatprep.subr.bf16.mxu1 %v1951_v1 }
  0x39   : > { %896 = vmatpush2.bf16.msra.mxu0 %v1825_v25  ;;  %1073 = vmatpush2.bf16.msra.mxu1 %v1826_v26  ;;  %v1919_v25 = vld [vmem:[%s2055_s26 + $0x1c4] ss:$16 sps:$4 sm:$0xff]   ;;  %v1921_v26 = vld [vmem:[%s2055_s26 + $0x1cc] ss:$16 sps:$4 sm:$0xff]  }
  0x3a   : > { %897 = vmatprep.subr.bf16.mxu0 %v1951_v1  ;;  %1074 = vmatprep.subr.bf16.mxu1 %v1951_v1 }
  0x3d   : > { %898 = vmatpush2.bf16.msra.mxu0 %v1827_v27  ;;  %1075 = vmatpush2.bf16.msra.mxu1 %v1828_v28  ;;  %v1923_v27 = vld [vmem:[%s2055_s26 + $0x1c0] ss:$16 sps:$4 sm:$0xff]   ;;  %v1924_v28 = vld [vmem:[%s2055_s26 + $0x1c8] ss:$16 sps:$4 sm:$0xff]  }
  0x3e   : > { %899 = vmatprep.subr.bf16.mxu0 %v1951_v1  ;;  %1076 = vmatprep.subr.bf16.mxu1 %v1951_v1 }
  0x41   : > { %900 = vmatpush2.bf16.msra.mxu0 %v1829_v29  ;;  %1077 = vmatpush2.bf16.msra.mxu1 %v1830_v30  ;;  %v1925_v29 = vld [vmem:[%s2055_s26 + $0x1e4] ss:$16 sps:$4 sm:$0xff]   ;;  %v1927_v30 = vld [vmem:[%s2055_s26 + $0x1ec] ss:$16 sps:$4 sm:$0xff]  }
  0x42   : > { %901 = vmatprep.subr.bf16.mxu0 %v1951_v1  ;;  %1078 = vmatprep.subr.bf16.mxu1 %v1951_v1 }
  0x45   : > { %902 = vmatpush2.bf16.msra.mxu0 %v1831_v31  ;;  %1079 = vmatpush2.bf16.msra.mxu1 %v1832_v32  ;;  %v1929_v31 = vld [vmem:[%s2055_s26 + $0x1e0] ss:$16 sps:$4 sm:$0xff]   ;;  %v1930_v32 = vld [vmem:[%s2055_s26 + $0x1e8] ss:$16 sps:$4 sm:$0xff]  }
  0x46   : > { %903 = vmatprep.subr.bf16.mxu0 %v1951_v1  ;;  %1080 = vmatprep.subr.bf16.mxu1 %v1951_v1  ;;  %v1883_v1 = vld [vmem:[%s2055_s26 + $0x104] ss:$16 sps:$4 sm:$0xff]  }
  0x49   : > { %904 = vmatpush2.bf16.msra.mxu0 %v1833_v33  ;;  %1081 = vmatpush2.bf16.msra.mxu1 %v1834_v34  ;;  %v1931_v33 = vld [vmem:[%s2055_s26 + $0x204] ss:$16 sps:$4 sm:$0xff]   ;;  %v1933_v34 = vld [vmem:[%s2055_s26 + $0x20c] ss:$16 sps:$4 sm:$0xff]  }
  0x4c   : > { %906 = vmatmul.mubr.bf16.vlgmr.msra.gmra.mxu0 %v1835_v35  ;;  %1083 = vmatmul.mubr.bf16.vlgmr.msra.gmra.mxu1 %v1838_v36  ;;  %v1935_v35 = vld [vmem:[%s2055_s26 + $0x200] ss:$16 sps:$4 sm:$0xff]   ;;  %v1936_v36 = vld [vmem:[%s2055_s26 + $0x208] ss:$16 sps:$4 sm:$0xff]  }
  0x4d   : > { %913 = vmatprep.mubr.bf16.mxu0 %v1841_v37  ;;  %1090 = vmatprep.mubr.bf16.mxu1 %v1843_v38  ;;  %v1937_v37 = vld [vmem:[%s2055_s26 + $0x224] ss:$16 sps:$4 sm:$0xff]   ;;  %v1939_v38 = vld [vmem:[%s2055_s26 + $0x22c] ss:$16 sps:$4 sm:$0xff]  }
  0x54   : > { %914 = vmatmul.mubr.bf16.gmra.mxu0 %v1845_v39  ;;  %1091 = vmatmul.mubr.bf16.gmra.mxu1 %v1846_v40  ;;  %v1941_v39 = vld [vmem:[%s2055_s26 + $0x220] ss:$16 sps:$4 sm:$0xff]   ;;  %v1942_v40 = vld [vmem:[%s2055_s26 + $0x228] ss:$16 sps:$4 sm:$0xff]   ;;  %s1506_s26 = sshll.u32 %s2263_s7, 2 }
  0x55   : > { %921 = vmatprep.mubr.bf16.mxu0 %v1847_v41  ;;  %1098 = vmatprep.mubr.bf16.mxu1 %v1849_v42  ;;  %v2193_v41 = vld [vmem:[%s2260_s2] ss:$0 sm:$0xff]  ;;  %s2202_s11 = scalar_lea.vmem %s2261_s3, %s1506_s26 }
  0x5c   : > { %922 = vmatmul.mubr.bf16.gmra.mxu0 %v1851_v43  ;;  %1099 = vmatmul.mubr.bf16.gmra.mxu1 %v1852_v44 }
  0x5d   : > { %929 = vmatprep.mubr.bf16.mxu0 %v1853_v45  ;;  %1106 = vmatprep.mubr.bf16.mxu1 %v1855_v46 }
  0x64   : > { %930 = vmatmul.mubr.bf16.gmra.mxu0 %v1857_v47  ;;  %1107 = vmatmul.mubr.bf16.gmra.mxu1 %v1858_v48 }
  0x65   : > { %937 = vmatprep.mubr.bf16.mxu0 %v1859_v49  ;;  %1114 = vmatprep.mubr.bf16.mxu1 %v1861_v50 }
  0x6c   : > { %938 = vmatmul.mubr.bf16.gmra.mxu0 %v1863_v51  ;;  %1115 = vmatmul.mubr.bf16.gmra.mxu1 %v1864_v52 }
  0x6d   : > { %945 = vmatprep.mubr.bf16.mxu0 %v1865_v53  ;;  %1122 = vmatprep.mubr.bf16.mxu1 %v1867_v54 }
  0x74   : > { %946 = vmatmul.mubr.bf16.gmra.mxu0 %v1869_v55  ;;  %1123 = vmatmul.mubr.bf16.gmra.mxu1 %v1870_v56 }
  0x75   : > { %953 = vmatprep.mubr.bf16.mxu0 %v1871_v57  ;;  %1130 = vmatprep.mubr.bf16.mxu1 %v1873_v58 }
  0x7c   : > { %954 = vmatmul.mubr.bf16.gmra.mxu0 %v1875_v59  ;;  %1131 = vmatmul.mubr.bf16.gmra.mxu1 %v1876_v60 }
  0x7d   : > { %961 = vmatprep.mubr.bf16.mxu0 %v1877_v61  ;;  %1138 = vmatprep.mubr.bf16.mxu1 %v1879_v62 }
  0x84   : > { %962 = vmatmul.mubr.bf16.gmra.mxu0 %v1881_v63  ;;  %1139 = vmatmul.mubr.bf16.gmra.mxu1 %v1882_v0 }
  0x85   : > { %969 = vmatprep.mubr.bf16.mxu0 %v1883_v1  ;;  %1146 = vmatprep.mubr.bf16.mxu1 %v1885_v2 }
  0x8c   : > { %970 = vmatmul.mubr.bf16.gmra.mxu0 %v1887_v3  ;;  %1147 = vmatmul.mubr.bf16.gmra.mxu1 %v1888_v4 }
  0x8d   : > { %977 = vmatprep.mubr.bf16.mxu0 %v1889_v5  ;;  %1154 = vmatprep.mubr.bf16.mxu1 %v1891_v6 }
  0x94   : > { %978 = vmatmul.mubr.bf16.gmra.mxu0 %v1893_v7  ;;  %1155 = vmatmul.mubr.bf16.gmra.mxu1 %v1894_v8 }
  0x95   : > { %985 = vmatprep.mubr.bf16.mxu0 %v1895_v9  ;;  %1162 = vmatprep.mubr.bf16.mxu1 %v1897_v10 }
  0x9c   : > { %986 = vmatmul.mubr.bf16.gmra.mxu0 %v1899_v11  ;;  %1163 = vmatmul.mubr.bf16.gmra.mxu1 %v1900_v12 }
  0x9d   : > { %993 = vmatprep.mubr.bf16.mxu0 %v1901_v13  ;;  %1170 = vmatprep.mubr.bf16.mxu1 %v1903_v14 }
  0xa4   : > { %994 = vmatmul.mubr.bf16.gmra.mxu0 %v1905_v15  ;;  %1171 = vmatmul.mubr.bf16.gmra.mxu1 %v1906_v16 }
  0xa5   : > { %1001 = vmatprep.mubr.bf16.mxu0 %v1907_v17  ;;  %1178 = vmatprep.mubr.bf16.mxu1 %v1909_v18 }
  0xac   : > { %1002 = vmatmul.mubr.bf16.gmra.mxu0 %v1911_v19  ;;  %1179 = vmatmul.mubr.bf16.gmra.mxu1 %v1912_v20 }
  0xad   : > { %1009 = vmatprep.mubr.bf16.mxu0 %v1913_v21  ;;  %1186 = vmatprep.mubr.bf16.mxu1 %v1915_v22 }
  0xb4   : > { %1010 = vmatmul.mubr.bf16.gmra.mxu0 %v1917_v23  ;;  %1187 = vmatmul.mubr.bf16.gmra.mxu1 %v1918_v24 }
  0xb5   : > { %1017 = vmatprep.mubr.bf16.mxu0 %v1919_v25  ;;  %1194 = vmatprep.mubr.bf16.mxu1 %v1921_v26 }
  0xbc   : > { %1018 = vmatmul.mubr.bf16.gmra.mxu0 %v1923_v27  ;;  %1195 = vmatmul.mubr.bf16.gmra.mxu1 %v1924_v28 }
  0xbd   : > { %1025 = vmatprep.mubr.bf16.mxu0 %v1925_v29  ;;  %1202 = vmatprep.mubr.bf16.mxu1 %v1927_v30 }
  0xc4   : > { %1026 = vmatmul.mubr.bf16.gmra.mxu0 %v1929_v31  ;;  %1203 = vmatmul.mubr.bf16.gmra.mxu1 %v1930_v32 }
  0xc5   : > { %1033 = vmatprep.mubr.bf16.mxu0 %v1931_v33  ;;  %1210 = vmatprep.mubr.bf16.mxu1 %v1933_v34 }
  0xcc   : > { %1034 = vmatmul.mubr.bf16.gmra.mxu0 %v1935_v35  ;;  %1211 = vmatmul.mubr.bf16.gmra.mxu1 %v1936_v36 }
  0xcd   : > { %1041 = vmatprep.mubr.bf16.mxu0 %v1937_v37  ;;  %1218 = vmatprep.mubr.bf16.mxu1 %v1939_v38 }
  0xd4   : > { %1042 = vmatmul.mubr.bf16.gmra.mxu0 %v1941_v39  ;;  %1219 = vmatmul.mubr.bf16.gmra.mxu1 %v1942_v40 }
 0x10c   : > { %v907_v42 = vpop.f32.mrf.mxu0  ;;  %v1084_v44 = vpop.f32.mrf.mxu1 }
 0x10d   : > { %v908_v43 = vadd.f32 %v2193_v41, %v907_v42 }
 0x10e   : > { %v909_v45 = vpop.f32.mrf.mxu0  ;;  %v1086_v46 = vpop.f32.mrf.mxu1 }
 0x10f   : > { %v1085_v48 = vadd.f32 %v1084_v44, %v908_v43 }
 0x110   : > { %v910_v47 = vpop.f32.mrf.mxu0  ;;  %v1087_v50 = vpop.f32.mrf.mxu1 }
 0x111   : > { %v911_v49 = vadd.f32 %v2193_v41, %v910_v47  ;;  %v1227_v55 = vmax.f32 %v1085_v48, 0.0 }
 0x112   : > { %v912_v51 = vpop.f32.mrf.mxu0  ;;  %v1089_v53 = vpop.f32.mrf.mxu1 }
 0x113   : > { %v1088_v52 = vadd.f32 %v1087_v50, %v911_v49 }
 0x114   : > { %v915_v54 = vpop.f32.mrf.mxu0  ;;  %v1092_v58 = vpop.f32.mrf.mxu1 }
 0x115   : > { %v1228_v56 = vmax.f32 %v1088_v52, 0.0  ;;  %v916_v57 = vadd.f32 %v2193_v41, %v915_v54 }
 0x116   : > { %v917_v59 = vpop.f32.mrf.mxu0  ;;  %v1094_v61 = vpop.f32.mrf.mxu1 }
 0x117   : > { %v1690_v60 = vpack.c.bf16 %v1228_v56, %v1227_v55  ;;  %v1093_v63 = vadd.f32 %v1092_v58, %v916_v57 }
 0x118   : > { %v918_v62 = vpop.f32.mrf.mxu0  ;;  %v1095_v1 = vpop.f32.mrf.mxu1 }
 0x119   : > { %1691 = vst [vmem:[%s2202_s11] sm:$0xff] %v1690_v60   ;;  %v919_v0 = vadd.f32 %v2193_v41, %v918_v62  ;;  %v1229_v6 = vmax.f32 %v1093_v63, 0.0 }
 0x11a   : > { %v920_v2 = vpop.f32.mrf.mxu0  ;;  %v1097_v4 = vpop.f32.mrf.mxu1 }
 0x11b   : > { %v1096_v3 = vadd.f32 %v1095_v1, %v919_v0 }
 0x11c   : > { %v923_v5 = vpop.f32.mrf.mxu0  ;;  %v1100_v9 = vpop.f32.mrf.mxu1 }
 0x11d   : > { %v1230_v7 = vmax.f32 %v1096_v3, 0.0  ;;  %v924_v8 = vadd.f32 %v2193_v41, %v923_v5 }
 0x11e   : > { %v925_v10 = vpop.f32.mrf.mxu0  ;;  %v1102_v12 = vpop.f32.mrf.mxu1 }
 0x11f   : > { %v1695_v11 = vpack.c.bf16 %v1230_v7, %v1229_v6  ;;  %v1101_v14 = vadd.f32 %v1100_v9, %v924_v8 }
 0x120   : > { %v926_v13 = vpop.f32.mrf.mxu0  ;;  %v1103_v16 = vpop.f32.mrf.mxu1 }
 0x121   : > { %1777 = vst [vmem:[%s2202_s11 + $0x8] sm:$0xff] %v1695_v11   ;;  %v927_v15 = vadd.f32 %v2193_v41, %v926_v13  ;;  %v1231_v21 = vmax.f32 %v1101_v14, 0.0 }
 0x122   : > { %v928_v17 = vpop.f32.mrf.mxu0  ;;  %v1105_v19 = vpop.f32.mrf.mxu1 }
 0x123   : > { %v1104_v18 = vadd.f32 %v1103_v16, %v927_v15 }
 0x124   : > { %v931_v20 = vpop.f32.mrf.mxu0  ;;  %v1108_v24 = vpop.f32.mrf.mxu1 }
 0x125   : > { %v1232_v22 = vmax.f32 %v1104_v18, 0.0  ;;  %v932_v23 = vadd.f32 %v2193_v41, %v931_v20 }
 0x126   : > { %v933_v25 = vpop.f32.mrf.mxu0  ;;  %v1110_v27 = vpop.f32.mrf.mxu1 }
 0x127   : > { %v1700_v26 = vpack.c.bf16 %v1232_v22, %v1231_v21  ;;  %v1109_v29 = vadd.f32 %v1108_v24, %v932_v23 }
 0x128   : > { %v934_v28 = vpop.f32.mrf.mxu0  ;;  %v1111_v31 = vpop.f32.mrf.mxu1 }
 0x129   : > { %1778 = vst [vmem:[%s2202_s11 + $0x10] sm:$0xff] %v1700_v26   ;;  %v935_v30 = vadd.f32 %v2193_v41, %v934_v28  ;;  %v1233_v36 = vmax.f32 %v1109_v29, 0.0 }
 0x12a   : > { %v936_v32 = vpop.f32.mrf.mxu0  ;;  %v1113_v34 = vpop.f32.mrf.mxu1 }
 0x12b   : > { %v1112_v33 = vadd.f32 %v1111_v31, %v935_v30 }
 0x12c   : > { %v939_v35 = vpop.f32.mrf.mxu0  ;;  %v1116_v39 = vpop.f32.mrf.mxu1 }
 0x12d   : > { %v1234_v37 = vmax.f32 %v1112_v33, 0.0  ;;  %v940_v38 = vadd.f32 %v2193_v41, %v939_v35 }
 0x12e   : > { %v941_v40 = vpop.f32.mrf.mxu0  ;;  %v1118_v43 = vpop.f32.mrf.mxu1 }
 0x12f   : > { %v1705_v42 = vpack.c.bf16 %v1234_v37, %v1233_v36  ;;  %v1117_v45 = vadd.f32 %v1116_v39, %v940_v38 }
 0x130   : > { %v942_v44 = vpop.f32.mrf.mxu0  ;;  %v1119_v47 = vpop.f32.mrf.mxu1 }
 0x131   : > { %1779 = vst [vmem:[%s2202_s11 + $0x18] sm:$0xff] %v1705_v42   ;;  %v943_v46 = vadd.f32 %v2193_v41, %v942_v44  ;;  %v1235_v52 = vmax.f32 %v1117_v45, 0.0 }
 0x132   : > { %v944_v48 = vpop.f32.mrf.mxu0  ;;  %v1121_v50 = vpop.f32.mrf.mxu1 }
 0x133   : > { %v1120_v49 = vadd.f32 %v1119_v47, %v943_v46 }
 0x134   : > { %v947_v51 = vpop.f32.mrf.mxu0  ;;  %v1124_v55 = vpop.f32.mrf.mxu1 }
 0x135   : > { %v1236_v53 = vmax.f32 %v1120_v49, 0.0  ;;  %v948_v54 = vadd.f32 %v2193_v41, %v947_v51 }
 0x136   : > { %v949_v56 = vpop.f32.mrf.mxu0  ;;  %v1126_v58 = vpop.f32.mrf.mxu1 }
 0x137   : > { %v1710_v57 = vpack.c.bf16 %v1236_v53, %v1235_v52  ;;  %v1125_v60 = vadd.f32 %v1124_v55, %v948_v54 }
 0x138   : > { %v950_v59 = vpop.f32.mrf.mxu0  ;;  %v1127_v62 = vpop.f32.mrf.mxu1 }
 0x139   : > { %1780 = vst [vmem:[%s2202_s11 + $0x20] sm:$0xff] %v1710_v57   ;;  %v951_v61 = vadd.f32 %v2193_v41, %v950_v59  ;;  %v1237_v3 = vmax.f32 %v1125_v60, 0.0 }
 0x13a   : > { %v952_v63 = vpop.f32.mrf.mxu0  ;;  %v1129_v1 = vpop.f32.mrf.mxu1 }
 0x13b   : > { %v1128_v0 = vadd.f32 %v1127_v62, %v951_v61 }
 0x13c   : > { %v955_v2 = vpop.f32.mrf.mxu0  ;;  %v1132_v6 = vpop.f32.mrf.mxu1 }
 0x13d   : > { %v1238_v4 = vmax.f32 %v1128_v0, 0.0  ;;  %v956_v5 = vadd.f32 %v2193_v41, %v955_v2 }
 0x13e   : > { %v957_v7 = vpop.f32.mrf.mxu0  ;;  %v1134_v9 = vpop.f32.mrf.mxu1 }
 0x13f   : > { %v1715_v8 = vpack.c.bf16 %v1238_v4, %v1237_v3  ;;  %v1133_v11 = vadd.f32 %v1132_v6, %v956_v5 }
 0x140   : > { %v958_v10 = vpop.f32.mrf.mxu0  ;;  %v1135_v13 = vpop.f32.mrf.mxu1 }
 0x141   : > { %1781 = vst [vmem:[%s2202_s11 + $0x28] sm:$0xff] %v1715_v8   ;;  %v959_v12 = vadd.f32 %v2193_v41, %v958_v10  ;;  %v1239_v18 = vmax.f32 %v1133_v11, 0.0 }
 0x142   : > { %v960_v14 = vpop.f32.mrf.mxu0  ;;  %v1137_v16 = vpop.f32.mrf.mxu1 }
 0x143   : > { %v1136_v15 = vadd.f32 %v1135_v13, %v959_v12 }
 0x144   : > { %v963_v17 = vpop.f32.mrf.mxu0  ;;  %v1140_v21 = vpop.f32.mrf.mxu1 }
 0x145   : > { %v1240_v19 = vmax.f32 %v1136_v15, 0.0  ;;  %v964_v20 = vadd.f32 %v2193_v41, %v963_v17 }
 0x146   : > { %v965_v22 = vpop.f32.mrf.mxu0  ;;  %v1142_v24 = vpop.f32.mrf.mxu1 }
 0x147   : > { %v1720_v23 = vpack.c.bf16 %v1240_v19, %v1239_v18  ;;  %v1141_v26 = vadd.f32 %v1140_v21, %v964_v20 }
 0x148   : > { %v966_v25 = vpop.f32.mrf.mxu0  ;;  %v1143_v28 = vpop.f32.mrf.mxu1 }
 0x149   : > { %1782 = vst [vmem:[%s2202_s11 + $0x30] sm:$0xff] %v1720_v23   ;;  %v967_v27 = vadd.f32 %v2193_v41, %v966_v25  ;;  %v1241_v33 = vmax.f32 %v1141_v26, 0.0 }
 0x14a   : > { %v968_v29 = vpop.f32.mrf.mxu0  ;;  %v1145_v31 = vpop.f32.mrf.mxu1 }
 0x14b   : > { %v1144_v30 = vadd.f32 %v1143_v28, %v967_v27 }
 0x14c   : > { %v971_v32 = vpop.f32.mrf.mxu0  ;;  %v1148_v36 = vpop.f32.mrf.mxu1 }
 0x14d   : > { %v1242_v34 = vmax.f32 %v1144_v30, 0.0  ;;  %v972_v35 = vadd.f32 %v2193_v41, %v971_v32 }
 0x14e   : > { %v973_v37 = vpop.f32.mrf.mxu0  ;;  %v1150_v39 = vpop.f32.mrf.mxu1 }
 0x14f   : > { %v1725_v38 = vpack.c.bf16 %v1242_v34, %v1241_v33  ;;  %v1149_v42 = vadd.f32 %v1148_v36, %v972_v35 }
 0x150   : > { %v974_v40 = vpop.f32.mrf.mxu0  ;;  %v1151_v44 = vpop.f32.mrf.mxu1 }
 0x151   : > { %1783 = vst [vmem:[%s2202_s11 + $0x38] sm:$0xff] %v1725_v38   ;;  %v975_v43 = vadd.f32 %v2193_v41, %v974_v40  ;;  %v1243_v49 = vmax.f32 %v1149_v42, 0.0 }
 0x152   : > { %v976_v45 = vpop.f32.mrf.mxu0  ;;  %v1153_v47 = vpop.f32.mrf.mxu1 }
 0x153   : > { %v1152_v46 = vadd.f32 %v1151_v44, %v975_v43 }
 0x154   : > { %v979_v48 = vpop.f32.mrf.mxu0  ;;  %v1156_v52 = vpop.f32.mrf.mxu1 }
 0x155   : > { %v1244_v50 = vmax.f32 %v1152_v46, 0.0  ;;  %v980_v51 = vadd.f32 %v2193_v41, %v979_v48 }
 0x156   : > { %v981_v53 = vpop.f32.mrf.mxu0  ;;  %v1158_v55 = vpop.f32.mrf.mxu1 }
 0x157   : > { %v1730_v54 = vpack.c.bf16 %v1244_v50, %v1243_v49  ;;  %v1157_v57 = vadd.f32 %v1156_v52, %v980_v51 }
 0x158   : > { %v982_v56 = vpop.f32.mrf.mxu0  ;;  %v1159_v59 = vpop.f32.mrf.mxu1 }
 0x159   : > { %1784 = vst [vmem:[%s2202_s11 + $0x40] sm:$0xff] %v1730_v54   ;;  %v983_v58 = vadd.f32 %v2193_v41, %v982_v56  ;;  %v1245_v0 = vmax.f32 %v1157_v57, 0.0 }
 0x15a   : > { %v984_v60 = vpop.f32.mrf.mxu0  ;;  %v1161_v62 = vpop.f32.mrf.mxu1 }
 0x15b   : > { %v1160_v61 = vadd.f32 %v1159_v59, %v983_v58 }
 0x15c   : > { %v987_v63 = vpop.f32.mrf.mxu0  ;;  %v1164_v3 = vpop.f32.mrf.mxu1 }
 0x15d   : > { %v1246_v1 = vmax.f32 %v1160_v61, 0.0  ;;  %v988_v2 = vadd.f32 %v2193_v41, %v987_v63 }
 0x15e   : > { %v989_v4 = vpop.f32.mrf.mxu0  ;;  %v1166_v6 = vpop.f32.mrf.mxu1 }
 0x15f   : > { %v1735_v5 = vpack.c.bf16 %v1246_v1, %v1245_v0  ;;  %v1165_v8 = vadd.f32 %v1164_v3, %v988_v2 }
 0x160   : > { %v990_v7 = vpop.f32.mrf.mxu0  ;;  %v1167_v10 = vpop.f32.mrf.mxu1 }
 0x161   : > { %1785 = vst [vmem:[%s2202_s11 + $0x48] sm:$0xff] %v1735_v5   ;;  %v991_v9 = vadd.f32 %v2193_v41, %v990_v7  ;;  %v1247_v15 = vmax.f32 %v1165_v8, 0.0 }
 0x162   : > { %v992_v11 = vpop.f32.mrf.mxu0  ;;  %v1169_v13 = vpop.f32.mrf.mxu1 }
 0x163   : > { %v1168_v12 = vadd.f32 %v1167_v10, %v991_v9 }
 0x164   : > { %v995_v14 = vpop.f32.mrf.mxu0  ;;  %v1172_v18 = vpop.f32.mrf.mxu1 }
 0x165   : > { %v1248_v16 = vmax.f32 %v1168_v12, 0.0  ;;  %v996_v17 = vadd.f32 %v2193_v41, %v995_v14 }
 0x166   : > { %v997_v19 = vpop.f32.mrf.mxu0  ;;  %v1174_v21 = vpop.f32.mrf.mxu1 }
 0x167   : > { %v1740_v20 = vpack.c.bf16 %v1248_v16, %v1247_v15  ;;  %v1173_v23 = vadd.f32 %v1172_v18, %v996_v17 }
 0x168   : > { %v998_v22 = vpop.f32.mrf.mxu0  ;;  %v1175_v25 = vpop.f32.mrf.mxu1 }
 0x169   : > { %1786 = vst [vmem:[%s2202_s11 + $0x50] sm:$0xff] %v1740_v20   ;;  %v999_v24 = vadd.f32 %v2193_v41, %v998_v22  ;;  %v1249_v30 = vmax.f32 %v1173_v23, 0.0 }
 0x16a   : > { %v1000_v26 = vpop.f32.mrf.mxu0  ;;  %v1177_v28 = vpop.f32.mrf.mxu1 }
 0x16b   : > { %v1176_v27 = vadd.f32 %v1175_v25, %v999_v24 }
 0x16c   : > { %v1003_v29 = vpop.f32.mrf.mxu0  ;;  %v1180_v33 = vpop.f32.mrf.mxu1 }
 0x16d   : > { %v1250_v31 = vmax.f32 %v1176_v27, 0.0  ;;  %v1004_v32 = vadd.f32 %v2193_v41, %v1003_v29 }
 0x16e   : > { %v1005_v34 = vpop.f32.mrf.mxu0  ;;  %v1182_v36 = vpop.f32.mrf.mxu1 }
 0x16f   : > { %v1745_v35 = vpack.c.bf16 %v1250_v31, %v1249_v30  ;;  %v1181_v38 = vadd.f32 %v1180_v33, %v1004_v32 }
 0x170   : > { %v1006_v37 = vpop.f32.mrf.mxu0  ;;  %v1183_v40 = vpop.f32.mrf.mxu1 }
 0x171   : > { %1787 = vst [vmem:[%s2202_s11 + $0x58] sm:$0xff] %v1745_v35   ;;  %v1007_v39 = vadd.f32 %v2193_v41, %v1006_v37  ;;  %v1251_v46 = vmax.f32 %v1181_v38, 0.0 }
 0x172   : > { %v1008_v42 = vpop.f32.mrf.mxu0  ;;  %v1185_v44 = vpop.f32.mrf.mxu1 }
 0x173   : > { %v1184_v43 = vadd.f32 %v1183_v40, %v1007_v39 }
 0x174   : > { %v1011_v45 = vpop.f32.mrf.mxu0  ;;  %v1188_v49 = vpop.f32.mrf.mxu1 }
 0x175   : > { %v1252_v47 = vmax.f32 %v1184_v43, 0.0  ;;  %v1012_v48 = vadd.f32 %v2193_v41, %v1011_v45 }
 0x176   : > { %v1013_v50 = vpop.f32.mrf.mxu0  ;;  %v1190_v52 = vpop.f32.mrf.mxu1 }
 0x177   : > { %v1750_v51 = vpack.c.bf16 %v1252_v47, %v1251_v46  ;;  %v1189_v54 = vadd.f32 %v1188_v49, %v1012_v48 }
 0x178   : > { %v1014_v53 = vpop.f32.mrf.mxu0  ;;  %v1191_v56 = vpop.f32.mrf.mxu1 }
 0x179   : > { %1788 = vst [vmem:[%s2202_s11 + $0x60] sm:$0xff] %v1750_v51   ;;  %v1015_v55 = vadd.f32 %v2193_v41, %v1014_v53  ;;  %v1253_v61 = vmax.f32 %v1189_v54, 0.0 }
 0x17a   : > { %v1016_v57 = vpop.f32.mrf.mxu0  ;;  %v1193_v59 = vpop.f32.mrf.mxu1 }
 0x17b   : > { %v1192_v58 = vadd.f32 %v1191_v56, %v1015_v55 }
 0x17c   : > { %v1019_v60 = vpop.f32.mrf.mxu0  ;;  %v1196_v0 = vpop.f32.mrf.mxu1 }
 0x17d   : > { %v1254_v62 = vmax.f32 %v1192_v58, 0.0  ;;  %v1020_v63 = vadd.f32 %v2193_v41, %v1019_v60 }
 0x17e   : > { %v1021_v1 = vpop.f32.mrf.mxu0  ;;  %v1198_v3 = vpop.f32.mrf.mxu1 }
 0x17f   : > { %v1755_v2 = vpack.c.bf16 %v1254_v62, %v1253_v61  ;;  %v1197_v5 = vadd.f32 %v1196_v0, %v1020_v63 }
 0x180   : > { %v1022_v4 = vpop.f32.mrf.mxu0  ;;  %v1199_v7 = vpop.f32.mrf.mxu1 }
 0x181   : > { %1789 = vst [vmem:[%s2202_s11 + $0x68] sm:$0xff] %v1755_v2   ;;  %v1023_v6 = vadd.f32 %v2193_v41, %v1022_v4  ;;  %v1255_v12 = vmax.f32 %v1197_v5, 0.0 }
 0x182   : > { %v1024_v8 = vpop.f32.mrf.mxu0  ;;  %v1201_v10 = vpop.f32.mrf.mxu1 }
 0x183   : > { %v1200_v9 = vadd.f32 %v1199_v7, %v1023_v6 }
 0x184   : > { %v1027_v11 = vpop.f32.mrf.mxu0  ;;  %v1204_v15 = vpop.f32.mrf.mxu1 }
 0x185   : > { %v1256_v13 = vmax.f32 %v1200_v9, 0.0  ;;  %v1028_v14 = vadd.f32 %v2193_v41, %v1027_v11 }
 0x186   : > { %v1029_v16 = vpop.f32.mrf.mxu0  ;;  %v1206_v18 = vpop.f32.mrf.mxu1 }
 0x187   : > { %v1760_v17 = vpack.c.bf16 %v1256_v13, %v1255_v12  ;;  %v1205_v20 = vadd.f32 %v1204_v15, %v1028_v14 }
 0x188   : > { %v1030_v19 = vpop.f32.mrf.mxu0  ;;  %v1207_v22 = vpop.f32.mrf.mxu1 }
 0x189   : > { %1790 = vst [vmem:[%s2202_s11 + $0x70] sm:$0xff] %v1760_v17   ;;  %v1031_v21 = vadd.f32 %v2193_v41, %v1030_v19  ;;  %v1257_v27 = vmax.f32 %v1205_v20, 0.0 }
 0x18a   : > { %v1032_v23 = vpop.f32.mrf.mxu0  ;;  %v1209_v25 = vpop.f32.mrf.mxu1 }
 0x18b   : > { %v1208_v24 = vadd.f32 %v1207_v22, %v1031_v21 }
 0x18c   : > { %v1035_v26 = vpop.f32.mrf.mxu0  ;;  %v1212_v30 = vpop.f32.mrf.mxu1 }
 0x18d   : > { %v1258_v28 = vmax.f32 %v1208_v24, 0.0  ;;  %v1036_v29 = vadd.f32 %v2193_v41, %v1035_v26 }
 0x18e   : > { %v1037_v31 = vpop.f32.mrf.mxu0  ;;  %v1214_v33 = vpop.f32.mrf.mxu1 }
 0x18f   : > { %v1765_v32 = vpack.c.bf16 %v1258_v28, %v1257_v27  ;;  %v1213_v35 = vadd.f32 %v1212_v30, %v1036_v29 }
 0x190   : > { %v1038_v34 = vpop.f32.mrf.mxu0  ;;  %v1215_v37 = vpop.f32.mrf.mxu1 }
 0x191   : > { %1791 = vst [vmem:[%s2202_s11 + $0x78] sm:$0xff] %v1765_v32   ;;  %v1039_v36 = vadd.f32 %v2193_v41, %v1038_v34  ;;  %v1259_v43 = vmax.f32 %v1213_v35, 0.0 }
 0x192   : > { %v1040_v38 = vpop.f32.mrf.mxu0  ;;  %v1217_v40 = vpop.f32.mrf.mxu1 }
 0x193   : > { %v1216_v39 = vadd.f32 %v1215_v37, %v1039_v36 }
 0x194   : > { %v1043_v42 = vpop.f32.mrf.mxu0  ;;  %v1220_v46 = vpop.f32.mrf.mxu1 }
 0x195   : > { %v1260_v44 = vmax.f32 %v1216_v39, 0.0  ;;  %v1044_v45 = vadd.f32 %v2193_v41, %v1043_v42 }
 0x196   : > { %v1045_v47 = vpop.f32.mrf.mxu0  ;;  %v1222_v49 = vpop.f32.mrf.mxu1 }
 0x197   : > { %v1770_v48 = vpack.c.bf16 %v1260_v44, %v1259_v43  ;;  %v1221_v51 = vadd.f32 %v1220_v46, %v1044_v45 }
 0x198   : > { %v1046_v50 = vpop.f32.mrf.mxu0  ;;  %v1223_v53 = vpop.f32.mrf.mxu1 }
 0x199   : > { %1792 = vst [vmem:[%s2202_s11 + $0x80] sm:$0xff] %v1770_v48   ;;  %v1047_v52 = vadd.f32 %v2193_v41, %v1046_v50  ;;  %v1261_v57 = vmax.f32 %v1221_v51, 0.0 }
 0x19a   : > { %v1048_v54 = vpop.f32.mrf.mxu0  ;;  %v1225_v56 = vpop.f32.mrf.mxu1 }
 0x19b   : > { %v1224_v55 = vadd.f32 %v1223_v53, %v1047_v52 }
 0x19d   : > { %v1262_v58 = vmax.f32 %v1224_v55, 0.0 }
 0x19f   : > { %v1775_v59 = vpack.c.bf16 %v1262_v58, %v1261_v57 }
 0x1a1   : > { %1793 = vst [vmem:[%s2202_s11 + $0x88] sm:$0xff] %v1775_v59  }
 0x1a2 PF: > { %s13_s12 = sadd.s32 1, %s1949_s12  }
 0x1a3   : > { %p10_p4 = scmp.ge.s32.totalorder %s13_s12, 4  }
 0x1a5   :  { %12 = sbr.rel (!%p10_p4) target bundleno = 1 (0x1), region = 62 }

// kernel: squeeze.1
= control target key start
LH: loop header
LB: loop body
LE: loop exit
PB: predicated region body
PF: predicated region fallthrough
CT: control target
= control target key end

     0   :  { %s125_s0 = inlined_call_operand.vmem [shape: f32[64], index: 0, kind: input, shape index: {}]   ;;  %s126_s1 = inlined_call_operand.hbm [shape: f32[8,8], index: 1, kind: output, shape index: {}]  }
   0x1   :  { %v6_v0 = vld [vmem:[%s125_s0] sm:$0x1] }
   0x2   :  { %7 = vst [vmem:[#allocation2] sm:$0x1] %v6_v0 }
   0x3   :  { %2 = vsyncpa [#allocation1], 0  ;;  %s93_s0 = smov 120   ;;  %s94_s8 = smov 104   ;;  %vm9_vm0 = vcmask 64512  }
   0x4   :  { %s95_s9 = smov 112   ;;  %s96_s10 = smov 96  }
   0x5   :  { %s97_s11 = smov 88   ;;  %s98_s12 = smov 80  }
   0x6   :  { %s99_s13 = smov 72   ;;  %s100_s14 = smov [#allocation0]  }
   0x7   :  { %s57_s15 = sshll.u32 %s100_s14, 4  ;;  %s58_s15 = int_to_ptr.vmem [resolvable:$true] %s57_s15 }
   0x8   :  { %s71_s16 = scalar_lea.vmem %s58_s15, 128  ;;  %p76_p1 = scmp.lt.s32.totalorder %s58_s15, %s58_s15 }
   0x9   :  { %v11_v1 = vld [vmem:[#allocation2] sm:$0x1]   ;;  %p72_p0 = scmp.ne.s32.totalorder %s58_s15, %s71_s16  ;;  %p77_p2 = scmp.lt.s32.totalorder %s71_s16, %s71_s16 }
   0xa   :  { %v23_v2 = vld [vmem:[#allocation2] sm:$0x1]   ;;  %12 = vrot.lane.b32.xlu0 %v11_v1, %s93_s0 }
   0xb   :  { %24 = vrot.lane.b32.xlu1 %v23_v2, %s94_s8  ;;  %v17_v3 = vld [vmem:[#allocation2] sm:$0x1]   ;;  %p78_p3 = por %p77_p2, %p76_p1 }
   0xc   :  { %v29_v4 = vld [vmem:[#allocation2] sm:$0x1]  }
   0xd   :  { %v8_v5 = vld [vmem:[#allocation2] sm:$0x1]   ;;  %p79_p4 = pnand %p78_p3, %p72_p0 }
   0xe   :  { %10 = vst.msk [vmem:[#allocation0] sm:$0x1] %vm9_vm0, %v8_v5   ;;  %18 = vrot.lane.b32.xlu0 %v17_v3, %s95_s9  ;;  %v35_v6 = vld [vmem:[#allocation2] sm:$0x1]  }
   0xf   :  { %30 = vrot.lane.b32.xlu1 %v29_v4, %s96_s10  ;;  %v41_v7 = vld [vmem:[#allocation2] sm:$0x1]  }
  0x10   :  { %v47_v8 = vld [vmem:[#allocation2] sm:$0x1]  }
  0x12   :  { %36 = vrot.lane.b32.xlu0 %v35_v6, %s97_s11 }
  0x13   :  { %42 = vrot.lane.b32.xlu1 %v41_v7, %s98_s12 }
  0x16   :  { %48 = vrot.lane.b32.xlu0 %v47_v8, %s99_s13 }
  0x7c   :  { %v13_v9 = vpop.permute.xlu0 %12  }
  0x7d   :  { %v25_v10 = vpop.permute.xlu1 %24   ;;  %16 = vst.msk [vmem:[#allocation0 + $0x1] sm:$0x1] %vm9_vm0, %v13_v9  }
  0x7e   :  { %28 = vst.msk [vmem:[#allocation0 + $0x3] sm:$0x1] %vm9_vm0, %v25_v10  }
  0x80   :  { %v19_v11 = vpop.permute.xlu0 %18  }
  0x81   :  { %v31_v12 = vpop.permute.xlu1 %30   ;;  %22 = vst.msk [vmem:[#allocation0 + $0x2] sm:$0x1] %vm9_vm0, %v19_v11  }
  0x82   :  { %34 = vst.msk [vmem:[#allocation0 + $0x4] sm:$0x1] %vm9_vm0, %v31_v12  }
  0x84   :  { %v37_v13 = vpop.permute.xlu0 %36  }
  0x85   :  { %v43_v14 = vpop.permute.xlu1 %42   ;;  %40 = vst.msk [vmem:[#allocation0 + $0x5] sm:$0x1] %vm9_vm0, %v37_v13  }
  0x86   :  { %46 = vst.msk [vmem:[#allocation0 + $0x6] sm:$0x1] %vm9_vm0, %v43_v14  }
  0x88   :  { %v49_v15 = vpop.permute.xlu0 %48  }
  0x89   :  { %52 = vst.msk [vmem:[#allocation0 + $0x7] sm:$0x1] %vm9_vm0, %v49_v15  }
  0x8a   :  { %82 = shalt.err (!%p79_p4)
}
  0x8b   :  { %60 = dma.vmem_to_hbm [thread:$0]  %s58_s15, 128, %s126_s1, [#allocation1]  }
  0x8c   :  { %91 = dma.done.wait [#allocation1], 128  }
  0x8d   :  { %92 = vsyncadd [#allocation1], 4294967168 }
  0x8e   :  { %62 = vsyncpa [#allocation1], 1 }

// kernel: doom_lstm_forward.5
= control target key start
LH: loop header
LB: loop body
LE: loop exit
PB: predicated region body
PF: predicated region fallthrough
CT: control target
= control target key end

     0   :  { %s7985_s0 = inlined_call_operand.vmem [shape: bf16[4,64,576], index: 0, kind: input, shape index: {}]   ;;  %s7986_s1 = inlined_call_operand.vmem [shape: bf16[576,128], index: 1, kind: input, shape index: {}]   ;;  %s7987_s2 = inlined_call_operand.vmem [shape: f32[1,128], index: 2, kind: input, shape index: {}]   ;;  %s7988_s3 = inlined_call_operand.vmem [shape: bf16[512,128], index: 3, kind: input, shape index: {}]   ;;  %s7989_s4 = inlined_call_operand.vmem [shape: f32[1,128], index: 4, kind: input, shape index: {}]   ;;  %s7990_s5 = inlined_call_operand.vmem [shape: bf16[64,8], index: 5, kind: input, shape index: {}]   ;;  %s7991_s6 = inlined_call_operand.vmem [shape: bf16[128,512], index: 6, kind: input, shape index: {}]   ;;  %s7992_s7 = inlined_call_operand.vmem [shape: bf16[8,512], index: 7, kind: input, shape index: {}]   ;;  %s7993_s8 = inlined_call_operand.vmem [shape: f32[1,512], index: 8, kind: input, shape index: {}]   ;;  %s7994_s9 = inlined_call_operand.vmem [shape: bf16[128,512], index: 9, kind: input, shape index: {}]   ;;  %s7995_s10 = inlined_call_operand.vmem [shape: f32[8,128], index: 10, kind: input, shape index: {}]   ;;  %s7996_s11 = inlined_call_operand.vmem [shape: f32[8,128], index: 11, kind: input, shape index: {}]   ;;  %s7997_s12 = inlined_call_operand.vmem [shape: bf16[128,128], index: 12, kind: input, shape index: {}]   ;;  %s7998_s13 = inlined_call_operand.vmem [shape: f32[1,128], index: 13, kind: input, shape index: {}]   ;;  %s7999_s14 = inlined_call_operand.vmem [shape: f32[64,128], index: 14, kind: output, shape index: {0}]   ;;  %s8000_s15 = inlined_call_operand.hbm [shape: f32[8,128], index: 15, kind: output, shape index: {1}]   ;;  %s8001_s16 = inlined_call_operand.hbm [shape: f32[8,128], index: 16, kind: output, shape index: {2}]  }
   0x1   :  { %8054 = sst [smem:[#allocation49_spill]] %s7985_s0 }
   0x2   :  { %22 = vsyncpa [#allocation5], 0  ;;  %v5274_v0 = vld [vmem:[%s7986_s1 + $0x78] sm:$0xff]   ;;  %v5276_v2 = vld [vmem:[%s7986_s1 + $0x70] sm:$0xff]   ;;  %s8055_s30 = sld [smem:[#allocation49_spill]]  ;;  %vm472_vm0 = vcmask 523264  }
   0x3   :  { %v5275_v1 = vld [vmem:[%s7986_s1 + $0x38] sm:$0xff]   ;;  %4675 = vmatprep.subr.bf16.mxu1 %v5274_v0  ;;  %4763 = vmatprep.subr.bf16.mxu0 %v5274_v0  ;;  %v5277_v3 = vld [vmem:[%s7986_s1 + $0x30] sm:$0xff]   ;;  %v5278_v4 = vld [vmem:[%s7986_s1 + $0x68] sm:$0xff]  }
   0x4   :  { %4676 = vmatpush3.bf16.msra.mxu1 %v5275_v1  ;;  %4764 = vmatpush3.bf16.msra.mxu0 %v5275_v1  ;;  %v5279_v5 = vld [vmem:[%s7986_s1 + $0x28] sm:$0xff]   ;;  %v5280_v6 = vld [vmem:[%s7986_s1 + $0x60] sm:$0xff]   ;;  %v5282_v8 = vld [vmem:[%s7986_s1 + $0x58] sm:$0xff]  }
   0x5   :  { %4677 = vmatprep.subr.bf16.mxu1 %v5276_v2  ;;  %4765 = vmatprep.subr.bf16.mxu0 %v5276_v2  ;;  %v5281_v7 = vld [vmem:[%s7986_s1 + $0x20] sm:$0xff]   ;;  %v5283_v9 = vld [vmem:[%s7986_s1 + $0x18] sm:$0xff]   ;;  %v5284_v10 = vld [vmem:[%s7986_s1 + $0x50] sm:$0xff]  }
   0x6   :  { %v5285_v12 = vld [vmem:[%s7986_s1 + $0x10] sm:$0xff]   ;;  %v5286_v14 = vld [vmem:[%s7986_s1 + $0x48] sm:$0xff]   ;;  %v5288_v16 = vld [vmem:[%s7986_s1 + $0x40] sm:$0xff]  }
   0x7   :  { %v5287_v15 = vld [vmem:[%s7986_s1 + $0x8] sm:$0xff]   ;;  %v5289_v17 = vld [vmem:[%s7986_s1] sm:$0xff]   ;;  %v5984_v18 = vld [vmem:[%s7986_s1 + $0xf8] sm:$0xff]  }
   0x8   :  { %4678 = vmatpush3.bf16.msra.mxu1 %v5277_v3  ;;  %4766 = vmatpush3.bf16.msra.mxu0 %v5277_v3  ;;  %v5292_v11 = vld [vmem:[%s8055_s30 + $0x4] ss:$20 sps:$4 sm:$0xff]   ;;  %v5290_v19 = vld [vmem:[%s8055_s30] ss:$20 sps:$4 sm:$0xff]   ;;  %v5303_v26 = vld [vmem:[%s7986_s1 + $0xe8] sm:$0xff]  }
   0x9   :  { %4679 = vmatprep.subr.bf16.mxu1 %v5278_v4  ;;  %4767 = vmatprep.subr.bf16.mxu0 %v5278_v4  ;;  %v5296_v13 = vld [vmem:[%s8055_s30 + $0xa4] ss:$20 sps:$4 sm:$0xff]   ;;  %v5294_v20 = vld [vmem:[%s8055_s30 + $0xa0] ss:$20 sps:$4 sm:$0xff]   ;;  %v5302_v27 = vld [vmem:[%s8055_s30 + $0x28] ss:$20 sps:$4 sm:$0xff]  }
   0xa   :  { %517 = vmatprep.mubr.bf16.mxu1 %v5292_v11  ;;  %877 = vmatprep.mubr.bf16.mxu0 %v5296_v13  ;;  %v5297_v21 = vld [vmem:[%s7986_s1 + $0xb8] sm:$0xff]   ;;  %v5298_v22 = vld [vmem:[%s7986_s1 + $0xf0] sm:$0xff]   ;;  %v5300_v23 = vld [vmem:[%s8055_s30 + $0x2c] ss:$20 sps:$4 sm:$0xff]  }
   0xb   :  { %v5304_v24 = vld [vmem:[%s8055_s30 + $0xcc] ss:$20 sps:$4 sm:$0xff]   ;;  %v5299_v25 = vld [vmem:[%s7986_s1 + $0xb0] sm:$0xff]   ;;  %v5307_v28 = vld [vmem:[%s8055_s30 + $0xc8] ss:$20 sps:$4 sm:$0xff]  }
   0xc   :  { %4680 = vmatpush3.bf16.msra.mxu1 %v5279_v5  ;;  %4768 = vmatpush3.bf16.msra.mxu0 %v5279_v5  ;;  %v5306_v29 = vld [vmem:[%s7986_s1 + $0xa8] sm:$0xff]   ;;  %v5308_v30 = vld [vmem:[%s7986_s1 + $0xe0] sm:$0xff]   ;;  %v5313_v34 = vld [vmem:[%s7986_s1 + $0xd8] sm:$0xff]  }
   0xd   :  { %4681 = vmatprep.subr.bf16.mxu1 %v5280_v6  ;;  %4769 = vmatprep.subr.bf16.mxu0 %v5280_v6  ;;  %v5310_v31 = vld [vmem:[%s8055_s30 + $0x54] ss:$20 sps:$4 sm:$0xff]   ;;  %v5309_v33 = vld [vmem:[%s7986_s1 + $0xa0] sm:$0xff]   ;;  %v5316_v37 = vld [vmem:[%s7986_s1 + $0x98] sm:$0xff]  }
   0xe   :  { %v5314_v32 = vld [vmem:[%s8055_s30 + $0xf4] ss:$20 sps:$4 sm:$0xff]   ;;  %v5312_v35 = vld [vmem:[%s8055_s30 + $0x50] ss:$20 sps:$4 sm:$0xff]   ;;  %v5322_v43 = vld [vmem:[%s8055_s30 + $0x78] ss:$20 sps:$4 sm:$0xff]  }
   0xf   :  { %v5317_v36 = vld [vmem:[%s8055_s30 + $0xf0] ss:$20 sps:$4 sm:$0xff]   ;;  %v5323_v42 = vld [vmem:[%s7986_s1 + $0xc8] sm:$0xff]   ;;  %v5333_v51 = vld [vmem:[%s7986_s1 + $0x118] sm:$0xff]  }
  0x10   :  { %4682 = vmatpush3.bf16.msra.mxu1 %v5281_v7  ;;  %4770 = vmatpush3.bf16.msra.mxu0 %v5281_v7  ;;  %v5318_v38 = vld [vmem:[%s7986_s1 + $0xd0] sm:$0xff]   ;;  %v5326_v44 = vld [vmem:[%s7986_s1 + $0x88] sm:$0xff]   ;;  %v5328_v46 = vld [vmem:[%s7986_s1 + $0xc0] sm:$0xff]  }
  0x11   :  { %4683 = vmatprep.subr.bf16.mxu1 %v5282_v8  ;;  %4771 = vmatprep.subr.bf16.mxu0 %v5282_v8  ;;  %v5320_v39 = vld [vmem:[%s8055_s30 + $0x7c] ss:$20 sps:$4 sm:$0xff]   ;;  %v5327_v45 = vld [vmem:[%s8055_s30 + $0x118] ss:$20 sps:$4 sm:$0xff]   ;;  %v5329_v49 = vld [vmem:[%s7986_s1 + $0x80] sm:$0xff]  }
  0x12   :  { %v5324_v40 = vld [vmem:[%s8055_s30 + $0x11c] ss:$20 sps:$4 sm:$0xff]   ;;  %v5332_v47 = vld [vmem:[%s8055_s30 + $0xc] ss:$20 sps:$4 sm:$0xff]   ;;  %v5337_v53 = vld [vmem:[%s8055_s30 + $0x34] ss:$20 sps:$4 sm:$0xff]  }
  0x13   :  { %v5319_v41 = vld [vmem:[%s7986_s1 + $0x90] sm:$0xff]   ;;  %v5336_v48 = vld [vmem:[%s8055_s30 + $0xac] ss:$20 sps:$4 sm:$0xff]   ;;  %v5330_v50 = vld [vmem:[%s8055_s30 + $0x8] ss:$20 sps:$4 sm:$0xff]  }
  0x14   :  { %4684 = vmatpush3.bf16.msra.mxu1 %v5283_v9  ;;  %4772 = vmatpush3.bf16.msra.mxu0 %v5283_v9  ;;  %v5334_v52 = vld [vmem:[%s8055_s30 + $0xa8] ss:$20 sps:$4 sm:$0xff]   ;;  %v5340_v54 = vld [vmem:[%s7986_s1 + $0x110] sm:$0xff]   ;;  %v5354_v61 = vld [vmem:[%s7986_s1 + $0x100] sm:$0xff]  }
  0x15   :  { %4685 = vmatprep.subr.bf16.mxu1 %v5284_v10  ;;  %4773 = vmatprep.subr.bf16.mxu0 %v5284_v10  ;;  %v5341_v55 = vld [vmem:[%s8055_s30 + $0xd4] ss:$20 sps:$4 sm:$0xff]   ;;  %v5339_v57 = vld [vmem:[%s8055_s30 + $0x30] ss:$20 sps:$4 sm:$0xff]   ;;  %v5346_v62 = vld [vmem:[%s8055_s30 + $0x58] ss:$20 sps:$4 sm:$0xff]  }
  0x16   :  { %v5347_v56 = vld [vmem:[%s7986_s1 + $0x108] sm:$0xff]   ;;  %v5343_v58 = vld [vmem:[%s8055_s30 + $0xd0] ss:$20 sps:$4 sm:$0xff]   ;;  %v5353_v2 = vld [vmem:[%s8055_s30 + $0x80] ss:$20 sps:$4 sm:$0xff]  }
  0x17   :  { %v5344_v59 = vld [vmem:[%s8055_s30 + $0x5c] ss:$20 sps:$4 sm:$0xff]   ;;  %v5350_v63 = vld [vmem:[%s8055_s30 + $0xf8] ss:$20 sps:$4 sm:$0xff]   ;;  %v5357_v3 = vld [vmem:[%s8055_s30 + $0x120] ss:$20 sps:$4 sm:$0xff]  }
  0x18   :  { %4686 = vmatpush3.bf16.msra.mxu1 %v5285_v12  ;;  %4774 = vmatpush3.bf16.msra.mxu0 %v5285_v12  ;;  %v5348_v60 = vld [vmem:[%s8055_s30 + $0xfc] ss:$20 sps:$4 sm:$0xff]   ;;  %v5351_v0 = vld [vmem:[%s8055_s30 + $0x84] ss:$20 sps:$4 sm:$0xff]   ;;  %v5360_v6 = vld [vmem:[%s8055_s30 + $0x60] ss:$20 sps:$4 sm:$0xff]  }
  0x19   :  { %4687 = vmatprep.subr.bf16.mxu1 %v5286_v14  ;;  %4775 = vmatprep.subr.bf16.mxu0 %v5286_v14  ;;  %v5355_v1 = vld [vmem:[%s8055_s30 + $0x124] ss:$20 sps:$4 sm:$0xff]   ;;  %v5361_v7 = vld [vmem:[%s8055_s30 + $0x88] ss:$20 sps:$4 sm:$0xff]   ;;  %v5364_v10 = vld [vmem:[%s8055_s30 + $0x100] ss:$20 sps:$4 sm:$0xff]  }
  0x1a   :  { %v5358_v4 = vld [vmem:[%s8055_s30 + $0x10] ss:$20 sps:$4 sm:$0xff]   ;;  %v5359_v5 = vld [vmem:[%s8055_s30 + $0x38] ss:$20 sps:$4 sm:$0xff]   ;;  %v5365_v11 = vld [vmem:[%s8055_s30 + $0x128] ss:$20 sps:$4 sm:$0xff]  }
  0x1b   :  { %v5362_v8 = vld [vmem:[%s8055_s30 + $0xb0] ss:$20 sps:$4 sm:$0xff]   ;;  %v5363_v9 = vld [vmem:[%s8055_s30 + $0xd8] ss:$20 sps:$4 sm:$0xff]  }
  0x1c   :  { %4688 = vmatpush3.bf16.msra.mxu1 %v5287_v15  ;;  %4776 = vmatpush3.bf16.msra.mxu0 %v5287_v15 }
  0x1d   :  { %4689 = vmatprep.subr.bf16.mxu1 %v5288_v16  ;;  %4777 = vmatprep.subr.bf16.mxu0 %v5288_v16 }
  0x20   :  { %4690 = vmatpush3.bf16.msra.mxu1 %v5289_v17  ;;  %4778 = vmatpush3.bf16.msra.mxu0 %v5289_v17 }
  0x21   :  { %4715 = vmatprep.subr.bf16.mxu1 %v5984_v18  ;;  %4803 = vmatprep.subr.bf16.mxu0 %v5984_v18 }
  0x23   :  { %518 = vmatmul.mubr.bf16.vlgmr.msra.gmra.mxu1 %v5290_v19  ;;  %878 = vmatmul.mubr.bf16.vlgmr.msra.gmra.mxu0 %v5294_v20 }
  0x24   :  { %4716 = vmatpush3.bf16.msra.mxu1 %v5297_v21  ;;  %4804 = vmatpush3.bf16.msra.mxu0 %v5297_v21 }
  0x25   :  { %4717 = vmatprep.subr.bf16.mxu1 %v5298_v22  ;;  %4805 = vmatprep.subr.bf16.mxu0 %v5298_v22 }
  0x26   :  { %525 = vmatprep.mubr.bf16.mxu1 %v5300_v23  ;;  %885 = vmatprep.mubr.bf16.mxu0 %v5304_v24 }
  0x28   :  { %4718 = vmatpush3.bf16.msra.mxu1 %v5299_v25  ;;  %4806 = vmatpush3.bf16.msra.mxu0 %v5299_v25 }
  0x29   :  { %4719 = vmatprep.subr.bf16.mxu1 %v5303_v26  ;;  %4807 = vmatprep.subr.bf16.mxu0 %v5303_v26 }
  0x2b   :  { %526 = vmatmul.mubr.bf16.gmra.mxu1 %v5302_v27  ;;  %886 = vmatmul.mubr.bf16.gmra.mxu0 %v5307_v28 }
  0x2c   :  { %4720 = vmatpush3.bf16.msra.mxu1 %v5306_v29  ;;  %4808 = vmatpush3.bf16.msra.mxu0 %v5306_v29 }
  0x2d   :  { %4721 = vmatprep.subr.bf16.mxu1 %v5308_v30  ;;  %4809 = vmatprep.subr.bf16.mxu0 %v5308_v30 }
  0x2e   :  { %533 = vmatprep.mubr.bf16.mxu1 %v5310_v31  ;;  %893 = vmatprep.mubr.bf16.mxu0 %v5314_v32 }
  0x30   :  { %4722 = vmatpush3.bf16.msra.mxu1 %v5309_v33  ;;  %4810 = vmatpush3.bf16.msra.mxu0 %v5309_v33 }
  0x31   :  { %4723 = vmatprep.subr.bf16.mxu1 %v5313_v34  ;;  %4811 = vmatprep.subr.bf16.mxu0 %v5313_v34 }
  0x33   :  { %534 = vmatmul.mubr.bf16.gmra.mxu1 %v5312_v35  ;;  %894 = vmatmul.mubr.bf16.gmra.mxu0 %v5317_v36 }
  0x34   :  { %4724 = vmatpush3.bf16.msra.mxu1 %v5316_v37  ;;  %4812 = vmatpush3.bf16.msra.mxu0 %v5316_v37 }
  0x35   :  { %4725 = vmatprep.subr.bf16.mxu1 %v5318_v38  ;;  %4813 = vmatprep.subr.bf16.mxu0 %v5318_v38 }
  0x36   :  { %541 = vmatprep.mubr.bf16.mxu1 %v5320_v39  ;;  %901 = vmatprep.mubr.bf16.mxu0 %v5324_v40 }
  0x38   :  { %4726 = vmatpush3.bf16.msra.mxu1 %v5319_v41  ;;  %4814 = vmatpush3.bf16.msra.mxu0 %v5319_v41 }
  0x39   :  { %4727 = vmatprep.subr.bf16.mxu1 %v5323_v42  ;;  %4815 = vmatprep.subr.bf16.mxu0 %v5323_v42 }
  0x3b   :  { %542 = vmatmul.mubr.bf16.gmra.mxu1 %v5322_v43  ;;  %902 = vmatmul.mubr.bf16.gmra.mxu0 %v5327_v45 }
  0x3c   :  { %4728 = vmatpush3.bf16.msra.mxu1 %v5326_v44  ;;  %4816 = vmatpush3.bf16.msra.mxu0 %v5326_v44 }
  0x3d   :  { %4729 = vmatprep.subr.bf16.mxu1 %v5328_v46  ;;  %4817 = vmatprep.subr.bf16.mxu0 %v5328_v46 }
  0x3e   :  { %582 = vmatprep.mubr.bf16.mxu1 %v5332_v47  ;;  %942 = vmatprep.mubr.bf16.mxu0 %v5336_v48 }
  0x40   :  { %4730 = vmatpush3.bf16.msra.mxu1 %v5329_v49  ;;  %4818 = vmatpush3.bf16.msra.mxu0 %v5329_v49 }
  0x41   :  { %5087 = vmatprep.subr.bf16.mxu1 %v5333_v51 }
  0x43   :  { %583 = vmatmul.mubr.bf16.vlgmr.msra.gmra.mxu1 %v5330_v50  ;;  %943 = vmatmul.mubr.bf16.vlgmr.msra.gmra.mxu0 %v5334_v52 }
  0x44   :  { %5088 = vmatpush3.bf16.msra.mxu1 %v5333_v51  ;;  %590 = vmatprep.mubr.bf16.mxu1 %v5337_v53 }
  0x45   :  { %5089 = vmatprep.subr.bf16.mxu1 %v5340_v54  ;;  %950 = vmatprep.mubr.bf16.mxu0 %v5341_v55 }
  0x48   :  { %5090 = vmatpush3.bf16.msra.mxu1 %v5340_v54 }
  0x49   :  { %5091 = vmatprep.subr.bf16.mxu1 %v5347_v56 }
  0x4b   :  { %591 = vmatmul.mubr.bf16.gmra.mxu1 %v5339_v57  ;;  %951 = vmatmul.mubr.bf16.gmra.mxu0 %v5343_v58 }
  0x4c   :  { %598 = vmatprep.mubr.bf16.mxu1 %v5344_v59  ;;  %958 = vmatprep.mubr.bf16.mxu0 %v5348_v60 }
  0x4d   :  { %5092 = vmatpush3.bf16.msra.mxu1 %v5347_v56 }
  0x4e   :  { %5093 = vmatprep.subr.bf16.mxu1 %v5354_v61 }
  0x51   :  { %5094 = vmatpush3.bf16.msra.mxu1 %v5354_v61 }
  0x52   :  { %5103 = vmatprep.subr.bf16.mxu1 %v5333_v51 }
  0x53   :  { %599 = vmatmul.mubr.bf16.gmra.mxu1 %v5346_v62  ;;  %959 = vmatmul.mubr.bf16.gmra.mxu0 %v5350_v63 }
  0x54   :  { %606 = vmatprep.mubr.bf16.mxu1 %v5351_v0  ;;  %966 = vmatprep.mubr.bf16.mxu0 %v5355_v1 }
  0x5b   :  { %607 = vmatmul.mubr.bf16.gmra.mxu1 %v5353_v2  ;;  %967 = vmatmul.mubr.bf16.gmra.mxu0 %v5357_v3 }
  0x5c   :  { %5095 = vmatprep.mubr.msk.bf16.mxu1 %vm472_vm0, %v5358_v4 }
  0x63   :  { %5096 = vmatmul.mubr.msk.bf16.vlgmr.msra.gmra.mxu1 %vm472_vm0, %v5359_v5 }
  0x64   :  { %5104 = vmatpush3.bf16.msra.mxu1 %v5333_v51  ;;  %5099 = vmatprep.mubr.msk.bf16.mxu1 %vm472_vm0, %v5360_v6 }
  0x65   :  { %5105 = vmatprep.subr.bf16.mxu1 %v5340_v54 }
  0x68   :  { %5106 = vmatpush3.bf16.msra.mxu1 %v5340_v54 }
  0x69   :  { %5107 = vmatprep.subr.bf16.mxu1 %v5347_v56 }
  0x6b   :  { %5100 = vmatmul.mubr.msk.bf16.gmra.mxu1 %vm472_vm0, %v5361_v7 }
  0x6c   :  { %5108 = vmatpush3.bf16.msra.mxu1 %v5347_v56  ;;  %5111 = vmatprep.mubr.msk.bf16.mxu1 %vm472_vm0, %v5362_v8 }
  0x6d   :  { %5109 = vmatprep.subr.bf16.mxu1 %v5354_v61 }
  0x70   :  { %5110 = vmatpush3.bf16.msra.mxu1 %v5354_v61 }
  0x73   :  { %5112 = vmatmul.mubr.msk.bf16.vlgmr.msra.gmra.mxu1 %vm472_vm0, %v5363_v9 }
  0x74   :  { %5115 = vmatprep.mubr.msk.bf16.mxu1 %vm472_vm0, %v5364_v10 }
  0x7b   :  { %5116 = vmatmul.mubr.msk.bf16.gmra.mxu1 %vm472_vm0, %v5365_v11 }
  0x7c   :  { %23 = vsyncpa [#allocation7], 0  ;;  %v5366_v12 = vld [vmem:[%s7988_s3 + $0x38] sm:$0xff]   ;;  %v5367_v13 = vld [vmem:[%s7988_s3 + $0x30] sm:$0xff]   ;;  %vm2368_vm1 = vcmask 1043456   ;;  %vm2355_vm2 = vcmask 64512  }
  0x7d   :  { %5143 = vmatprep.subr.bf16.mxu1 %v5366_v12  ;;  %v5368_v14 = vld [vmem:[%s7988_s3 + $0x28] sm:$0xff]   ;;  %v5369_v15 = vld [vmem:[%s7988_s3 + $0x20] sm:$0xff]   ;;  %v5370_v16 = vld [vmem:[%s7988_s3 + $0x78] sm:$0xff]  }
  0x7e   :  { %5144 = vmatpush3.bf16.msra.mxu1 %v5366_v12  ;;  %v5371_v17 = vld [vmem:[%s7988_s3 + $0x18] sm:$0xff]   ;;  %5119 = vmatprep.subr.bf16.mxu0 %v5370_v16  ;;  %v5372_v19 = vld [vmem:[%s7988_s3 + $0x70] sm:$0xff]   ;;  %v5374_v21 = vld [vmem:[%s7988_s3 + $0x68] sm:$0xff]  }
  0x7f   :  { %5145 = vmatprep.subr.bf16.mxu1 %v5367_v13  ;;  %5120 = vmatpush3.bf16.msra.mxu0 %v5370_v16  ;;  %v5373_v20 = vld [vmem:[%s7988_s3 + $0x10] sm:$0xff]   ;;  %v5375_v22 = vld [vmem:[%s7988_s3 + $0x8] sm:$0xff]   ;;  %v5376_v23 = vld [vmem:[%s7988_s3 + $0x60] sm:$0xff]  }
  0x80   :  { %5121 = vmatprep.subr.bf16.mxu0 %v5372_v19  ;;  %v5377_v24 = vld [vmem:[%s7988_s3] sm:$0xff]   ;;  %v5378_v25 = vld [vmem:[%s7988_s3 + $0x58] sm:$0xff]   ;;  %v5379_v26 = vld [vmem:[%s7988_s3 + $0x50] sm:$0xff]  }
  0x81   :  { %v5380_v27 = vld [vmem:[%s7988_s3 + $0x48] sm:$0xff]   ;;  %v5381_v28 = vld [vmem:[%s7988_s3 + $0x40] sm:$0xff]  }
  0x82   :  { %5146 = vmatpush3.bf16.msra.mxu1 %v5367_v13 }
  0x83   :  { %5147 = vmatprep.subr.bf16.mxu1 %v5368_v14  ;;  %5122 = vmatpush3.bf16.msra.mxu0 %v5372_v19 }
  0x84   :  { %5123 = vmatprep.subr.bf16.mxu0 %v5374_v21 }
  0x86   :  { %5148 = vmatpush3.bf16.msra.mxu1 %v5368_v14 }
  0x87   :  { %5149 = vmatprep.subr.bf16.mxu1 %v5369_v15  ;;  %5124 = vmatpush3.bf16.msra.mxu0 %v5374_v21 }
  0x88   :  { %5125 = vmatprep.subr.bf16.mxu0 %v5376_v23 }
  0x8a   :  { %5150 = vmatpush3.bf16.msra.mxu1 %v5369_v15 }
  0x8b   :  { %5151 = vmatprep.subr.bf16.mxu1 %v5371_v17  ;;  %5126 = vmatpush3.bf16.msra.mxu0 %v5376_v23 }
  0x8c   :  { %5127 = vmatprep.subr.bf16.mxu0 %v5378_v25 }
  0x8e   :  { %5152 = vmatpush3.bf16.msra.mxu1 %v5371_v17 }
  0x8f   :  { %5153 = vmatprep.subr.bf16.mxu1 %v5373_v20  ;;  %5128 = vmatpush3.bf16.msra.mxu0 %v5378_v25  ;;  %v6281_v25 = vld [vmem:[%s7987_s2] ss:$0 sm:$0xff] }
  0x90   :  { %5129 = vmatprep.subr.bf16.mxu0 %v5379_v26 }
  0x92   :  { %5154 = vmatpush3.bf16.msra.mxu1 %v5373_v20 }
  0x93   :  { %5155 = vmatprep.subr.bf16.mxu1 %v5375_v22  ;;  %5130 = vmatpush3.bf16.msra.mxu0 %v5379_v26 }
  0x94   :  { %5131 = vmatprep.subr.bf16.mxu0 %v5380_v27 }
  0x96   :  { %5156 = vmatpush3.bf16.msra.mxu1 %v5375_v22 }
  0x97   :  { %5157 = vmatprep.subr.bf16.mxu1 %v5377_v24  ;;  %5132 = vmatpush3.bf16.msra.mxu0 %v5380_v27 }
  0x98   :  { %5133 = vmatprep.subr.bf16.mxu0 %v5381_v28 }
  0x9a   :  { %5158 = vmatpush3.bf16.msra.mxu1 %v5377_v24 }
  0x9b   :  { %4915 = vmatprep.subr.bf16.mxu1 %v5984_v18  ;;  %5134 = vmatpush3.bf16.msra.mxu0 %v5381_v28  ;;  %v6219_v18 = vld [vmem:[%s7986_s1 + $0x78] sm:$0xff]  }
  0x9c   :  { %8056 = vst [vmem:[#allocation10_spill] sm:$0xff] %v6219_v18  ;;  %4875 = vmatprep.subr.bf16.mxu0 %v6219_v18 }
  0xe3   :  { %v4691_v29 = vpop.f32.mrf.mxu1  ;;  %v6222_v30 = vpop.f32.mrf.mxu0 }
  0xe5   :  { %v4692_v31 = vpop.f32.mrf.mxu1  ;;  %v6224_v32 = vpop.f32.mrf.mxu0 }
  0xe6   :  { %v4693_v23 = vadd.f32 %v4692_v31, %v4691_v29 }
  0xe7   :  { %v4694_v33 = vpop.f32.mrf.mxu1  ;;  %v6226_v34 = vpop.f32.mrf.mxu0 }
  0xe9   :  { %v4695_v35 = vpop.f32.mrf.mxu1  ;;  %v6228_v36 = vpop.f32.mrf.mxu0 }
  0xea   :  { %v4696_v28 = vadd.f32 %v4695_v35, %v4694_v33 }
  0xeb   :  { %v4697_v37 = vpop.f32.mrf.mxu1  ;;  %v6230_v38 = vpop.f32.mrf.mxu0 }
  0xed   :  { %v4698_v39 = vpop.f32.mrf.mxu1  ;;  %v6232_v40 = vpop.f32.mrf.mxu0 }
  0xee   :  { %v4699_v26 = vadd.f32 %v4698_v39, %v4697_v37 }
  0xef   :  { %v4700_v41 = vpop.f32.mrf.mxu1  ;;  %v6234_v42 = vpop.f32.mrf.mxu0 }
  0xf0   :  { %v528_v31 = vadd.f32 %v4699_v26, %v6281_v25 }
  0xf1   :  { %v4701_v43 = vpop.f32.mrf.mxu1  ;;  %v6236_v44 = vpop.f32.mrf.mxu0 }
  0xf2   :  { %v4702_v24 = vadd.f32 %v4701_v43, %v4700_v41  ;;  %v523_v43 = vadd.f32 %v4696_v28, %v6281_v25 }
  0xf3   :  { %v4703_v45 = vpop.f32.mrf.mxu1  ;;  %v6238_v46 = vpop.f32.mrf.mxu0 }
  0xf5   :  { %v4704_v47 = vpop.f32.mrf.mxu1  ;;  %v6240_v48 = vpop.f32.mrf.mxu0 }
  0xf6   :  { %v4705_v39 = vadd.f32 %v4704_v47, %v4703_v45 }
  0xf7   :  { %v6242_v49 = vpop.f32.mrf.mxu1  ;;  %v6244_v50 = vpop.f32.mrf.mxu0 }
  0xf8   :  { %8057 = vst [vmem:[#allocation11_spill] sm:$0xff] %v6244_v50 }
  0xf9   :  { %v6246_v51 = vpop.f32.mrf.mxu1  ;;  %v6248_v52 = vpop.f32.mrf.mxu0 }
  0xfa   :  { %8058 = vst [vmem:[#allocation12_spill] sm:$0xff] %v6248_v52 }
  0xfb   :  { %v4709_v53 = vpop.f32.mrf.mxu1  ;;  %v6250_v54 = vpop.f32.mrf.mxu0 }
  0xfc   :  { %8059 = vst [vmem:[#allocation13_spill] sm:$0xff] %v6250_v54  ;;  %v520_v54 = vadd.f32 %v4693_v23, %v6281_v25 }
  0xfd   :  { %v4710_v55 = vpop.f32.mrf.mxu1  ;;  %v6252_v56 = vpop.f32.mrf.mxu0 }
  0xfe   :  { %8060 = vst [vmem:[#allocation14_spill] sm:$0xff] %v6252_v56 }
  0xff   :  { %v4712_v57 = vpop.f32.mrf.mxu1  ;;  %v6254_v58 = vpop.f32.mrf.mxu0 }
 0x101   :  { %v4713_v59 = vpop.f32.mrf.mxu1  ;;  %v6256_v60 = vpop.f32.mrf.mxu0 }
 0x102   :  { %8061 = vst [vmem:[#allocation15_spill] sm:$0xff] %v6256_v60 }
 0x103   :  { %v4731_v61 = vpop.f32.mrf.mxu1  ;;  %v6258_v62 = vpop.f32.mrf.mxu0 }
 0x105   :  { %v4732_v63 = vpop.f32.mrf.mxu1  ;;  %v6260_v0 = vpop.f32.mrf.mxu0 }
 0x106   :  { %v4733_v18 = vadd.f32 %v4732_v63, %v4731_v61  ;;  %v4714_v63 = vadd.f32 %v4713_v59, %v4712_v57 }
 0x107   :  { %v4734_v1 = vpop.f32.mrf.mxu1  ;;  %v6262_v2 = vpop.f32.mrf.mxu0 }
 0x108   :  { %v585_v60 = vadd.f32 %v4733_v18, %v520_v54  ;;  %v536_v18 = vadd.f32 %v4705_v39, %v6281_v25  ;;  %v547_v54 = vadd.f32 %v4714_v63, %v6281_v25 }
 0x109   :  { %v4735_v3 = vpop.f32.mrf.mxu1  ;;  %v6264_v4 = vpop.f32.mrf.mxu0 }
 0x10a   :  { %v4736_v29 = vadd.f32 %v4735_v3, %v4734_v1  ;;  %v4708_v1 = vadd.f32 %v6246_v51, %v6242_v49  ;;  %v4790_v49 = vadd.f32 %v6236_v44, %v6234_v42 }
 0x10b   :  { %v4737_v5 = vpop.f32.mrf.mxu1  ;;  %v6266_v6 = vpop.f32.mrf.mxu0 }
 0x10d   :  { %v4738_v7 = vpop.f32.mrf.mxu1  ;;  %v6268_v8 = vpop.f32.mrf.mxu0 }
 0x10e   :  { %v4739_v50 = vadd.f32 %v4738_v7, %v4737_v5  ;;  %v4827_v39 = vadd.f32 %v6268_v8, %v6266_v6  ;;  %v4793_v6 = vadd.f32 %v6240_v48, %v6238_v46  ;;  %v8064_v8 = vld [vmem:[#allocation15_spill] sm:$0xff]  ;;  %v8065_v46 = vld [vmem:[#allocation13_spill] sm:$0xff]  ;;  %v8066_v48 = vld [vmem:[#allocation14_spill] sm:$0xff] }
 0x10f   :  { %v4740_v9 = vpop.f32.mrf.mxu1  ;;  %v6270_v11 = vpop.f32.mrf.mxu0 }
 0x110   :  { %v593_v35 = vadd.f32 %v4739_v50, %v528_v31 }
 0x111   :  { %v4741_v10 = vpop.f32.mrf.mxu1  ;;  %v6272_v14 = vpop.f32.mrf.mxu0 }
 0x112   :  { %v4742_v52 = vadd.f32 %v4741_v10, %v4740_v9  ;;  %v588_v9 = vadd.f32 %v4736_v29, %v523_v43  ;;  %v4711_v10 = vadd.f32 %v4710_v55, %v4709_v53  ;;  %v4781_v55 = vadd.f32 %v6224_v32, %v6222_v30 }
 0x113   :  { %v4743_v12 = vpop.f32.mrf.mxu1  ;;  %v6274_v17 = vpop.f32.mrf.mxu0  ;;  %v4784_v32 = vadd.f32 %v6228_v36, %v6226_v34  ;;  %v891_v43 = vadd.f32 %v4790_v49, %v6281_v25  ;;  %v6318_v34 = vld [vmem:[%s7986_s1 + $0xb8] sm:$0xff]  }
 0x114   :  { %8062 = vst [vmem:[#allocation16_spill] sm:$0xff] %v6274_v17  ;;  %v544_v51 = vadd.f32 %v4711_v10, %v6281_v25  ;;  %v880_v29 = vadd.f32 %v4781_v55, %v6281_v25  ;;  %v896_v55 = vadd.f32 %v4793_v6, %v6281_v25 }
 0x115   :  { %v4744_v13 = vpop.f32.mrf.mxu1  ;;  %v6276_v21 = vpop.f32.mrf.mxu0 }
 0x116   :  { %8063 = vst [vmem:[#allocation17_spill] sm:$0xff] %v6276_v21  ;;  %v531_v21 = vadd.f32 %v4702_v24, %v6281_v25  ;;  %v4745_v3 = vadd.f32 %v4744_v13, %v4743_v12  ;;  %v539_v13 = vadd.f32 %v4708_v1, %v6281_v25 }
 0x117   :  { %v4746_v15 = vpop.f32.mrf.mxu1  ;;  %v6283_v56 = vpop.f32.mrf.mxu0 }
 0x118   :  { %v596_v37 = vadd.f32 %v4742_v52, %v531_v21 }
 0x119   :  { %v4747_v16 = vpop.f32.mrf.mxu1  ;;  %v6289_v33 = vpop.f32.mrf.mxu0 }
 0x11a   :  { %v4748_v57 = vadd.f32 %v4747_v16, %v4746_v15  ;;  %v4787_v15 = vadd.f32 %v6232_v40, %v6230_v38  ;;  %v4821_v38 = vadd.f32 %v6260_v0, %v6258_v62  ;;  %v4830_v40 = vadd.f32 %v6272_v14, %v6270_v11  ;;  %v6327_v62 = vld [vmem:[%s7986_s1 + $0xf0] sm:$0xff]  }
 0x11b   :  { %v4749_v19 = vpop.f32.mrf.mxu1  ;;  %v6294_v45 = vpop.f32.mrf.mxu0  ;;  %v883_v0 = vadd.f32 %v4784_v32, %v6281_v25  ;;  %v4824_v11 = vadd.f32 %v6264_v4, %v6262_v2  ;;  %v5387_v2 = vld [vmem:[%s8055_s30 + $0x14c] ss:$20 sps:$4 sm:$0xff]   ;;  %v4799_v4 = vadd.f32 %v8066_v48, %v8065_v46 }
 0x11c   :  { %v888_v36 = vadd.f32 %v4787_v15, %v6281_v25  ;;  %v6363_v15 = vld [vmem:[%s7986_s1 + $0xa8] sm:$0xff]  }
 0x11d   :  { %v4750_v20 = vpop.f32.mrf.mxu1  ;;  %v6305_v16 = vpop.f32.mrf.mxu0  ;;  %v6429_v48 = vld [vmem:[%s7986_s1 + $0x68] sm:$0xff]  }
 0x11e   :  { %v4751_v47 = vadd.f32 %v4750_v20, %v4749_v19 }
 0x11f   :  { %v4752_v22 = vpop.f32.mrf.mxu1 }
 0x121   :  { %v4753_v27 = vpop.f32.mrf.mxu1 }
 0x122   :  { %v4754_v26 = vadd.f32 %v4753_v27, %v4752_v22  ;;  %v609_v22 = vadd.f32 %v4751_v47, %v544_v51  ;;  %v604_v27 = vadd.f32 %v4748_v57, %v539_v13  ;;  %v6351_v47 = vld [vmem:[%s7986_s1 + $0xe8] sm:$0xff]  }
 0x123   :  { %v5097_v17 = vpop.f32.mrf.mxu1  ;;  %v8070_v13 = vld [vmem:[#allocation17_spill] sm:$0xff] }
 0x124   :  { %v658_v23 = vadd.f32 %v5097_v17, %v593_v35  ;;  %v601_v17 = vadd.f32 %v4745_v3, %v536_v18  ;;  %v612_v19 = vadd.f32 %v4754_v26, %v547_v54  ;;  %v4840_v35 = vpop.f32.mrf.mxu0  ;;  %v6340_v3 = vld [vmem:[%s7986_s1 + $0xb0] sm:$0xff]  }
 0x125   :  { %v649_v41 = vpop.f32.mrf.mxu1 }
 0x126   :  { %v650_v5 = vadd.f32 %v649_v41, %v585_v60  ;;  %v682_v60 = vmax.f32 %v658_v23, 0.0  ;;  %v945_v23 = vadd.f32 %v4821_v38, %v880_v29 }
 0x127   :  { %v5098_v61 = vpop.f32.mrf.mxu1 }
 0x128   :  { %v661_v7 = vadd.f32 %v5098_v61, %v596_v37  ;;  %v680_v59 = vmax.f32 %v650_v5, 0.0 }
 0x129   :  { %v652_v24 = vpop.f32.mrf.mxu1 }
 0x12a   :  { %v653_v28 = vadd.f32 %v652_v24, %v588_v9  ;;  %v683_v50 = vmax.f32 %v661_v7, 0.0  ;;  %v4802_v7 = vadd.f32 %v8064_v8, %v6254_v58  ;;  %v956_v24 = vadd.f32 %v4830_v40, %v891_v43  ;;  %v4841_v58 = vpop.f32.mrf.mxu0  ;;  %v6381_v40 = vld [vmem:[%s7986_s1 + $0xa0] sm:$0xff]   ;;  %v6405_v8 = vld [vmem:[%s7986_s1 + $0x70] sm:$0xff]  }
 0x12b   :  { %v5101_v52 = vpop.f32.mrf.mxu1 }
 0x12c   :  { %v681_v53 = vmax.f32 %v653_v28, 0.0  ;;  %v689_v21 = vpack.c.bf16 %v683_v50, %v682_v60  ;;  %v674_v31 = vadd.f32 %v5101_v52, %v609_v22  ;;  %v953_v28 = vadd.f32 %v4827_v39, %v888_v36  ;;  %v8067_v50 = vld [vmem:[#allocation11_spill] sm:$0xff]  ;;  %v8068_v52 = vld [vmem:[#allocation12_spill] sm:$0xff] }
 0x12d   :  { %v665_v12 = vpop.f32.mrf.mxu1  ;;  %v4796_v54 = vadd.f32 %v8068_v52, %v8067_v50  ;;  %v907_v49 = vadd.f32 %v4802_v7, %v6281_v25  ;;  %v4839_v22 = vadd.f32 %v6305_v16, %v6294_v45  ;;  %v6411_v7 = vld [vmem:[%s7986_s1 + $0xd0] sm:$0xff]   ;;  %v6462_v50 = vld [vmem:[%s7986_s1 + $0xc0] sm:$0xff]   ;;  %v5385_v52 = vld [vmem:[%s8055_s30 + $0x148] ss:$20 sps:$4 sm:$0xff]  }
 0x12e   :  { %v688_v20 = vpack.c.bf16 %v681_v53, %v680_v59  ;;  %v666_v42 = vadd.f32 %v665_v12, %v601_v17  ;;  %v686_v9 = vmax.f32 %v674_v31, 0.0  ;;  %v948_v53 = vadd.f32 %v4824_v11, %v883_v0  ;;  %v8069_v12 = vld [vmem:[#allocation16_spill] sm:$0xff] }
 0x12f   :  { %v5102_v30 = vpop.f32.mrf.mxu1  ;;  %v4833_v17 = vadd.f32 %v8070_v13, %v8069_v12  ;;  %v5397_v12 = vld [vmem:[%s8055_s30 + $0x19c] ss:$20 sps:$4 sm:$0xff]   ;;  %v5753_v13 = vld [vmem:[%s7986_s1 + $0x48] sm:$0xff]  }
 0x130   :  { %v677_v44 = vadd.f32 %v5102_v30, %v612_v19  ;;  %5159 = vmatprep.mubr.bf16.mxu1 %v688_v20  ;;  %v684_v14 = vmax.f32 %v666_v42, 0.0  ;;  %v4842_v19 = vadd.f32 %v4841_v58, %v4840_v35  ;;  %v6372_v42 = vld [vmem:[%s7986_s1 + $0xe0] sm:$0xff]  }
 0x131   :  { %v668_v41 = vpop.f32.mrf.mxu1  ;;  %5160 = vmatmul.mubr.bf16.vlgmr.msra.gmra.mxu1 %v689_v21  ;;  %v904_v21 = vadd.f32 %v4799_v4, %v6281_v25  ;;  %v961_v38 = vadd.f32 %v4833_v17, %v896_v55  ;;  %v6435_v4 = vld [vmem:[%s7986_s1 + $0xc8] sm:$0xff]   ;;  %v5384_v58 = vld [vmem:[%s8055_s30 + $0x144] ss:$20 sps:$4 sm:$0xff]  }
 0x132   :  { %v669_v37 = vadd.f32 %v668_v41, %v604_v27  ;;  %4916 = vmatpush3.bf16.msra.mxu1 %v6318_v34  ;;  %v687_v61 = vmax.f32 %v677_v44, 0.0  ;;  %v899_v44 = vadd.f32 %v4796_v54, %v6281_v25  ;;  %v4836_v27 = vadd.f32 %v6289_v33, %v6283_v56  ;;  %v6387_v56 = vld [vmem:[%s7986_s1 + $0xd8] sm:$0xff]   ;;  %v6471_v54 = vld [vmem:[%s7986_s1 + $0x20] sm:$0xff]   ;;  %v5754_v17 = vld [vmem:[%s7986_s1 + $0x8] sm:$0xff]  }
 0x133   :  { %v5113_v63 = vpop.f32.mrf.mxu1  ;;  %4917 = vmatprep.subr.bf16.mxu1 %v6327_v62  ;;  %v972_v45 = vadd.f32 %v4842_v19, %v907_v49  ;;  %v969_v36 = vadd.f32 %v4839_v22, %v904_v21  ;;  %v6492_v55 = vld [vmem:[%s7986_s1 + $0x18] sm:$0xff]   ;;  %v6498_v49 = vld [vmem:[%s7986_s1 + $0x50] sm:$0xff]   ;;  %v5755_v19 = vld [vmem:[%s7986_s1 + $0x40] sm:$0xff]  }
 0x134   :  { %v685_v5 = vmax.f32 %v669_v37, 0.0  ;;  %v691_v26 = vpack.c.bf16 %v687_v61, %v686_v9  ;;  %v1018_v51 = vadd.f32 %v5113_v63, %v953_v28  ;;  %v964_v61 = vadd.f32 %v4836_v27, %v899_v44  ;;  %v6450_v28 = vld [vmem:[%s7986_s1 + $0x88] sm:$0xff]   ;;  %v5756_v22 = vld [vmem:[%s7986_s1] sm:$0xff]   ;;  %v6547_v27 = vld [vmem:[%s7986_s1 + $0x110] sm:$0xff]  }
 0x135   :  { %v1009_v10 = vpop.f32.mrf.mxu1  ;;  %v5399_v21 = vld [vmem:[%s8055_s30 + $0x198] ss:$20 sps:$4 sm:$0xff]  }
 0x136   :  { %v690_v1 = vpack.c.bf16 %v685_v5, %v684_v14  ;;  %4918 = vmatpush3.bf16.msra.mxu1 %v6340_v3  ;;  %v1010_v57 = vadd.f32 %v1009_v10, %v945_v23  ;;  %v1042_v41 = vmax.f32 %v1018_v51, 0.0  ;;  %v6393_v14 = vld [vmem:[%s7986_s1 + $0x38] sm:$0xff]   ;;  %v5393_v51 = vld [vmem:[%s8055_s30 + $0x170] ss:$20 sps:$4 sm:$0xff]  }
 0x137   :  { %v5114_v18 = vpop.f32.mrf.mxu1  ;;  %4919 = vmatprep.subr.bf16.mxu1 %v6351_v47  ;;  %v6399_v5 = vld [vmem:[%s7986_s1 + $0x98] sm:$0xff]  }
 0x138   :  { %v1021_v59 = vadd.f32 %v5114_v18, %v956_v24  ;;  %5163 = vmatprep.mubr.bf16.mxu1 %v690_v1  ;;  %v1040_v29 = vmax.f32 %v1010_v57, 0.0  ;;  %v6417_v24 = vld [vmem:[%s7986_s1 + $0x30] sm:$0xff]   ;;  %v6456_v18 = vld [vmem:[%s7986_s1 + $0x60] sm:$0xff]  }
 0x139   :  { %v1012_v60 = vpop.f32.mrf.mxu1  ;;  %5164 = vmatmul.mubr.bf16.gmra.mxu1 %v691_v26  ;;  %v6444_v26 = vld [vmem:[%s7986_s1 + $0x28] sm:$0xff]   ;;  %v6477_v57 = vld [vmem:[%s7986_s1 + $0x80] sm:$0xff]  }
 0x13a   :  { %v1013_v20 = vadd.f32 %v1012_v60, %v948_v53  ;;  %4920 = vmatpush3.bf16.msra.mxu1 %v6363_v15  ;;  %1528 = vmatprep.mubr.bf16.mxu1 %v5387_v2  ;;  %v1043_v30 = vmax.f32 %v1021_v59, 0.0  ;;  %v6423_v2 = vld [vmem:[%s7986_s1 + $0x90] sm:$0xff]   ;;  %v6486_v53 = vld [vmem:[%s7986_s1 + $0x58] sm:$0xff]  }
 0x13b   :  { %v5117_v32 = vpop.f32.mrf.mxu1  ;;  %4921 = vmatprep.subr.bf16.mxu1 %v6372_v42  ;;  %v5391_v59 = vld [vmem:[%s8055_s30 + $0x174] ss:$20 sps:$4 sm:$0xff]   ;;  %v5403_v44 = vld [vmem:[%s8055_s30 + $0x1c4] ss:$20 sps:$4 sm:$0xff]  }
 0x13c   :  { %v1041_v31 = vmax.f32 %v1013_v20, 0.0  ;;  %v1049_v37 = vpack.c.bf16 %v1043_v30, %v1042_v41  ;;  %v1034_v63 = vadd.f32 %v5117_v32, %v969_v36  ;;  %v6507_v60 = vld [vmem:[%s7986_s1 + $0x10] sm:$0xff]   ;;  %v5388_v30 = vld [vmem:[%s8055_s30 + $0x16c] ss:$20 sps:$4 sm:$0xff]   ;;  %v6537_v32 = vld [vmem:[%s7986_s1 + $0x118] sm:$0xff]  }
 0x13d   :  { %v1025_v43 = vpop.f32.mrf.mxu1  ;;  %v5382_v20 = vld [vmem:[%s8055_s30 + $0x140] ss:$20 sps:$4 sm:$0xff]   ;;  %v5402_v36 = vld [vmem:[%s8055_s30 + $0x1b8] ss:$20 sps:$4 sm:$0xff]  }
 0x13e   :  { %v1048_v16 = vpack.c.bf16 %v1041_v31, %v1040_v29  ;;  %4922 = vmatpush3.bf16.msra.mxu1 %v6381_v40  ;;  %v1026_v33 = vadd.f32 %v1025_v43, %v961_v38  ;;  %v1046_v23 = vmax.f32 %v1034_v63, 0.0  ;;  %v5390_v29 = vld [vmem:[%s8055_s30 + $0x168] ss:$20 sps:$4 sm:$0xff]   ;;  %v5405_v31 = vld [vmem:[%s8055_s30 + $0x1c0] ss:$20 sps:$4 sm:$0xff]  }
 0x13f   :  { %v5118_v39 = vpop.f32.mrf.mxu1  ;;  %4923 = vmatprep.subr.bf16.mxu1 %v6387_v56  ;;  %v5394_v41 = vld [vmem:[%s8055_s30 + $0x194] ss:$20 sps:$4 sm:$0xff]   ;;  %v6570_v38 = vld [vmem:[%s7986_s1 + $0x100] sm:$0xff]   ;;  %v5410_v63 = vld [vmem:[%s7988_s3 + $0xb8] sm:$0xff]  }
 0x140   :  { %v1037_v35 = vadd.f32 %v5118_v39, %v972_v45  ;;  %5135 = vmatprep.mubr.bf16.mxu0 %v1048_v16  ;;  %v1044_v9 = vmax.f32 %v1026_v33, 0.0  ;;  %v6563_v43 = vld [vmem:[%s7986_s1 + $0x108] sm:$0xff]   ;;  %v5396_v45 = vld [vmem:[%s8055_s30 + $0x190] ss:$20 sps:$4 sm:$0xff]  }
 0x141   :  { %v1028_v0 = vpop.f32.mrf.mxu1  ;;  %5136 = vmatmul.mubr.bf16.vlgmr.msra.gmra.mxu0 %v1049_v37  ;;  %v5400_v16 = vld [vmem:[%s8055_s30 + $0x1bc] ss:$20 sps:$4 sm:$0xff]   ;;  %v5407_v33 = vld [vmem:[%s8055_s30 + $0x178] ss:$20 sps:$4 sm:$0xff]  }
 0x142   :  { %v1029_v11 = vadd.f32 %v1028_v0, %v964_v61  ;;  %4876 = vmatpush3.bf16.msra.mxu0 %v6393_v14  ;;  %4924 = vmatpush3.bf16.msra.mxu1 %v6399_v5  ;;  %v1047_v6 = vmax.f32 %v1037_v35, 0.0  ;;  %v8071_v37 = vld [vmem:[#allocation10_spill] sm:$0xff]  ;;  %v5409_v61 = vld [vmem:[%s8055_s30 + $0x1c8] ss:$20 sps:$4 sm:$0xff]  }
 0x143   :  { %4877 = vmatprep.subr.bf16.mxu0 %v6405_v8  ;;  %4925 = vmatprep.subr.bf16.mxu1 %v6411_v7  ;;  %v5406_v39 = vld [vmem:[%s8055_s30 + $0x150] ss:$20 sps:$4 sm:$0xff]   ;;  %v5408_v35 = vld [vmem:[%s8055_s30 + $0x1a0] ss:$20 sps:$4 sm:$0xff]  }
 0x144   :  { %v1045_v10 = vmax.f32 %v1029_v11, 0.0  ;;  %v1051_v46 = vpack.c.bf16 %v1047_v6, %v1046_v23  ;;  %v5411_v0 = vld [vmem:[%s7988_s3 + $0xb0] sm:$0xff]   ;;  %v5412_v11 = vld [vmem:[%s7988_s3 + $0xa8] sm:$0xff]   ;;  %v5414_v6 = vld [vmem:[%s7988_s3 + $0x98] sm:$0xff]  }
 0x145   :  { %v5761_v23 = vld [vmem:[%s7986_s1 + $0xf8] sm:$0xff]  }
 0x146   :  { %4878 = vmatpush3.bf16.msra.mxu0 %v6417_v24  ;;  %v1050_v1 = vpack.c.bf16 %v1045_v10, %v1044_v9  ;;  %4926 = vmatpush3.bf16.msra.mxu1 %v6423_v2  ;;  %v5416_v9 = vld [vmem:[%s7988_s3 + $0x88] sm:$0xff]   ;;  %v5417_v10 = vld [vmem:[%s7988_s3 + $0x80] sm:$0xff]  }
 0x147   :  { %4879 = vmatprep.subr.bf16.mxu0 %v6429_v48  ;;  %4927 = vmatprep.subr.bf16.mxu1 %v6435_v4 }
 0x148   :  { %5139 = vmatprep.mubr.bf16.mxu0 %v1050_v1  ;;  %v5418_v1 = vld [vmem:[%s8055_s30 + $0x1e0] ss:$20 sps:$4 sm:$0xff]  }
 0x149   :  { %5140 = vmatmul.mubr.bf16.gmra.mxu0 %v1051_v46  ;;  %v5421_v46 = vld [vmem:[%s8055_s30 + $0x20c] ss:$20 sps:$4 sm:$0xff]  }
 0x14a   :  { %4880 = vmatpush3.bf16.msra.mxu0 %v6444_v26  ;;  %4928 = vmatpush3.bf16.msra.mxu1 %v6450_v28 }
 0x14b   :  { %4881 = vmatprep.subr.bf16.mxu0 %v6456_v18  ;;  %4929 = vmatprep.subr.bf16.mxu1 %v6462_v50 }
 0x14c   :  { %1463 = vmatprep.mubr.bf16.mxu0 %v5384_v58  ;;  %v5424_v58 = vld [vmem:[%s8055_s30 + $0x234] ss:$20 sps:$4 sm:$0xff]  }
 0x14e   :  { %4882 = vmatpush3.bf16.msra.mxu0 %v6471_v54  ;;  %4930 = vmatpush3.bf16.msra.mxu1 %v6477_v57 }
 0x14f   :  { %4883 = vmatprep.subr.bf16.mxu0 %v6486_v53  ;;  %5183 = vmatprep.subr.bf16.mxu1 %v5410_v63 }
 0x151   :  { %1529 = vmatmul.mubr.bf16.vlgmr.msra.gmra.mxu1 %v5385_v52  ;;  %v5429_v52 = vld [vmem:[%s8055_s30 + $0x258] ss:$20 sps:$4 sm:$0xff]  }
 0x152   :  { %4884 = vmatpush3.bf16.msra.mxu0 %v6492_v55  ;;  %1536 = vmatprep.mubr.bf16.mxu1 %v5391_v59  ;;  %v5434_v59 = vld [vmem:[%s8055_s30 + $0x218] ss:$20 sps:$4 sm:$0xff]  }
 0x153   :  { %4885 = vmatprep.subr.bf16.mxu0 %v6498_v49  ;;  %5184 = vmatpush3.bf16.msra.mxu1 %v5410_v63 }
 0x154   :  { %5185 = vmatprep.subr.bf16.mxu1 %v5411_v0 }
 0x156   :  { %4886 = vmatpush3.bf16.msra.mxu0 %v6507_v60 }
 0x157   :  { %4887 = vmatprep.subr.bf16.mxu0 %v5753_v13  ;;  %5186 = vmatpush3.bf16.msra.mxu1 %v5411_v0 }
 0x158   :  { %5187 = vmatprep.subr.bf16.mxu1 %v5412_v11 }
 0x159   :  { %1537 = vmatmul.mubr.bf16.gmra.mxu1 %v5393_v51 }
 0x15a   :  { %4888 = vmatpush3.bf16.msra.mxu0 %v5754_v17  ;;  %1544 = vmatprep.mubr.bf16.mxu1 %v5397_v12  ;;  %v5442_v12 = vld [vmem:[%s8055_s30 + $0x268] ss:$20 sps:$4 sm:$0xff]  }
 0x15b   :  { %4889 = vmatprep.subr.bf16.mxu0 %v5755_v19  ;;  %5188 = vmatpush3.bf16.msra.mxu1 %v5412_v11 }
 0x15e   :  { %4890 = vmatpush3.bf16.msra.mxu0 %v5756_v22 }
 0x15f   :  { %5167 = vmatprep.subr.bf16.mxu0 %v6537_v32 }
 0x161   :  { %1464 = vmatmul.mubr.bf16.vlgmr.msra.gmra.mxu0 %v5382_v20  ;;  %1545 = vmatmul.mubr.bf16.gmra.mxu1 %v5399_v21 }
 0x162   :  { %5168 = vmatpush3.bf16.msra.mxu0 %v6537_v32  ;;  %1471 = vmatprep.mubr.bf16.mxu0 %v5388_v30 }
 0x163   :  { %5169 = vmatprep.subr.bf16.mxu0 %v6547_v27  ;;  %1552 = vmatprep.mubr.bf16.mxu1 %v5403_v44 }
 0x166   :  { %5170 = vmatpush3.bf16.msra.mxu0 %v6547_v27 }
 0x167   :  { %5171 = vmatprep.subr.bf16.mxu0 %v6563_v43 }
 0x169   :  { %1472 = vmatmul.mubr.bf16.gmra.mxu0 %v5390_v29  ;;  %1553 = vmatmul.mubr.bf16.gmra.mxu1 %v5405_v31 }
 0x16a   :  { %1479 = vmatprep.mubr.bf16.mxu0 %v5394_v41  ;;  %5172 = vmatpush3.bf16.msra.mxu0 %v6563_v43 }
 0x16b   :  { %5173 = vmatprep.subr.bf16.mxu0 %v6570_v38 }
 0x16e   :  { %5174 = vmatpush3.bf16.msra.mxu0 %v6570_v38 }
 0x16f   :  { %4975 = vmatprep.subr.bf16.mxu0 %v8071_v37 }
 0x171   :  { %1480 = vmatmul.mubr.bf16.gmra.mxu0 %v5396_v45 }
 0x172   :  { %1487 = vmatprep.mubr.bf16.mxu0 %v5400_v16 }
 0x179   :  { %1488 = vmatmul.mubr.bf16.gmra.mxu0 %v5402_v36 }
 0x17a   :  { %5175 = vmatprep.mubr.msk.bf16.mxu0 %vm472_vm0, %v5406_v39 }
 0x181   :  { %5176 = vmatmul.mubr.msk.bf16.vlgmr.msra.gmra.mxu0 %vm472_vm0, %v5407_v33 }
 0x182   :  { %5179 = vmatprep.mubr.msk.bf16.mxu0 %vm472_vm0, %v5408_v35  ;;  %4976 = vmatpush3.bf16.msra.mxu0 %v6393_v14  ;;  %v5413_v14 = vld [vmem:[%s7988_s3 + $0xa0] sm:$0xff]  }
 0x183   :  { %4977 = vmatprep.subr.bf16.mxu0 %v6405_v8  ;;  %5189 = vmatprep.subr.bf16.mxu1 %v5413_v14  ;;  %v5415_v8 = vld [vmem:[%s7988_s3 + $0x90] sm:$0xff]  }
 0x184   :  { %5190 = vmatpush3.bf16.msra.mxu1 %v5413_v14 }
 0x185   :  { %5191 = vmatprep.subr.bf16.mxu1 %v5414_v6 }
 0x186   :  { %4978 = vmatpush3.bf16.msra.mxu0 %v6417_v24  ;;  %v5420_v24 = vld [vmem:[%s8055_s30 + $0x1e4] ss:$20 sps:$4 sm:$0xff]  }
 0x187   :  { %4979 = vmatprep.subr.bf16.mxu0 %v6429_v48  ;;  %v5423_v48 = vld [vmem:[%s8055_s30 + $0x208] ss:$20 sps:$4 sm:$0xff]  }
 0x188   :  { %5192 = vmatpush3.bf16.msra.mxu1 %v5414_v6 }
 0x189   :  { %5180 = vmatmul.mubr.msk.bf16.gmra.mxu0 %vm472_vm0, %v5409_v61  ;;  %5193 = vmatprep.subr.bf16.mxu1 %v5415_v8 }
 0x18a   :  { %4980 = vmatpush3.bf16.msra.mxu0 %v6444_v26  ;;  %1944 = vmatprep.mubr.bf16.mxu0 %v5420_v24  ;;  %v5426_v26 = vld [vmem:[%s8055_s30 + $0x230] ss:$20 sps:$4 sm:$0xff]  }
 0x18b   :  { %4981 = vmatprep.subr.bf16.mxu0 %v6456_v18  ;;  %v5427_v18 = vld [vmem:[%s8055_s30 + $0x25c] ss:$20 sps:$4 sm:$0xff]  }
 0x18c   :  { %5194 = vmatpush3.bf16.msra.mxu1 %v5415_v8 }
 0x18d   :  { %5195 = vmatprep.subr.bf16.mxu1 %v5416_v9 }
 0x18e   :  { %4982 = vmatpush3.bf16.msra.mxu0 %v6471_v54  ;;  %v5433_v54 = vld [vmem:[%s8055_s30 + $0x1f0] ss:$20 sps:$4 sm:$0xff]  }
 0x18f   :  { %4983 = vmatprep.subr.bf16.mxu0 %v6486_v53 }
 0x190   :  { %5196 = vmatpush3.bf16.msra.mxu1 %v5416_v9 }
 0x191   :  { %5197 = vmatprep.subr.bf16.mxu1 %v5417_v10 }
 0x192   :  { %4984 = vmatpush3.bf16.msra.mxu0 %v6492_v55 }
 0x193   :  { %4985 = vmatprep.subr.bf16.mxu0 %v6498_v49 }
 0x194   :  { %5198 = vmatpush3.bf16.msra.mxu1 %v5417_v10 }
 0x195   :  { %5015 = vmatprep.subr.bf16.mxu1 %v5761_v23 }
 0x196   :  { %4986 = vmatpush3.bf16.msra.mxu0 %v6507_v60  ;;  %v5441_v60 = vld [vmem:[%s8055_s30 + $0x240] ss:$20 sps:$4 sm:$0xff]  }
 0x197   :  { %4987 = vmatprep.subr.bf16.mxu0 %v5753_v13 }
 0x19a   :  { %4988 = vmatpush3.bf16.msra.mxu0 %v5754_v17 }
 0x19b   :  { %4989 = vmatprep.subr.bf16.mxu0 %v5755_v19 }
 0x19e   :  { %4990 = vmatpush3.bf16.msra.mxu0 %v5756_v22 }
 0x19f   :  { %5207 = vmatprep.subr.bf16.mxu0 %v6537_v32 }
 0x1a1   :  { %1945 = vmatmul.mubr.bf16.vlgmr.msra.gmra.mxu0 %v5418_v1 }
 0x1a2   :  { %5208 = vmatpush3.bf16.msra.mxu0 %v6537_v32  ;;  %1952 = vmatprep.mubr.bf16.mxu0 %v5421_v46 }
 0x1a3   :  { %5209 = vmatprep.subr.bf16.mxu0 %v6547_v27 }
 0x1a6   :  { %5210 = vmatpush3.bf16.msra.mxu0 %v6547_v27 }
 0x1a7   :  { %5211 = vmatprep.subr.bf16.mxu0 %v6563_v43 }
 0x1a9   :  { %1953 = vmatmul.mubr.bf16.gmra.mxu0 %v5423_v48 }
 0x1aa   :  { %5212 = vmatpush3.bf16.msra.mxu0 %v6563_v43  ;;  %1960 = vmatprep.mubr.bf16.mxu0 %v5424_v58 }
 0x1ab   :  { %5213 = vmatprep.subr.bf16.mxu0 %v6570_v38 }
 0x1ae   :  { %5214 = vmatpush3.bf16.msra.mxu0 %v6570_v38 }
 0x1b1   :  { %1961 = vmatmul.mubr.bf16.gmra.mxu0 %v5426_v26 }
 0x1b2   :  { %1968 = vmatprep.mubr.bf16.mxu0 %v5427_v18 }
 0x1b9   :  { %1969 = vmatmul.mubr.bf16.gmra.mxu0 %v5429_v52 }
 0x1ba   :  { %5215 = vmatprep.mubr.msk.bf16.mxu0 %vm472_vm0, %v5433_v54 }
 0x1c1   :  { %5216 = vmatmul.mubr.msk.bf16.vlgmr.msra.gmra.mxu0 %vm472_vm0, %v5434_v59 }
 0x1c2   :  { %5219 = vmatprep.mubr.msk.bf16.mxu0 %vm472_vm0, %v5441_v60 }
 0x1c9   :  { %5220 = vmatmul.mubr.msk.bf16.gmra.mxu0 %vm472_vm0, %v5442_v12 }
 0x1f1   :  { %v5161_v53 = vpop.f32.mrf.mxu1 }
 0x1f3   :  { %v1263_v55 = vpop.f32.mrf.mxu1 }
 0x1f5   :  { %v5162_v49 = vpop.f32.mrf.mxu1 }
 0x1f7   :  { %v6678_v51 = vpop.f32.mrf.mxu1 }
 0x1f8   :  { %8072 = vst [vmem:[#allocation15_spill] sm:$0xff] %v6678_v51 }
 0x1f9   :  { %v5165_v19 = vpop.f32.mrf.mxu1 }
 0x1fb   :  { %v1279_v32 = vpop.f32.mrf.mxu1 }
 0x1fd   :  { %v5166_v31 = vpop.f32.mrf.mxu1 }
 0x1ff   :  { %v6702_v16 = vpop.f32.mrf.mxu1 }
 0x200   :  { %8076 = vst [vmem:[#allocation12_spill] sm:$0xff] %v6702_v16 }
 0x201   :  { %v5137_v13 = vpop.f32.mrf.mxu0 }
 0x202   :  { %v6687_v17 = vadd.f32 %v5161_v53, %v5137_v13 }
 0x203   :  { %v1150_v20 = vpop.f32.mrf.mxu0 }
 0x204   :  { %v6690_v21 = vadd.f32 %v1263_v55, %v1150_v20 }
 0x205   :  { %v5138_v22 = vpop.f32.mrf.mxu0 }
 0x206   :  { %v6692_v30 = vadd.f32 %v5162_v49, %v5138_v22 }
 0x207   :  { %v6694_v44 = vpop.f32.mrf.mxu0 }
 0x208   :  { %8073 = vst [vmem:[#allocation13_spill] sm:$0xff] %v6694_v44 }
 0x209   :  { %v5141_v27 = vpop.f32.mrf.mxu0 }
 0x20a   :  { %v6696_v29 = vadd.f32 %v5165_v19, %v5141_v27 }
 0x20b   :  { %v1166_v41 = vpop.f32.mrf.mxu0 }
 0x20c   :  { %v6698_v43 = vadd.f32 %v1279_v32, %v1166_v41 }
 0x20d   :  { %v5142_v38 = vpop.f32.mrf.mxu0 }
 0x20e   :  { %8074 = vst [vmem:[#allocation14_spill] sm:$0xff] %v6698_v43  ;;  %v6700_v45 = vadd.f32 %v5166_v31, %v5142_v38 }
 0x20f   :  { %v6704_v63 = vpop.f32.mrf.mxu0 }
 0x210   :  { %8075 = vst [vmem:[#allocation11_spill] sm:$0xff] %v6700_v45  ;;  %8077 = vst [vmem:[#allocation16_spill] sm:$0xff] %v6704_v63 }
 0x211   :  { %v4931_v37 = vpop.f32.mrf.mxu1 }
 0x213   :  { %v4932_v36 = vpop.f32.mrf.mxu1 }
 0x214   :  { %v4933_v31 = vadd.f32 %v4932_v36, %v4931_v37 }
 0x215   :  { %v4934_v39 = vpop.f32.mrf.mxu1 }
 0x217   :  { %v4935_v33 = vpop.f32.mrf.mxu1 }
 0x219   :  { %v4937_v35 = vpop.f32.mrf.mxu1 }
 0x21b   :  { %v4938_v61 = vpop.f32.mrf.mxu1 }
 0x21c   :  { %v4939_v63 = vadd.f32 %v4938_v61, %v4937_v35 }
 0x21d   :  { %v4940_v11 = vpop.f32.mrf.mxu1 }
 0x21f   :  { %v4941_v8 = vpop.f32.mrf.mxu1 }
 0x220   :  { %v4942_v38 = vadd.f32 %v4941_v8, %v4940_v11 }
 0x221   :  { %v4891_v0 = vpop.f32.mrf.mxu0  ;;  %v4943_v23 = vpop.f32.mrf.mxu1 }
 0x223   :  { %v4892_v14 = vpop.f32.mrf.mxu0  ;;  %v4944_v46 = vpop.f32.mrf.mxu1 }
 0x224   :  { %v4893_v60 = vadd.f32 %v4892_v14, %v4891_v0  ;;  %v4936_v0 = vadd.f32 %v4935_v33, %v4934_v39 }
 0x225   :  { %v4894_v6 = vpop.f32.mrf.mxu0  ;;  %v4946_v26 = vpop.f32.mrf.mxu1 }
 0x226   :  { %v1466_v27 = vadd.f32 %v4893_v60, %v6281_v25 }
 0x227   :  { %v4895_v9 = vpop.f32.mrf.mxu0  ;;  %v4947_v54 = vpop.f32.mrf.mxu1 }
 0x228   :  { %v4896_v22 = vadd.f32 %v4895_v9, %v4894_v6 }
 0x229   :  { %v4897_v10 = vpop.f32.mrf.mxu0  ;;  %v4949_v55 = vpop.f32.mrf.mxu1 }
 0x22a   :  { %v1469_v45 = vadd.f32 %v4896_v22, %v6281_v25 }
 0x22b   :  { %v4898_v24 = vpop.f32.mrf.mxu0  ;;  %v4950_v20 = vpop.f32.mrf.mxu1 }
 0x22c   :  { %v4899_v13 = vadd.f32 %v4898_v24, %v4897_v10  ;;  %v1534_v8 = vadd.f32 %v4936_v0, %v1469_v45 }
 0x22d   :  { %v4900_v1 = vpop.f32.mrf.mxu0  ;;  %v4952_v51 = vpop.f32.mrf.mxu1 }
 0x22e   :  { %v1474_v16 = vadd.f32 %v4899_v13, %v6281_v25  ;;  %v4945_v13 = vadd.f32 %v4944_v46, %v4943_v23 }
 0x22f   :  { %v4901_v48 = vpop.f32.mrf.mxu0 }
 0x230   :  { %v4902_v12 = vadd.f32 %v4901_v48, %v4900_v1  ;;  %v1531_v1 = vadd.f32 %v4933_v31, %v1466_v27  ;;  %v4953_v48 = vpop.f32.mrf.mxu1  ;;  %v1539_v60 = vadd.f32 %v4939_v63, %v1474_v16  ;;  %v4948_v63 = vadd.f32 %v4947_v54, %v4946_v26 }
 0x231   :  { %v4903_v58 = vpop.f32.mrf.mxu0  ;;  %v4954_v33 = vadd.f32 %v4953_v48, %v4952_v51 }
 0x232   :  { %v1477_v41 = vadd.f32 %v4902_v12, %v6281_v25 }
 0x233   :  { %v4904_v18 = vpop.f32.mrf.mxu0 }
 0x234   :  { %v4905_v10 = vadd.f32 %v4904_v18, %v4903_v58  ;;  %v1542_v6 = vadd.f32 %v4942_v38, %v1477_v41 }
 0x235   :  { %v4906_v52 = vpop.f32.mrf.mxu0 }
 0x236   :  { %v1482_v43 = vadd.f32 %v4905_v10, %v6281_v25  ;;  %v5432_v10 = vld [vmem:[%s8055_s30 + $0x1ec] ss:$20 sps:$4 sm:$0xff]  }
 0x237   :  { %v4907_v59 = vpop.f32.mrf.mxu0 }
 0x238   :  { %v4908_v36 = vadd.f32 %v4907_v59, %v4906_v52  ;;  %v1547_v46 = vadd.f32 %v4945_v13, %v1482_v43  ;;  %v5459_v13 = vld [vmem:[%s7991_s6 + $0xe0] ss:$16 sps:$4 sm:$0xff]  }
 0x239   :  { %v4909_v53 = vpop.f32.mrf.mxu0 }
 0x23a   :  { %v1485_v16 = vadd.f32 %v4908_v36, %v6281_v25 }
 0x23b   :  { %v4910_v49 = vpop.f32.mrf.mxu0 }
 0x23c   :  { %v4911_v9 = vadd.f32 %v4910_v49, %v4909_v53  ;;  %v1550_v38 = vadd.f32 %v4948_v63, %v1485_v16  ;;  %v5479_v16 = vld [vmem:[%s7991_s6 + $0x80] ss:$16 sps:$4 sm:$0xff]  }
 0x23d   :  { %v4912_v19 = vpop.f32.mrf.mxu0 }
 0x23e   :  { %v1490_v18 = vadd.f32 %v4911_v9, %v6281_v25 }
 0x23f   :  { %v4913_v32 = vpop.f32.mrf.mxu0 }
 0x240   :  { %v4914_v24 = vadd.f32 %v4913_v32, %v4912_v19  ;;  %v4951_v19 = vadd.f32 %v4950_v20, %v4949_v55 }
 0x241   :  { %v5177_v44 = vpop.f32.mrf.mxu0 }
 0x242   :  { %v1604_v35 = vadd.f32 %v5177_v44, %v1539_v60  ;;  %v1493_v39 = vadd.f32 %v4914_v24, %v6281_v25  ;;  %v1555_v27 = vadd.f32 %v4951_v19, %v1490_v18  ;;  %v8004_v60 = vmov 0   ;;  %v5474_v18 = vld [vmem:[%s7991_s6 + $0xa4] ss:$16 sps:$4 sm:$0xff]  }
 0x243   :  { %v1595_v14 = vpop.f32.mrf.mxu0  ;;  %2413 = vmatprep.mubr.bf16.mxu0 %v8004_v60  ;;  %v5481_v19 = vld [vmem:[%s7991_s6 + $0x84] ss:$16 sps:$4 sm:$0xff]  }
 0x244   :  { %v1596_v12 = vadd.f32 %v1595_v14, %v1531_v1  ;;  %v1628_v45 = vmax.f32 %v1604_v35, 0.0  ;;  %v1558_v22 = vadd.f32 %v4954_v33, %v1493_v39  ;;  %v2323_v1 = vld [vmem:[%s7992_s7] sm:$0xff]  ;;  %v6806_v39 = vld [vmem:[%s7990_s5 + $0x8] sm:$0xff]  }
 0x245   :  { %v5178_v37 = vpop.f32.mrf.mxu0  ;;  %v4565_v9 = vcombine.high %v2323_v1, %v2323_v1  ;;  %v4564_v48 = vcombine.low %v2323_v1, %v2323_v1  ;;  %v5461_v35 = vld [vmem:[%s7991_s6 + $0xe4] ss:$16 sps:$4 sm:$0xff]   ;;  %v5466_v33 = vld [vmem:[%s7991_s6 + $0xc0] ss:$16 sps:$4 sm:$0xff]  }
 0x246   :  { %v1607_v11 = vadd.f32 %v5178_v37, %v1542_v6  ;;  %v1626_v52 = vmax.f32 %v1596_v12, 0.0  ;;  %v2324_v6 = vld [vmem:[%s7992_s7 + $0x8] sm:$0xff] }
 0x247   :  { %v1598_v61 = vpop.f32.mrf.mxu0  ;;  %v4567_v37 = vcombine.high %v2324_v6, %v2324_v6  ;;  %v4566_v36 = vcombine.low %v2324_v6, %v2324_v6  ;;  %4568 = vmatprep.subr.msk.bf16.mxu0 %vm2368_vm1, %v4565_v9  ;;  %v2370_v12 = vsel %vm2368_vm1, %v4564_v48, 0 }
 0x248   :  { %v1599_v58 = vadd.f32 %v1598_v61, %v1534_v8  ;;  %v1629_v53 = vmax.f32 %v1607_v11, 0.0  ;;  %v6787_v11 = vld [vmem:[%s7990_s5] sm:$0xff]   ;;  %2396 = vmatpush1.bf16.msra.mxu0 %v2370_v12 }
 0x249   :  { %v5181_v49 = vpop.f32.mrf.mxu0  ;;  %v6789_v8 = vsel %vm2368_vm1, %v4566_v36, 0  ;;  %2687 = vmatprep.subr.bf16.mxu0 %v5461_v35  ;;  %v5468_v61 = vld [vmem:[%s7991_s6 + $0xc4] ss:$16 sps:$4 sm:$0xff]  }
 0x24a   :  { %v1627_v59 = vmax.f32 %v1599_v58, 0.0  ;;  %v1635_v32 = vpack.c.bf16 %v1629_v53, %v1628_v45  ;;  %v1620_v55 = vadd.f32 %v5181_v49, %v1555_v27  ;;  %v5472_v58 = vld [vmem:[%s7991_s6 + $0xa0] ss:$16 sps:$4 sm:$0xff]  }
 0x24b   :  { %v1611_v23 = vpop.f32.mrf.mxu0  ;;  %4569 = vmatmul.mubr.msk.bf16.vlgmr.msra.gmra.mxu0 %vm2355_vm2, %v6787_v11  ;;  %v6826_v49 = vld [vmem:[%s7990_s5 + $0x10] sm:$0xff]  }
 0x24c   :  { %v1634_v44 = vpack.c.bf16 %v1627_v59, %v1626_v52  ;;  %v1612_v51 = vadd.f32 %v1611_v23, %v1547_v46  ;;  %v1632_v43 = vmax.f32 %v1620_v55, 0.0  ;;  %2423 = vmatprep.mubr.bf16.mxu0 %v8004_v60  ;;  %2688 = vmatpush1.bf16.msra.mxu0 %v5459_v13  ;;  %v5485_v52 = vld [vmem:[%s7991_s6 + $0x60] ss:$16 sps:$4 sm:$0xff]   ;;  %v5487_v59 = vld [vmem:[%s7991_s6 + $0x64] ss:$16 sps:$4 sm:$0xff]  }
 0x24d   :  { %v5182_v31 = vpop.f32.mrf.mxu0  ;;  %2689 = vmatprep.subr.bf16.mxu0 %v5468_v61 }
 0x24e   :  { %v1623_v41 = vadd.f32 %v5182_v31, %v1558_v22  ;;  %5199 = vmatprep.mubr.bf16.mxu1 %v1634_v44  ;;  %v1630_v26 = vmax.f32 %v1612_v51, 0.0 }
 0x24f   :  { %v1614_v20 = vpop.f32.mrf.mxu0  ;;  %5200 = vmatmul.mubr.bf16.vlgmr.msra.gmra.mxu1 %v1635_v32 }
 0x250   :  { %v1615_v0 = vadd.f32 %v1614_v20, %v1550_v38  ;;  %5016 = vmatpush3.bf16.msra.mxu1 %v6318_v34  ;;  %v1633_v25 = vmax.f32 %v1623_v41, 0.0  ;;  %v5430_v34 = vld [vmem:[%s8055_s30 + $0x1e8] ss:$20 sps:$4 sm:$0xff]   ;;  %2690 = vmatpush1.bf16.msra.mxu0 %v5466_v33 }
 0x251   :  { %5017 = vmatprep.subr.bf16.mxu1 %v6327_v62  ;;  %v5435_v62 = vld [vmem:[%s8055_s30 + $0x214] ss:$20 sps:$4 sm:$0xff]   ;;  %2691 = vmatprep.subr.bf16.mxu0 %v5474_v18 }
 0x252   :  { %v1631_v54 = vmax.f32 %v1615_v0, 0.0  ;;  %v1637_v24 = vpack.c.bf16 %v1633_v25, %v1632_v43 }
 0x253   :  { %4570 = vmatmul.mubr.msk.bf16.gmra.mxu0 %vm2355_vm2, %v6806_v39 }
 0x254   :  { %v1636_v14 = vpack.c.bf16 %v1631_v54, %v1630_v26  ;;  %5018 = vmatpush3.bf16.msra.mxu1 %v6340_v3  ;;  %v5437_v3 = vld [vmem:[%s8055_s30 + $0x210] ss:$20 sps:$4 sm:$0xff]   ;;  %2433 = vmatprep.mubr.bf16.mxu0 %v8004_v60 }
 0x255   :  { %5019 = vmatprep.subr.bf16.mxu1 %v6351_v47  ;;  %v5438_v47 = vld [vmem:[%s8055_s30 + $0x23c] ss:$20 sps:$4 sm:$0xff]   ;;  %2692 = vmatpush1.bf16.msra.mxu0 %v5472_v58 }
 0x256   :  { %5203 = vmatprep.mubr.bf16.mxu1 %v1636_v14  ;;  %2693 = vmatprep.subr.bf16.mxu0 %v5481_v19 }
 0x257   :  { %5204 = vmatmul.mubr.bf16.gmra.mxu1 %v1637_v24  ;;  %v8078_v24 = vld [vmem:[#allocation14_spill] sm:$0xff] }
 0x258   :  { %5020 = vmatpush3.bf16.msra.mxu1 %v6363_v15  ;;  %2009 = vmatprep.mubr.bf16.mxu1 %v5432_v10  ;;  %v5440_v15 = vld [vmem:[%s8055_s30 + $0x238] ss:$20 sps:$4 sm:$0xff]  }
 0x259   :  { %5021 = vmatprep.subr.bf16.mxu1 %v6372_v42  ;;  %v5443_v42 = vld [vmem:[%s8055_s30 + $0x264] ss:$20 sps:$4 sm:$0xff]   ;;  %2694 = vmatpush1.bf16.msra.mxu0 %v5479_v16 }
 0x25a   :  { %2695 = vmatprep.subr.bf16.mxu0 %v5487_v59 }
 0x25b   :  { %4571 = vmatmul.mubr.msk.bf16.gmra.mxu0 %vm2355_vm2, %v6826_v49 }
 0x25c   :  { %5022 = vmatpush3.bf16.msra.mxu1 %v6381_v40  ;;  %v5445_v40 = vld [vmem:[%s8055_s30 + $0x260] ss:$20 sps:$4 sm:$0xff]   ;;  %2443 = vmatprep.mubr.bf16.mxu0 %v8004_v60 }
 0x25d   :  { %5023 = vmatprep.subr.bf16.mxu1 %v6387_v56  ;;  %v5446_v56 = vld [vmem:[%s7988_s3 + $0xf8] sm:$0xff]   ;;  %2696 = vmatpush1.bf16.msra.mxu0 %v5485_v52 }
 0x260   :  { %5024 = vmatpush3.bf16.msra.mxu1 %v6399_v5  ;;  %v5447_v5 = vld [vmem:[%s7988_s3 + $0xf0] sm:$0xff]  }
 0x261   :  { %5025 = vmatprep.subr.bf16.mxu1 %v6411_v7  ;;  %v5448_v7 = vld [vmem:[%s7988_s3 + $0xe8] sm:$0xff]   ;;  %v4991_v53 = vpop.f32.mrf.mxu0 }
 0x263   :  { %v4992_v63 = vpop.f32.mrf.mxu0 }
 0x264   :  { %5026 = vmatpush3.bf16.msra.mxu1 %v6423_v2  ;;  %v5449_v2 = vld [vmem:[%s7988_s3 + $0xe0] sm:$0xff]  }
 0x265   :  { %5027 = vmatprep.subr.bf16.mxu1 %v6435_v4  ;;  %v5450_v4 = vld [vmem:[%s7988_s3 + $0xd8] sm:$0xff]   ;;  %v4994_v45 = vpop.f32.mrf.mxu0 }
 0x267   :  { %v4995_v23 = vpop.f32.mrf.mxu0 }
 0x268   :  { %5028 = vmatpush3.bf16.msra.mxu1 %v6450_v28  ;;  %v5451_v28 = vld [vmem:[%s7988_s3 + $0xd0] sm:$0xff]  }
 0x269   :  { %5029 = vmatprep.subr.bf16.mxu1 %v6462_v50  ;;  %v5452_v50 = vld [vmem:[%s7988_s3 + $0xc8] sm:$0xff]   ;;  %v4997_v44 = vpop.f32.mrf.mxu0 }
 0x26b   :  { %v4998_v46 = vpop.f32.mrf.mxu0 }
 0x26c   :  { %5030 = vmatpush3.bf16.msra.mxu1 %v6477_v57  ;;  %v5453_v57 = vld [vmem:[%s7988_s3 + $0xc0] sm:$0xff]  }
 0x26d   :  { %5223 = vmatprep.subr.bf16.mxu1 %v5446_v56  ;;  %v5000_v22 = vpop.f32.mrf.mxu0 }
 0x26f   :  { %2010 = vmatmul.mubr.bf16.vlgmr.msra.gmra.mxu1 %v5430_v34  ;;  %v5001_v32 = vpop.f32.mrf.mxu0 }
 0x270   :  { %2017 = vmatprep.mubr.bf16.mxu1 %v5435_v62  ;;  %5224 = vmatpush3.bf16.msra.mxu1 %v5446_v56  ;;  %v4993_v56 = vadd.f32 %v4992_v63, %v4991_v53  ;;  %v5002_v18 = vadd.f32 %v5001_v32, %v5000_v22 }
 0x271   :  { %5225 = vmatprep.subr.bf16.mxu1 %v5447_v5  ;;  %v5003_v27 = vpop.f32.mrf.mxu0 }
 0x273   :  { %v5004_v51 = vpop.f32.mrf.mxu0 }
 0x274   :  { %5226 = vmatpush3.bf16.msra.mxu1 %v5447_v5 }
 0x275   :  { %5227 = vmatprep.subr.bf16.mxu1 %v5448_v7  ;;  %v5006_v0 = vpop.f32.mrf.mxu0 }
 0x277   :  { %2018 = vmatmul.mubr.bf16.gmra.mxu1 %v5437_v3  ;;  %v5007_v43 = vpop.f32.mrf.mxu0 }
 0x278   :  { %2025 = vmatprep.mubr.bf16.mxu1 %v5438_v47  ;;  %5228 = vmatpush3.bf16.msra.mxu1 %v5448_v7  ;;  %v5008_v32 = vadd.f32 %v5007_v43, %v5006_v0 }
 0x279   :  { %5229 = vmatprep.subr.bf16.mxu1 %v5449_v2  ;;  %v5009_v62 = vpop.f32.mrf.mxu0 }
 0x27b   :  { %v5010_v47 = vpop.f32.mrf.mxu0 }
 0x27c   :  { %5230 = vmatpush3.bf16.msra.mxu1 %v5449_v2  ;;  %v6869_v2 = vld [vmem:[%s7987_s2] ss:$0 sm:$0xff]  ;;  %s5840_s2 = smov [#allocation4]  }
 0x27d   :  { %5231 = vmatprep.subr.bf16.mxu1 %v5450_v4  ;;  %s4298_s1 = sshll.u32 %s5840_s2, 4  ;;  %s4299_s1 = int_to_ptr.vmem [resolvable:$true] %s4298_s1 }
 0x27e   :  { %s5795_s19 = scalar_lea.vmem %s4299_s1, 128  ;;  %p5800_p1 = scmp.lt.s32.totalorder %s4299_s1, %s4299_s1 }
 0x27f   :  { %2026 = vmatmul.mubr.bf16.gmra.mxu1 %v5440_v15  ;;  %v6860_v15 = vpop.f32.mrf.mxu0  ;;  %p5796_p0 = scmp.ne.s32.totalorder %s4299_s1, %s5795_s19  ;;  %p5801_p2 = scmp.lt.s32.totalorder %s5795_s19, %s5795_s19 }
 0x280   :  { %2033 = vmatprep.mubr.bf16.mxu1 %v5443_v42  ;;  %5232 = vmatpush3.bf16.msra.mxu1 %v5450_v4  ;;  %v1947_v4 = vadd.f32 %v6869_v2, %v4993_v56 }
 0x281   :  { %5233 = vmatprep.subr.bf16.mxu1 %v5451_v28  ;;  %p5802_p3 = por %p5801_p2, %p5800_p1 }
 0x283   :  { %p5803_p4 = pnand %p5802_p3, %p5796_p0 }
 0x284   :  { %5234 = vmatpush3.bf16.msra.mxu1 %v5451_v28  ;;  %v4996_v28 = vadd.f32 %v4995_v23, %v4994_v45 }
 0x285   :  { %5235 = vmatprep.subr.bf16.mxu1 %v5452_v50 }
 0x286   :  { %v1950_v48 = vadd.f32 %v6869_v2, %v4996_v28 }
 0x287   :  { %2034 = vmatmul.mubr.bf16.gmra.mxu1 %v5445_v40 }
 0x288   :  { %5236 = vmatpush3.bf16.msra.mxu1 %v5452_v50 }
 0x289   :  { %5237 = vmatprep.subr.bf16.mxu1 %v5453_v57 }
 0x28c   :  { %5238 = vmatpush3.bf16.msra.mxu1 %v5453_v57 }
 0x28d   :  { %4573 = vmatprep.subr.msk.bf16.mxu1 %vm2368_vm1, %v4567_v37  ;;  %v4999_v37 = vadd.f32 %v4998_v46, %v4997_v44  ;;  %v5005_v44 = vadd.f32 %v5004_v51, %v5003_v27  ;;  %v1966_v27 = vadd.f32 %v6869_v2, %v5008_v32  ;;  %v5011_v51 = vadd.f32 %v5010_v47, %v5009_v62  ;;  %v5506_v32 = vld [vmem:[%s7991_s6 + $0x4] ss:$16 sps:$4 sm:$0xff]  }
 0x28f   :  { %v1955_v58 = vadd.f32 %v6869_v2, %v4999_v37  ;;  %v1963_v22 = vadd.f32 %v6869_v2, %v5005_v44  ;;  %v1971_v37 = vadd.f32 %v6869_v2, %v5011_v51  ;;  %v5490_v44 = vld [vmem:[%s7991_s6 + $0x6c] ss:$16 sps:$4 sm:$0xff]  }
 0x290   :  { %v8082_v51 = vld [vmem:[#allocation13_spill] sm:$0xff] }
 0x30f   :  { %v5201_v31 = vpop.f32.mrf.mxu1 }
 0x310   :  { %v6841_v41 = vadd.f32 %v5201_v31, %v6687_v17  ;;  %v1958_v31 = vadd.f32 %v6869_v2, %v5002_v18 }
 0x311   :  { %v1736_v38 = vpop.f32.mrf.mxu1 }
 0x312   :  { %v6844_v55 = vadd.f32 %v1736_v38, %v6690_v21  ;;  %v8079_v21 = vld [vmem:[#allocation11_spill] sm:$0xff] }
 0x313   :  { %v5202_v20 = vpop.f32.mrf.mxu1 }
 0x314   :  { %v6847_v25 = vadd.f32 %v5202_v20, %v6692_v30  ;;  %v6862_v30 = vpop.f32.mrf.mxu0 }
 0x315   :  { %v6849_v26 = vpop.f32.mrf.mxu1 }
 0x316   :  { %v5217_v42 = vpop.f32.mrf.mxu0 }
 0x317   :  { %v5205_v54 = vpop.f32.mrf.mxu1 }
 0x318   :  { %v6852_v14 = vadd.f32 %v5205_v54, %v6696_v29  ;;  %v2076_v5 = vpop.f32.mrf.mxu0 }
 0x319   :  { %v1752_v10 = vpop.f32.mrf.mxu1 }
 0x31a   :  { %v6855_v17 = vadd.f32 %v1752_v10, %v8078_v24  ;;  %v5218_v1 = vpop.f32.mrf.mxu0 }
 0x31b   :  { %v5206_v34 = vpop.f32.mrf.mxu1 }
 0x31c   :  { %v6858_v3 = vadd.f32 %v5206_v34, %v8079_v21  ;;  %v2079_v13 = vpop.f32.mrf.mxu0 }
 0x31d   :  { %v6864_v40 = vpop.f32.mrf.mxu1 }
 0x31e   :  { %v5221_v63 = vpop.f32.mrf.mxu0 }
 0x320   :  { %v2092_v54 = vpop.f32.mrf.mxu0 }
 0x32f   :  { %v5031_v29 = vpop.f32.mrf.mxu1 }
 0x331   :  { %v5032_v7 = vpop.f32.mrf.mxu1 }
 0x332   :  { %v5033_v50 = vadd.f32 %v5032_v7, %v5031_v29 }
 0x333   :  { %v5034_v57 = vpop.f32.mrf.mxu1 }
 0x334   :  { %v2012_v6 = vadd.f32 %v5033_v50, %v1947_v4 }
 0x335   :  { %v5035_v9 = vpop.f32.mrf.mxu1 }
 0x336   :  { %v5036_v36 = vadd.f32 %v5035_v9, %v5034_v57  ;;  %v2077_v35 = vadd.f32 %v2076_v5, %v2012_v6  ;;  %v5222_v5 = vpop.f32.mrf.mxu0 }
 0x337   :  { %v5037_v12 = vpop.f32.mrf.mxu1 }
 0x338   :  { %v2015_v61 = vadd.f32 %v5036_v36, %v1950_v48  ;;  %v2107_v52 = vmax.f32 %v2077_v35, 0.0  ;;  %v2095_v48 = vpop.f32.mrf.mxu0  ;;  %v5014_v36 = vadd.f32 %v6862_v30, %v6860_v15  ;;  %v5462_v15 = vld [vmem:[%s7991_s6 + $0xe8] ss:$16 sps:$4 sm:$0xff]   ;;  %v5471_v30 = vld [vmem:[%s7991_s6 + $0xcc] ss:$16 sps:$4 sm:$0xff]  }
 0x339   :  { %v5038_v33 = vpop.f32.mrf.mxu1 }
 0x33a   :  { %v5039_v19 = vadd.f32 %v5038_v33, %v5037_v12  ;;  %v2080_v53 = vadd.f32 %v2079_v13, %v2015_v61 }
 0x33b   :  { %v5040_v16 = vpop.f32.mrf.mxu1 }
 0x33c   :  { %v2020_v59 = vadd.f32 %v5039_v19, %v1955_v58  ;;  %v2108_v45 = vmax.f32 %v2080_v53, 0.0  ;;  %v1974_v58 = vadd.f32 %v6869_v2, %v5014_v36  ;;  %v5469_v2 = vld [vmem:[%s7991_s6 + $0xc8] ss:$16 sps:$4 sm:$0xff]  }
 0x33d   :  { %v5041_v23 = vpop.f32.mrf.mxu1 }
 0x33e   :  { %v2115_v46 = vpack.c.bf16 %v2108_v45, %v2107_v52  ;;  %v5042_v38 = vadd.f32 %v5041_v23, %v5040_v16  ;;  %v2085_v10 = vadd.f32 %v5217_v42, %v2020_v59  ;;  %v5464_v42 = vld [vmem:[%s7991_s6 + $0xec] ss:$16 sps:$4 sm:$0xff]   ;;  %v5475_v23 = vld [vmem:[%s7991_s6 + $0xa8] ss:$16 sps:$4 sm:$0xff]  }
 0x33f   :  { %v5043_v20 = vpop.f32.mrf.mxu1 }
 0x340   :  { %v2023_v24 = vadd.f32 %v5042_v38, %v1958_v31  ;;  %5239 = vmatprep.mubr.bf16.mxu1 %v2115_v46  ;;  %v2109_v7 = vmax.f32 %v2085_v10, 0.0  ;;  %v5482_v31 = vld [vmem:[%s7991_s6 + $0x88] ss:$16 sps:$4 sm:$0xff]   ;;  %v5494_v38 = vld [vmem:[%s7991_s6 + $0x44] ss:$16 sps:$4 sm:$0xff]  }
 0x341   :  { %v5044_v34 = vpop.f32.mrf.mxu1  ;;  %v5488_v46 = vld [vmem:[%s7991_s6 + $0x68] ss:$16 sps:$4 sm:$0xff]   ;;  %2697 = vmatprep.subr.bf16.mxu0 %v5494_v38  ;;  %v5500_v10 = vld [vmem:[%s7991_s6 + $0x24] ss:$16 sps:$4 sm:$0xff]  }
 0x342   :  { %v2088_v21 = vadd.f32 %v5218_v1, %v2023_v24  ;;  %v5045_v56 = vadd.f32 %v5044_v34, %v5043_v20  ;;  %v5497_v20 = vld [vmem:[%s7991_s6 + $0x4c] ss:$16 sps:$4 sm:$0xff]   ;;  %v5498_v34 = vld [vmem:[%s7991_s6 + $0x20] ss:$16 sps:$4 sm:$0xff]  }
 0x343   :  { %v5046_v29 = vpop.f32.mrf.mxu1  ;;  %v5503_v24 = vld [vmem:[%s7991_s6 + $0x2c] ss:$16 sps:$4 sm:$0xff]  }
 0x344   :  { %v2110_v4 = vmax.f32 %v2088_v21, 0.0  ;;  %v2028_v28 = vadd.f32 %v5045_v56, %v1963_v22  ;;  %v5501_v22 = vld [vmem:[%s7991_s6 + $0x28] ss:$16 sps:$4 sm:$0xff]   ;;  %v5509_v21 = vld [vmem:[%s7991_s6 + $0xc] ss:$16 sps:$4 sm:$0xff]  }
 0x345   :  { %v5047_v50 = vpop.f32.mrf.mxu1  ;;  %v5504_v56 = vld [vmem:[%s7991_s6] ss:$16 sps:$4 sm:$0xff]  }
 0x346   :  { %v2116_v57 = vpack.c.bf16 %v2110_v4, %v2109_v7  ;;  %v5048_v6 = vadd.f32 %v5047_v50, %v5046_v29  ;;  %v2093_v0 = vadd.f32 %v2092_v54, %v2028_v28  ;;  %v5495_v54 = vld [vmem:[%s7991_s6 + $0x48] ss:$16 sps:$4 sm:$0xff]   ;;  %v6973_v7 = vld [vmem:[%s7994_s9 + $0xec] ss:$16 sps:$4 sm:$0xff]   ;;  %v6981_v50 = vld [vmem:[%s7989_s4] ss:$0 sm:$0xff] }
 0x347   :  { %v5049_v9 = vpop.f32.mrf.mxu1  ;;  %v5507_v29 = vld [vmem:[%s7991_s6 + $0x8] ss:$16 sps:$4 sm:$0xff]   ;;  %8081 = vst [vmem:[#allocation10_spill] sm:$0xff] %v6973_v7 }
 0x348   :  { %5240 = vmatmul.mubr.bf16.vlgmr.msra.gmra.mxu1 %v2116_v57  ;;  %v2031_v43 = vadd.f32 %v5048_v6, %v1966_v27  ;;  %v2111_v13 = vmax.f32 %v2093_v0, 0.0  ;;  %v8083_v57 = vld [vmem:[#allocation15_spill] sm:$0xff] }
 0x349   :  { %v5050_v1 = vpop.f32.mrf.mxu1  ;;  %2469 = vmatpush1.bf16.msra.mxu1 %v6789_v8  ;;  %v1267_v6 = vadd.f32 %v8083_v57, %v8082_v51  ;;  %v7127_v51 = vld [vmem:[%s7994_s9 + $0x40] ss:$16 sps:$4 sm:$0xff]   ;;  %v7132_v57 = vld [vmem:[%s7994_s9 + $0x48] ss:$16 sps:$4 sm:$0xff]  }
 0x34a   :  { %v5051_v62 = vadd.f32 %v5050_v1, %v5049_v9  ;;  %v2096_v47 = vadd.f32 %v2095_v48, %v2031_v43  ;;  %2760 = vmatprep.subr.bf16.mxu1 %v5464_v42  ;;  %8097 = vst [vmem:[#allocation23_spill] sm:$0xff] %v7127_v51  ;;  %8098 = vst [vmem:[#allocation24_spill] sm:$0xff] %v7132_v57 }
 0x34b   :  { %v5052_v12 = vpop.f32.mrf.mxu1  ;;  %v1768_v48 = vadd.f32 %v6849_v26, %v1267_v6  ;;  %v6995_v26 = vld [vmem:[%s7994_s9 + $0xe0] ss:$16 sps:$4 sm:$0xff]   ;;  %v7139_v6 = vld [vmem:[%s7994_s9 + $0x24] ss:$16 sps:$4 sm:$0xff]  }
 0x34c   :  { %v2036_v35 = vadd.f32 %v5051_v62, %v1971_v37  ;;  %v2112_v61 = vmax.f32 %v2096_v47, 0.0  ;;  %8099 = vst [vmem:[#allocation25_spill] sm:$0xff] %v7139_v6 }
 0x34d   :  { %v5053_v33 = vpop.f32.mrf.mxu1 }
 0x34e   :  { %v2117_v18 = vpack.c.bf16 %v2112_v61, %v2111_v13  ;;  %v5054_v19 = vadd.f32 %v5053_v33, %v5052_v12  ;;  %v2101_v53 = vadd.f32 %v5221_v63, %v2036_v35  ;;  %v5477_v63 = vld [vmem:[%s7991_s6 + $0xac] ss:$16 sps:$4 sm:$0xff]   ;;  %v7005_v33 = vld [vmem:[%s7994_s9 + $0xc4] ss:$16 sps:$4 sm:$0xff]  }
 0x350   :  { %v2039_v16 = vadd.f32 %v5054_v19, %v1974_v58  ;;  %5243 = vmatprep.mubr.bf16.mxu1 %v2117_v18  ;;  %v2113_v52 = vmax.f32 %v2101_v53, 0.0  ;;  %v7010_v58 = vld [vmem:[%s7994_s9 + $0xcc] ss:$16 sps:$4 sm:$0xff]   ;;  %v7017_v19 = vld [vmem:[%s7994_s9 + $0xc0] ss:$16 sps:$4 sm:$0xff]  }
 0x351   :  { %v7022_v53 = vld [vmem:[%s7994_s9 + $0xc8] ss:$16 sps:$4 sm:$0xff]  }
 0x352   :  { %v2104_v8 = vadd.f32 %v5222_v5, %v2039_v16  ;;  %v6968_v5 = vld [vmem:[%s7994_s9 + $0xe4] ss:$16 sps:$4 sm:$0xff]  }
 0x353   :  { %8080 = vst [vmem:[#allocation17_spill] sm:$0xff] %v6968_v5 }
 0x354   :  { %v2114_v59 = vmax.f32 %v2104_v8, 0.0  ;;  %v7030_v8 = vld [vmem:[%s7994_s9 + $0xa4] ss:$16 sps:$4 sm:$0xff]  }
 0x356   :  { %v2118_v45 = vpack.c.bf16 %v2114_v59, %v2113_v52  ;;  %v7035_v52 = vld [vmem:[%s7994_s9 + $0xac] ss:$16 sps:$4 sm:$0xff]  }
 0x358   :  { %5244 = vmatmul.mubr.bf16.gmra.mxu1 %v2118_v45  ;;  %v8085_v45 = vld [vmem:[#allocation12_spill] sm:$0xff] }
 0x359   :  { %2486 = vmatprep.mubr.bf16.mxu1 %v8004_v60 }
 0x360   :  { %4574 = vmatmul.mubr.msk.bf16.vlgmr.msra.gmra.mxu1 %vm2355_vm2, %v6787_v11  ;;  %v5484_v11 = vld [vmem:[%s7991_s6 + $0x8c] ss:$16 sps:$4 sm:$0xff]  }
 0x361   :  { %2761 = vmatpush1.bf16.msra.mxu1 %v5462_v15  ;;  %2496 = vmatprep.mubr.bf16.mxu1 %v8004_v60 }
 0x362   :  { %2762 = vmatprep.subr.bf16.mxu1 %v5471_v30 }
 0x365   :  { %2763 = vmatpush1.bf16.msra.mxu1 %v5469_v2 }
 0x366   :  { %2764 = vmatprep.subr.bf16.mxu1 %v5477_v63  ;;  %v7047_v63 = vld [vmem:[%s7994_s9 + $0xa0] ss:$16 sps:$4 sm:$0xff]  }
 0x368   :  { %4575 = vmatmul.mubr.msk.bf16.gmra.mxu1 %vm2355_vm2, %v6806_v39  ;;  %v5491_v39 = vld [vmem:[%s7990_s5 + $0x18] sm:$0xff]  }
 0x369   :  { %2765 = vmatpush1.bf16.msra.mxu1 %v5475_v23  ;;  %2506 = vmatprep.mubr.bf16.mxu1 %v8004_v60  ;;  %v7052_v23 = vld [vmem:[%s7994_s9 + $0xa8] ss:$16 sps:$4 sm:$0xff]  }
 0x36a   :  { %2766 = vmatprep.subr.bf16.mxu1 %v5484_v11  ;;  %4572 = vmatmul.mubr.msk.bf16.gmra.mxu0 %vm2355_vm2, %v5491_v39  ;;  %8086 = vst [vmem:[#allocation14_spill] sm:$0xff] %v7052_v23 }
 0x36b   :  { %2719 = vmatprep.mubr.bf16.mxu0 %v8004_v60 }
 0x36d   :  { %2767 = vmatpush1.bf16.msra.mxu1 %v5482_v31 }
 0x36e   :  { %2768 = vmatprep.subr.bf16.mxu1 %v5490_v44  ;;  %v7062_v44 = vld [vmem:[%s7994_s9 + $0x84] ss:$16 sps:$4 sm:$0xff]  }
 0x36f   :  { %8087 = vst [vmem:[#allocation11_spill] sm:$0xff] %v7062_v44 }
 0x370   :  { %4576 = vmatmul.mubr.msk.bf16.gmra.mxu1 %vm2355_vm2, %v6826_v49  ;;  %v5492_v49 = vld [vmem:[%s7991_s6 + $0x40] ss:$16 sps:$4 sm:$0xff]  }
 0x371   :  { %2769 = vmatpush1.bf16.msra.mxu1 %v5488_v46  ;;  %2516 = vmatprep.mubr.bf16.mxu1 %v8004_v60  ;;  %v7067_v46 = vld [vmem:[%s7994_s9 + $0x8c] ss:$16 sps:$4 sm:$0xff]  }
 0x372   :  { %2770 = vmatprep.subr.bf16.mxu1 %v5497_v20  ;;  %2698 = vmatpush1.bf16.msra.mxu0 %v5492_v49  ;;  %8088 = vst [vmem:[#allocation13_spill] sm:$0xff] %v7067_v46  ;;  %v7076_v20 = vld [vmem:[%s7994_s9 + $0x80] ss:$16 sps:$4 sm:$0xff]   ;;  %v7081_v49 = vld [vmem:[%s7994_s9 + $0x88] ss:$16 sps:$4 sm:$0xff]  }
 0x373   :  { %2699 = vmatprep.subr.bf16.mxu0 %v5500_v10  ;;  %8089 = vst [vmem:[#allocation15_spill] sm:$0xff] %v7076_v20 }
 0x375   :  { %2771 = vmatpush1.bf16.msra.mxu1 %v5495_v54 }
 0x376   :  { %2772 = vmatprep.subr.bf16.mxu1 %v5503_v24  ;;  %2700 = vmatpush1.bf16.msra.mxu0 %v5498_v34  ;;  %v7089_v34 = vld [vmem:[%s7994_s9 + $0x64] ss:$16 sps:$4 sm:$0xff]  }
 0x377   :  { %2701 = vmatprep.subr.bf16.mxu0 %v5506_v32  ;;  %8091 = vst [vmem:[#allocation12_spill] sm:$0xff] %v7089_v34 }
 0x378   :  { %4577 = vmatmul.mubr.msk.bf16.gmra.mxu1 %vm2355_vm2, %v5491_v39 }
 0x379   :  { %2792 = vmatprep.mubr.bf16.mxu1 %v8004_v60  ;;  %2773 = vmatpush1.bf16.msra.mxu1 %v5501_v22  ;;  %v7094_v22 = vld [vmem:[%s7994_s9 + $0x6c] ss:$16 sps:$4 sm:$0xff]  }
 0x37a   :  { %2774 = vmatprep.subr.bf16.mxu1 %v5509_v21  ;;  %2702 = vmatpush1.bf16.msra.mxu0 %v5504_v56  ;;  %8092 = vst [vmem:[#allocation18_spill] sm:$0xff] %v7094_v22 }
 0x37b   :  { %3118 = vmatprep.subr.bf16.mxu0 %v6968_v5 }
 0x37d   :  { %2775 = vmatpush1.bf16.msra.mxu1 %v5507_v29  ;;  %v7103_v29 = vld [vmem:[%s7994_s9 + $0x60] ss:$16 sps:$4 sm:$0xff]  }
 0x37e   :  { %3159 = vmatprep.subr.bf16.mxu1 %v6973_v7  ;;  %8093 = vst [vmem:[#allocation19_spill] sm:$0xff] %v7103_v29 }
 0x408   :  { %v5241_v4 = vpop.f32.mrf.mxu1 }
 0x409   :  { %v2250_v28 = vadd.f32 %v5241_v4, %v6841_v41  ;;  %v7108_v4 = vld [vmem:[%s7994_s9 + $0x68] ss:$16 sps:$4 sm:$0xff]  }
 0x40a   :  { %v2217_v27 = vpop.f32.mrf.mxu1  ;;  %8094 = vst [vmem:[#allocation20_spill] sm:$0xff] %v7108_v4 }
 0x40b   :  { %v2248_v42 = vadd.f32 %v2217_v27, %v6844_v55  ;;  %v2265_v0 = vadd.f32 %v6981_v50, %v2250_v28  ;;  %v7120_v27 = vld [vmem:[%s7994_s9 + $0x4c] ss:$16 sps:$4 sm:$0xff]  }
 0x40c   :  { %v5242_v9 = vpop.f32.mrf.mxu1  ;;  %8096 = vst [vmem:[#allocation22_spill] sm:$0xff] %v7120_v27 }
 0x40d   :  { %v2251_v43 = vadd.f32 %v5242_v9, %v6847_v25  ;;  %v2263_v41 = vadd.f32 %v6981_v50, %v2248_v42  ;;  %v2273_v62 = vmax.f32 %v2265_v0, 0.0  ;;  %v7000_v25 = vld [vmem:[%s7994_s9 + $0xe8] ss:$16 sps:$4 sm:$0xff]   ;;  %v7144_v42 = vld [vmem:[%s7994_s9 + $0x2c] ss:$16 sps:$4 sm:$0xff]  }
 0x40e   :  { %v2220_v1 = vpop.f32.mrf.mxu1  ;;  %8100 = vst [vmem:[#allocation26_spill] sm:$0xff] %v7144_v42  ;;  %v7153_v9 = vld [vmem:[%s7994_s9 + $0x20] ss:$16 sps:$4 sm:$0xff]   ;;  %v7165_v0 = vld [vmem:[%s7994_s9 + $0x4] ss:$16 sps:$4 sm:$0xff]  }
 0x40f   :  { %v2266_v37 = vadd.f32 %v6981_v50, %v2251_v43  ;;  %v2249_v36 = vadd.f32 %v2220_v1, %v1768_v48  ;;  %v2271_v13 = vmax.f32 %v2263_v41, 0.0  ;;  %8101 = vst [vmem:[#allocation27_spill] sm:$0xff] %v7153_v9  ;;  %v7158_v48 = vld [vmem:[%s7994_s9 + $0x28] ss:$16 sps:$4 sm:$0xff]   ;;  %8103 = vst [vmem:[#allocation29_spill] sm:$0xff] %v7165_v0 }
 0x410   :  { %8102 = vst [vmem:[#allocation28_spill] sm:$0xff] %v7158_v48  ;;  %v7170_v43 = vld [vmem:[%s7994_s9 + $0xc] ss:$16 sps:$4 sm:$0xff]   ;;  %v7177_v1 = vld [vmem:[%s7994_s9] ss:$16 sps:$4 sm:$0xff]  }
 0x411   :  { %v2274_v47 = vmax.f32 %v2266_v37, 0.0  ;;  %v2264_v12 = vadd.f32 %v6981_v50, %v2249_v36  ;;  %8104 = vst [vmem:[#allocation30_spill] sm:$0xff] %v7170_v43  ;;  %8105 = vst [vmem:[#allocation31_spill] sm:$0xff] %v7177_v1  ;;  %v7182_v41 = vld [vmem:[%s7994_s9 + $0x8] ss:$16 sps:$4 sm:$0xff]   ;;  %v2951_v37 = vld [vmem:[%s7995_s10] sm:$0xff] }
 0x412   :  { %8106 = vst [vmem:[#allocation32_spill] sm:$0xff] %v7182_v41  ;;  %v2957_v36 = vpack.c.bf16 %v2951_v37, %v2951_v37  ;;  %v8030_v37 = vlaneseq }
 0x413   :  { %v2272_v35 = vmax.f32 %v2264_v12, 0.0  ;;  %v2280_v55 = vpack.c.bf16 %v2274_v47, %v2273_v62  ;;  %v7231_v47 = vpop.f32.mrf.mxu0 }
 0x415   :  { %v2279_v61 = vpack.c.bf16 %v2272_v35, %v2271_v13  ;;  %v7235_v13 = vpop.f32.mrf.mxu0 }
 0x417   :  { %2720 = vmatmul.mubr.bf16.vlgmr.msra.gmra.mxu0 %v2279_v61  ;;  %2793 = vmatmul.mubr.bf16.vlgmr.msra.gmra.mxu1 %v2279_v61 }
 0x418   :  { %v5245_v18 = vpop.f32.mrf.mxu1  ;;  %3119 = vmatpush1.bf16.msra.mxu0 %v6995_v26  ;;  %3160 = vmatpush1.bf16.msra.mxu1 %v7000_v25 }
 0x419   :  { %v2254_v16 = vadd.f32 %v5245_v18, %v6852_v14  ;;  %3120 = vmatprep.subr.bf16.mxu0 %v7005_v33  ;;  %3161 = vmatprep.subr.bf16.mxu1 %v7010_v58  ;;  %v8084_v14 = vld [vmem:[#allocation16_spill] sm:$0xff] }
 0x41a   :  { %v2233_v59 = vpop.f32.mrf.mxu1  ;;  %2729 = vmatprep.mubr.bf16.mxu0 %v8004_v60  ;;  %2802 = vmatprep.mubr.bf16.mxu1 %v8004_v60  ;;  %v1283_v15 = vadd.f32 %v8085_v45, %v8084_v14  ;;  %8090 = vst [vmem:[#allocation16_spill] sm:$0xff] %v7081_v49 }
 0x41b   :  { %v2252_v30 = vadd.f32 %v2233_v59, %v6855_v17  ;;  %v2269_v31 = vadd.f32 %v6981_v50, %v2254_v16 }
 0x41c   :  { %v5246_v2 = vpop.f32.mrf.mxu1  ;;  %3121 = vmatpush1.bf16.msra.mxu0 %v7017_v19  ;;  %3162 = vmatpush1.bf16.msra.mxu1 %v7022_v53  ;;  %v1772_v11 = vadd.f32 %v6864_v40, %v1283_v15 }
 0x41d   :  { %v2255_v17 = vadd.f32 %v5246_v2, %v6858_v3  ;;  %3122 = vmatprep.subr.bf16.mxu0 %v7030_v8  ;;  %3163 = vmatprep.subr.bf16.mxu1 %v7035_v52  ;;  %v2267_v40 = vadd.f32 %v6981_v50, %v2252_v30  ;;  %v2277_v54 = vmax.f32 %v2269_v31, 0.0 }
 0x41e   :  { %v2236_v39 = vpop.f32.mrf.mxu1 }
 0x41f   :  { %v2270_v38 = vadd.f32 %v6981_v50, %v2255_v17  ;;  %v2253_v3 = vadd.f32 %v2236_v39, %v1772_v11  ;;  %2730 = vmatmul.mubr.bf16.gmra.mxu0 %v2280_v55  ;;  %2803 = vmatmul.mubr.bf16.gmra.mxu1 %v2280_v55  ;;  %v2275_v32 = vmax.f32 %v2267_v40, 0.0  ;;  %v2419_v55 = vpop.f32.mrf.mxu0 }
 0x420   :  { %3123 = vmatpush1.bf16.msra.mxu0 %v7047_v63  ;;  %3164 = vmatpush1.bf16.msra.mxu1 %v7052_v23  ;;  %v7229_v62 = vpop.f32.mrf.mxu1 }
 0x421   :  { %v2278_v10 = vmax.f32 %v2270_v38, 0.0  ;;  %v2268_v24 = vadd.f32 %v6981_v50, %v2253_v3  ;;  %3124 = vmatprep.subr.bf16.mxu0 %v7062_v44  ;;  %3165 = vmatprep.subr.bf16.mxu1 %v7067_v46  ;;  %v7115_v50 = vld [vmem:[%s7994_s9 + $0x44] ss:$16 sps:$4 sm:$0xff]   ;;  %v2421_v18 = vpop.f32.mrf.mxu0 }
 0x422   :  { %2739 = vmatprep.mubr.bf16.mxu0 %v8004_v60  ;;  %2812 = vmatprep.mubr.bf16.mxu1 %v8004_v60  ;;  %8095 = vst [vmem:[#allocation21_spill] sm:$0xff] %v7115_v50  ;;  %v7233_v12 = vpop.f32.mrf.mxu1 }
 0x423   :  { %v2282_v21 = vpack.c.bf16 %v2278_v10, %v2277_v54  ;;  %v2276_v56 = vmax.f32 %v2268_v24, 0.0  ;;  %v2425_v59 = vpop.f32.mrf.mxu0 }
 0x424   :  { %3125 = vmatpush1.bf16.msra.mxu0 %v7076_v20  ;;  %3166 = vmatpush1.bf16.msra.mxu1 %v7081_v49  ;;  %v2492_v35 = vpop.f32.mrf.mxu1 }
 0x425   :  { %v2281_v28 = vpack.c.bf16 %v2276_v56, %v2275_v32  ;;  %3126 = vmatprep.subr.bf16.mxu0 %v7089_v34  ;;  %3167 = vmatprep.subr.bf16.mxu1 %v7094_v22  ;;  %v2427_v45 = vpop.f32.mrf.mxu0 }
 0x426   :  { %v2494_v61 = vpop.f32.mrf.mxu1 }
 0x427   :  { %2740 = vmatmul.mubr.bf16.gmra.mxu0 %v2281_v28  ;;  %2813 = vmatmul.mubr.bf16.gmra.mxu1 %v2281_v28  ;;  %v2429_v30 = vpop.f32.mrf.mxu0 }
 0x428   :  { %3127 = vmatpush1.bf16.msra.mxu0 %v7103_v29  ;;  %3168 = vmatpush1.bf16.msra.mxu1 %v7108_v4  ;;  %v2498_v16 = vpop.f32.mrf.mxu1 }
 0x429   :  { %3128 = vmatprep.subr.bf16.mxu0 %v7115_v50  ;;  %3169 = vmatprep.subr.bf16.mxu1 %v7120_v27  ;;  %v2431_v11 = vpop.f32.mrf.mxu0 }
 0x42a   :  { %2749 = vmatprep.mubr.bf16.mxu0 %v8004_v60  ;;  %2822 = vmatprep.mubr.bf16.mxu1 %v8004_v60  ;;  %v2500_v14 = vpop.f32.mrf.mxu1 }
 0x42b   :  { %v7241_v17 = vpop.f32.mrf.mxu0 }
 0x42c   :  { %3129 = vmatpush1.bf16.msra.mxu0 %v7127_v51  ;;  %3170 = vmatpush1.bf16.msra.mxu1 %v7132_v57  ;;  %v2502_v15 = vpop.f32.mrf.mxu1 }
 0x42d   :  { %3130 = vmatprep.subr.bf16.mxu0 %v7139_v6  ;;  %3171 = vmatprep.subr.bf16.mxu1 %v7144_v42  ;;  %v7245_v40 = vpop.f32.mrf.mxu0 }
 0x42e   :  { %v7237_v2 = vpop.f32.mrf.mxu1 }
 0x42f   :  { %2750 = vmatmul.mubr.bf16.gmra.mxu0 %v2282_v21  ;;  %2823 = vmatmul.mubr.bf16.gmra.mxu1 %v2282_v21  ;;  %v7249_v3 = vpop.f32.mrf.mxu0 }
 0x430   :  { %3131 = vmatpush1.bf16.msra.mxu0 %v7153_v9  ;;  %3172 = vmatpush1.bf16.msra.mxu1 %v7158_v48  ;;  %v7239_v31 = vpop.f32.mrf.mxu1 }
 0x431   :  { %3132 = vmatprep.subr.bf16.mxu0 %v7165_v0  ;;  %3173 = vmatprep.subr.bf16.mxu1 %v7170_v43  ;;  %v7253_v10 = vpop.f32.mrf.mxu0 }
 0x432   :  { %3150 = vmatprep.mubr.bf16.mxu0 %v8004_v60  ;;  %3191 = vmatprep.mubr.bf16.mxu1 %v8004_v60  ;;  %v7243_v39 = vpop.f32.mrf.mxu1 }
 0x433   :  { %v7257_v32 = vpop.f32.mrf.mxu0 }
 0x434   :  { %3133 = vmatpush1.bf16.msra.mxu0 %v7177_v1  ;;  %3174 = vmatpush1.bf16.msra.mxu1 %v7182_v41  ;;  %v7247_v38 = vpop.f32.mrf.mxu1 }
 0x435   :  { %3234 = vmatprep.subr.bf16.mxu0 %v6968_v5  ;;  %3275 = vmatprep.subr.bf16.mxu1 %v6973_v7  ;;  %v7261_v56 = vpop.f32.mrf.mxu0 }
 0x436   :  { %v7251_v54 = vpop.f32.mrf.mxu1 }
 0x437   :  { %3151 = vmatmul.mubr.bf16.vlgmr.msra.gmra.mxu0 %v2957_v36  ;;  %3192 = vmatmul.mubr.bf16.vlgmr.msra.gmra.mxu1 %v2957_v36  ;;  %v7265_v36 = vpop.f32.mrf.mxu0 }
 0x438   :  { %3235 = vmatpush1.bf16.msra.mxu0 %v6995_v26  ;;  %3276 = vmatpush1.bf16.msra.mxu1 %v7000_v25  ;;  %v7255_v24 = vpop.f32.mrf.mxu1 }
 0x439   :  { %3236 = vmatprep.subr.bf16.mxu0 %v7005_v33  ;;  %3277 = vmatprep.subr.bf16.mxu1 %v7010_v58 }
 0x43a   :  { %3266 = vmatprep.mubr.bf16.mxu0 %v8004_v60  ;;  %3307 = vmatprep.mubr.bf16.mxu1 %v8004_v60  ;;  %v7259_v21 = vpop.f32.mrf.mxu1 }
 0x43c   :  { %3237 = vmatpush1.bf16.msra.mxu0 %v7017_v19  ;;  %3278 = vmatpush1.bf16.msra.mxu1 %v7022_v53  ;;  %v7263_v28 = vpop.f32.mrf.mxu1 }
 0x43d   :  { %3238 = vmatprep.subr.bf16.mxu0 %v7030_v8  ;;  %3279 = vmatprep.subr.bf16.mxu1 %v7035_v52 }
 0x43e   :  { %v7267_v60 = vpop.f32.mrf.mxu1 }
 0x440   :  { %3239 = vmatpush1.bf16.msra.mxu0 %v7047_v63  ;;  %3280 = vmatpush1.bf16.msra.mxu1 %v7052_v23 }
 0x441   :  { %3240 = vmatprep.subr.bf16.mxu0 %v7062_v44  ;;  %3281 = vmatprep.subr.bf16.mxu1 %v7067_v46 }
 0x444   :  { %3241 = vmatpush1.bf16.msra.mxu0 %v7076_v20  ;;  %3282 = vmatpush1.bf16.msra.mxu1 %v7081_v49 }
 0x445   :  { %3242 = vmatprep.subr.bf16.mxu0 %v7089_v34  ;;  %3283 = vmatprep.subr.bf16.mxu1 %v7094_v22 }
 0x448   :  { %3243 = vmatpush1.bf16.msra.mxu0 %v7103_v29  ;;  %3284 = vmatpush1.bf16.msra.mxu1 %v7108_v4 }
 0x449   :  { %3244 = vmatprep.subr.bf16.mxu0 %v7115_v50  ;;  %3285 = vmatprep.subr.bf16.mxu1 %v7120_v27 }
 0x44c   :  { %3245 = vmatpush1.bf16.msra.mxu0 %v7127_v51  ;;  %3286 = vmatpush1.bf16.msra.mxu1 %v7132_v57 }
 0x44d   :  { %3246 = vmatprep.subr.bf16.mxu0 %v7139_v6  ;;  %3287 = vmatprep.subr.bf16.mxu1 %v7144_v42  ;;  %v2833_v42 = vld [vmem:[%s7993_s8] sm:$0xf] }
 0x450   :  { %3247 = vmatpush1.bf16.msra.mxu0 %v7153_v9  ;;  %3288 = vmatpush1.bf16.msra.mxu1 %v7158_v48 }
 0x451   :  { %3248 = vmatprep.subr.bf16.mxu0 %v7165_v0  ;;  %3289 = vmatprep.subr.bf16.mxu1 %v7170_v43 }
 0x454   :  { %3249 = vmatpush1.bf16.msra.mxu0 %v7177_v1  ;;  %3290 = vmatpush1.bf16.msra.mxu1 %v7182_v41 }
 0x455   :  { %3350 = vmatprep.subr.bf16.mxu0 %v6968_v5  ;;  %3391 = vmatprep.subr.bf16.mxu1 %v6973_v7  ;;  %v2836_v7 = vshrl.u32 %v8030_v37, 7  ;;  %v7270_v5 = vpop.f32.mrf.mxu0 }
 0x457   :  { %v2837_v43 = vsub.s32 0, %v2836_v7  ;;  %v2845_v0 = vsub.s32 2, %v2836_v7  ;;  %v2841_v6 = vsub.s32 1, %v2836_v7  ;;  %v2849_v57 = vsub.s32 3, %v2836_v7 }
 0x459   :  { %v7283_v4 = vrot.slane %v2833_v42, %v2837_v43  ;;  %v7285_v29 = vrot.slane %v2833_v42, %v2845_v0  ;;  %v7287_v49 = vrot.slane %v2833_v42, %v2841_v6  ;;  %v7289_v20 = vrot.slane %v2833_v42, %v2849_v57 }
 0x4d7   :  { %v7272_v41 = vpop.f32.mrf.mxu0  ;;  %v7274_v1 = vpop.f32.mrf.mxu1 }
 0x4d9   :  { %v7276_v48 = vpop.f32.mrf.mxu0  ;;  %v7278_v9 = vpop.f32.mrf.mxu1 }
 0x4db   :  { %v2725_v51 = vpop.f32.mrf.mxu0  ;;  %v2798_v37 = vpop.f32.mrf.mxu1 }
 0x4dc   :  { %v2726_v27 = vadd.f32 %v2725_v51, %v2419_v55  ;;  %v2799_v50 = vadd.f32 %v2798_v37, %v2492_v35 }
 0x4dd   :  { %v2727_v22 = vpop.f32.mrf.mxu0  ;;  %v2800_v34 = vpop.f32.mrf.mxu1 }
 0x4de   :  { %v2728_v46 = vadd.f32 %v2727_v22, %v2421_v18  ;;  %v2801_v44 = vadd.f32 %v2800_v34, %v2494_v61  ;;  %v7292_v23 = vadd.f32 %v7283_v4, %v2726_v27  ;;  %v7295_v7 = vadd.f32 %v7285_v29, %v2799_v50 }
 0x4df   :  { %v2731_v51 = vpop.f32.mrf.mxu0  ;;  %v2804_v35 = vpop.f32.mrf.mxu1 }
 0x4e0   :  { %v2732_v43 = vadd.f32 %v2731_v51, %v2425_v59  ;;  %v2805_v55 = vadd.f32 %v2804_v35, %v2498_v16  ;;  %v7298_v0 = vadd.f32 %v7287_v49, %v2728_v46  ;;  %v7301_v6 = vadd.f32 %v7289_v20, %v2801_v44 }
 0x4e1   :  { %v2733_v57 = vpop.f32.mrf.mxu0  ;;  %v2806_v42 = vpop.f32.mrf.mxu1 }
 0x4e2   :  { %v2734_v22 = vadd.f32 %v2733_v57, %v2427_v45  ;;  %v2807_v34 = vadd.f32 %v2806_v42, %v2500_v14  ;;  %v7304_v27 = vadd.f32 %v7283_v4, %v2732_v43  ;;  %v7307_v50 = vadd.f32 %v7285_v29, %v2805_v55 }
 0x4e3   :  { %v2735_v61 = vpop.f32.mrf.mxu0  ;;  %v2808_v18 = vpop.f32.mrf.mxu1 }
 0x4e4   :  { %v2736_v59 = vadd.f32 %v2735_v61, %v2429_v30  ;;  %v2809_v16 = vadd.f32 %v2808_v18, %v2502_v15  ;;  %v7310_v46 = vadd.f32 %v7287_v49, %v2734_v22  ;;  %v7313_v44 = vadd.f32 %v7289_v20, %v2807_v34 }
 0x4e5   :  { %v2737_v37 = vpop.f32.mrf.mxu0  ;;  %v2810_v51 = vpop.f32.mrf.mxu1 }
 0x4e6   :  { %v2738_v45 = vadd.f32 %v2737_v37, %v2431_v11  ;;  %v2811_v14 = vadd.f32 %v2810_v51, %v7237_v2  ;;  %v7317_v35 = vadd.f32 %v7283_v4, %v2736_v59  ;;  %v7320_v43 = vadd.f32 %v7285_v29, %v2809_v16 }
 0x4e7   :  { %v2741_v55 = vpop.f32.mrf.mxu0  ;;  %v2814_v30 = vpop.f32.mrf.mxu1 }
 0x4e8   :  { %v2742_v15 = vadd.f32 %v2741_v55, %v7241_v17  ;;  %v2815_v57 = vadd.f32 %v2814_v30, %v7239_v31  ;;  %v7325_v42 = vadd.f32 %v7287_v49, %v2738_v45  ;;  %v7328_v22 = vadd.f32 %v7289_v20, %v2811_v14 }
 0x4e9   :  { %v2743_v11 = vpop.f32.mrf.mxu0  ;;  %v2816_v2 = vpop.f32.mrf.mxu1 }
 0x4ea   :  { %v2744_v34 = vadd.f32 %v2743_v11, %v7245_v40  ;;  %v2817_v61 = vadd.f32 %v2816_v2, %v7243_v39  ;;  %v7333_v18 = vadd.f32 %v7283_v4, %v2742_v15  ;;  %v7336_v59 = vadd.f32 %v7285_v29, %v2815_v57 }
 0x4eb   :  { %v2745_v17 = vpop.f32.mrf.mxu0  ;;  %v2818_v31 = vpop.f32.mrf.mxu1 }
 0x4ec   :  { %8107 = vst [vmem:[#allocation33_spill] sm:$0xff] %v7336_v59  ;;  %v2746_v16 = vadd.f32 %v2745_v17, %v7249_v3  ;;  %v2819_v37 = vadd.f32 %v2818_v31, %v7247_v38  ;;  %v7341_v51 = vadd.f32 %v7287_v49, %v2744_v34  ;;  %v7344_v45 = vadd.f32 %v7289_v20, %v2817_v61 }
 0x4ed   :  { %v2747_v40 = vpop.f32.mrf.mxu0  ;;  %v2820_v39 = vpop.f32.mrf.mxu1 }
 0x4ee   :  { %8108 = vst [vmem:[#allocation34_spill] sm:$0xff] %v7341_v51  ;;  %8109 = vst [vmem:[#allocation35_spill] sm:$0xff] %v7344_v45  ;;  %v2748_v14 = vadd.f32 %v2747_v40, %v7253_v10  ;;  %v2821_v55 = vadd.f32 %v2820_v39, %v7251_v54  ;;  %v7349_v30 = vadd.f32 %v7283_v4, %v2746_v16 }
 0x4ef   :  { %v7352_v15 = vadd.f32 %v7285_v29, %v2819_v37  ;;  %v2751_v3 = vpop.f32.mrf.mxu0  ;;  %v2824_v38 = vpop.f32.mrf.mxu1  ;;  %v2722_v54 = vadd.f32 %v7272_v41, %v7231_v47 }
 0x4f0   :  { %8110 = vst [vmem:[#allocation36_spill] sm:$0xff] %v7349_v30  ;;  %v2752_v57 = vadd.f32 %v2751_v3, %v7257_v32  ;;  %v2825_v11 = vadd.f32 %v2824_v38, %v7255_v24  ;;  %v7357_v2 = vadd.f32 %v7287_v49, %v2748_v14  ;;  %v7360_v34 = vadd.f32 %v7289_v20, %v2821_v55 }
 0x4f1   :  { %8111 = vst [vmem:[#allocation37_spill] sm:$0xff] %v7352_v15  ;;  %v2753_v10 = vpop.f32.mrf.mxu0  ;;  %v2826_v61 = vpop.f32.mrf.mxu1  ;;  %v2724_v32 = vadd.f32 %v7276_v48, %v7235_v13  ;;  %v2855_v55 = vadd.f32 %v7283_v4, %v2722_v54 }
 0x4f2   :  { %8112 = vst [vmem:[#allocation38_spill] sm:$0xff] %v7357_v2  ;;  %8113 = vst [vmem:[#allocation39_spill] sm:$0xff] %v7360_v34  ;;  %v2754_v17 = vadd.f32 %v2753_v10, %v7261_v56  ;;  %v2827_v31 = vadd.f32 %v2826_v61, %v7259_v21  ;;  %v7367_v16 = vadd.f32 %v7283_v4, %v2752_v57 }
 0x4f3   :  { %v7370_v24 = vadd.f32 %v7285_v29, %v2825_v11  ;;  %v2755_v37 = vpop.f32.mrf.mxu0  ;;  %v2828_v40 = vpop.f32.mrf.mxu1  ;;  %v2856_v11 = vadd.f32 %v7287_v49, %v2724_v32  ;;  %v2795_v32 = vadd.f32 %v7274_v1, %v7229_v62 }
 0x4f4   :  { %8114 = vst [vmem:[#allocation40_spill] sm:$0xff] %v7367_v16  ;;  %v2756_v39 = vadd.f32 %v2755_v37, %v7265_v36  ;;  %v2829_v41 = vadd.f32 %v2828_v40, %v7263_v28  ;;  %v7377_v47 = vadd.f32 %v7287_v49, %v2754_v17  ;;  %v7380_v21 = vadd.f32 %v7289_v20, %v2827_v31 }
 0x4f5   :  { %8115 = vst [vmem:[#allocation41_spill] sm:$0xff] %v7370_v24  ;;  %v2757_v56 = vpop.f32.mrf.mxu0  ;;  %v2830_v14 = vpop.f32.mrf.mxu1  ;;  %v2797_v40 = vadd.f32 %v7278_v9, %v7233_v12 }
 0x4f6   :  { %8116 = vst [vmem:[#allocation42_spill] sm:$0xff] %v7377_v47  ;;  %8117 = vst [vmem:[#allocation43_spill] sm:$0xff] %v7380_v21  ;;  %v2758_v3 = vadd.f32 %v2757_v56, %v7270_v5  ;;  %v2831_v48 = vadd.f32 %v2830_v14, %v7267_v60  ;;  %v7386_v13 = vadd.f32 %v7283_v4, %v2756_v39 }
 0x4f7   :  { %v7389_v36 = vadd.f32 %v7285_v29, %v2829_v41  ;;  %v3152_v28 = vpop.f32.mrf.mxu0  ;;  %v3193_v38 = vpop.f32.mrf.mxu1  ;;  %v2857_v14 = vadd.f32 %v7285_v29, %v2795_v32  ;;  %v8128_v32 = vld [vmem:[#allocation16_spill] sm:$0xff] }
 0x4f8   :  { %8118 = vst [vmem:[#allocation44_spill] sm:$0xff] %v7386_v13  ;;  %v3200_v57 = vadd.f32 %v3152_v28, %v2855_v55  ;;  %v7393_v10 = vadd.f32 %v7287_v49, %v2758_v3  ;;  %v7396_v54 = vadd.f32 %v7289_v20, %v2831_v48  ;;  %v2858_v49 = vadd.f32 %v7289_v20, %v2797_v40  ;;  %v2952_v20 = vld [vmem:[%s7996_s11] sm:$0xff]  ;;  %v8124_v40 = vld [vmem:[#allocation14_spill] sm:$0xff] }
 0x4f9   :  { %8119 = vst [vmem:[#allocation45_spill] sm:$0xff] %v7389_v36  ;;  %v3154_v5 = vpop.f32.mrf.mxu0  ;;  %v3195_v61 = vpop.f32.mrf.mxu1  ;;  %v3202_v48 = vadd.f32 %v3193_v38, %v2857_v14  ;;  %v8130_v14 = vld [vmem:[#allocation18_spill] sm:$0xff] }
 0x4fa   :  { %8120 = vst [vmem:[#allocation46_spill] sm:$0xff] %v7393_v10  ;;  %8121 = vst [vmem:[#allocation47_spill] sm:$0xff] %v7396_v54  ;;  %v4642_v60 = vmul.f32 -1.442695, %v3200_v57  ;;  %v3201_v17 = vadd.f32 %v3154_v5, %v2856_v11  ;;  %v3203_v56 = vadd.f32 %v3195_v61, %v2858_v49  ;;  %v8127_v49 = vld [vmem:[#allocation15_spill] sm:$0xff] }
 0x4fb   :  { %v3156_v4 = vpop.f32.mrf.mxu0  ;;  %v3197_v31 = vpop.f32.mrf.mxu1 }
 0x4fc   :  { %5566 = vpow2.f32 %v4642_v60  ;;  %v4643_v37 = vmul.f32 -1.442695, %v3201_v17  ;;  %v4644_v55 = vmul.f32 -1.442695, %v3203_v56  ;;  %v8129_v56 = vld [vmem:[#allocation12_spill] sm:$0xff] }
 0x4fd   :  { %v3157_v39 = vpop.f32.mrf.mxu0  ;;  %v3198_v41 = vpop.f32.mrf.mxu1 }
 0x4fe   :  { %5568 = vpow2.f32 %v4643_v37  ;;  %v8123_v37 = vmov 0   ;;  %v8125_v39 = vld [vmem:[#allocation11_spill] sm:$0xff]  ;;  %v8126_v41 = vld [vmem:[#allocation13_spill] sm:$0xff] }
 0x4ff   :  { %5570 = vpow2.f32 %v4644_v55  ;;  %v8131_v55 = vld [vmem:[#allocation19_spill] sm:$0xff] }
 0x509   :  { %v5567_v3 = vpop.eup %5566 }
 0x50a   :  { %v3207_v28 = vadd.f32 1.0, %v5567_v3  ;;  %v8132_v3 = vld [vmem:[#allocation20_spill] sm:$0xff] }
 0x50b   :  { %v5569_v57 = vpop.eup %5568 }
 0x50c   :  { %5572 = vrcp.f32 %v3207_v28  ;;  %v3213_v11 = vadd.f32 1.0, %v5569_v57  ;;  %v5571_v9 = vpop.eup %5570  ;;  %v8134_v28 = vld [vmem:[#allocation22_spill] sm:$0xff]  ;;  %v8135_v57 = vld [vmem:[#allocation23_spill] sm:$0xff] }
 0x50d   :  { %5574 = vtanh.f32 %v3202_v48  ;;  %v3220_v5 = vadd.f32 1.0, %v5571_v9  ;;  %v8133_v48 = vld [vmem:[#allocation21_spill] sm:$0xff] }
 0x50e   :  { %5576 = vrcp.f32 %v3213_v11  ;;  %v8136_v11 = vld [vmem:[#allocation24_spill] sm:$0xff]  ;;  %v8137_v9 = vld [vmem:[#allocation25_spill] sm:$0xff] }
 0x50f   :  { %5578 = vrcp.f32 %v3220_v5  ;;  %v8142_v5 = vld [vmem:[#allocation30_spill] sm:$0xff] }
 0x519   :  { %v5573_v12 = vpop.eup %5572 }
 0x51a   :  { %v5575_v1 = vpop.eup %5574 }
 0x51b   :  { %v5577_v62 = vpop.eup %5576  ;;  %v3224_v29 = vmul.f32 %v5575_v1, %v5573_v12  ;;  %v8138_v12 = vld [vmem:[#allocation26_spill] sm:$0xff]  ;;  %v8140_v1 = vld [vmem:[#allocation28_spill] sm:$0xff] }
 0x51c   :  { %v3223_v61 = vmul.f32 %v5577_v62, %v2952_v20  ;;  %v5579_v38 = vpop.eup %5578  ;;  %v8139_v20 = vld [vmem:[#allocation27_spill] sm:$0xff]  ;;  %v8141_v62 = vld [vmem:[#allocation29_spill] sm:$0xff] }
 0x51e   :  { %v7407_v60 = vadd.f32 %v3224_v29, %v3223_v61  ;;  %v8143_v29 = vld [vmem:[#allocation31_spill] sm:$0xff]  ;;  %v8144_v61 = vld [vmem:[#allocation32_spill] sm:$0xff] }
 0x520   :  { %5580 = vtanh.f32 %v7407_v60 }
 0x52d   :  { %v5581_v17 = vpop.eup %5580 }
 0x52e   :  { %v7410_v4 = vmul.f32 %v5581_v17, %v5579_v38  ;;  %v8145_v38 = vld [vmem:[#allocation17_spill] sm:$0xff]  ;;  %v8146_v17 = vld [vmem:[#allocation10_spill] sm:$0xff] }
 0x530   :  { %8122 = vst [vmem:[#allocation48_spill] sm:$0xff] %v7410_v4  ;;  %v3233_v31 = vpack.c.bf16 %v7410_v4, %v7410_v4 }
 0x532   :  { %3267 = vmatmul.mubr.bf16.vlgmr.msra.gmra.mxu0 %v3233_v31  ;;  %3308 = vmatmul.mubr.bf16.vlgmr.msra.gmra.mxu1 %v3233_v31 }
 0x533   :  { %3351 = vmatpush1.bf16.msra.mxu0 %v6995_v26  ;;  %3392 = vmatpush1.bf16.msra.mxu1 %v7000_v25 }
 0x534   :  { %3352 = vmatprep.subr.bf16.mxu0 %v7005_v33  ;;  %3393 = vmatprep.subr.bf16.mxu1 %v7010_v58 }
 0x535   :  { %3382 = vmatprep.mubr.bf16.mxu0 %v8123_v37  ;;  %3423 = vmatprep.mubr.bf16.mxu1 %v8123_v37 }
 0x537   :  { %3353 = vmatpush1.bf16.msra.mxu0 %v7017_v19  ;;  %3394 = vmatpush1.bf16.msra.mxu1 %v7022_v53 }
 0x538   :  { %3354 = vmatprep.subr.bf16.mxu0 %v7030_v8  ;;  %3395 = vmatprep.subr.bf16.mxu1 %v7035_v52 }
 0x53b   :  { %3355 = vmatpush1.bf16.msra.mxu0 %v7047_v63  ;;  %3396 = vmatpush1.bf16.msra.mxu1 %v8124_v40 }
 0x53c   :  { %3356 = vmatprep.subr.bf16.mxu0 %v8125_v39  ;;  %3397 = vmatprep.subr.bf16.mxu1 %v8126_v41 }
 0x53f   :  { %3357 = vmatpush1.bf16.msra.mxu0 %v8127_v49  ;;  %3398 = vmatpush1.bf16.msra.mxu1 %v8128_v32 }
 0x540   :  { %3358 = vmatprep.subr.bf16.mxu0 %v8129_v56  ;;  %3399 = vmatprep.subr.bf16.mxu1 %v8130_v14 }
 0x543   :  { %3359 = vmatpush1.bf16.msra.mxu0 %v8131_v55  ;;  %3400 = vmatpush1.bf16.msra.mxu1 %v8132_v3 }
 0x544   :  { %3360 = vmatprep.subr.bf16.mxu0 %v8133_v48  ;;  %3401 = vmatprep.subr.bf16.mxu1 %v8134_v28 }
 0x547   :  { %3361 = vmatpush1.bf16.msra.mxu0 %v8135_v57  ;;  %3402 = vmatpush1.bf16.msra.mxu1 %v8136_v11 }
 0x548   :  { %3362 = vmatprep.subr.bf16.mxu0 %v8137_v9  ;;  %3403 = vmatprep.subr.bf16.mxu1 %v8138_v12 }
 0x54b   :  { %3363 = vmatpush1.bf16.msra.mxu0 %v8139_v20  ;;  %3404 = vmatpush1.bf16.msra.mxu1 %v8140_v1 }
 0x54c   :  { %3364 = vmatprep.subr.bf16.mxu0 %v8141_v62  ;;  %3405 = vmatprep.subr.bf16.mxu1 %v8142_v5 }
 0x54f   :  { %3365 = vmatpush1.bf16.msra.mxu0 %v8143_v29  ;;  %3406 = vmatpush1.bf16.msra.mxu1 %v8144_v61 }
 0x550   :  { %3466 = vmatprep.subr.bf16.mxu0 %v8145_v38  ;;  %3507 = vmatprep.subr.bf16.mxu1 %v8146_v17 }
 0x5f2   :  { %v3268_v31 = vpop.f32.mrf.mxu0  ;;  %v3309_v36 = vpop.f32.mrf.mxu1 }
 0x5f3   :  { %v3316_v54 = vadd.f32 %v3268_v31, %v7292_v23  ;;  %v3318_v30 = vadd.f32 %v3309_v36, %v7295_v7 }
 0x5f4   :  { %v3270_v10 = vpop.f32.mrf.mxu0  ;;  %v3311_v13 = vpop.f32.mrf.mxu1 }
 0x5f5   :  { %v4645_v4 = vmul.f32 -1.442695, %v3316_v54  ;;  %v3317_v24 = vadd.f32 %v3270_v10, %v7298_v0  ;;  %v3319_v2 = vadd.f32 %v3311_v13, %v7301_v6 }
 0x5f6   :  { %v3272_v21 = vpop.f32.mrf.mxu0  ;;  %v3313_v47 = vpop.f32.mrf.mxu1 }
 0x5f7   :  { %5582 = vpow2.f32 %v4645_v4  ;;  %v4646_v16 = vmul.f32 -1.442695, %v3317_v24  ;;  %v4647_v59 = vmul.f32 -1.442695, %v3319_v2 }
 0x5f8   :  { %v3273_v15 = vpop.f32.mrf.mxu0  ;;  %v3314_v34 = vpop.f32.mrf.mxu1 }
 0x5f9   :  { %5584 = vpow2.f32 %v4646_v16 }
 0x5fa   :  { %5586 = vtanh.f32 %v3318_v30 }
 0x5fb   :  { %5588 = vpow2.f32 %v4647_v59 }
 0x604   :  { %v5583_v45 = vpop.eup %5582 }
 0x605   :  { %v3323_v51 = vadd.f32 1.0, %v5583_v45 }
 0x606   :  { %v5585_v23 = vpop.eup %5584 }
 0x607   :  { %5590 = vrcp.f32 %v3323_v51  ;;  %v3329_v54 = vadd.f32 1.0, %v5585_v23  ;;  %v5587_v0 = vpop.eup %5586 }
 0x608   :  { %v5589_v47 = vpop.eup %5588 }
 0x609   :  { %5592 = vrcp.f32 %v3329_v54  ;;  %v3336_v34 = vadd.f32 1.0, %v5589_v47 }
 0x60b   :  { %5594 = vrcp.f32 %v3336_v34 }
 0x614   :  { %v5591_v21 = vpop.eup %5590 }
 0x615   :  { %v3340_v24 = vmul.f32 %v5591_v21, %v5587_v0 }
 0x616   :  { %v5593_v15 = vpop.eup %5592 }
 0x617   :  { %v3339_v16 = vmul.f32 %v5593_v15, %v7407_v60 }
 0x618   :  { %v5595_v7 = vpop.eup %5594 }
 0x619   :  { %v7453_v6 = vadd.f32 %v3340_v24, %v3339_v16 }
 0x61b   :  { %5596 = vtanh.f32 %v7453_v6 }
 0x628   :  { %v5597_v45 = vpop.eup %5596 }
 0x629   :  { %v7456_v30 = vmul.f32 %v5597_v45, %v5595_v7 }
 0x62b   :  { %v3349_v59 = vpack.c.bf16 %v7456_v30, %v7456_v30 }
 0x62d   :  { %3383 = vmatmul.mubr.bf16.vlgmr.msra.gmra.mxu0 %v3349_v59  ;;  %3424 = vmatmul.mubr.bf16.vlgmr.msra.gmra.mxu1 %v3349_v59 }
 0x62e   :  { %3467 = vmatpush1.bf16.msra.mxu0 %v6995_v26  ;;  %3508 = vmatpush1.bf16.msra.mxu1 %v7000_v25 }
 0x62f   :  { %3468 = vmatprep.subr.bf16.mxu0 %v7005_v33  ;;  %3509 = vmatprep.subr.bf16.mxu1 %v7010_v58 }
 0x630   :  { %3498 = vmatprep.mubr.bf16.mxu0 %v8123_v37  ;;  %3539 = vmatprep.mubr.bf16.mxu1 %v8123_v37 }
 0x632   :  { %3469 = vmatpush1.bf16.msra.mxu0 %v7017_v19  ;;  %3510 = vmatpush1.bf16.msra.mxu1 %v7022_v53 }
 0x633   :  { %3470 = vmatprep.subr.bf16.mxu0 %v7030_v8  ;;  %3511 = vmatprep.subr.bf16.mxu1 %v7035_v52 }
 0x636   :  { %3471 = vmatpush1.bf16.msra.mxu0 %v7047_v63  ;;  %3512 = vmatpush1.bf16.msra.mxu1 %v8124_v40 }
 0x637   :  { %3472 = vmatprep.subr.bf16.mxu0 %v8125_v39  ;;  %3513 = vmatprep.subr.bf16.mxu1 %v8126_v41 }
 0x63a   :  { %3473 = vmatpush1.bf16.msra.mxu0 %v8127_v49  ;;  %3514 = vmatpush1.bf16.msra.mxu1 %v8128_v32 }
 0x63b   :  { %3474 = vmatprep.subr.bf16.mxu0 %v8129_v56  ;;  %3515 = vmatprep.subr.bf16.mxu1 %v8130_v14 }
 0x63e   :  { %3475 = vmatpush1.bf16.msra.mxu0 %v8131_v55  ;;  %3516 = vmatpush1.bf16.msra.mxu1 %v8132_v3 }
 0x63f   :  { %3476 = vmatprep.subr.bf16.mxu0 %v8133_v48  ;;  %3517 = vmatprep.subr.bf16.mxu1 %v8134_v28 }
 0x642   :  { %3477 = vmatpush1.bf16.msra.mxu0 %v8135_v57  ;;  %3518 = vmatpush1.bf16.msra.mxu1 %v8136_v11 }
 0x643   :  { %3478 = vmatprep.subr.bf16.mxu0 %v8137_v9  ;;  %3519 = vmatprep.subr.bf16.mxu1 %v8138_v12 }
 0x646   :  { %3479 = vmatpush1.bf16.msra.mxu0 %v8139_v20  ;;  %3520 = vmatpush1.bf16.msra.mxu1 %v8140_v1 }
 0x647   :  { %3480 = vmatprep.subr.bf16.mxu0 %v8141_v62  ;;  %3521 = vmatprep.subr.bf16.mxu1 %v8142_v5 }
 0x64a   :  { %3481 = vmatpush1.bf16.msra.mxu0 %v8143_v29  ;;  %3522 = vmatpush1.bf16.msra.mxu1 %v8144_v61 }
 0x64b   :  { %3582 = vmatprep.subr.bf16.mxu0 %v8145_v38  ;;  %3623 = vmatprep.subr.bf16.mxu1 %v8146_v17 }
 0x6ed   :  { %v3384_v51 = vpop.f32.mrf.mxu0  ;;  %v3425_v2 = vpop.f32.mrf.mxu1 }
 0x6ee   :  { %v3432_v13 = vadd.f32 %v3384_v51, %v7304_v27  ;;  %v3434_v17 = vadd.f32 %v3425_v2, %v7307_v50 }
 0x6ef   :  { %v3386_v36 = vpop.f32.mrf.mxu0  ;;  %v3427_v10 = vpop.f32.mrf.mxu1 }
 0x6f0   :  { %v4648_v60 = vmul.f32 -1.442695, %v3432_v13  ;;  %v3433_v4 = vadd.f32 %v3386_v36, %v7310_v46  ;;  %v3435_v38 = vadd.f32 %v3427_v10, %v7313_v44 }
 0x6f1   :  { %v3388_v31 = vpop.f32.mrf.mxu0  ;;  %v3429_v23 = vpop.f32.mrf.mxu1 }
 0x6f2   :  { %5598 = vpow2.f32 %v4648_v60  ;;  %v4649_v54 = vmul.f32 -1.442695, %v3433_v4  ;;  %v4650_v21 = vmul.f32 -1.442695, %v3435_v38 }
 0x6f3   :  { %v3389_v0 = vpop.f32.mrf.mxu0  ;;  %v3430_v47 = vpop.f32.mrf.mxu1 }
 0x6f4   :  { %5600 = vpow2.f32 %v4649_v54 }
 0x6f5   :  { %5602 = vtanh.f32 %v3434_v17 }
 0x6f6   :  { %5604 = vpow2.f32 %v4650_v21 }
 0x6ff   :  { %v5599_v24 = vpop.eup %5598 }
 0x700   :  { %v3439_v15 = vadd.f32 1.0, %v5599_v24 }
 0x701   :  { %v5601_v27 = vpop.eup %5600 }
 0x702   :  { %5606 = vrcp.f32 %v3439_v15  ;;  %v3445_v34 = vadd.f32 1.0, %v5601_v27  ;;  %v5603_v46 = vpop.eup %5602 }
 0x703   :  { %v5605_v16 = vpop.eup %5604 }
 0x704   :  { %5608 = vrcp.f32 %v3445_v34  ;;  %v3452_v51 = vadd.f32 1.0, %v5605_v16  ;;  %v7571_v16 = vld [vmem:[%s7994_s9 + $0xe8] ss:$16 sps:$4 sm:$0xff]  }
 0x706   :  { %5610 = vrcp.f32 %v3452_v51  ;;  %v7597_v51 = vld [vmem:[%s7994_s9 + $0xc8] ss:$16 sps:$4 sm:$0xff]  }
 0x70f   :  { %v5607_v7 = vpop.eup %5606 }
 0x710   :  { %v3456_v45 = vmul.f32 %v5607_v7, %v5603_v46  ;;  %v7565_v46 = vld [vmem:[%s7994_s9 + $0xe0] ss:$16 sps:$4 sm:$0xff]   ;;  %v7577_v7 = vld [vmem:[%s7994_s9 + $0xc4] ss:$16 sps:$4 sm:$0xff]  }
 0x711   :  { %v5609_v59 = vpop.eup %5608 }
 0x712   :  { %v3455_v13 = vmul.f32 %v5609_v59, %v7453_v6  ;;  %v7591_v59 = vld [vmem:[%s7994_s9 + $0xc0] ss:$16 sps:$4 sm:$0xff]  }
 0x713   :  { %v5611_v50 = vpop.eup %5610 }
 0x714   :  { %v7499_v44 = vadd.f32 %v3456_v45, %v3455_v13  ;;  %v7583_v45 = vld [vmem:[%s7994_s9 + $0xcc] ss:$16 sps:$4 sm:$0xff]   ;;  %v7603_v13 = vld [vmem:[%s7994_s9 + $0xa4] ss:$16 sps:$4 sm:$0xff]  }
 0x716   :  { %5612 = vtanh.f32 %v7499_v44 }
 0x723   :  { %v5613_v2 = vpop.eup %5612 }
 0x724   :  { %v7502_v36 = vmul.f32 %v5613_v2, %v5611_v50  ;;  %v7615_v50 = vld [vmem:[%s7994_s9 + $0xa0] ss:$16 sps:$4 sm:$0xff]   ;;  %v7621_v2 = vld [vmem:[%s7994_s9 + $0xa8] ss:$16 sps:$4 sm:$0xff]  }
 0x726   :  { %v3465_v10 = vpack.c.bf16 %v7502_v36, %v7502_v36 }
 0x728   :  { %3499 = vmatmul.mubr.bf16.vlgmr.msra.gmra.mxu0 %v3465_v10  ;;  %3540 = vmatmul.mubr.bf16.vlgmr.msra.gmra.mxu1 %v3465_v10  ;;  %v7627_v10 = vld [vmem:[%s7994_s9 + $0x84] ss:$16 sps:$4 sm:$0xff]  }
 0x729   :  { %3583 = vmatpush1.bf16.msra.mxu0 %v6995_v26  ;;  %3624 = vmatpush1.bf16.msra.mxu1 %v7000_v25  ;;  %v7541_v26 = vld [vmem:[%s7994_s9 + $0xe4] ss:$16 sps:$4 sm:$0xff]   ;;  %v7547_v25 = vld [vmem:[%s7994_s9 + $0xec] ss:$16 sps:$4 sm:$0xff]  }
 0x72a   :  { %3584 = vmatprep.subr.bf16.mxu0 %v7005_v33  ;;  %3625 = vmatprep.subr.bf16.mxu1 %v7010_v58 }
 0x72b   :  { %3614 = vmatprep.mubr.bf16.mxu0 %v8123_v37  ;;  %3655 = vmatprep.mubr.bf16.mxu1 %v8123_v37 }
 0x72d   :  { %3585 = vmatpush1.bf16.msra.mxu0 %v7017_v19  ;;  %3626 = vmatpush1.bf16.msra.mxu1 %v7022_v53 }
 0x72e   :  { %3586 = vmatprep.subr.bf16.mxu0 %v7030_v8  ;;  %3627 = vmatprep.subr.bf16.mxu1 %v7035_v52 }
 0x731   :  { %3587 = vmatpush1.bf16.msra.mxu0 %v7047_v63  ;;  %3628 = vmatpush1.bf16.msra.mxu1 %v8124_v40 }
 0x732   :  { %3588 = vmatprep.subr.bf16.mxu0 %v8125_v39  ;;  %3629 = vmatprep.subr.bf16.mxu1 %v8126_v41 }
 0x735   :  { %3589 = vmatpush1.bf16.msra.mxu0 %v8127_v49  ;;  %3630 = vmatpush1.bf16.msra.mxu1 %v8128_v32 }
 0x736   :  { %3590 = vmatprep.subr.bf16.mxu0 %v8129_v56  ;;  %3631 = vmatprep.subr.bf16.mxu1 %v8130_v14 }
 0x739   :  { %3591 = vmatpush1.bf16.msra.mxu0 %v8131_v55  ;;  %3632 = vmatpush1.bf16.msra.mxu1 %v8132_v3 }
 0x73a   :  { %3592 = vmatprep.subr.bf16.mxu0 %v8133_v48  ;;  %3633 = vmatprep.subr.bf16.mxu1 %v8134_v28 }
 0x73d   :  { %3593 = vmatpush1.bf16.msra.mxu0 %v8135_v57  ;;  %3634 = vmatpush1.bf16.msra.mxu1 %v8136_v11 }
 0x73e   :  { %3594 = vmatprep.subr.bf16.mxu0 %v8137_v9  ;;  %3635 = vmatprep.subr.bf16.mxu1 %v8138_v12 }
 0x741   :  { %3595 = vmatpush1.bf16.msra.mxu0 %v8139_v20  ;;  %3636 = vmatpush1.bf16.msra.mxu1 %v8140_v1 }
 0x742   :  { %3596 = vmatprep.subr.bf16.mxu0 %v8141_v62  ;;  %3637 = vmatprep.subr.bf16.mxu1 %v8142_v5 }
 0x745   :  { %3597 = vmatpush1.bf16.msra.mxu0 %v8143_v29  ;;  %3638 = vmatpush1.bf16.msra.mxu1 %v8144_v61 }
 0x746   :  { %3698 = vmatprep.subr.bf16.mxu0 %v7541_v26  ;;  %3739 = vmatprep.subr.bf16.mxu1 %v7547_v25 }
 0x7e8   :  { %v3500_v33 = vpop.f32.mrf.mxu0  ;;  %v3541_v58 = vpop.f32.mrf.mxu1 }
 0x7e9   :  { %v3548_v19 = vadd.f32 %v3500_v33, %v7317_v35  ;;  %v3550_v60 = vadd.f32 %v3541_v58, %v7320_v43  ;;  %v7633_v33 = vld [vmem:[%s7994_s9 + $0x8c] ss:$16 sps:$4 sm:$0xff]   ;;  %v7639_v58 = vld [vmem:[%s7994_s9 + $0x80] ss:$16 sps:$4 sm:$0xff]  }
 0x7ea   :  { %v3502_v53 = vpop.f32.mrf.mxu0  ;;  %v3543_v8 = vpop.f32.mrf.mxu1 }
 0x7eb   :  { %v4651_v52 = vmul.f32 -1.442695, %v3548_v19  ;;  %v3549_v63 = vadd.f32 %v3502_v53, %v7325_v42  ;;  %v3551_v6 = vadd.f32 %v3543_v8, %v7328_v22  ;;  %v7645_v19 = vld [vmem:[%s7994_s9 + $0x88] ss:$16 sps:$4 sm:$0xff]  }
 0x7ec   :  { %v3504_v40 = vpop.f32.mrf.mxu0  ;;  %v3545_v39 = vpop.f32.mrf.mxu1 }
 0x7ed   :  { %5614 = vpow2.f32 %v4651_v52  ;;  %v4652_v41 = vmul.f32 -1.442695, %v3549_v63  ;;  %v4653_v4 = vmul.f32 -1.442695, %v3551_v6 }
 0x7ee   :  { %v3505_v49 = vpop.f32.mrf.mxu0  ;;  %v3546_v32 = vpop.f32.mrf.mxu1 }
 0x7ef   :  { %5616 = vpow2.f32 %v4652_v41 }
 0x7f0   :  { %5618 = vtanh.f32 %v3550_v60 }
 0x7f1   :  { %5620 = vpow2.f32 %v4653_v4 }
 0x7fa   :  { %v5615_v31 = vpop.eup %5614 }
 0x7fb   :  { %v3555_v23 = vadd.f32 1.0, %v5615_v31 }
 0x7fc   :  { %v5617_v35 = vpop.eup %5616 }
 0x7fd   :  { %5622 = vrcp.f32 %v3555_v23  ;;  %v3561_v54 = vadd.f32 1.0, %v5617_v35  ;;  %v5619_v42 = vpop.eup %5618 }
 0x7fe   :  { %v5621_v0 = vpop.eup %5620 }
 0x7ff   :  { %5624 = vrcp.f32 %v3561_v54  ;;  %v3568_v21 = vadd.f32 1.0, %v5621_v0  ;;  %v7697_v0 = vld [vmem:[%s7994_s9 + $0x64] ss:$16 sps:$4 sm:$0xff]  }
 0x801   :  { %5626 = vrcp.f32 %v3568_v21  ;;  %v7721_v21 = vld [vmem:[%s7994_s9 + $0x44] ss:$16 sps:$4 sm:$0xff]  }
 0x80a   :  { %v5623_v47 = vpop.eup %5622 }
 0x80b   :  { %v3572_v38 = vmul.f32 %v5623_v47, %v5619_v42  ;;  %v7703_v47 = vld [vmem:[%s7994_s9 + $0x6c] ss:$16 sps:$4 sm:$0xff]  }
 0x80c   :  { %v5625_v17 = vpop.eup %5624 }
 0x80d   :  { %v3571_v24 = vmul.f32 %v5625_v17, %v7499_v44  ;;  %v7609_v44 = vld [vmem:[%s7994_s9 + $0xac] ss:$16 sps:$4 sm:$0xff]   ;;  %v7715_v17 = vld [vmem:[%s7994_s9 + $0x68] ss:$16 sps:$4 sm:$0xff]  }
 0x80e   :  { %v5627_v43 = vpop.eup %5626 }
 0x80f   :  { %v7555_v22 = vadd.f32 %v3572_v38, %v3571_v24  ;;  %v7709_v38 = vld [vmem:[%s7994_s9 + $0x60] ss:$16 sps:$4 sm:$0xff]   ;;  %v7727_v24 = vld [vmem:[%s7994_s9 + $0x4c] ss:$16 sps:$4 sm:$0xff]  }
 0x811   :  { %5628 = vtanh.f32 %v7555_v22 }
 0x81e   :  { %v5629_v15 = vpop.eup %5628 }
 0x81f   :  { %v7558_v27 = vmul.f32 %v5629_v15, %v5627_v43  ;;  %v7739_v43 = vld [vmem:[%s7994_s9 + $0x48] ss:$16 sps:$4 sm:$0xff]   ;;  %v7745_v15 = vld [vmem:[%s7994_s9 + $0x24] ss:$16 sps:$4 sm:$0xff]  }
 0x821   :  { %v3581_v34 = vpack.c.bf16 %v7558_v27, %v7558_v27 }
 0x823   :  { %3615 = vmatmul.mubr.bf16.vlgmr.msra.gmra.mxu0 %v3581_v34  ;;  %3656 = vmatmul.mubr.bf16.vlgmr.msra.gmra.mxu1 %v3581_v34  ;;  %v7751_v34 = vld [vmem:[%s7994_s9 + $0x2c] ss:$16 sps:$4 sm:$0xff]  }
 0x824   :  { %3699 = vmatpush1.bf16.msra.mxu0 %v7565_v46  ;;  %3740 = vmatpush1.bf16.msra.mxu1 %v7571_v16 }
 0x825   :  { %3700 = vmatprep.subr.bf16.mxu0 %v7577_v7  ;;  %3741 = vmatprep.subr.bf16.mxu1 %v7583_v45 }
 0x826   :  { %3730 = vmatprep.mubr.bf16.mxu0 %v8123_v37  ;;  %3771 = vmatprep.mubr.bf16.mxu1 %v8123_v37 }
 0x828   :  { %3701 = vmatpush1.bf16.msra.mxu0 %v7591_v59  ;;  %3742 = vmatpush1.bf16.msra.mxu1 %v7597_v51 }
 0x829   :  { %3702 = vmatprep.subr.bf16.mxu0 %v7603_v13  ;;  %3743 = vmatprep.subr.bf16.mxu1 %v7609_v44 }
 0x82c   :  { %3703 = vmatpush1.bf16.msra.mxu0 %v7615_v50  ;;  %3744 = vmatpush1.bf16.msra.mxu1 %v7621_v2 }
 0x82d   :  { %3704 = vmatprep.subr.bf16.mxu0 %v7627_v10  ;;  %3745 = vmatprep.subr.bf16.mxu1 %v7633_v33 }
 0x830   :  { %3705 = vmatpush1.bf16.msra.mxu0 %v7639_v58  ;;  %3746 = vmatpush1.bf16.msra.mxu1 %v7645_v19 }
 0x831   :  { %3706 = vmatprep.subr.bf16.mxu0 %v8129_v56  ;;  %3747 = vmatprep.subr.bf16.mxu1 %v8130_v14 }
 0x834   :  { %3707 = vmatpush1.bf16.msra.mxu0 %v8131_v55  ;;  %3748 = vmatpush1.bf16.msra.mxu1 %v8132_v3 }
 0x835   :  { %3708 = vmatprep.subr.bf16.mxu0 %v8133_v48  ;;  %3749 = vmatprep.subr.bf16.mxu1 %v8134_v28 }
 0x838   :  { %3709 = vmatpush1.bf16.msra.mxu0 %v8135_v57  ;;  %3750 = vmatpush1.bf16.msra.mxu1 %v8136_v11  ;;  %v8147_v57 = vld [vmem:[#allocation34_spill] sm:$0xff] }
 0x839   :  { %3710 = vmatprep.subr.bf16.mxu0 %v8137_v9  ;;  %3751 = vmatprep.subr.bf16.mxu1 %v8138_v12 }
 0x83c   :  { %3711 = vmatpush1.bf16.msra.mxu0 %v8139_v20  ;;  %3752 = vmatpush1.bf16.msra.mxu1 %v8140_v1 }
 0x83d   :  { %3712 = vmatprep.subr.bf16.mxu0 %v8141_v62  ;;  %3753 = vmatprep.subr.bf16.mxu1 %v8142_v5  ;;  %v8148_v5 = vld [vmem:[#allocation35_spill] sm:$0xff] }
 0x840   :  { %3713 = vmatpush1.bf16.msra.mxu0 %v8143_v29  ;;  %3754 = vmatpush1.bf16.msra.mxu1 %v8144_v61  ;;  %v8149_v61 = vld [vmem:[#allocation33_spill] sm:$0xff] }
 0x841   :  { %3814 = vmatprep.subr.bf16.mxu0 %v7541_v26  ;;  %3855 = vmatprep.subr.bf16.mxu1 %v7547_v25 }
 0x8e3   :  { %v3616_v56 = vpop.f32.mrf.mxu0  ;;  %v3657_v14 = vpop.f32.mrf.mxu1 }
 0x8e4   :  { %v3664_v55 = vadd.f32 %v3616_v56, %v7333_v18  ;;  %v3666_v53 = vadd.f32 %v3657_v14, %v8149_v61  ;;  %v7757_v56 = vld [vmem:[%s7994_s9 + $0x20] ss:$16 sps:$4 sm:$0xff]   ;;  %v7763_v14 = vld [vmem:[%s7994_s9 + $0x28] ss:$16 sps:$4 sm:$0xff]  }
 0x8e5   :  { %v3618_v3 = vpop.f32.mrf.mxu0  ;;  %v3659_v48 = vpop.f32.mrf.mxu1 }
 0x8e6   :  { %v4654_v28 = vmul.f32 -1.442695, %v3664_v55  ;;  %v3665_v11 = vadd.f32 %v3618_v3, %v8147_v57  ;;  %v3667_v29 = vadd.f32 %v3659_v48, %v8148_v5  ;;  %v7769_v55 = vld [vmem:[%s7994_s9 + $0x4] ss:$16 sps:$4 sm:$0xff]   ;;  %v7775_v3 = vld [vmem:[%s7994_s9 + $0xc] ss:$16 sps:$4 sm:$0xff]  }
 0x8e7   :  { %v3620_v9 = vpop.f32.mrf.mxu0  ;;  %v3661_v12 = vpop.f32.mrf.mxu1  ;;  %v7781_v48 = vld [vmem:[%s7994_s9] ss:$16 sps:$4 sm:$0xff]  }
 0x8e8   :  { %5630 = vpow2.f32 %v4654_v28  ;;  %v4655_v20 = vmul.f32 -1.442695, %v3665_v11  ;;  %v4656_v8 = vmul.f32 -1.442695, %v3667_v29  ;;  %v7787_v28 = vld [vmem:[%s7994_s9 + $0x8] ss:$16 sps:$4 sm:$0xff]  }
 0x8e9   :  { %v3621_v1 = vpop.f32.mrf.mxu0  ;;  %v3662_v62 = vpop.f32.mrf.mxu1  ;;  %v8150_v9 = vld [vmem:[#allocation36_spill] sm:$0xff]  ;;  %v8151_v5 = vld [vmem:[#allocation38_spill] sm:$0xff] }
 0x8ea   :  { %5632 = vpow2.f32 %v4655_v20 }
 0x8eb   :  { %5634 = vtanh.f32 %v3666_v53 }
 0x8ec   :  { %5636 = vpow2.f32 %v4656_v8 }
 0x8f5   :  { %v5631_v52 = vpop.eup %5630 }
 0x8f6   :  { %v3671_v63 = vadd.f32 1.0, %v5631_v52 }
 0x8f7   :  { %v5633_v18 = vpop.eup %5632 }
 0x8f8   :  { %5638 = vrcp.f32 %v3671_v63  ;;  %v3677_v40 = vadd.f32 1.0, %v5633_v18  ;;  %v5635_v39 = vpop.eup %5634  ;;  %v8152_v18 = vld [vmem:[#allocation39_spill] sm:$0xff] }
 0x8f9   :  { %v5637_v41 = vpop.eup %5636 }
 0x8fa   :  { %5640 = vrcp.f32 %v3677_v40  ;;  %v3684_v60 = vadd.f32 1.0, %v5637_v41  ;;  %v8153_v40 = vld [vmem:[#allocation37_spill] sm:$0xff] }
 0x8fc   :  { %5642 = vrcp.f32 %v3684_v60 }
 0x905   :  { %v5639_v49 = vpop.eup %5638 }
 0x906   :  { %v3688_v32 = vmul.f32 %v5639_v49, %v5635_v39 }
 0x907   :  { %v5641_v6 = vpop.eup %5640 }
 0x908   :  { %v3687_v4 = vmul.f32 %v5641_v6, %v7555_v22  ;;  %v7733_v22 = vld [vmem:[%s7994_s9 + $0x40] ss:$16 sps:$4 sm:$0xff]   ;;  %s5841_s9 = smov [#allocation6]  }
 0x909   :  { %v5643_v23 = vpop.eup %5642  ;;  %s4308_s18 = sshll.u32 %s5841_s9, 4  ;;  %s4309_s18 = int_to_ptr.vmem [resolvable:$true] %s4308_s18 }
 0x90a   :  { %v7671_v31 = vadd.f32 %v3688_v32, %v3687_v4 }
 0x90c   :  { %5644 = vtanh.f32 %v7671_v31 }
 0x919   :  { %v5645_v35 = vpop.eup %5644 }
 0x91a   :  { %v7674_v54 = vmul.f32 %v5645_v35, %v5643_v23 }
 0x91c   :  { %v3697_v42 = vpack.c.bf16 %v7674_v54, %v7674_v54 }
 0x91e   :  { %3731 = vmatmul.mubr.bf16.vlgmr.msra.gmra.mxu0 %v3697_v42  ;;  %3772 = vmatmul.mubr.bf16.vlgmr.msra.gmra.mxu1 %v3697_v42 }
 0x91f   :  { %3815 = vmatpush1.bf16.msra.mxu0 %v7565_v46  ;;  %3856 = vmatpush1.bf16.msra.mxu1 %v7571_v16 }
 0x920   :  { %3816 = vmatprep.subr.bf16.mxu0 %v7577_v7  ;;  %3857 = vmatprep.subr.bf16.mxu1 %v7583_v45 }
 0x921   :  { %3846 = vmatprep.mubr.bf16.mxu0 %v8123_v37  ;;  %3887 = vmatprep.mubr.bf16.mxu1 %v8123_v37 }
 0x923   :  { %3817 = vmatpush1.bf16.msra.mxu0 %v7591_v59  ;;  %3858 = vmatpush1.bf16.msra.mxu1 %v7597_v51 }
 0x924   :  { %3818 = vmatprep.subr.bf16.mxu0 %v7603_v13  ;;  %3859 = vmatprep.subr.bf16.mxu1 %v7609_v44 }
 0x927   :  { %3819 = vmatpush1.bf16.msra.mxu0 %v7615_v50  ;;  %3860 = vmatpush1.bf16.msra.mxu1 %v7621_v2 }
 0x928   :  { %3820 = vmatprep.subr.bf16.mxu0 %v7627_v10  ;;  %3861 = vmatprep.subr.bf16.mxu1 %v7633_v33 }
 0x92b   :  { %3821 = vmatpush1.bf16.msra.mxu0 %v7639_v58  ;;  %3862 = vmatpush1.bf16.msra.mxu1 %v7645_v19 }
 0x92c   :  { %3822 = vmatprep.subr.bf16.mxu0 %v7697_v0  ;;  %3863 = vmatprep.subr.bf16.mxu1 %v7703_v47 }
 0x92f   :  { %3823 = vmatpush1.bf16.msra.mxu0 %v7709_v38  ;;  %3864 = vmatpush1.bf16.msra.mxu1 %v7715_v17 }
 0x930   :  { %3824 = vmatprep.subr.bf16.mxu0 %v7721_v21  ;;  %3865 = vmatprep.subr.bf16.mxu1 %v7727_v24 }
 0x933   :  { %3825 = vmatpush1.bf16.msra.mxu0 %v7733_v22  ;;  %3866 = vmatpush1.bf16.msra.mxu1 %v7739_v43 }
 0x934   :  { %3826 = vmatprep.subr.bf16.mxu0 %v7745_v15  ;;  %3867 = vmatprep.subr.bf16.mxu1 %v7751_v34 }
 0x937   :  { %3827 = vmatpush1.bf16.msra.mxu0 %v7757_v56  ;;  %3868 = vmatpush1.bf16.msra.mxu1 %v7763_v14 }
 0x938   :  { %3828 = vmatprep.subr.bf16.mxu0 %v7769_v55  ;;  %3869 = vmatprep.subr.bf16.mxu1 %v7775_v3 }
 0x93b   :  { %3829 = vmatpush1.bf16.msra.mxu0 %v7781_v48  ;;  %3870 = vmatpush1.bf16.msra.mxu1 %v7787_v28 }
 0x93c   :  { %3930 = vmatprep.subr.bf16.mxu0 %v7541_v26  ;;  %3971 = vmatprep.subr.bf16.mxu1 %v7547_v25 }
 0x9de   :  { %v3732_v57 = vpop.f32.mrf.mxu0  ;;  %v3773_v11 = vpop.f32.mrf.mxu1 }
 0x9df   :  { %v3780_v12 = vadd.f32 %v3732_v57, %v8150_v9  ;;  %v3782_v25 = vadd.f32 %v3773_v11, %v8153_v40  ;;  %v5563_v40 = vld [vmem:[%s7997_s12 + $0x10] sm:$0xff]  }
 0x9e0   :  { %v3734_v20 = vpop.f32.mrf.mxu0  ;;  %v3775_v1 = vpop.f32.mrf.mxu1 }
 0x9e1   :  { %v4657_v62 = vmul.f32 -1.442695, %v3780_v12  ;;  %v3781_v29 = vadd.f32 %v3734_v20, %v8151_v5  ;;  %v3783_v26 = vadd.f32 %v3775_v1, %v8152_v18  ;;  %v5560_v18 = vld [vmem:[%s7997_s12 + $0x28] sm:$0xff]  }
 0x9e2   :  { %v3736_v61 = vpop.f32.mrf.mxu0  ;;  %v3777_v53 = vpop.f32.mrf.mxu1 }
 0x9e3   :  { %5646 = vpow2.f32 %v4657_v62  ;;  %v4658_v8 = vmul.f32 -1.442695, %v3781_v29  ;;  %v4659_v39 = vmul.f32 -1.442695, %v3783_v26  ;;  %v5561_v26 = vld [vmem:[%s7997_s12 + $0x20] sm:$0xff]  }
 0x9e4   :  { %v3737_v52 = vpop.f32.mrf.mxu0  ;;  %v3778_v63 = vpop.f32.mrf.mxu1 }
 0x9e5   :  { %5648 = vpow2.f32 %v4658_v8  ;;  %v5559_v8 = vld [vmem:[%s7997_s12 + $0x30] sm:$0xff]   ;;  %v8158_v52 = vld [vmem:[#allocation48_spill] sm:$0xff] }
 0x9e6   :  { %5650 = vtanh.f32 %v3782_v25  ;;  %v4051_v63 = vpack.c.bf16 %v7456_v30, %v8158_v52  ;;  %v5562_v30 = vld [vmem:[%s7997_s12 + $0x18] sm:$0xff]   ;;  %v5564_v25 = vld [vmem:[%s7997_s12 + $0x8] sm:$0xff]  }
 0x9e7   :  { %5652 = vpow2.f32 %v4659_v39  ;;  %v5565_v39 = vld [vmem:[%s7997_s12] sm:$0xff]  }
 0x9f0   :  { %v5647_v41 = vpop.eup %5646 }
 0x9f1   :  { %v3787_v49 = vadd.f32 1.0, %v5647_v41  ;;  %v4052_v41 = vpack.c.bf16 %v7558_v27, %v7502_v36  ;;  %v8161_v27 = vld [vmem:[#allocation47_spill] sm:$0xff] }
 0x9f2   :  { %v5649_v32 = vpop.eup %5648 }
 0x9f3   :  { %5654 = vrcp.f32 %v3787_v49  ;;  %v3793_v6 = vadd.f32 1.0, %v5649_v32  ;;  %v5651_v60 = vpop.eup %5650 }
 0x9f4   :  { %v5653_v4 = vpop.eup %5652 }
 0x9f5   :  { %5656 = vrcp.f32 %v3793_v6  ;;  %v3800_v57 = vadd.f32 1.0, %v5653_v4 }
 0x9f7   :  { %5658 = vrcp.f32 %v3800_v57  ;;  %v8160_v57 = vld [vmem:[#allocation46_spill] sm:$0xff] }
 0xa00   :  { %v5655_v23 = vpop.eup %5654 }
 0xa01   :  { %v3804_v35 = vmul.f32 %v5655_v23, %v5651_v60  ;;  %v8159_v60 = vld [vmem:[#allocation44_spill] sm:$0xff] }
 0xa02   :  { %v5657_v42 = vpop.eup %5656 }
 0xa03   :  { %v3803_v9 = vmul.f32 %v5657_v42, %v7671_v31  ;;  %v8156_v31 = vld [vmem:[#allocation43_spill] sm:$0xff] }
 0xa04   :  { %v5659_v11 = vpop.eup %5658 }
 0xa05   :  { %v7797_v12 = vadd.f32 %v3804_v35, %v3803_v9 }
 0xa07   :  { %5660 = vtanh.f32 %v7797_v12 }
 0xa14   :  { %v5661_v20 = vpop.eup %5660 }
 0xa15   :  { %v7800_v1 = vmul.f32 %v5661_v20, %v5659_v11 }
 0xa17   :  { %v3813_v62 = vpack.c.bf16 %v7800_v1, %v7800_v1  ;;  %v4053_v49 = vpack.c.bf16 %v7800_v1, %v7674_v54  ;;  %v8162_v1 = vld [vmem:[#allocation45_spill] sm:$0xff] }
 0xa19   :  { %3847 = vmatmul.mubr.bf16.vlgmr.msra.gmra.mxu0 %v3813_v62  ;;  %3888 = vmatmul.mubr.bf16.vlgmr.msra.gmra.mxu1 %v3813_v62 }
 0xa1a   :  { %3931 = vmatpush1.bf16.msra.mxu0 %v7565_v46  ;;  %3972 = vmatpush1.bf16.msra.mxu1 %v7571_v16 }
 0xa1b   :  { %3932 = vmatprep.subr.bf16.mxu0 %v7577_v7  ;;  %3973 = vmatprep.subr.bf16.mxu1 %v7583_v45  ;;  %v8154_v7 = vld [vmem:[#allocation40_spill] sm:$0xff] }
 0xa1c   :  { %3962 = vmatprep.mubr.bf16.mxu0 %v8123_v37  ;;  %4003 = vmatprep.mubr.bf16.mxu1 %v8123_v37  ;;  %v5558_v37 = vld [vmem:[%s7997_s12 + $0x38] sm:$0xff]  }
 0xa1e   :  { %3933 = vmatpush1.bf16.msra.mxu0 %v7591_v59  ;;  %3974 = vmatpush1.bf16.msra.mxu1 %v7597_v51 }
 0xa1f   :  { %3934 = vmatprep.subr.bf16.mxu0 %v7603_v13  ;;  %3975 = vmatprep.subr.bf16.mxu1 %v7609_v44  ;;  %v8155_v44 = vld [vmem:[#allocation42_spill] sm:$0xff] }
 0xa22   :  { %3935 = vmatpush1.bf16.msra.mxu0 %v7615_v50  ;;  %3976 = vmatpush1.bf16.msra.mxu1 %v7621_v2 }
 0xa23   :  { %3936 = vmatprep.subr.bf16.mxu0 %v7627_v10  ;;  %3977 = vmatprep.subr.bf16.mxu1 %v7633_v33 }
 0xa26   :  { %3937 = vmatpush1.bf16.msra.mxu0 %v7639_v58  ;;  %3978 = vmatpush1.bf16.msra.mxu1 %v7645_v19 }
 0xa27   :  { %3938 = vmatprep.subr.bf16.mxu0 %v7697_v0  ;;  %3979 = vmatprep.subr.bf16.mxu1 %v7703_v47  ;;  %v8157_v47 = vld [vmem:[#allocation41_spill] sm:$0xff] }
 0xa2a   :  { %3939 = vmatpush1.bf16.msra.mxu0 %v7709_v38  ;;  %3980 = vmatpush1.bf16.msra.mxu1 %v7715_v17 }
 0xa2b   :  { %3940 = vmatprep.subr.bf16.mxu0 %v7721_v21  ;;  %3981 = vmatprep.subr.bf16.mxu1 %v7727_v24 }
 0xa2e   :  { %3941 = vmatpush1.bf16.msra.mxu0 %v7733_v22  ;;  %3982 = vmatpush1.bf16.msra.mxu1 %v7739_v43 }
 0xa2f   :  { %3942 = vmatprep.subr.bf16.mxu0 %v7745_v15  ;;  %3983 = vmatprep.subr.bf16.mxu1 %v7751_v34 }
 0xa32   :  { %3943 = vmatpush1.bf16.msra.mxu0 %v7757_v56  ;;  %3984 = vmatpush1.bf16.msra.mxu1 %v7763_v14 }
 0xa33   :  { %3944 = vmatprep.subr.bf16.mxu0 %v7769_v55  ;;  %3985 = vmatprep.subr.bf16.mxu1 %v7775_v3 }
 0xa36   :  { %3945 = vmatpush1.bf16.msra.mxu0 %v7781_v48  ;;  %3986 = vmatpush1.bf16.msra.mxu1 %v7787_v28 }
 0xa37   :  { %5247 = vmatprep.subr.bf16.mxu0 %v5558_v37 }
 0xad9   :  { %v3848_v46 = vpop.f32.mrf.mxu0  ;;  %v3889_v16 = vpop.f32.mrf.mxu1 }
 0xada   :  { %v3896_v45 = vadd.f32 %v3848_v46, %v8154_v7  ;;  %v3898_v38 = vadd.f32 %v3889_v16, %v8157_v47 }
 0xadb   :  { %v3850_v59 = vpop.f32.mrf.mxu0  ;;  %v3891_v51 = vpop.f32.mrf.mxu1 }
 0xadc   :  { %v4660_v13 = vmul.f32 -1.442695, %v3896_v45  ;;  %v3897_v50 = vadd.f32 %v3850_v59, %v8155_v44  ;;  %v3899_v0 = vadd.f32 %v3891_v51, %v8156_v31  ;;  %v8163_v51 = vlaneseq  ;;  %v4666_v44 = vld [vmem:[%s7998_s13] ss:$0 sm:$0xff] }
 0xadd   :  { %v3852_v2 = vpop.f32.mrf.mxu0  ;;  %v3893_v10 = vpop.f32.mrf.mxu1 }
 0xade   :  { %5662 = vpow2.f32 %v4660_v13  ;;  %v4661_v33 = vmul.f32 -1.442695, %v3897_v50  ;;  %v4662_v17 = vmul.f32 -1.442695, %v3899_v0  ;;  %v7883_v13 = vand.u32 127, %v8163_v51 }
 0xadf   :  { %v3853_v58 = vpop.f32.mrf.mxu0  ;;  %v3894_v19 = vpop.f32.mrf.mxu1 }
 0xae0   :  { %5664 = vpow2.f32 %v4661_v33  ;;  %vm4193_vm3 = vcmp.lt.s32.totalorder %v7883_v13, 6 }
 0xae1   :  { %5666 = vtanh.f32 %v3898_v38 }
 0xae2   :  { %5668 = vpow2.f32 %v4662_v17 }
 0xaeb   :  { %v5663_v21 = vpop.eup %5662 }
 0xaec   :  { %v3903_v24 = vadd.f32 1.0, %v5663_v21 }
 0xaed   :  { %v5665_v22 = vpop.eup %5664 }
 0xaee   :  { %5670 = vrcp.f32 %v3903_v24  ;;  %v3909_v43 = vadd.f32 1.0, %v5665_v22  ;;  %v5667_v15 = vpop.eup %5666 }
 0xaef   :  { %v5669_v34 = vpop.eup %5668 }
 0xaf0   :  { %5672 = vrcp.f32 %v3909_v43  ;;  %v3916_v3 = vadd.f32 1.0, %v5669_v34 }
 0xaf2   :  { %5674 = vrcp.f32 %v3916_v3 }
 0xafb   :  { %v5671_v56 = vpop.eup %5670 }
 0xafc   :  { %v3920_v14 = vmul.f32 %v5671_v56, %v5667_v15 }
 0xafd   :  { %v5673_v55 = vpop.eup %5672 }
 0xafe   :  { %v3919_v48 = vmul.f32 %v5673_v55, %v7797_v12 }
 0xaff   :  { %v5675_v5 = vpop.eup %5674 }
 0xb00   :  { %v7844_v28 = vadd.f32 %v3920_v14, %v3919_v48 }
 0xb02   :  { %5676 = vtanh.f32 %v7844_v28 }
 0xb0f   :  { %v5677_v29 = vpop.eup %5676 }
 0xb10   :  { %v7847_v61 = vmul.f32 %v5677_v29, %v5675_v5 }
 0xb12   :  { %v3929_v53 = vpack.c.bf16 %v7847_v61, %v7847_v61 }
 0xb14   :  { %3963 = vmatmul.mubr.bf16.vlgmr.msra.gmra.mxu0 %v3929_v53  ;;  %4004 = vmatmul.mubr.bf16.vlgmr.msra.gmra.mxu1 %v3929_v53 }
 0xb15   :  { %5248 = vmatpush3.bf16.msra.mxu0 %v5558_v37  ;;  %5263 = vmatprep.mubr.bf16.mxu0 %v4051_v63 }
 0xb16   :  { %5249 = vmatprep.subr.bf16.mxu0 %v5559_v8 }
 0xb19   :  { %5250 = vmatpush3.bf16.msra.mxu0 %v5559_v8 }
 0xb1a   :  { %5251 = vmatprep.subr.bf16.mxu0 %v5560_v18 }
 0xb1d   :  { %5252 = vmatpush3.bf16.msra.mxu0 %v5560_v18 }
 0xb1e   :  { %5253 = vmatprep.subr.bf16.mxu0 %v5561_v26 }
 0xb21   :  { %5254 = vmatpush3.bf16.msra.mxu0 %v5561_v26 }
 0xb22   :  { %5255 = vmatprep.subr.bf16.mxu0 %v5562_v30 }
 0xb25   :  { %5256 = vmatpush3.bf16.msra.mxu0 %v5562_v30 }
 0xb26   :  { %5257 = vmatprep.subr.bf16.mxu0 %v5563_v40 }
 0xb29   :  { %5258 = vmatpush3.bf16.msra.mxu0 %v5563_v40 }
 0xb2a   :  { %5259 = vmatprep.subr.bf16.mxu0 %v5564_v25 }
 0xb2d   :  { %5260 = vmatpush3.bf16.msra.mxu0 %v5564_v25 }
 0xb2e   :  { %5261 = vmatprep.subr.bf16.mxu0 %v5565_v39 }
 0xb31   :  { %5262 = vmatpush3.bf16.msra.mxu0 %v5565_v39 }
 0xb34   :  { %5264 = vmatmul.mubr.bf16.vlgmr.msra.gmra.mxu0 %v4052_v41 }
 0xb35   :  { %5267 = vmatprep.mubr.bf16.mxu0 %v4053_v49 }
 0xbd4   :  { %v3964_v32 = vpop.f32.mrf.mxu0  ;;  %v4005_v6 = vpop.f32.mrf.mxu1 }
 0xbd5   :  { %v4012_v4 = vadd.f32 %v3964_v32, %v8159_v60  ;;  %v4014_v37 = vadd.f32 %v4005_v6, %v8162_v1 }
 0xbd6   :  { %v3966_v23 = vpop.f32.mrf.mxu0  ;;  %v4007_v35 = vpop.f32.mrf.mxu1 }
 0xbd7   :  { %v4663_v42 = vmul.f32 -1.442695, %v4012_v4  ;;  %v4013_v9 = vadd.f32 %v3966_v23, %v8160_v57  ;;  %v4015_v54 = vadd.f32 %v4007_v35, %v8161_v27 }
 0xbd8   :  { %v3968_v12 = vpop.f32.mrf.mxu0  ;;  %v4009_v11 = vpop.f32.mrf.mxu1 }
 0xbd9   :  { %5678 = vpow2.f32 %v4663_v42  ;;  %v4664_v20 = vmul.f32 -1.442695, %v4013_v9  ;;  %v4665_v46 = vmul.f32 -1.442695, %v4015_v54 }
 0xbda   :  { %v3969_v62 = vpop.f32.mrf.mxu0  ;;  %v4010_v36 = vpop.f32.mrf.mxu1 }
 0xbdb   :  { %5680 = vpow2.f32 %v4664_v20 }
 0xbdc   :  { %5682 = vtanh.f32 %v4014_v37 }
 0xbdd   :  { %5684 = vpow2.f32 %v4665_v46 }
 0xbe6   :  { %v5679_v16 = vpop.eup %5678 }
 0xbe7   :  { %v4019_v7 = vadd.f32 1.0, %v5679_v16 }
 0xbe8   :  { %v5681_v45 = vpop.eup %5680 }
 0xbe9   :  { %5686 = vrcp.f32 %v4019_v7  ;;  %v4025_v59 = vadd.f32 1.0, %v5681_v45  ;;  %v5683_v50 = vpop.eup %5682 }
 0xbea   :  { %v5685_v10 = vpop.eup %5684 }
 0xbeb   :  { %5688 = vrcp.f32 %v4025_v59  ;;  %v4032_v17 = vadd.f32 1.0, %v5685_v10 }
 0xbed   :  { %5690 = vrcp.f32 %v4032_v17 }
 0xbf4   :  { %v5265_v2 = vpop.f32.mrf.mxu0 }
 0xbf5   :  { %v7889_v33 = vadd.f32 %v5265_v2, %v4666_v44 }
 0xbf6   :  { %v5687_v58 = vpop.eup %5686  ;;  %v4160_v19 = vpop.f32.mrf.mxu0 }
 0xbf7   :  { %v4036_v31 = vmul.f32 %v5687_v58, %v5683_v50  ;;  %v7891_v0 = vadd.f32 %v4666_v44, %v4160_v19  ;;  %v4196_v47 = vsel %vm4193_vm3, %v7889_v33, -1e+30 }
 0xbf8   :  { %v5689_v38 = vpop.eup %5688  ;;  %4206 = vmax.xlane.f32.xlu1 %v4196_v47  ;;  %v5266_v21 = vpop.f32.mrf.mxu0 }
 0xbf9   :  { %v4035_v24 = vmul.f32 %v5689_v38, %v7844_v28  ;;  %v7897_v22 = vadd.f32 %v5266_v21, %v4666_v44  ;;  %v4194_v43 = vsel %vm4193_vm3, %v7891_v0, -1e+30 }
 0xbfa   :  { %v4163_v15 = vpop.f32.mrf.mxu0  ;;  %4202 = vmax.xlane.f32.xlu0 %v4194_v43  ;;  %v5691_v3 = vpop.eup %5690 }
 0xbfb   :  { %v4037_v34 = vadd.f32 %v4036_v31, %v4035_v24  ;;  %v7902_v56 = vadd.f32 %v4666_v44, %v4163_v15  ;;  %v4197_v14 = vsel %vm4193_vm3, %v7897_v22, -1e+30 }
 0xbfc   :  { %4208 = vmax.xlane.f32.xlu1 %v4197_v14 }
 0xbfd   :  { %4042 = vst [vmem:[#allocation6] sm:$0xff] %v4037_v34  ;;  %v4195_v55 = vsel %vm4193_vm3, %v7902_v56, -1e+30  ;;  %5692 = vtanh.f32 %v4037_v34 }
 0xbfe   :  { %4204 = vmax.xlane.f32.xlu0 %v4195_v55 }
 0xc0a   :  { %v5693_v48 = vpop.eup %5692 }
 0xc0b   :  { %v4039_v28 = vmul.f32 %v5693_v48, %v5691_v3 }
 0xc0d   :  { %v4054_v5 = vpack.c.bf16 %v4039_v28, %v7847_v61  ;;  %4041 = vst [vmem:[#allocation4] sm:$0xff] %v4039_v28 }
 0xc0f   :  { %5268 = vmatmul.mubr.bf16.gmra.mxu0 %v4054_v5 }
 0xc81   :  { %v4207_v53 = vpop.xlane.xlu1 %4206 }
 0xc82   :  { %v4220_v63 = vsub.f32 %v4196_v47, %v4207_v53 }
 0xc83   :  { %v4203_v29 = vpop.xlane.xlu0 %4202 }
 0xc84   :  { %v4218_v8 = vsub.f32 %v4194_v43, %v4203_v29  ;;  %v4230_v40 = vmul.f32 1.442695, %v4220_v63 }
 0xc85   :  { %v4209_v30 = vpop.xlane.xlu1 %4208 }
 0xc86   :  { %v4226_v18 = vmul.f32 1.442695, %v4218_v8  ;;  %v4221_v25 = vsub.f32 %v4197_v14, %v4209_v30 }
 0xc87   :  { %v4205_v52 = vpop.xlane.xlu0 %4204 }
 0xc88   :  { %v4219_v26 = vsub.f32 %v4195_v55, %v4205_v52  ;;  %5694 = vpow2.f32 %v4226_v18  ;;  %v4232_v61 = vmul.f32 1.442695, %v4221_v25 }
 0xc89   :  { %5696 = vpow2.f32 %v4230_v40 }
 0xc8a   :  { %v4228_v39 = vmul.f32 1.442695, %v4219_v26 }
 0xc8c   :  { %5698 = vpow2.f32 %v4228_v39 }
 0xc8d   :  { %5700 = vpow2.f32 %v4232_v61 }
 0xc95   :  { %v5695_v12 = vpop.eup %5694 }
 0xc96   :  { %v5697_v20 = vpop.eup %5696 }
 0xc99   :  { %v5699_v62 = vpop.eup %5698 }
 0xc9a   :  { %v5701_v36 = vpop.eup %5700 }
 0xccf   :  { %v5269_v41 = vpop.f32.mrf.mxu0 }
 0xcd0   :  { %v7913_v60 = vadd.f32 %v5269_v41, %v4666_v44 }
 0xcd1   :  { %v4176_v49 = vpop.f32.mrf.mxu0 }
 0xcd2   :  { %v7911_v32 = vadd.f32 %v4666_v44, %v4176_v49  ;;  %v4200_v9 = vsel %vm4193_vm3, %v7913_v60, -1e+30 }
 0xcd3   :  { %v5270_v6 = vpop.f32.mrf.mxu0 }
 0xcd4   :  { %v4198_v4 = vsel %vm4193_vm3, %v7911_v32, -1e+30  ;;  %v7920_v42 = vadd.f32 %v5270_v6, %v4666_v44 }
 0xcd5   :  { %v4179_v23 = vpop.f32.mrf.mxu0  ;;  %4210 = vmax.xlane.f32.xlu0 %v4198_v4 }
 0xcd6   :  { %v7918_v35 = vadd.f32 %v4666_v44, %v4179_v23  ;;  %v4201_v11 = vsel %vm4193_vm3, %v7920_v42, -1e+30 }
 0xcd8   :  { %v4199_v57 = vsel %vm4193_vm3, %v7918_v35, -1e+30 }
 0xcd9   :  { %4212 = vmax.xlane.f32.xlu1 %v4199_v57  ;;  %4214 = vmax.xlane.f32.xlu0 %v4200_v9 }
 0xcdd   :  { %4216 = vmax.xlane.f32.xlu1 %v4201_v11  ;;  %4242 = vadd.xlane.f32.xlu0 %v5695_v12 }
 0xce1   :  { %4246 = vadd.xlane.f32.xlu0 %v5697_v20  ;;  %4244 = vadd.xlane.f32.xlu1 %v5699_v62 }
 0xce5   :  { %4248 = vadd.xlane.f32.xlu1 %v5701_v36 }
 0xd5e   :  { %v4211_v27 = vpop.xlane.xlu0 %4210 }
 0xd5f   :  { %v4222_v54 = vsub.f32 %v4198_v4, %v4211_v27 }
 0xd61   :  { %v4234_v1 = vmul.f32 1.442695, %v4222_v54 }
 0xd62   :  { %v4213_v37 = vpop.xlane.xlu1 %4212  ;;  %v4215_v46 = vpop.xlane.xlu0 %4214 }
 0xd63   :  { %5702 = vpow2.f32 %v4234_v1  ;;  %v4223_v16 = vsub.f32 %v4199_v57, %v4213_v37  ;;  %v4224_v7 = vsub.f32 %v4200_v9, %v4215_v46 }
 0xd65   :  { %v4236_v45 = vmul.f32 1.442695, %v4223_v16  ;;  %v4238_v59 = vmul.f32 1.442695, %v4224_v7 }
 0xd66   :  { %v4217_v51 = vpop.xlane.xlu1 %4216  ;;  %v4243_v44 = vpop.xlane.xlu0 %4242 }
 0xd67   :  { %5704 = vpow2.f32 %v4236_v45  ;;  %v4225_v50 = vsub.f32 %v4201_v11, %v4217_v51 }
 0xd68   :  { %5706 = vpow2.f32 %v4238_v59 }
 0xd69   :  { %v4240_v2 = vmul.f32 1.442695, %v4225_v50  ;;  %5708 = vrcp.f32 %v4243_v44 }
 0xd6a   :  { %v4245_v10 = vpop.xlane.xlu1 %4244  ;;  %v4247_v58 = vpop.xlane.xlu0 %4246 }
 0xd6b   :  { %5710 = vpow2.f32 %v4240_v2 }
 0xd6c   :  { %5712 = vrcp.f32 %v4245_v10 }
 0xd6d   :  { %5714 = vrcp.f32 %v4247_v58 }
 0xd6e   :  { %v4249_v19 = vpop.xlane.xlu1 %4248 }
 0xd6f   :  { %5716 = vrcp.f32 %v4249_v19 }
 0xd70   :  { %v5703_v31 = vpop.eup %5702 }
 0xd71   :  { %4250 = vadd.xlane.f32.xlu0 %v5703_v31 }
 0xd74   :  { %v5705_v47 = vpop.eup %5704 }
 0xd75   :  { %v5707_v38 = vpop.eup %5706  ;;  %4252 = vadd.xlane.f32.xlu1 %v5705_v47 }
 0xd76   :  { %v5709_v17 = vpop.eup %5708  ;;  %4254 = vadd.xlane.f32.xlu0 %v5707_v38 }
 0xd77   :  { %v4266_v21 = vmul.f32 %v5709_v17, %v5695_v12 }
 0xd78   :  { %v5711_v24 = vpop.eup %5710 }
 0xd79   :  { %v5713_v43 = vpop.eup %5712  ;;  %v4274_v15 = vsel %vm4193_vm3, %v4266_v21, %v7891_v0  ;;  %4256 = vadd.xlane.f32.xlu1 %v5711_v24 }
 0xd7a   :  { %v5715_v34 = vpop.eup %5714  ;;  %4282 = vst [vmem:[%s7999_s14] sm:$0xff] %v4274_v15  ;;  %v4267_v14 = vmul.f32 %v5713_v43, %v5699_v62 }
 0xd7b   :  { %v4268_v55 = vmul.f32 %v5715_v34, %v5697_v20 }
 0xd7c   :  { %v5717_v3 = vpop.eup %5716  ;;  %v4275_v48 = vsel %vm4193_vm3, %v4267_v14, %v7902_v56 }
 0xd7d   :  { %4283 = vst [vmem:[%s7999_s14 + $0x8] sm:$0xff] %v4275_v48  ;;  %v4276_v0 = vsel %vm4193_vm3, %v4268_v55, %v7889_v33  ;;  %v4269_v28 = vmul.f32 %v5717_v3, %v5701_v36 }
 0xd7e   :  { %4284 = vst [vmem:[%s7999_s14 + $0x10] sm:$0xff] %v4276_v0 }
 0xd7f   :  { %v4277_v5 = vsel %vm4193_vm3, %v4269_v28, %v7897_v22 }
 0xd80   :  { %4285 = vst [vmem:[%s7999_s14 + $0x18] sm:$0xff] %v4277_v5 }
 0xd81   :  { %5806 = shalt.err (!%p5803_p4)
}
 0xd82   :  { %4301 = dma.vmem_to_hbm [thread:$0]  %s4299_s1, 128, %s8000_s15, [#allocation5]  }
 0xd83   :  { %s5815_s22 = scalar_lea.vmem %s4309_s18, 128  ;;  %p5820_p6 = scmp.lt.s32.totalorder %s4309_s18, %s4309_s18 }
 0xd84   :  { %p5816_p5 = scmp.ne.s32.totalorder %s4309_s18, %s5815_s22  ;;  %p5821_p7 = scmp.lt.s32.totalorder %s5815_s22, %s5815_s22 }
 0xd86   :  { %p5822_p8 = por %p5821_p7, %p5820_p6 }
 0xd88   :  { %p5823_p9 = pnand %p5822_p8, %p5816_p5 }
 0xd8a   :  { %5826 = shalt.err (!%p5823_p9)
}
 0xd8b   :  { %4311 = dma.vmem_to_hbm [thread:$0]  %s4309_s18, 128, %s8001_s16, [#allocation7]  }
 0xdfa   :  { %v4251_v33 = vpop.xlane.xlu0 %4250 }
 0xdfb   :  { %5718 = vrcp.f32 %v4251_v33 }
 0xdfe   :  { %v4253_v22 = vpop.xlane.xlu1 %4252 }
 0xdff   :  { %5720 = vrcp.f32 %v4253_v22  ;;  %v4255_v56 = vpop.xlane.xlu0 %4254 }
 0xe00   :  { %5722 = vrcp.f32 %v4255_v56 }
 0xe02   :  { %v4257_v29 = vpop.xlane.xlu1 %4256 }
 0xe03   :  { %5724 = vrcp.f32 %v4257_v29 }
 0xe08   :  { %v5719_v53 = vpop.eup %5718 }
 0xe09   :  { %v4270_v8 = vmul.f32 %v5719_v53, %v5703_v31 }
 0xe0b   :  { %v4278_v52 = vsel %vm4193_vm3, %v4270_v8, %v7911_v32 }
 0xe0c   :  { %v5721_v63 = vpop.eup %5720  ;;  %4286 = vst [vmem:[%s7999_s14 + $0x20] sm:$0xff] %v4278_v52 }
 0xe0d   :  { %v5723_v18 = vpop.eup %5722  ;;  %v4271_v26 = vmul.f32 %v5721_v63, %v5705_v47 }
 0xe0e   :  { %v4272_v30 = vmul.f32 %v5723_v18, %v5707_v38 }
 0xe0f   :  { %v4279_v40 = vsel %vm4193_vm3, %v4271_v26, %v7918_v35 }
 0xe10   :  { %v5725_v25 = vpop.eup %5724  ;;  %4287 = vst [vmem:[%s7999_s14 + $0x28] sm:$0xff] %v4279_v40  ;;  %v4280_v39 = vsel %vm4193_vm3, %v4272_v30, %v7913_v60 }
 0xe11   :  { %4288 = vst [vmem:[%s7999_s14 + $0x30] sm:$0xff] %v4280_v39  ;;  %v4273_v41 = vmul.f32 %v5725_v25, %v5711_v24 }
 0xe13   :  { %v4281_v49 = vsel %vm4193_vm3, %v4273_v41, %v7920_v42 }
 0xe14   :  { %4289 = vst [vmem:[%s7999_s14 + $0x38] sm:$0xff] %v4281_v49 }
 0xe15   :  { %5835 = dma.done.wait [#allocation5], 128  }
 0xe16   :  { %5836 = vsyncadd [#allocation5], 4294967168 }
 0xe17   :  { %5837 = dma.done.wait [#allocation7], 128  }
 0xe18   :  { %5838 = vsyncadd [#allocation7], 4294967168 }
 0xe19   :  { %4320 = vsyncpa [#allocation5], 1 }
 0xe1a   :  { %4321 = vsyncpa [#allocation7], 1 }

</bundles_post_ra>
